<compile_context>
chip_gen: v6e
topology: v6e:2x2x1
jax: 0.10.0
libtpu: 0.0.40
codegen_flags: <defaults>
</compile_context>

<pallas_src>
import math

import jax
import jax.numpy as jnp
from jax.experimental import pallas as pl
from jax.experimental.pallas import tpu as pltpu

EPS = 1e-12          # LayerNorm eps (matches the reference LayerNorm impl)
NEG_INF = -10000.0   # masked_fill value used by ScaleDotProductAttention

_WEIGHT_ORDER = ("w_sa_qkv", "b_sa_qkv", "w_sa_o", "b_sa_o", "gb1",
                 "w_ca_q", "b_ca_q", "w_ca_kv", "b_ca_kv",
                 "w_ca_o", "b_ca_o", "gb2",
                 "w_lin", "b_lin",
                 "w_f1", "b_f1", "w_f2", "b_f2", "gb3")

_MATMUL_WEIGHTS = ("w_sa_qkv", "w_sa_o", "w_ca_q", "w_ca_kv",
                   "w_ca_o", "w_lin", "w_f1", "w_f2")


# ----------------------------------------------------------------------------
# in-kernel math helpers
# ----------------------------------------------------------------------------
def _layer_norm(x, gb):
    """LayerNorm over the last axis.  gb = stacked (gamma, beta), shape (2, D)."""
    gamma = gb[0:1, :]
    beta = gb[1:2, :]
    mean = jnp.mean(x, axis=-1, keepdims=True)
    var = jnp.mean((x - mean) ** 2, axis=-1, keepdims=True)   # biased variance
    return (x - mean) * jax.lax.rsqrt(var + EPS) * gamma + beta


def _attention_heads(q3, k3, v3, mask_add, n_head):
    """Scaled-dot attention, batched over the leading (batch-block) dim.

    q3: (Bb, Sq, D) (Q scale already folded into the projection weights),
    k3 / v3: (Bb, Sk, D), mask_add: (Bb, Sq, Sk) additive f32 mask (already
    broadcast once — hoisted out of the head loop).
    Returns the concatenated head contexts, shape (Bb, Sq, D), f32.

    Heads are a short static loop over lane slices of D; production d_head
    that is a multiple of 128 makes the slices free.
    # TODO(synk): KV-tiled (flash-style) variant for production S/Se >~ 1024.
    """
    d_head = q3.shape[-1] // n_head
    qb = q3.astype(jnp.bfloat16)
    kb = k3.astype(jnp.bfloat16)
    vb = v3.astype(jnp.bfloat16)
    ctx = []
    for h in range(n_head):
        sl = slice(h * d_head, (h + 1) * d_head)
        s = jnp.einsum('bqe,bke->bqk', qb[:, :, sl], kb[:, :, sl],
                       preferred_element_type=jnp.float32)
        s = s + mask_add
        m = jnp.max(s, axis=-1, keepdims=True)
        p = jnp.exp(s - m)
        p = p * pl.reciprocal(jnp.sum(p, axis=-1, keepdims=True), approx=True)
        ctx.append(jnp.einsum('bqk,bke->bqe', p.astype(jnp.bfloat16),
                              vb[:, :, sl],
                              preferred_element_type=jnp.float32))
    return jnp.concatenate(ctx, axis=-1)


# ----------------------------------------------------------------------------
# Pallas kernel: one batch-block per grid step, everything resident in VMEM
# ----------------------------------------------------------------------------
def _decoder_body(n_head, dec_ref, enc_ref, tmask_ref, smask_ref, w,
                  x_out_ref, enc_out_ref):
    (w_sa_qkv_ref, b_sa_qkv_ref, w_sa_o_ref, b_sa_o_ref, gb1_ref,
     w_ca_q_ref, b_ca_q_ref, w_ca_kv_ref, b_ca_kv_ref,
     w_ca_o_ref, b_ca_o_ref, gb2_ref,
     w_lin_ref, b_lin_ref,
     w_f1_ref, b_f1_ref, w_f2_ref, b_f2_ref, gb3_ref) = w

    Bb, S, Din = dec_ref.shape
    Se = enc_ref.shape[1]
    Dout = x_out_ref.shape[-1]

    dec2 = dec_ref[...].reshape(Bb * S, Din)           # f32
    enc2 = enc_ref[...].reshape(Bb * Se, Din)          # f32
    dec2_b = dec2.astype(jnp.bfloat16)
    enc2_b = enc2.astype(jnp.bfloat16)

    # --- encoder projection (independent of the decoder path).  Kept
    #     in-kernel because w_lin/b_lin easily fit the VMEM budget at these
    #     sizes; for VMEM-tight production configs emit it as a plain XLA GEMM
    #     outside the kernel instead.
    enc_out_ref[...] = (
        jnp.dot(enc2_b, w_lin_ref[...], preferred_element_type=jnp.float32)
        + b_lin_ref[...]).reshape(Bb, Se, Dout)

    # --- additive masks, materialized ONCE per kernel body (hoisted out of
    #     the per-head loops)
    if tmask_ref is None:
        rows = jax.lax.broadcasted_iota(jnp.int32, (S, S), 0)
        cols = jax.lax.broadcasted_iota(jnp.int32, (S, S), 1)
        tmask = jnp.where(cols <= rows, 0.0, NEG_INF).astype(jnp.float32)
        tmask_full = jnp.broadcast_to(tmask[None], (Bb, S, S))
    else:
        tmask_full = tmask_ref[...]                    # (Bb, S, S) additive f32
    smask_full = jnp.broadcast_to(smask_ref[...], (Bb, S, Se))

    # --- self attention: fused QKV matmul (Q scale pre-folded into weights),
    #     per-head attention, single out-proj, dropout(identity) -> +res -> norm1
    qkv = (jnp.dot(dec2_b, w_sa_qkv_ref[...],
                   preferred_element_type=jnp.float32) + b_sa_qkv_ref[...])
    qkv3 = qkv.reshape(Bb, S, 3 * Din)
    ctx = _attention_heads(qkv3[:, :, :Din],
                           qkv3[:, :, Din:2 * Din],
                           qkv3[:, :, 2 * Din:],
                           tmask_full, n_head)
    sa = (jnp.dot(ctx.reshape(Bb * S, Din).astype(jnp.bfloat16),
                  w_sa_o_ref[...], preferred_element_type=jnp.float32)
          + b_sa_o_ref[...])
    x = _layer_norm(sa + dec2, gb1_ref[...])

    # --- enc-dec attention: Q from x, fused K/V from enc, dropout(identity)
    #     -> norm2 (NO residual, exactly matching the reference forward)
    q = (jnp.dot(x.astype(jnp.bfloat16), w_ca_q_ref[...],
                 preferred_element_type=jnp.float32) + b_ca_q_ref[...])
    kv = (jnp.dot(enc2_b, w_ca_kv_ref[...],
                  preferred_element_type=jnp.float32) + b_ca_kv_ref[...])
    kv3 = kv.reshape(Bb, Se, 2 * Din)
    ctx = _attention_heads(q.reshape(Bb, S, Din),
                           kv3[:, :, :Din], kv3[:, :, Din:],
                           smask_full, n_head)
    ca = (jnp.dot(ctx.reshape(Bb * S, Din).astype(jnp.bfloat16),
                  w_ca_o_ref[...], preferred_element_type=jnp.float32)
          + b_ca_o_ref[...])
    x = _layer_norm(ca, gb2_ref[...])

    # --- positionwise FFN -> dropout(identity) -> residual -> norm3 ---------
    h1 = jnp.maximum(
        jnp.dot(x.astype(jnp.bfloat16), w_f1_ref[...],
                preferred_element_type=jnp.float32) + b_f1_ref[...], 0.0)
    f = (jnp.dot(h1.astype(jnp.bfloat16), w_f2_ref[...],
                 preferred_element_type=jnp.float32) + b_f2_ref[...])
    y = _layer_norm(f + x, gb3_ref[...])

    x_out_ref[...] = y.reshape(Bb, S, Dout)


def _make_decoder_layer_kernel(n_head, causal):
    n_w = len(_WEIGHT_ORDER)

    def kernel(*refs):
        dec_ref, enc_ref = refs[0], refs[1]
        if causal:
            tmask_ref, smask_ref = None, refs[2]
            w = refs[3:3 + n_w]
        else:
            tmask_ref, smask_ref = refs[2], refs[3]
            w = refs[4:4 + n_w]
        x_out_ref, enc_out_ref = refs[-2], refs[-1]
        _decoder_body(n_head, dec_ref, enc_ref, tmask_ref, smask_ref, w,
                      x_out_ref, enc_out_ref)

    return kernel


# ----------------------------------------------------------------------------
# host-side helpers: generation-aware sizing, weight prep
# ----------------------------------------------------------------------------
def _tpu_vmem_and_cores():
    """(physical VMEM bytes per core, has-two-TensorCores) for device 0."""
    kind = ""
    try:
        kind = jax.devices()[0].device_kind.lower()
    except Exception:
        pass
    two_core = any(t in kind for t in ("v4", "v5p", "v7"))
    cap = None
    try:
        cap = int(pltpu.get_tpu_info().vmem_capacity_bytes)
    except Exception:
        cap = None
    if not cap:
        # conservative fallback: 64 MiB (v7x); v5e/v6e physically have 128 MiB
        cap = (128 << 20) if any(t in kind for t in ("v5", "v6")) else (64 << 20)
    return cap, two_core


def _pick_batch_block(B, per_elem_bytes, fixed_bytes, budget_bytes,
                      two_core, max_bb):
    """Largest divisor of B that fits the VMEM budget.

    On 1-TC parts (v5e/v6e): maximal block (fewer, fatter grid steps).
    On 2-TC parts (v4/v5p/v7x): prefer >= 2 grid steps so both cores get work.
    """
    divisors = [d for d in range(1, B + 1) if B % d == 0 and d <= max_bb]
    fits = [d for d in divisors
            if fixed_bytes + d * per_elem_bytes <= budget_bytes] or [1]
    bb = fits[-1]
    if two_core:
        for d in reversed(fits):
            if B // d >= 2:
                return d
    return bb


def _prepare_weights(params, n_head):
    """Fold the 1/sqrt(d_head) Q scale into the weights and store matmul
    weights in bf16 (one-time host transform)."""
    p = dict(params)
    Din = p["w_sa_qkv"].shape[0]
    scale = 1.0 / math.sqrt(Din // n_head)
    w, b = p["w_sa_qkv"], p["b_sa_qkv"]
    p["w_sa_qkv"] = jnp.concatenate([w[:, :Din] * scale, w[:, Din:]], axis=1)
    p["b_sa_qkv"] = jnp.concatenate([b[:, :Din] * scale, b[:, Din:]], axis=1)
    p["w_ca_q"] = p["w_ca_q"] * scale
    p["b_ca_q"] = p["b_ca_q"] * scale
    for k in _MATMUL_WEIGHTS:
        p[k] = p[k].astype(jnp.bfloat16)
    return p


# ----------------------------------------------------------------------------
# wrapper
# ----------------------------------------------------------------------------
def decoder_layer(dec, enc, trg_mask, src_mask, params, n_head,
                  *, max_batch_block=64):
    """dec: (B,S,Din)  enc: (B,Se,Din)  src_mask: (B,1,Se).

    trg_mask: (B,S,S) 0/1 mask, or None to generate a causal mask in-kernel
    (avoids DMAing a (B,S,S) f32 mask).
    Production note: Din, 3*Din, 2*Din, Dout, ffn_hidden should be multiples
    of 128 and S, Se multiples of 8 so the in-kernel reshapes / lane splits
    stay layout-trivial (pad weights on the host if needed).
    """
    # TODO(synk): the `enc is None` branch of the PyTorch forward is not
    # implemented; this kernel always runs the cross-attention path.
    B, S, Din = dec.shape
    Se = enc.shape[1]
    Dout = params["w_ca_o"].shape[1]
    ffn_hidden = params["w_f1"].shape[1]
    causal = trg_mask is None

    p = _prepare_weights(params, n_head)
    ws = [p[k] for k in _WEIGHT_ORDER]

    # additive masks (0 kept, NEG_INF masked), hoisted out of the kernel math
    smask_add = (1.0 - src_mask.astype(jnp.float32)) * NEG_INF
    tmask_add = None
    if not causal:
        tmask_add = (1.0 - trg_mask.astype(jnp.float32)) * NEG_INF

    # --- generation-aware batch-block sizing & VMEM budget -------------------
    vmem_cap, two_core = _tpu_vmem_and_cores()
    budget = int(vmem_cap * 0.70)                       # headroom
    w_bytes = sum(int(a.size) * a.dtype.itemsize for a in ws)
    per_elem = 4 * (                                    # f32, per batch element
        2 * (S * Din + Se * Din)                        # dec/enc blocks (x2 buf)
        + 2 * (S * Dout + Se * Dout)                    # output blocks (x2 buf)
        + S * 3 * Din + Se * 2 * Din                    # qkv / kv projections
        + 3 * S * Din + S * ffn_hidden + 3 * S * Dout   # ctx / x / ffn slabs
        + 2 * (S * S + S * Se)                          # scores + hoisted masks
        + (0 if causal else 2 * S * S)                  # DMA'd trg mask (x2 buf)
    )
    bb = _pick_batch_block(B, per_elem, 2 * w_bytes, budget, two_core,
                           max_batch_block)
    grid = (B // bb,)
    vmem_limit = int(min(max(1.5 * (2 * w_bytes + bb * per_elem), 32 << 20),
                         vmem_cap))

    data_specs = [
        pl.BlockSpec((bb, S, Din), lambda b: (b, 0, 0)),    # dec (batch block)
        pl.BlockSpec((bb, Se, Din), lambda b: (b, 0, 0)),   # enc (batch block)
    ]
    if not causal:
        data_specs.append(pl.BlockSpec((bb, S, S), lambda b: (b, 0, 0)))
    data_specs.append(pl.BlockSpec((bb, 1, Se), lambda b: (b, 0, 0)))

    def weight_spec(a, single_buffer):
        nd = a.ndim
        if single_buffer:
            # constant index_map -> never re-fetched; one buffer halves the
            # resident weight VMEM.
            return pl.BlockSpec(a.shape, lambda b, _nd=nd: (0,) * _nd,
                                pipeline_mode=pl.Buffered(1))
        return pl.BlockSpec(a.shape, lambda b, _nd=nd: (0,) * _nd)

    out_specs = (pl.BlockSpec((bb, S, Dout), lambda b: (b, 0, 0)),
                 pl.BlockSpec((bb, Se, Dout), lambda b: (b, 0, 0)))
    out_shape = (jax.ShapeDtypeStruct((B, S, Dout), jnp.float32),
                 jax.ShapeDtypeStruct((B, Se, Dout), jnp.float32))

    args = [dec, enc] + ([] if causal else [tmask_add]) + [smask_add] + ws

    def run(single_buffer_weights):
        in_specs = data_specs + [weight_spec(a, single_buffer_weights)
                                 for a in ws]
        return pl.pallas_call(
            _make_decoder_layer_kernel(n_head, causal),
            grid=grid,
            in_specs=in_specs,
            out_specs=out_specs,
            out_shape=out_shape,
            compiler_params=pltpu.CompilerParams(
                dimension_semantics=("parallel",),
                vmem_limit_bytes=vmem_limit),
        )(*args)

    try:
        return run(True)
    except Exception:
        # pl.Buffered(1) not supported by this jax version / lowering path:
        # fall back to default (double-buffered) weight specs.
        return run(False)


# ----------------------------------------------------------------------------
# deterministic parameter init (synthetic weights; shapes from the module init,
# QKV / KV weights stored pre-fused along the output-feature axis)
# ----------------------------------------------------------------------------
def init_params(key, in_dim, out_dim, ffn_hidden):
    ks = jax.random.split(key, 16)

    def dense(k, i, o):
        return jax.random.normal(k, (i, o), jnp.float32) / math.sqrt(i)

    def bias(k, o):
        return jax.random.normal(k, (1, o), jnp.float32) * 0.02

    def gb(d):
        return jnp.stack([jnp.ones((d,), jnp.float32),
                          jnp.zeros((d,), jnp.float32)])

    return {
        "w_sa_qkv": dense(ks[0], in_dim, 3 * in_dim),
        "b_sa_qkv": bias(ks[1], 3 * in_dim),
        "w_sa_o": dense(ks[2], in_dim, in_dim),
        "b_sa_o": bias(ks[3], in_dim),
        "gb1": gb(in_dim),
        "w_ca_q": dense(ks[4], in_dim, in_dim),
        "b_ca_q": bias(ks[5], in_dim),
        "w_ca_kv": dense(ks[6], in_dim, 2 * in_dim),
        "b_ca_kv": bias(ks[7], 2 * in_dim),
        "w_ca_o": dense(ks[8], in_dim, out_dim),
        "b_ca_o": bias(ks[9], out_dim),
        "gb2": gb(out_dim),
        "w_lin": dense(ks[10], in_dim, out_dim),
        "b_lin": bias(ks[11], out_dim),
        "w_f1": dense(ks[12], out_dim, ffn_hidden),
        "b_f1": bias(ks[13], ffn_hidden),
        "w_f2": dense(ks[14], ffn_hidden, out_dim),
        "b_f2": bias(ks[15], out_dim),
        "gb3": gb(out_dim),
    }


# ----------------------------------------------------------------------------
# independent pure-JAX reference (head-major einsum formulation, masked_fill
# semantics, exact softmax) for a cross-check of the kernel math
# ----------------------------------------------------------------------------
def reference(dec, enc, trg_mask, src_mask, params, n_head):
    def ln(x, gb):
        g, b = gb[0], gb[1]
        mu = x.mean(axis=-1, keepdims=True)
        var = ((x - mu) ** 2).mean(axis=-1, keepdims=True)
        return (x - mu) / jnp.sqrt(var + EPS) * g + b

    def mha(xq, xkv, w_q, b_q, w_kv, b_kv, w_o, b_o, mask):
        B, Sq, D = xq.shape
        Sk = xkv.shape[1]
        e = D // n_head
        q = xq @ w_q + b_q
        kv = xkv @ w_kv + b_kv
        k, v = kv[..., :D], kv[..., D:]
        qh = q.reshape(B, Sq, n_head, e).transpose(0, 2, 1, 3)
        kh = k.reshape(B, Sk, n_head, e).transpose(0, 2, 1, 3)
        vh = v.reshape(B, Sk, n_head, e).transpose(0, 2, 1, 3)
        s = jnp.einsum('bhqe,bhke->bhqk', qh, kh) / math.sqrt(e)
        s = jnp.where(mask[:, None, :, :] == 0, jnp.float32(NEG_INF), s)
        p = jax.nn.softmax(s, axis=-1)
        ctx = jnp.einsum('bhqk,bhke->bhqe', p, vh)
        ctx = ctx.transpose(0, 2, 1, 3).reshape(B, Sq, D)
        return ctx @ w_o + b_o

    Din = dec.shape[-1]
    sa = mha(dec, dec,
             params["w_sa_qkv"][:, :Din], params["b_sa_qkv"][:, :Din],
             params["w_sa_qkv"][:, Din:], params["b_sa_qkv"][:, Din:],
             params["w_sa_o"], params["b_sa_o"], trg_mask)
    x = ln(sa + dec, params["gb1"])
    ca = mha(x, enc,
             params["w_ca_q"], params["b_ca_q"],
             params["w_ca_kv"], params["b_ca_kv"],
             params["w_ca_o"], params["b_ca_o"], src_mask)
    x = ln(ca, params["gb2"])
    enc_out = enc @ params["w_lin"] + params["b_lin"]
    h1 = jnp.maximum(x @ params["w_f1"] + params["b_f1"], 0.0)
    f = h1 @ params["w_f2"] + params["b_f2"]
    return ln(f + x, params["gb3"]), enc_out


def _rel_l2(a, b):
    return float(jnp.sqrt(jnp.sum((a - b) ** 2)) / jnp.sqrt(jnp.sum(b ** 2)))


if __name__ == "__main__":
    B, S, Se = 4, 8, 8
    in_dim, out_dim, ffn_hidden, n_head = 32, 48, 64, 4

    key = jax.random.PRNGKey(0)
    k_dec, k_enc, k_par = jax.random.split(key, 3)

    dec = jax.random.normal(k_dec, (B, S, in_dim), jnp.float32)
    enc = jax.random.normal(k_enc, (B, Se, in_dim), jnp.float32)
    # causal target mask (B, S, S); 0 == masked
    trg_mask = jnp.broadcast_to(jnp.tril(jnp.ones((S, S), jnp.float32)),
                                (B, S, S))
    # source padding mask (B, 1, Se); varying numbers of padded positions
    lengths = jnp.array([Se, Se - 3, Se - 1, Se - 5])
    src_mask = (jnp.arange(Se)[None, None, :]
                < lengths[:, None, None]).astype(jnp.float32)

    params = init_params(k_par, in_dim, out_dim, ffn_hidden)

    # kernel: (a) causal mask generated in-kernel, (b) explicit trg_mask DMA'd
    x_out, enc_out = decoder_layer(dec, enc, None, src_mask, params, n_head)
    x_out2, enc_out2 = decoder_layer(dec, enc, trg_mask, src_mask,
                                     params, n_head)
    jax.block_until_ready((x_out, enc_out, x_out2, enc_out2))

    # reference: f32 math with the same bf16-rounded matmul weights the kernel
    # uses (isolates the expected bf16-activation error inside the kernel)
    params_ref = {k: (v.astype(jnp.bfloat16).astype(jnp.float32)
                      if k in _MATMUL_WEIGHTS else v)
                  for k, v in params.items()}
    with jax.default_matmul_precision("highest"):
        x_ref, enc_ref = reference(dec, enc, trg_mask, src_mask,
                                   params_ref, n_head)
        x_ref, enc_ref = jax.block_until_ready((x_ref, enc_ref))

    assert x_out.shape == (B, S, out_dim) and enc_out.shape == (B, Se, out_dim)
    # the two kernel paths (in-kernel causal vs DMA'd mask) must agree exactly
    assert jnp.allclose(x_out, x_out2, atol=1e-4, rtol=1e-4)
    assert jnp.allclose(enc_out, enc_out2, atol=1e-4, rtol=1e-4)
    # bf16-MXU kernel vs f32 reference (loose: bf16 activation rounding)
    assert _rel_l2(x_out, x_ref) < 8e-2, _rel_l2(x_out, x_ref)
    assert _rel_l2(x_out2, x_ref) < 8e-2, _rel_l2(x_out2, x_ref)
    assert _rel_l2(enc_out, enc_ref) < 3e-2, _rel_l2(enc_out, enc_ref)

    print("KERNEL_OK")
</pallas_src>

<mosaic_0001>
module attributes {stable_mosaic.version = 11 : i64} {
  func.func @kernel(%arg0: i32, %arg1: memref<4x8x32xf32, #tpu.memory_space<vmem>>, %arg2: memref<4x8x32xf32, #tpu.memory_space<vmem>>, %arg3: memref<4x1x8xf32, #tpu.memory_space<vmem>>, %arg4: memref<32x96xbf16, #tpu.memory_space<vmem>>, %arg5: memref<1x96xf32, #tpu.memory_space<vmem>>, %arg6: memref<32x32xbf16, #tpu.memory_space<vmem>>, %arg7: memref<1x32xf32, #tpu.memory_space<vmem>>, %arg8: memref<2x32xf32, #tpu.memory_space<vmem>>, %arg9: memref<32x32xbf16, #tpu.memory_space<vmem>>, %arg10: memref<1x32xf32, #tpu.memory_space<vmem>>, %arg11: memref<32x64xbf16, #tpu.memory_space<vmem>>, %arg12: memref<1x64xf32, #tpu.memory_space<vmem>>, %arg13: memref<32x48xbf16, #tpu.memory_space<vmem>>, %arg14: memref<1x48xf32, #tpu.memory_space<vmem>>, %arg15: memref<2x48xf32, #tpu.memory_space<vmem>>, %arg16: memref<32x48xbf16, #tpu.memory_space<vmem>>, %arg17: memref<1x48xf32, #tpu.memory_space<vmem>>, %arg18: memref<48x64xbf16, #tpu.memory_space<vmem>>, %arg19: memref<1x64xf32, #tpu.memory_space<vmem>>, %arg20: memref<64x48xbf16, #tpu.memory_space<vmem>>, %arg21: memref<1x48xf32, #tpu.memory_space<vmem>>, %arg22: memref<2x48xf32, #tpu.memory_space<vmem>>, %arg23: memref<4x8x48xf32, #tpu.memory_space<vmem>>, %arg24: memref<4x8x48xf32, #tpu.memory_space<vmem>>) attributes {dimension_semantics = [#tpu.dimension_semantics<parallel>], iteration_bounds = array<i64: 1>, scalar_prefetch = 0 : i64, scratch_operands = 0 : i64, tpu.core_type = #tpu.core_type<tc>, window_params = [{transform_indices = @transform_0, window_bounds = array<i64: 4, 8, 32>}, {transform_indices = @transform_1, window_bounds = array<i64: 4, 8, 32>}, {transform_indices = @transform_2, window_bounds = array<i64: 4, 1, 8>}, {pipeline_mode = #tpu.pipeline_mode<synchronous>, transform_indices = @transform_3, window_bounds = array<i64: 32, 96>}, {pipeline_mode = #tpu.pipeline_mode<synchronous>, transform_indices = @transform_4, window_bounds = array<i64: 1, 96>}, {pipeline_mode = #tpu.pipeline_mode<synchronous>, transform_indices = @transform_5, window_bounds = array<i64: 32, 32>}, {pipeline_mode = #tpu.pipeline_mode<synchronous>, transform_indices = @transform_6, window_bounds = array<i64: 1, 32>}, {pipeline_mode = #tpu.pipeline_mode<synchronous>, transform_indices = @transform_7, window_bounds = array<i64: 2, 32>}, {pipeline_mode = #tpu.pipeline_mode<synchronous>, transform_indices = @transform_8, window_bounds = array<i64: 32, 32>}, {pipeline_mode = #tpu.pipeline_mode<synchronous>, transform_indices = @transform_9, window_bounds = array<i64: 1, 32>}, {pipeline_mode = #tpu.pipeline_mode<synchronous>, transform_indices = @transform_10, window_bounds = array<i64: 32, 64>}, {pipeline_mode = #tpu.pipeline_mode<synchronous>, transform_indices = @transform_11, window_bounds = array<i64: 1, 64>}, {pipeline_mode = #tpu.pipeline_mode<synchronous>, transform_indices = @transform_12, window_bounds = array<i64: 32, 48>}, {pipeline_mode = #tpu.pipeline_mode<synchronous>, transform_indices = @transform_13, window_bounds = array<i64: 1, 48>}, {pipeline_mode = #tpu.pipeline_mode<synchronous>, transform_indices = @transform_14, window_bounds = array<i64: 2, 48>}, {pipeline_mode = #tpu.pipeline_mode<synchronous>, transform_indices = @transform_15, window_bounds = array<i64: 32, 48>}, {pipeline_mode = #tpu.pipeline_mode<synchronous>, transform_indices = @transform_16, window_bounds = array<i64: 1, 48>}, {pipeline_mode = #tpu.pipeline_mode<synchronous>, transform_indices = @transform_17, window_bounds = array<i64: 48, 64>}, {pipeline_mode = #tpu.pipeline_mode<synchronous>, transform_indices = @transform_18, window_bounds = array<i64: 1, 64>}, {pipeline_mode = #tpu.pipeline_mode<synchronous>, transform_indices = @transform_19, window_bounds = array<i64: 64, 48>}, {pipeline_mode = #tpu.pipeline_mode<synchronous>, transform_indices = @transform_20, window_bounds = array<i64: 1, 48>}, {pipeline_mode = #tpu.pipeline_mode<synchronous>, transform_indices = @transform_21, window_bounds = array<i64: 2, 48>}, {transform_indices = @transform_22, window_bounds = array<i64: 4, 8, 48>}, {transform_indices = @transform_23, window_bounds = array<i64: 4, 8, 48>}]} {
    %c0 = arith.constant 0 : index
    %c0_0 = arith.constant 0 : index
    %c0_1 = arith.constant 0 : index
    %0 = vector.load %arg1[%c0, %c0_0, %c0_1] : memref<4x8x32xf32, #tpu.memory_space<vmem>>, vector<4x8x32xf32>
    %1 = vector.shape_cast %0 : vector<4x8x32xf32> to vector<32x32xf32>
    %c0_2 = arith.constant 0 : index
    %c0_3 = arith.constant 0 : index
    %c0_4 = arith.constant 0 : index
    %2 = vector.load %arg2[%c0_2, %c0_3, %c0_4] : memref<4x8x32xf32, #tpu.memory_space<vmem>>, vector<4x8x32xf32>
    %3 = vector.shape_cast %2 : vector<4x8x32xf32> to vector<32x32xf32>
    %4 = arith.truncf %1 : vector<32x32xf32> to vector<32x32xbf16>
    %5 = arith.truncf %3 : vector<32x32xf32> to vector<32x32xbf16>
    %c0_5 = arith.constant 0 : index
    %c0_6 = arith.constant 0 : index
    %6 = vector.load %arg16[%c0_5, %c0_6] : memref<32x48xbf16, #tpu.memory_space<vmem>>, vector<32x48xbf16>
    %cst = arith.constant dense<0.000000e+00> : vector<32x48xf32>
    %7 = tpu.matmul %5, %6, %cst {dimension_numbers = #tpu.dot_dimension_numbers<[1], [0], [0], [1], [0, 0, 1, 1], [], []>} : vector<32x32xbf16>, vector<32x48xbf16>, vector<32x48xf32> -> vector<32x48xf32>
    %c0_7 = arith.constant 0 : index
    %c0_8 = arith.constant 0 : index
    %8 = vector.load %arg17[%c0_7, %c0_8] : memref<1x48xf32, #tpu.memory_space<vmem>>, vector<1x48xf32>
    %9 = vector.broadcast %8 : vector<1x48xf32> to vector<32x48xf32>
    %10 = arith.addf %7, %9 : vector<32x48xf32>
    %11 = vector.shape_cast %10 : vector<32x48xf32> to vector<4x8x48xf32>
    %c0_9 = arith.constant 0 : index
    %c0_10 = arith.constant 0 : index
    %c0_11 = arith.constant 0 : index
    %12 = vector.load %arg24[%c0_9, %c0_10, %c0_11] : memref<4x8x48xf32, #tpu.memory_space<vmem>>, vector<4x8x48xf32>
    tpu.vector_store %arg24[%c0_9, %c0_10, %c0_11], %11 {strides = array<i32>} : memref<4x8x48xf32, #tpu.memory_space<vmem>>, vector<4x8x48xf32>,
    %13 = tpu.iota {dimensions = array<i32: 0>} : vector<8x8xi32>
    %14 = tpu.iota {dimensions = array<i32: 1>} : vector<8x8xi32>
    %15 = arith.cmpi sle, %14, %13 : vector<8x8xi32>
    %cst_12 = arith.constant 0.000000e+00 : f32
    %cst_13 = arith.constant -1.000000e+04 : f32
    %16 = vector.broadcast %cst_12 : f32 to vector<8x8xf32>
    %17 = vector.broadcast %cst_13 : f32 to vector<8x8xf32>
    %18 = arith.select %15, %16, %17 : vector<8x8xi1>, vector<8x8xf32>
    %19 = vector.shape_cast %18 : vector<8x8xf32> to vector<1x8x8xf32>
    %20 = vector.shape_cast %19 : vector<1x8x8xf32> to vector<1x8x8xf32>
    %21 = vector.broadcast %20 : vector<1x8x8xf32> to vector<4x8x8xf32>
    %c0_14 = arith.constant 0 : index
    %c0_15 = arith.constant 0 : index
    %c0_16 = arith.constant 0 : index
    %22 = vector.load %arg3[%c0_14, %c0_15, %c0_16] : memref<4x1x8xf32, #tpu.memory_space<vmem>>, vector<4x1x8xf32>
    %23 = vector.shape_cast %22 : vector<4x1x8xf32> to vector<4x1x8xf32>
    %24 = vector.broadcast %23 : vector<4x1x8xf32> to vector<4x8x8xf32>
    %c0_17 = arith.constant 0 : index
    %c0_18 = arith.constant 0 : index
    %25 = vector.load %arg4[%c0_17, %c0_18] : memref<32x96xbf16, #tpu.memory_space<vmem>>, vector<32x96xbf16>
    %cst_19 = arith.constant dense<0.000000e+00> : vector<32x96xf32>
    %26 = tpu.matmul %4, %25, %cst_19 {dimension_numbers = #tpu.dot_dimension_numbers<[1], [0], [0], [1], [0, 0, 1, 1], [], []>} : vector<32x32xbf16>, vector<32x96xbf16>, vector<32x96xf32> -> vector<32x96xf32>
    %c0_20 = arith.constant 0 : index
    %c0_21 = arith.constant 0 : index
    %27 = vector.load %arg5[%c0_20, %c0_21] : memref<1x96xf32, #tpu.memory_space<vmem>>, vector<1x96xf32>
    %28 = vector.broadcast %27 : vector<1x96xf32> to vector<32x96xf32>
    %29 = arith.addf %26, %28 : vector<32x96xf32>
    %30 = vector.shape_cast %29 : vector<32x96xf32> to vector<4x8x96xf32>
    %31 = vector.extract_strided_slice %30 {offsets = [0, 0, 0], sizes = [4, 8, 32], strides = [1, 1, 1]} : vector<4x8x96xf32> to vector<4x8x32xf32>
    %32 = vector.extract_strided_slice %30 {offsets = [0, 0, 32], sizes = [4, 8, 32], strides = [1, 1, 1]} : vector<4x8x96xf32> to vector<4x8x32xf32>
    %33 = vector.extract_strided_slice %30 {offsets = [0, 0, 64], sizes = [4, 8, 32], strides = [1, 1, 1]} : vector<4x8x96xf32> to vector<4x8x32xf32>
    %34 = arith.truncf %31 : vector<4x8x32xf32> to vector<4x8x32xbf16>
    %35 = arith.truncf %32 : vector<4x8x32xf32> to vector<4x8x32xbf16>
    %36 = arith.truncf %33 : vector<4x8x32xf32> to vector<4x8x32xbf16>
    %37 = vector.extract_strided_slice %34 {offsets = [0, 0, 0], sizes = [4, 8, 8], strides = [1, 1, 1]} : vector<4x8x32xbf16> to vector<4x8x8xbf16>
    %38 = vector.extract_strided_slice %35 {offsets = [0, 0, 0], sizes = [4, 8, 8], strides = [1, 1, 1]} : vector<4x8x32xbf16> to vector<4x8x8xbf16>
    "tpu.trace_start"() <{level = 10 : i32, message = "bqe,bke->bqk"}> : () -> ()
    %cst_22 = arith.constant dense<0.000000e+00> : vector<4x8x8xf32>
    %39 = tpu.matmul %37, %38, %cst_22 {dimension_numbers = #tpu.dot_dimension_numbers<[2], [2], [1], [1], [0, 0, 0, 1, 1, 1], [0], [0]>} : vector<4x8x8xbf16>, vector<4x8x8xbf16>, vector<4x8x8xf32> -> vector<4x8x8xf32>
    "tpu.trace_stop"() : () -> ()
    %40 = arith.addf %39, %21 : vector<4x8x8xf32>
    %cst_23 = arith.constant dense<0xFF800000> : vector<4x8xf32>
    %41 = vector.multi_reduction <maximumf>, %40, %cst_23 [2] : vector<4x8x8xf32> to vector<4x8xf32>
    %42 = vector.shape_cast %41 : vector<4x8xf32> to vector<4x8x1xf32>
    %43 = vector.broadcast %42 : vector<4x8x1xf32> to vector<4x8x8xf32>
    %44 = arith.subf %40, %43 : vector<4x8x8xf32>
    %45 = math.exp %44 : vector<4x8x8xf32>
    %cst_24 = arith.constant dense<0.000000e+00> : vector<4x8xf32>
    %46 = vector.multi_reduction <add>, %45, %cst_24 [2] : vector<4x8x8xf32> to vector<4x8xf32>
    %47 = vector.shape_cast %46 : vector<4x8xf32> to vector<4x8x1xf32>
    %48 = tpu.reciprocal %47 {approx = true} : vector<4x8x1xf32> -> vector<4x8x1xf32>
    %49 = vector.broadcast %48 : vector<4x8x1xf32> to vector<4x8x8xf32>
    %50 = arith.mulf %45, %49 : vector<4x8x8xf32>
    %51 = arith.truncf %50 : vector<4x8x8xf32> to vector<4x8x8xbf16>
    %52 = vector.extract_strided_slice %36 {offsets = [0, 0, 0], sizes = [4, 8, 8], strides = [1, 1, 1]} : vector<4x8x32xbf16> to vector<4x8x8xbf16>
    "tpu.trace_start"() <{level = 10 : i32, message = "bqk,bke->bqe"}> : () -> ()
    %cst_25 = arith.constant dense<0.000000e+00> : vector<4x8x8xf32>
    %53 = tpu.matmul %51, %52, %cst_25 {dimension_numbers = #tpu.dot_dimension_numbers<[2], [1], [1], [2], [0, 0, 0, 1, 1, 2], [0], [0]>} : vector<4x8x8xbf16>, vector<4x8x8xbf16>, vector<4x8x8xf32> -> vector<4x8x8xf32>
    "tpu.trace_stop"() : () -> ()
    %54 = vector.extract_strided_slice %34 {offsets = [0, 0, 8], sizes = [4, 8, 8], strides = [1, 1, 1]} : vector<4x8x32xbf16> to vector<4x8x8xbf16>
    %55 = vector.extract_strided_slice %35 {offsets = [0, 0, 8], sizes = [4, 8, 8], strides = [1, 1, 1]} : vector<4x8x32xbf16> to vector<4x8x8xbf16>
    "tpu.trace_start"() <{level = 10 : i32, message = "bqe,bke->bqk"}> : () -> ()
    %cst_26 = arith.constant dense<0.000000e+00> : vector<4x8x8xf32>
    %56 = tpu.matmul %54, %55, %cst_26 {dimension_numbers = #tpu.dot_dimension_numbers<[2], [2], [1], [1], [0, 0, 0, 1, 1, 1], [0], [0]>} : vector<4x8x8xbf16>, vector<4x8x8xbf16>, vector<4x8x8xf32> -> vector<4x8x8xf32>
    "tpu.trace_stop"() : () -> ()
    %57 = arith.addf %56, %21 : vector<4x8x8xf32>
    %cst_27 = arith.constant dense<0xFF800000> : vector<4x8xf32>
    %58 = vector.multi_reduction <maximumf>, %57, %cst_27 [2] : vector<4x8x8xf32> to vector<4x8xf32>
    %59 = vector.shape_cast %58 : vector<4x8xf32> to vector<4x8x1xf32>
    %60 = vector.broadcast %59 : vector<4x8x1xf32> to vector<4x8x8xf32>
    %61 = arith.subf %57, %60 : vector<4x8x8xf32>
    %62 = math.exp %61 : vector<4x8x8xf32>
    %cst_28 = arith.constant dense<0.000000e+00> : vector<4x8xf32>
    %63 = vector.multi_reduction <add>, %62, %cst_28 [2] : vector<4x8x8xf32> to vector<4x8xf32>
    %64 = vector.shape_cast %63 : vector<4x8xf32> to vector<4x8x1xf32>
    %65 = tpu.reciprocal %64 {approx = true} : vector<4x8x1xf32> -> vector<4x8x1xf32>
    %66 = vector.broadcast %65 : vector<4x8x1xf32> to vector<4x8x8xf32>
    %67 = arith.mulf %62, %66 : vector<4x8x8xf32>
    %68 = arith.truncf %67 : vector<4x8x8xf32> to vector<4x8x8xbf16>
    %69 = vector.extract_strided_slice %36 {offsets = [0, 0, 8], sizes = [4, 8, 8], strides = [1, 1, 1]} : vector<4x8x32xbf16> to vector<4x8x8xbf16>
    "tpu.trace_start"() <{level = 10 : i32, message = "bqk,bke->bqe"}> : () -> ()
    %cst_29 = arith.constant dense<0.000000e+00> : vector<4x8x8xf32>
    %70 = tpu.matmul %68, %69, %cst_29 {dimension_numbers = #tpu.dot_dimension_numbers<[2], [1], [1], [2], [0, 0, 0, 1, 1, 2], [0], [0]>} : vector<4x8x8xbf16>, vector<4x8x8xbf16>, vector<4x8x8xf32> -> vector<4x8x8xf32>
    "tpu.trace_stop"() : () -> ()
    %71 = vector.extract_strided_slice %34 {offsets = [0, 0, 16], sizes = [4, 8, 8], strides = [1, 1, 1]} : vector<4x8x32xbf16> to vector<4x8x8xbf16>
    %72 = vector.extract_strided_slice %35 {offsets = [0, 0, 16], sizes = [4, 8, 8], strides = [1, 1, 1]} : vector<4x8x32xbf16> to vector<4x8x8xbf16>
    "tpu.trace_start"() <{level = 10 : i32, message = "bqe,bke->bqk"}> : () -> ()
    %cst_30 = arith.constant dense<0.000000e+00> : vector<4x8x8xf32>
    %73 = tpu.matmul %71, %72, %cst_30 {dimension_numbers = #tpu.dot_dimension_numbers<[2], [2], [1], [1], [0, 0, 0, 1, 1, 1], [0], [0]>} : vector<4x8x8xbf16>, vector<4x8x8xbf16>, vector<4x8x8xf32> -> vector<4x8x8xf32>
    "tpu.trace_stop"() : () -> ()
    %74 = arith.addf %73, %21 : vector<4x8x8xf32>
    %cst_31 = arith.constant dense<0xFF800000> : vector<4x8xf32>
    %75 = vector.multi_reduction <maximumf>, %74, %cst_31 [2] : vector<4x8x8xf32> to vector<4x8xf32>
    %76 = vector.shape_cast %75 : vector<4x8xf32> to vector<4x8x1xf32>
    %77 = vector.broadcast %76 : vector<4x8x1xf32> to vector<4x8x8xf32>
    %78 = arith.subf %74, %77 : vector<4x8x8xf32>
    %79 = math.exp %78 : vector<4x8x8xf32>
    %cst_32 = arith.constant dense<0.000000e+00> : vector<4x8xf32>
    %80 = vector.multi_reduction <add>, %79, %cst_32 [2] : vector<4x8x8xf32> to vector<4x8xf32>
    %81 = vector.shape_cast %80 : vector<4x8xf32> to vector<4x8x1xf32>
    %82 = tpu.reciprocal %81 {approx = true} : vector<4x8x1xf32> -> vector<4x8x1xf32>
    %83 = vector.broadcast %82 : vector<4x8x1xf32> to vector<4x8x8xf32>
    %84 = arith.mulf %79, %83 : vector<4x8x8xf32>
    %85 = arith.truncf %84 : vector<4x8x8xf32> to vector<4x8x8xbf16>
    %86 = vector.extract_strided_slice %36 {offsets = [0, 0, 16], sizes = [4, 8, 8], strides = [1, 1, 1]} : vector<4x8x32xbf16> to vector<4x8x8xbf16>
    "tpu.trace_start"() <{level = 10 : i32, message = "bqk,bke->bqe"}> : () -> ()
    %cst_33 = arith.constant dense<0.000000e+00> : vector<4x8x8xf32>
    %87 = tpu.matmul %85, %86, %cst_33 {dimension_numbers = #tpu.dot_dimension_numbers<[2], [1], [1], [2], [0, 0, 0, 1, 1, 2], [0], [0]>} : vector<4x8x8xbf16>, vector<4x8x8xbf16>, vector<4x8x8xf32> -> vector<4x8x8xf32>
    "tpu.trace_stop"() : () -> ()
    %88 = vector.extract_strided_slice %34 {offsets = [0, 0, 24], sizes = [4, 8, 8], strides = [1, 1, 1]} : vector<4x8x32xbf16> to vector<4x8x8xbf16>
    %89 = vector.extract_strided_slice %35 {offsets = [0, 0, 24], sizes = [4, 8, 8], strides = [1, 1, 1]} : vector<4x8x32xbf16> to vector<4x8x8xbf16>
    "tpu.trace_start"() <{level = 10 : i32, message = "bqe,bke->bqk"}> : () -> ()
    %cst_34 = arith.constant dense<0.000000e+00> : vector<4x8x8xf32>
    %90 = tpu.matmul %88, %89, %cst_34 {dimension_numbers = #tpu.dot_dimension_numbers<[2], [2], [1], [1], [0, 0, 0, 1, 1, 1], [0], [0]>} : vector<4x8x8xbf16>, vector<4x8x8xbf16>, vector<4x8x8xf32> -> vector<4x8x8xf32>
    "tpu.trace_stop"() : () -> ()
    %91 = arith.addf %90, %21 : vector<4x8x8xf32>
    %cst_35 = arith.constant dense<0xFF800000> : vector<4x8xf32>
    %92 = vector.multi_reduction <maximumf>, %91, %cst_35 [2] : vector<4x8x8xf32> to vector<4x8xf32>
    %93 = vector.shape_cast %92 : vector<4x8xf32> to vector<4x8x1xf32>
    %94 = vector.broadcast %93 : vector<4x8x1xf32> to vector<4x8x8xf32>
    %95 = arith.subf %91, %94 : vector<4x8x8xf32>
    %96 = math.exp %95 : vector<4x8x8xf32>
    %cst_36 = arith.constant dense<0.000000e+00> : vector<4x8xf32>
    %97 = vector.multi_reduction <add>, %96, %cst_36 [2] : vector<4x8x8xf32> to vector<4x8xf32>
    %98 = vector.shape_cast %97 : vector<4x8xf32> to vector<4x8x1xf32>
    %99 = tpu.reciprocal %98 {approx = true} : vector<4x8x1xf32> -> vector<4x8x1xf32>
    %100 = vector.broadcast %99 : vector<4x8x1xf32> to vector<4x8x8xf32>
    %101 = arith.mulf %96, %100 : vector<4x8x8xf32>
    %102 = arith.truncf %101 : vector<4x8x8xf32> to vector<4x8x8xbf16>
    %103 = vector.extract_strided_slice %36 {offsets = [0, 0, 24], sizes = [4, 8, 8], strides = [1, 1, 1]} : vector<4x8x32xbf16> to vector<4x8x8xbf16>
    "tpu.trace_start"() <{level = 10 : i32, message = "bqk,bke->bqe"}> : () -> ()
    %cst_37 = arith.constant dense<0.000000e+00> : vector<4x8x8xf32>
    %104 = tpu.matmul %102, %103, %cst_37 {dimension_numbers = #tpu.dot_dimension_numbers<[2], [1], [1], [2], [0, 0, 0, 1, 1, 2], [0], [0]>} : vector<4x8x8xbf16>, vector<4x8x8xbf16>, vector<4x8x8xf32> -> vector<4x8x8xf32>
    "tpu.trace_stop"() : () -> ()
    %105 = tpu.concatenate %53, %70, %87, %104 in 2 : vector<4x8x8xf32>, vector<4x8x8xf32>, vector<4x8x8xf32>, vector<4x8x8xf32> -> vector<4x8x32xf32>
    %106 = vector.shape_cast %105 : vector<4x8x32xf32> to vector<32x32xf32>
    %107 = arith.truncf %106 : vector<32x32xf32> to vector<32x32xbf16>
    %c0_38 = arith.constant 0 : index
    %c0_39 = arith.constant 0 : index
    %108 = vector.load %arg6[%c0_38, %c0_39] : memref<32x32xbf16, #tpu.memory_space<vmem>>, vector<32x32xbf16>
    %cst_40 = arith.constant dense<0.000000e+00> : vector<32x32xf32>
    %109 = tpu.matmul %107, %108, %cst_40 {dimension_numbers = #tpu.dot_dimension_numbers<[1], [0], [0], [1], [0, 0, 1, 1], [], []>} : vector<32x32xbf16>, vector<32x32xbf16>, vector<32x32xf32> -> vector<32x32xf32>
    %c0_41 = arith.constant 0 : index
    %c0_42 = arith.constant 0 : index
    %110 = vector.load %arg7[%c0_41, %c0_42] : memref<1x32xf32, #tpu.memory_space<vmem>>, vector<1x32xf32>
    %111 = vector.broadcast %110 : vector<1x32xf32> to vector<32x32xf32>
    %112 = arith.addf %109, %111 : vector<32x32xf32>
    %113 = arith.addf %112, %1 : vector<32x32xf32>
    %c0_43 = arith.constant 0 : index
    %c0_44 = arith.constant 0 : index
    %114 = vector.load %arg8[%c0_43, %c0_44] : memref<2x32xf32, #tpu.memory_space<vmem>>, vector<2x32xf32>
    %115 = vector.extract_strided_slice %114 {offsets = [0, 0], sizes = [1, 32], strides = [1, 1]} : vector<2x32xf32> to vector<1x32xf32>
    %116 = vector.extract_strided_slice %114 {offsets = [1, 0], sizes = [1, 32], strides = [1, 1]} : vector<2x32xf32> to vector<1x32xf32>
    %cst_45 = arith.constant dense<0.000000e+00> : vector<32xf32>
    %117 = vector.multi_reduction <add>, %113, %cst_45 [1] : vector<32x32xf32> to vector<32xf32>
    %118 = vector.shape_cast %117 : vector<32xf32> to vector<32x1xf32>
    %cst_46 = arith.constant 3.200000e+01 : f32
    %119 = vector.broadcast %cst_46 : f32 to vector<32x1xf32>
    %120 = arith.divf %118, %119 : vector<32x1xf32>
    %121 = vector.broadcast %120 : vector<32x1xf32> to vector<32x32xf32>
    %122 = arith.subf %113, %121 : vector<32x32xf32>
    %123 = arith.mulf %122, %122 : vector<32x32xf32>
    %cst_47 = arith.constant dense<0.000000e+00> : vector<32xf32>
    %124 = vector.multi_reduction <add>, %123, %cst_47 [1] : vector<32x32xf32> to vector<32xf32>
    %125 = vector.shape_cast %124 : vector<32xf32> to vector<32x1xf32>
    %cst_48 = arith.constant 3.200000e+01 : f32
    %126 = vector.broadcast %cst_48 : f32 to vector<32x1xf32>
    %127 = arith.divf %125, %126 : vector<32x1xf32>
    %128 = vector.broadcast %120 : vector<32x1xf32> to vector<32x32xf32>
    %129 = arith.subf %113, %128 : vector<32x32xf32>
    %cst_49 = arith.constant 9.99999996E-13 : f32
    %130 = vector.broadcast %cst_49 : f32 to vector<32x1xf32>
    %131 = arith.addf %127, %130 : vector<32x1xf32>
    %132 = math.rsqrt %131 : vector<32x1xf32>
    %133 = vector.broadcast %132 : vector<32x1xf32> to vector<32x32xf32>
    %134 = arith.mulf %129, %133 : vector<32x32xf32>
    %135 = vector.broadcast %115 : vector<1x32xf32> to vector<32x32xf32>
    %136 = arith.mulf %134, %135 : vector<32x32xf32>
    %137 = vector.broadcast %116 : vector<1x32xf32> to vector<32x32xf32>
    %138 = arith.addf %136, %137 : vector<32x32xf32>
    %139 = arith.truncf %138 : vector<32x32xf32> to vector<32x32xbf16>
    %c0_50 = arith.constant 0 : index
    %c0_51 = arith.constant 0 : index
    %140 = vector.load %arg9[%c0_50, %c0_51] : memref<32x32xbf16, #tpu.memory_space<vmem>>, vector<32x32xbf16>
    %cst_52 = arith.constant dense<0.000000e+00> : vector<32x32xf32>
    %141 = tpu.matmul %139, %140, %cst_52 {dimension_numbers = #tpu.dot_dimension_numbers<[1], [0], [0], [1], [0, 0, 1, 1], [], []>} : vector<32x32xbf16>, vector<32x32xbf16>, vector<32x32xf32> -> vector<32x32xf32>
    %c0_53 = arith.constant 0 : index
    %c0_54 = arith.constant 0 : index
    %142 = vector.load %arg10[%c0_53, %c0_54] : memref<1x32xf32, #tpu.memory_space<vmem>>, vector<1x32xf32>
    %143 = vector.broadcast %142 : vector<1x32xf32> to vector<32x32xf32>
    %144 = arith.addf %141, %143 : vector<32x32xf32>
    %c0_55 = arith.constant 0 : index
    %c0_56 = arith.constant 0 : index
    %145 = vector.load %arg11[%c0_55, %c0_56] : memref<32x64xbf16, #tpu.memory_space<vmem>>, vector<32x64xbf16>
    %cst_57 = arith.constant dense<0.000000e+00> : vector<32x64xf32>
    %146 = tpu.matmul %5, %145, %cst_57 {dimension_numbers = #tpu.dot_dimension_numbers<[1], [0], [0], [1], [0, 0, 1, 1], [], []>} : vector<32x32xbf16>, vector<32x64xbf16>, vector<32x64xf32> -> vector<32x64xf32>
    %c0_58 = arith.constant 0 : index
    %c0_59 = arith.constant 0 : index
    %147 = vector.load %arg12[%c0_58, %c0_59] : memref<1x64xf32, #tpu.memory_space<vmem>>, vector<1x64xf32>
    %148 = vector.broadcast %147 : vector<1x64xf32> to vector<32x64xf32>
    %149 = arith.addf %146, %148 : vector<32x64xf32>
    %150 = vector.shape_cast %149 : vector<32x64xf32> to vector<4x8x64xf32>
    %151 = vector.shape_cast %144 : vector<32x32xf32> to vector<4x8x32xf32>
    %152 = vector.extract_strided_slice %150 {offsets = [0, 0, 0], sizes = [4, 8, 32], strides = [1, 1, 1]} : vector<4x8x64xf32> to vector<4x8x32xf32>
    %153 = vector.extract_strided_slice %150 {offsets = [0, 0, 32], sizes = [4, 8, 32], strides = [1, 1, 1]} : vector<4x8x64xf32> to vector<4x8x32xf32>
    %154 = arith.truncf %151 : vector<4x8x32xf32> to vector<4x8x32xbf16>
    %155 = arith.truncf %152 : vector<4x8x32xf32> to vector<4x8x32xbf16>
    %156 = arith.truncf %153 : vector<4x8x32xf32> to vector<4x8x32xbf16>
    %157 = vector.extract_strided_slice %154 {offsets = [0, 0, 0], sizes = [4, 8, 8], strides = [1, 1, 1]} : vector<4x8x32xbf16> to vector<4x8x8xbf16>
    %158 = vector.extract_strided_slice %155 {offsets = [0, 0, 0], sizes = [4, 8, 8], strides = [1, 1, 1]} : vector<4x8x32xbf16> to vector<4x8x8xbf16>
    "tpu.trace_start"() <{level = 10 : i32, message = "bqe,bke->bqk"}> : () -> ()
    %cst_60 = arith.constant dense<0.000000e+00> : vector<4x8x8xf32>
    %159 = tpu.matmul %157, %158, %cst_60 {dimension_numbers = #tpu.dot_dimension_numbers<[2], [2], [1], [1], [0, 0, 0, 1, 1, 1], [0], [0]>} : vector<4x8x8xbf16>, vector<4x8x8xbf16>, vector<4x8x8xf32> -> vector<4x8x8xf32>
    "tpu.trace_stop"() : () -> ()
    %160 = arith.addf %159, %24 : vector<4x8x8xf32>
    %cst_61 = arith.constant dense<0xFF800000> : vector<4x8xf32>
    %161 = vector.multi_reduction <maximumf>, %160, %cst_61 [2] : vector<4x8x8xf32> to vector<4x8xf32>
    %162 = vector.shape_cast %161 : vector<4x8xf32> to vector<4x8x1xf32>
    %163 = vector.broadcast %162 : vector<4x8x1xf32> to vector<4x8x8xf32>
    %164 = arith.subf %160, %163 : vector<4x8x8xf32>
    %165 = math.exp %164 : vector<4x8x8xf32>
    %cst_62 = arith.constant dense<0.000000e+00> : vector<4x8xf32>
    %166 = vector.multi_reduction <add>, %165, %cst_62 [2] : vector<4x8x8xf32> to vector<4x8xf32>
    %167 = vector.shape_cast %166 : vector<4x8xf32> to vector<4x8x1xf32>
    %168 = tpu.reciprocal %167 {approx = true} : vector<4x8x1xf32> -> vector<4x8x1xf32>
    %169 = vector.broadcast %168 : vector<4x8x1xf32> to vector<4x8x8xf32>
    %170 = arith.mulf %165, %169 : vector<4x8x8xf32>
    %171 = arith.truncf %170 : vector<4x8x8xf32> to vector<4x8x8xbf16>
    %172 = vector.extract_strided_slice %156 {offsets = [0, 0, 0], sizes = [4, 8, 8], strides = [1, 1, 1]} : vector<4x8x32xbf16> to vector<4x8x8xbf16>
    "tpu.trace_start"() <{level = 10 : i32, message = "bqk,bke->bqe"}> : () -> ()
    %cst_63 = arith.constant dense<0.000000e+00> : vector<4x8x8xf32>
    %173 = tpu.matmul %171, %172, %cst_63 {dimension_numbers = #tpu.dot_dimension_numbers<[2], [1], [1], [2], [0, 0, 0, 1, 1, 2], [0], [0]>} : vector<4x8x8xbf16>, vector<4x8x8xbf16>, vector<4x8x8xf32> -> vector<4x8x8xf32>
    "tpu.trace_stop"() : () -> ()
    %174 = vector.extract_strided_slice %154 {offsets = [0, 0, 8], sizes = [4, 8, 8], strides = [1, 1, 1]} : vector<4x8x32xbf16> to vector<4x8x8xbf16>
    %175 = vector.extract_strided_slice %155 {offsets = [0, 0, 8], sizes = [4, 8, 8], strides = [1, 1, 1]} : vector<4x8x32xbf16> to vector<4x8x8xbf16>
    "tpu.trace_start"() <{level = 10 : i32, message = "bqe,bke->bqk"}> : () -> ()
    %cst_64 = arith.constant dense<0.000000e+00> : vector<4x8x8xf32>
    %176 = tpu.matmul %174, %175, %cst_64 {dimension_numbers = #tpu.dot_dimension_numbers<[2], [2], [1], [1], [0, 0, 0, 1, 1, 1], [0], [0]>} : vector<4x8x8xbf16>, vector<4x8x8xbf16>, vector<4x8x8xf32> -> vector<4x8x8xf32>
    "tpu.trace_stop"() : () -> ()
    %177 = arith.addf %176, %24 : vector<4x8x8xf32>
    %cst_65 = arith.constant dense<0xFF800000> : vector<4x8xf32>
    %178 = vector.multi_reduction <maximumf>, %177, %cst_65 [2] : vector<4x8x8xf32> to vector<4x8xf32>
    %179 = vector.shape_cast %178 : vector<4x8xf32> to vector<4x8x1xf32>
    %180 = vector.broadcast %179 : vector<4x8x1xf32> to vector<4x8x8xf32>
    %181 = arith.subf %177, %180 : vector<4x8x8xf32>
    %182 = math.exp %181 : vector<4x8x8xf32>
    %cst_66 = arith.constant dense<0.000000e+00> : vector<4x8xf32>
    %183 = vector.multi_reduction <add>, %182, %cst_66 [2] : vector<4x8x8xf32> to vector<4x8xf32>
    %184 = vector.shape_cast %183 : vector<4x8xf32> to vector<4x8x1xf32>
    %185 = tpu.reciprocal %184 {approx = true} : vector<4x8x1xf32> -> vector<4x8x1xf32>
    %186 = vector.broadcast %185 : vector<4x8x1xf32> to vector<4x8x8xf32>
    %187 = arith.mulf %182, %186 : vector<4x8x8xf32>
    %188 = arith.truncf %187 : vector<4x8x8xf32> to vector<4x8x8xbf16>
    %189 = vector.extract_strided_slice %156 {offsets = [0, 0, 8], sizes = [4, 8, 8], strides = [1, 1, 1]} : vector<4x8x32xbf16> to vector<4x8x8xbf16>
    "tpu.trace_start"() <{level = 10 : i32, message = "bqk,bke->bqe"}> : () -> ()
    %cst_67 = arith.constant dense<0.000000e+00> : vector<4x8x8xf32>
    %190 = tpu.matmul %188, %189, %cst_67 {dimension_numbers = #tpu.dot_dimension_numbers<[2], [1], [1], [2], [0, 0, 0, 1, 1, 2], [0], [0]>} : vector<4x8x8xbf16>, vector<4x8x8xbf16>, vector<4x8x8xf32> -> vector<4x8x8xf32>
    "tpu.trace_stop"() : () -> ()
    %191 = vector.extract_strided_slice %154 {offsets = [0, 0, 16], sizes = [4, 8, 8], strides = [1, 1, 1]} : vector<4x8x32xbf16> to vector<4x8x8xbf16>
    %192 = vector.extract_strided_slice %155 {offsets = [0, 0, 16], sizes = [4, 8, 8], strides = [1, 1, 1]} : vector<4x8x32xbf16> to vector<4x8x8xbf16>
    "tpu.trace_start"() <{level = 10 : i32, message = "bqe,bke->bqk"}> : () -> ()
    %cst_68 = arith.constant dense<0.000000e+00> : vector<4x8x8xf32>
    %193 = tpu.matmul %191, %192, %cst_68 {dimension_numbers = #tpu.dot_dimension_numbers<[2], [2], [1], [1], [0, 0, 0, 1, 1, 1], [0], [0]>} : vector<4x8x8xbf16>, vector<4x8x8xbf16>, vector<4x8x8xf32> -> vector<4x8x8xf32>
    "tpu.trace_stop"() : () -> ()
    %194 = arith.addf %193, %24 : vector<4x8x8xf32>
    %cst_69 = arith.constant dense<0xFF800000> : vector<4x8xf32>
    %195 = vector.multi_reduction <maximumf>, %194, %cst_69 [2] : vector<4x8x8xf32> to vector<4x8xf32>
    %196 = vector.shape_cast %195 : vector<4x8xf32> to vector<4x8x1xf32>
    %197 = vector.broadcast %196 : vector<4x8x1xf32> to vector<4x8x8xf32>
    %198 = arith.subf %194, %197 : vector<4x8x8xf32>
    %199 = math.exp %198 : vector<4x8x8xf32>
    %cst_70 = arith.constant dense<0.000000e+00> : vector<4x8xf32>
    %200 = vector.multi_reduction <add>, %199, %cst_70 [2] : vector<4x8x8xf32> to vector<4x8xf32>
    %201 = vector.shape_cast %200 : vector<4x8xf32> to vector<4x8x1xf32>
    %202 = tpu.reciprocal %201 {approx = true} : vector<4x8x1xf32> -> vector<4x8x1xf32>
    %203 = vector.broadcast %202 : vector<4x8x1xf32> to vector<4x8x8xf32>
    %204 = arith.mulf %199, %203 : vector<4x8x8xf32>
    %205 = arith.truncf %204 : vector<4x8x8xf32> to vector<4x8x8xbf16>
    %206 = vector.extract_strided_slice %156 {offsets = [0, 0, 16], sizes = [4, 8, 8], strides = [1, 1, 1]} : vector<4x8x32xbf16> to vector<4x8x8xbf16>
    "tpu.trace_start"() <{level = 10 : i32, message = "bqk,bke->bqe"}> : () -> ()
    %cst_71 = arith.constant dense<0.000000e+00> : vector<4x8x8xf32>
    %207 = tpu.matmul %205, %206, %cst_71 {dimension_numbers = #tpu.dot_dimension_numbers<[2], [1], [1], [2], [0, 0, 0, 1, 1, 2], [0], [0]>} : vector<4x8x8xbf16>, vector<4x8x8xbf16>, vector<4x8x8xf32> -> vector<4x8x8xf32>
    "tpu.trace_stop"() : () -> ()
    %208 = vector.extract_strided_slice %154 {offsets = [0, 0, 24], sizes = [4, 8, 8], strides = [1, 1, 1]} : vector<4x8x32xbf16> to vector<4x8x8xbf16>
    %209 = vector.extract_strided_slice %155 {offsets = [0, 0, 24], sizes = [4, 8, 8], strides = [1, 1, 1]} : vector<4x8x32xbf16> to vector<4x8x8xbf16>
    "tpu.trace_start"() <{level = 10 : i32, message = "bqe,bke->bqk"}> : () -> ()
    %cst_72 = arith.constant dense<0.000000e+00> : vector<4x8x8xf32>
    %210 = tpu.matmul %208, %209, %cst_72 {dimension_numbers = #tpu.dot_dimension_numbers<[2], [2], [1], [1], [0, 0, 0, 1, 1, 1], [0], [0]>} : vector<4x8x8xbf16>, vector<4x8x8xbf16>, vector<4x8x8xf32> -> vector<4x8x8xf32>
    "tpu.trace_stop"() : () -> ()
    %211 = arith.addf %210, %24 : vector<4x8x8xf32>
    %cst_73 = arith.constant dense<0xFF800000> : vector<4x8xf32>
    %212 = vector.multi_reduction <maximumf>, %211, %cst_73 [2] : vector<4x8x8xf32> to vector<4x8xf32>
    %213 = vector.shape_cast %212 : vector<4x8xf32> to vector<4x8x1xf32>
    %214 = vector.broadcast %213 : vector<4x8x1xf32> to vector<4x8x8xf32>
    %215 = arith.subf %211, %214 : vector<4x8x8xf32>
    %216 = math.exp %215 : vector<4x8x8xf32>
    %cst_74 = arith.constant dense<0.000000e+00> : vector<4x8xf32>
    %217 = vector.multi_reduction <add>, %216, %cst_74 [2] : vector<4x8x8xf32> to vector<4x8xf32>
    %218 = vector.shape_cast %217 : vector<4x8xf32> to vector<4x8x1xf32>
    %219 = tpu.reciprocal %218 {approx = true} : vector<4x8x1xf32> -> vector<4x8x1xf32>
    %220 = vector.broadcast %219 : vector<4x8x1xf32> to vector<4x8x8xf32>
    %221 = arith.mulf %216, %220 : vector<4x8x8xf32>
    %222 = arith.truncf %221 : vector<4x8x8xf32> to vector<4x8x8xbf16>
    %223 = vector.extract_strided_slice %156 {offsets = [0, 0, 24], sizes = [4, 8, 8], strides = [1, 1, 1]} : vector<4x8x32xbf16> to vector<4x8x8xbf16>
    "tpu.trace_start"() <{level = 10 : i32, message = "bqk,bke->bqe"}> : () -> ()
    %cst_75 = arith.constant dense<0.000000e+00> : vector<4x8x8xf32>
    %224 = tpu.matmul %222, %223, %cst_75 {dimension_numbers = #tpu.dot_dimension_numbers<[2], [1], [1], [2], [0, 0, 0, 1, 1, 2], [0], [0]>} : vector<4x8x8xbf16>, vector<4x8x8xbf16>, vector<4x8x8xf32> -> vector<4x8x8xf32>
    "tpu.trace_stop"() : () -> ()
    %225 = tpu.concatenate %173, %190, %207, %224 in 2 : vector<4x8x8xf32>, vector<4x8x8xf32>, vector<4x8x8xf32>, vector<4x8x8xf32> -> vector<4x8x32xf32>
    %226 = vector.shape_cast %225 : vector<4x8x32xf32> to vector<32x32xf32>
    %227 = arith.truncf %226 : vector<32x32xf32> to vector<32x32xbf16>
    %c0_76 = arith.constant 0 : index
    %c0_77 = arith.constant 0 : index
    %228 = vector.load %arg13[%c0_76, %c0_77] : memref<32x48xbf16, #tpu.memory_space<vmem>>, vector<32x48xbf16>
    %cst_78 = arith.constant dense<0.000000e+00> : vector<32x48xf32>
    %229 = tpu.matmul %227, %228, %cst_78 {dimension_numbers = #tpu.dot_dimension_numbers<[1], [0], [0], [1], [0, 0, 1, 1], [], []>} : vector<32x32xbf16>, vector<32x48xbf16>, vector<32x48xf32> -> vector<32x48xf32>
    %c0_79 = arith.constant 0 : index
    %c0_80 = arith.constant 0 : index
    %230 = vector.load %arg14[%c0_79, %c0_80] : memref<1x48xf32, #tpu.memory_space<vmem>>, vector<1x48xf32>
    %231 = vector.broadcast %230 : vector<1x48xf32> to vector<32x48xf32>
    %232 = arith.addf %229, %231 : vector<32x48xf32>
    %c0_81 = arith.constant 0 : index
    %c0_82 = arith.constant 0 : index
    %233 = vector.load %arg15[%c0_81, %c0_82] : memref<2x48xf32, #tpu.memory_space<vmem>>, vector<2x48xf32>
    %234 = vector.extract_strided_slice %233 {offsets = [0, 0], sizes = [1, 48], strides = [1, 1]} : vector<2x48xf32> to vector<1x48xf32>
    %235 = vector.extract_strided_slice %233 {offsets = [1, 0], sizes = [1, 48], strides = [1, 1]} : vector<2x48xf32> to vector<1x48xf32>
    %cst_83 = arith.constant dense<0.000000e+00> : vector<32xf32>
    %236 = vector.multi_reduction <add>, %232, %cst_83 [1] : vector<32x48xf32> to vector<32xf32>
    %237 = vector.shape_cast %236 : vector<32xf32> to vector<32x1xf32>
    %cst_84 = arith.constant 4.800000e+01 : f32
    %238 = vector.broadcast %cst_84 : f32 to vector<32x1xf32>
    %239 = arith.divf %237, %238 : vector<32x1xf32>
    %240 = vector.broadcast %239 : vector<32x1xf32> to vector<32x48xf32>
    %241 = arith.subf %232, %240 : vector<32x48xf32>
    %242 = arith.mulf %241, %241 : vector<32x48xf32>
    %cst_85 = arith.constant dense<0.000000e+00> : vector<32xf32>
    %243 = vector.multi_reduction <add>, %242, %cst_85 [1] : vector<32x48xf32> to vector<32xf32>
    %244 = vector.shape_cast %243 : vector<32xf32> to vector<32x1xf32>
    %cst_86 = arith.constant 4.800000e+01 : f32
    %245 = vector.broadcast %cst_86 : f32 to vector<32x1xf32>
    %246 = arith.divf %244, %245 : vector<32x1xf32>
    %247 = vector.broadcast %239 : vector<32x1xf32> to vector<32x48xf32>
    %248 = arith.subf %232, %247 : vector<32x48xf32>
    %cst_87 = arith.constant 9.99999996E-13 : f32
    %249 = vector.broadcast %cst_87 : f32 to vector<32x1xf32>
    %250 = arith.addf %246, %249 : vector<32x1xf32>
    %251 = math.rsqrt %250 : vector<32x1xf32>
    %252 = vector.broadcast %251 : vector<32x1xf32> to vector<32x48xf32>
    %253 = arith.mulf %248, %252 : vector<32x48xf32>
    %254 = vector.broadcast %234 : vector<1x48xf32> to vector<32x48xf32>
    %255 = arith.mulf %253, %254 : vector<32x48xf32>
    %256 = vector.broadcast %235 : vector<1x48xf32> to vector<32x48xf32>
    %257 = arith.addf %255, %256 : vector<32x48xf32>
    %258 = arith.truncf %257 : vector<32x48xf32> to vector<32x48xbf16>
    %c0_88 = arith.constant 0 : index
    %c0_89 = arith.constant 0 : index
    %259 = vector.load %arg18[%c0_88, %c0_89] : memref<48x64xbf16, #tpu.memory_space<vmem>>, vector<48x64xbf16>
    %cst_90 = arith.constant dense<0.000000e+00> : vector<32x64xf32>
    %260 = tpu.matmul %258, %259, %cst_90 {dimension_numbers = #tpu.dot_dimension_numbers<[1], [0], [0], [1], [0, 0, 1, 1], [], []>} : vector<32x48xbf16>, vector<48x64xbf16>, vector<32x64xf32> -> vector<32x64xf32>
    %c0_91 = arith.constant 0 : index
    %c0_92 = arith.constant 0 : index
    %261 = vector.load %arg19[%c0_91, %c0_92] : memref<1x64xf32, #tpu.memory_space<vmem>>, vector<1x64xf32>
    %262 = vector.broadcast %261 : vector<1x64xf32> to vector<32x64xf32>
    %263 = arith.addf %260, %262 : vector<32x64xf32>
    %cst_93 = arith.constant 0.000000e+00 : f32
    %264 = vector.broadcast %cst_93 : f32 to vector<32x64xf32>
    %265 = arith.maximumf %263, %264 : vector<32x64xf32>
    %266 = arith.truncf %265 : vector<32x64xf32> to vector<32x64xbf16>
    %c0_94 = arith.constant 0 : index
    %c0_95 = arith.constant 0 : index
    %267 = vector.load %arg20[%c0_94, %c0_95] : memref<64x48xbf16, #tpu.memory_space<vmem>>, vector<64x48xbf16>
    %cst_96 = arith.constant dense<0.000000e+00> : vector<32x48xf32>
    %268 = tpu.matmul %266, %267, %cst_96 {dimension_numbers = #tpu.dot_dimension_numbers<[1], [0], [0], [1], [0, 0, 1, 1], [], []>} : vector<32x64xbf16>, vector<64x48xbf16>, vector<32x48xf32> -> vector<32x48xf32>
    %c0_97 = arith.constant 0 : index
    %c0_98 = arith.constant 0 : index
    %269 = vector.load %arg21[%c0_97, %c0_98] : memref<1x48xf32, #tpu.memory_space<vmem>>, vector<1x48xf32>
    %270 = vector.broadcast %269 : vector<1x48xf32> to vector<32x48xf32>
    %271 = arith.addf %268, %270 : vector<32x48xf32>
    %272 = arith.addf %271, %257 : vector<32x48xf32>
    %c0_99 = arith.constant 0 : index
    %c0_100 = arith.constant 0 : index
    %273 = vector.load %arg22[%c0_99, %c0_100] : memref<2x48xf32, #tpu.memory_space<vmem>>, vector<2x48xf32>
    %274 = vector.extract_strided_slice %273 {offsets = [0, 0], sizes = [1, 48], strides = [1, 1]} : vector<2x48xf32> to vector<1x48xf32>
    %275 = vector.extract_strided_slice %273 {offsets = [1, 0], sizes = [1, 48], strides = [1, 1]} : vector<2x48xf32> to vector<1x48xf32>
    %cst_101 = arith.constant dense<0.000000e+00> : vector<32xf32>
    %276 = vector.multi_reduction <add>, %272, %cst_101 [1] : vector<32x48xf32> to vector<32xf32>
    %277 = vector.shape_cast %276 : vector<32xf32> to vector<32x1xf32>
    %cst_102 = arith.constant 4.800000e+01 : f32
    %278 = vector.broadcast %cst_102 : f32 to vector<32x1xf32>
    %279 = arith.divf %277, %278 : vector<32x1xf32>
    %280 = vector.broadcast %279 : vector<32x1xf32> to vector<32x48xf32>
    %281 = arith.subf %272, %280 : vector<32x48xf32>
    %282 = arith.mulf %281, %281 : vector<32x48xf32>
    %cst_103 = arith.constant dense<0.000000e+00> : vector<32xf32>
    %283 = vector.multi_reduction <add>, %282, %cst_103 [1] : vector<32x48xf32> to vector<32xf32>
    %284 = vector.shape_cast %283 : vector<32xf32> to vector<32x1xf32>
    %cst_104 = arith.constant 4.800000e+01 : f32
    %285 = vector.broadcast %cst_104 : f32 to vector<32x1xf32>
    %286 = arith.divf %284, %285 : vector<32x1xf32>
    %287 = vector.broadcast %279 : vector<32x1xf32> to vector<32x48xf32>
    %288 = arith.subf %272, %287 : vector<32x48xf32>
    %cst_105 = arith.constant 9.99999996E-13 : f32
    %289 = vector.broadcast %cst_105 : f32 to vector<32x1xf32>
    %290 = arith.addf %286, %289 : vector<32x1xf32>
    %291 = math.rsqrt %290 : vector<32x1xf32>
    %292 = vector.broadcast %291 : vector<32x1xf32> to vector<32x48xf32>
    %293 = arith.mulf %288, %292 : vector<32x48xf32>
    %294 = vector.broadcast %274 : vector<1x48xf32> to vector<32x48xf32>
    %295 = arith.mulf %293, %294 : vector<32x48xf32>
    %296 = vector.broadcast %275 : vector<1x48xf32> to vector<32x48xf32>
    %297 = arith.addf %295, %296 : vector<32x48xf32>
    %298 = vector.shape_cast %297 : vector<32x48xf32> to vector<4x8x48xf32>
    %c0_106 = arith.constant 0 : index
    %c0_107 = arith.constant 0 : index
    %c0_108 = arith.constant 0 : index
    %299 = vector.load %arg23[%c0_106, %c0_107, %c0_108] : memref<4x8x48xf32, #tpu.memory_space<vmem>>, vector<4x8x48xf32>
    tpu.vector_store %arg23[%c0_106, %c0_107, %c0_108], %298 {strides = array<i32>} : memref<4x8x48xf32, #tpu.memory_space<vmem>>, vector<4x8x48xf32>,
    return
  }
  func.func @transform_0(%arg0: i32) -> (i32, i32, i32) {
    %c0_i32 = arith.constant 0 : i32
    %c0_i32_0 = arith.constant 0 : i32
    %c0_i32_1 = arith.constant 0 : i32
    return %arg0, %c0_i32, %c0_i32_0 : i32, i32, i32
  }
  func.func @transform_1(%arg0: i32) -> (i32, i32, i32) {
    %c0_i32 = arith.constant 0 : i32
    %c0_i32_0 = arith.constant 0 : i32
    %c0_i32_1 = arith.constant 0 : i32
    return %arg0, %c0_i32, %c0_i32_0 : i32, i32, i32
  }
  func.func @transform_2(%arg0: i32) -> (i32, i32, i32) {
    %c0_i32 = arith.constant 0 : i32
    %c0_i32_0 = arith.constant 0 : i32
    %c0_i32_1 = arith.constant 0 : i32
    return %arg0, %c0_i32, %c0_i32_0 : i32, i32, i32
  }
  func.func @transform_3(%arg0: i32) -> (i32, i32) {
    %c0_i32 = arith.constant 0 : i32
    %c0_i32_0 = arith.constant 0 : i32
    %c0_i32_1 = arith.constant 0 : i32
    return %c0_i32, %c0_i32_0 : i32, i32
  }
  func.func @transform_4(%arg0: i32) -> (i32, i32) {
    %c0_i32 = arith.constant 0 : i32
    %c0_i32_0 = arith.constant 0 : i32
    %c0_i32_1 = arith.constant 0 : i32
    return %c0_i32, %c0_i32_0 : i32, i32
  }
  func.func @transform_5(%arg0: i32) -> (i32, i32) {
    %c0_i32 = arith.constant 0 : i32
    %c0_i32_0 = arith.constant 0 : i32
    %c0_i32_1 = arith.constant 0 : i32
    return %c0_i32, %c0_i32_0 : i32, i32
  }
  func.func @transform_6(%arg0: i32) -> (i32, i32) {
    %c0_i32 = arith.constant 0 : i32
    %c0_i32_0 = arith.constant 0 : i32
    %c0_i32_1 = arith.constant 0 : i32
    return %c0_i32, %c0_i32_0 : i32, i32
  }
  func.func @transform_7(%arg0: i32) -> (i32, i32) {
    %c0_i32 = arith.constant 0 : i32
    %c0_i32_0 = arith.constant 0 : i32
    %c0_i32_1 = arith.constant 0 : i32
    return %c0_i32, %c0_i32_0 : i32, i32
  }
  func.func @transform_8(%arg0: i32) -> (i32, i32) {
    %c0_i32 = arith.constant 0 : i32
    %c0_i32_0 = arith.constant 0 : i32
    %c0_i32_1 = arith.constant 0 : i32
    return %c0_i32, %c0_i32_0 : i32, i32
  }
  func.func @transform_9(%arg0: i32) -> (i32, i32) {
    %c0_i32 = arith.constant 0 : i32
    %c0_i32_0 = arith.constant 0 : i32
    %c0_i32_1 = arith.constant 0 : i32
    return %c0_i32, %c0_i32_0 : i32, i32
  }
  func.func @transform_10(%arg0: i32) -> (i32, i32) {
    %c0_i32 = arith.constant 0 : i32
    %c0_i32_0 = arith.constant 0 : i32
    %c0_i32_1 = arith.constant 0 : i32
    return %c0_i32, %c0_i32_0 : i32, i32
  }
  func.func @transform_11(%arg0: i32) -> (i32, i32) {
    %c0_i32 = arith.constant 0 : i32
    %c0_i32_0 = arith.constant 0 : i32
    %c0_i32_1 = arith.constant 0 : i32
    return %c0_i32, %c0_i32_0 : i32, i32
  }
  func.func @transform_12(%arg0: i32) -> (i32, i32) {
    %c0_i32 = arith.constant 0 : i32
    %c0_i32_0 = arith.constant 0 : i32
    %c0_i32_1 = arith.constant 0 : i32
    return %c0_i32, %c0_i32_0 : i32, i32
  }
  func.func @transform_13(%arg0: i32) -> (i32, i32) {
    %c0_i32 = arith.constant 0 : i32
    %c0_i32_0 = arith.constant 0 : i32
    %c0_i32_1 = arith.constant 0 : i32
    return %c0_i32, %c0_i32_0 : i32, i32
  }
  func.func @transform_14(%arg0: i32) -> (i32, i32) {
    %c0_i32 = arith.constant 0 : i32
    %c0_i32_0 = arith.constant 0 : i32
    %c0_i32_1 = arith.constant 0 : i32
    return %c0_i32, %c0_i32_0 : i32, i32
  }
  func.func @transform_15(%arg0: i32) -> (i32, i32) {
    %c0_i32 = arith.constant 0 : i32
    %c0_i32_0 = arith.constant 0 : i32
    %c0_i32_1 = arith.constant 0 : i32
    return %c0_i32, %c0_i32_0 : i32, i32
  }
  func.func @transform_16(%arg0: i32) -> (i32, i32) {
    %c0_i32 = arith.constant 0 : i32
    %c0_i32_0 = arith.constant 0 : i32
    %c0_i32_1 = arith.constant 0 : i32
    return %c0_i32, %c0_i32_0 : i32, i32
  }
  func.func @transform_17(%arg0: i32) -> (i32, i32) {
    %c0_i32 = arith.constant 0 : i32
    %c0_i32_0 = arith.constant 0 : i32
    %c0_i32_1 = arith.constant 0 : i32
    return %c0_i32, %c0_i32_0 : i32, i32
  }
  func.func @transform_18(%arg0: i32) -> (i32, i32) {
    %c0_i32 = arith.constant 0 : i32
    %c0_i32_0 = arith.constant 0 : i32
    %c0_i32_1 = arith.constant 0 : i32
    return %c0_i32, %c0_i32_0 : i32, i32
  }
  func.func @transform_19(%arg0: i32) -> (i32, i32) {
    %c0_i32 = arith.constant 0 : i32
    %c0_i32_0 = arith.constant 0 : i32
    %c0_i32_1 = arith.constant 0 : i32
    return %c0_i32, %c0_i32_0 : i32, i32
  }
  func.func @transform_20(%arg0: i32) -> (i32, i32) {
    %c0_i32 = arith.constant 0 : i32
    %c0_i32_0 = arith.constant 0 : i32
    %c0_i32_1 = arith.constant 0 : i32
    return %c0_i32, %c0_i32_0 : i32, i32
  }
  func.func @transform_21(%arg0: i32) -> (i32, i32) {
    %c0_i32 = arith.constant 0 : i32
    %c0_i32_0 = arith.constant 0 : i32
    %c0_i32_1 = arith.constant 0 : i32
    return %c0_i32, %c0_i32_0 : i32, i32
  }
  func.func @transform_22(%arg0: i32) -> (i32, i32, i32) {
    %c0_i32 = arith.constant 0 : i32
    %c0_i32_0 = arith.constant 0 : i32
    %c0_i32_1 = arith.constant 0 : i32
    return %arg0, %c0_i32, %c0_i32_0 : i32, i32, i32
  }
  func.func @transform_23(%arg0: i32) -> (i32, i32, i32) {
    %c0_i32 = arith.constant 0 : i32
    %c0_i32_0 = arith.constant 0 : i32
    %c0_i32_1 = arith.constant 0 : i32
    return %arg0, %c0_i32, %c0_i32_0 : i32, i32, i32
  }
}

module attributes {stable_mosaic.version = 11 : i64} {
  func.func @kernel(%arg0: i32, %arg1: memref<4x8x32xf32, #tpu.memory_space<vmem>>, %arg2: memref<4x8x32xf32, #tpu.memory_space<vmem>>, %arg3: memref<4x1x8xf32, #tpu.memory_space<vmem>>, %arg4: memref<32x96xbf16, #tpu.memory_space<vmem>>, %arg5: memref<1x96xf32, #tpu.memory_space<vmem>>, %arg6: memref<32x32xbf16, #tpu.memory_space<vmem>>, %arg7: memref<1x32xf32, #tpu.memory_space<vmem>>, %arg8: memref<2x32xf32, #tpu.memory_space<vmem>>, %arg9: memref<32x32xbf16, #tpu.memory_space<vmem>>, %arg10: memref<1x32xf32, #tpu.memory_space<vmem>>, %arg11: memref<32x64xbf16, #tpu.memory_space<vmem>>, %arg12: memref<1x64xf32, #tpu.memory_space<vmem>>, %arg13: memref<32x48xbf16, #tpu.memory_space<vmem>>, %arg14: memref<1x48xf32, #tpu.memory_space<vmem>>, %arg15: memref<2x48xf32, #tpu.memory_space<vmem>>, %arg16: memref<32x48xbf16, #tpu.memory_space<vmem>>, %arg17: memref<1x48xf32, #tpu.memory_space<vmem>>, %arg18: memref<48x64xbf16, #tpu.memory_space<vmem>>, %arg19: memref<1x64xf32, #tpu.memory_space<vmem>>, %arg20: memref<64x48xbf16, #tpu.memory_space<vmem>>, %arg21: memref<1x48xf32, #tpu.memory_space<vmem>>, %arg22: memref<2x48xf32, #tpu.memory_space<vmem>>, %arg23: memref<4x8x48xf32, #tpu.memory_space<vmem>>, %arg24: memref<4x8x48xf32, #tpu.memory_space<vmem>>) attributes {dimension_semantics = [#tpu.dimension_semantics<parallel>], iteration_bounds = array<i64: 1>, scalar_prefetch = 0 : i64, scratch_operands = 0 : i64, tpu.core_type = #tpu.core_type<tc>, window_params = [{transform_indices = @transform_0, window_bounds = array<i64: 4, 8, 32>}, {transform_indices = @transform_1, window_bounds = array<i64: 4, 8, 32>}, {transform_indices = @transform_2, window_bounds = array<i64: 4, 1, 8>}, {pipeline_mode = #tpu.pipeline_mode<synchronous>, transform_indices = @transform_3, window_bounds = array<i64: 32, 96>}, {pipeline_mode = #tpu.pipeline_mode<synchronous>, transform_indices = @transform_4, window_bounds = array<i64: 1, 96>}, {pipeline_mode = #tpu.pipeline_mode<synchronous>, transform_indices = @transform_5, window_bounds = array<i64: 32, 32>}, {pipeline_mode = #tpu.pipeline_mode<synchronous>, transform_indices = @transform_6, window_bounds = array<i64: 1, 32>}, {pipeline_mode = #tpu.pipeline_mode<synchronous>, transform_indices = @transform_7, window_bounds = array<i64: 2, 32>}, {pipeline_mode = #tpu.pipeline_mode<synchronous>, transform_indices = @transform_8, window_bounds = array<i64: 32, 32>}, {pipeline_mode = #tpu.pipeline_mode<synchronous>, transform_indices = @transform_9, window_bounds = array<i64: 1, 32>}, {pipeline_mode = #tpu.pipeline_mode<synchronous>, transform_indices = @transform_10, window_bounds = array<i64: 32, 64>}, {pipeline_mode = #tpu.pipeline_mode<synchronous>, transform_indices = @transform_11, window_bounds = array<i64: 1, 64>}, {pipeline_mode = #tpu.pipeline_mode<synchronous>, transform_indices = @transform_12, window_bounds = array<i64: 32, 48>}, {pipeline_mode = #tpu.pipeline_mode<synchronous>, transform_indices = @transform_13, window_bounds = array<i64: 1, 48>}, {pipeline_mode = #tpu.pipeline_mode<synchronous>, transform_indices = @transform_14, window_bounds = array<i64: 2, 48>}, {pipeline_mode = #tpu.pipeline_mode<synchronous>, transform_indices = @transform_15, window_bounds = array<i64: 32, 48>}, {pipeline_mode = #tpu.pipeline_mode<synchronous>, transform_indices = @transform_16, window_bounds = array<i64: 1, 48>}, {pipeline_mode = #tpu.pipeline_mode<synchronous>, transform_indices = @transform_17, window_bounds = array<i64: 48, 64>}, {pipeline_mode = #tpu.pipeline_mode<synchronous>, transform_indices = @transform_18, window_bounds = array<i64: 1, 64>}, {pipeline_mode = #tpu.pipeline_mode<synchronous>, transform_indices = @transform_19, window_bounds = array<i64: 64, 48>}, {pipeline_mode = #tpu.pipeline_mode<synchronous>, transform_indices = @transform_20, window_bounds = array<i64: 1, 48>}, {pipeline_mode = #tpu.pipeline_mode<synchronous>, transform_indices = @transform_21, window_bounds = array<i64: 2, 48>}, {transform_indices = @transform_22, window_bounds = array<i64: 4, 8, 48>}, {transform_indices = @transform_23, window_bounds = array<i64: 4, 8, 48>}]} {
    %c0 = arith.constant 0 : index
    %c0_0 = arith.constant 0 : index
    %c0_1 = arith.constant 0 : index
    %0 = vector.load %arg1[%c0, %c0_0, %c0_1] : memref<4x8x32xf32, #tpu.memory_space<vmem>>, vector<4x8x32xf32>
    %1 = vector.shape_cast %0 : vector<4x8x32xf32> to vector<32x32xf32>
    %c0_2 = arith.constant 0 : index
    %c0_3 = arith.constant 0 : index
    %c0_4 = arith.constant 0 : index
    %2 = vector.load %arg2[%c0_2, %c0_3, %c0_4] : memref<4x8x32xf32, #tpu.memory_space<vmem>>, vector<4x8x32xf32>
    %3 = vector.shape_cast %2 : vector<4x8x32xf32> to vector<32x32xf32>
    %4 = arith.truncf %1 : vector<32x32xf32> to vector<32x32xbf16>
    %5 = arith.truncf %3 : vector<32x32xf32> to vector<32x32xbf16>
    %c0_5 = arith.constant 0 : index
    %c0_6 = arith.constant 0 : index
    %6 = vector.load %arg16[%c0_5, %c0_6] : memref<32x48xbf16, #tpu.memory_space<vmem>>, vector<32x48xbf16>
    %cst = arith.constant dense<0.000000e+00> : vector<32x48xf32>
    %7 = tpu.matmul %5, %6, %cst {dimension_numbers = #tpu.dot_dimension_numbers<[1], [0], [0], [1], [0, 0, 1, 1], [], []>} : vector<32x32xbf16>, vector<32x48xbf16>, vector<32x48xf32> -> vector<32x48xf32>
    %c0_7 = arith.constant 0 : index
    %c0_8 = arith.constant 0 : index
    %8 = vector.load %arg17[%c0_7, %c0_8] : memref<1x48xf32, #tpu.memory_space<vmem>>, vector<1x48xf32>
    %9 = vector.broadcast %8 : vector<1x48xf32> to vector<32x48xf32>
    %10 = arith.addf %7, %9 : vector<32x48xf32>
    %11 = vector.shape_cast %10 : vector<32x48xf32> to vector<4x8x48xf32>
    %c0_9 = arith.constant 0 : index
    %c0_10 = arith.constant 0 : index
    %c0_11 = arith.constant 0 : index
    %12 = vector.load %arg24[%c0_9, %c0_10, %c0_11] : memref<4x8x48xf32, #tpu.memory_space<vmem>>, vector<4x8x48xf32>
    tpu.vector_store %arg24[%c0_9, %c0_10, %c0_11], %11 {strides = array<i32>} : memref<4x8x48xf32, #tpu.memory_space<vmem>>, vector<4x8x48xf32>,
    %13 = tpu.iota {dimensions = array<i32: 0>} : vector<8x8xi32>
    %14 = tpu.iota {dimensions = array<i32: 1>} : vector<8x8xi32>
    %15 = arith.cmpi sle, %14, %13 : vector<8x8xi32>
    %cst_12 = arith.constant 0.000000e+00 : f32
    %cst_13 = arith.constant -1.000000e+04 : f32
    %16 = vector.broadcast %cst_12 : f32 to vector<8x8xf32>
    %17 = vector.broadcast %cst_13 : f32 to vector<8x8xf32>
    %18 = arith.select %15, %16, %17 : vector<8x8xi1>, vector<8x8xf32>
    %19 = vector.shape_cast %18 : vector<8x8xf32> to vector<1x8x8xf32>
    %20 = vector.shape_cast %19 : vector<1x8x8xf32> to vector<1x8x8xf32>
    %21 = vector.broadcast %20 : vector<1x8x8xf32> to vector<4x8x8xf32>
    %c0_14 = arith.constant 0 : index
    %c0_15 = arith.constant 0 : index
    %c0_16 = arith.constant 0 : index
    %22 = vector.load %arg3[%c0_14, %c0_15, %c0_16] : memref<4x1x8xf32, #tpu.memory_space<vmem>>, vector<4x1x8xf32>
    %23 = vector.shape_cast %22 : vector<4x1x8xf32> to vector<4x1x8xf32>
    %24 = vector.broadcast %23 : vector<4x1x8xf32> to vector<4x8x8xf32>
    %c0_17 = arith.constant 0 : index
    %c0_18 = arith.constant 0 : index
    %25 = vector.load %arg4[%c0_17, %c0_18] : memref<32x96xbf16, #tpu.memory_space<vmem>>, vector<32x96xbf16>
    %cst_19 = arith.constant dense<0.000000e+00> : vector<32x96xf32>
    %26 = tpu.matmul %4, %25, %cst_19 {dimension_numbers = #tpu.dot_dimension_numbers<[1], [0], [0], [1], [0, 0, 1, 1], [], []>} : vector<32x32xbf16>, vector<32x96xbf16>, vector<32x96xf32> -> vector<32x96xf32>
    %c0_20 = arith.constant 0 : index
    %c0_21 = arith.constant 0 : index
    %27 = vector.load %arg5[%c0_20, %c0_21] : memref<1x96xf32, #tpu.memory_space<vmem>>, vector<1x96xf32>
    %28 = vector.broadcast %27 : vector<1x96xf32> to vector<32x96xf32>
    %29 = arith.addf %26, %28 : vector<32x96xf32>
    %30 = vector.shape_cast %29 : vector<32x96xf32> to vector<4x8x96xf32>
    %31 = vector.extract_strided_slice %30 {offsets = [0, 0, 0], sizes = [4, 8, 32], strides = [1, 1, 1]} : vector<4x8x96xf32> to vector<4x8x32xf32>
    %32 = vector.extract_strided_slice %30 {offsets = [0, 0, 32], sizes = [4, 8, 32], strides = [1, 1, 1]} : vector<4x8x96xf32> to vector<4x8x32xf32>
    %33 = vector.extract_strided_slice %30 {offsets = [0, 0, 64], sizes = [4, 8, 32], strides = [1, 1, 1]} : vector<4x8x96xf32> to vector<4x8x32xf32>
    %34 = arith.truncf %31 : vector<4x8x32xf32> to vector<4x8x32xbf16>
    %35 = arith.truncf %32 : vector<4x8x32xf32> to vector<4x8x32xbf16>
    %36 = arith.truncf %33 : vector<4x8x32xf32> to vector<4x8x32xbf16>
    %37 = vector.extract_strided_slice %34 {offsets = [0, 0, 0], sizes = [4, 8, 8], strides = [1, 1, 1]} : vector<4x8x32xbf16> to vector<4x8x8xbf16>
    %38 = vector.extract_strided_slice %35 {offsets = [0, 0, 0], sizes = [4, 8, 8], strides = [1, 1, 1]} : vector<4x8x32xbf16> to vector<4x8x8xbf16>
    "tpu.trace_start"() <{level = 10 : i32, message = "bqe,bke->bqk"}> : () -> ()
    %cst_22 = arith.constant dense<0.000000e+00> : vector<4x8x8xf32>
    %39 = tpu.matmul %37, %38, %cst_22 {dimension_numbers = #tpu.dot_dimension_numbers<[2], [2], [1], [1], [0, 0, 0, 1, 1, 1], [0], [0]>} : vector<4x8x8xbf16>, vector<4x8x8xbf16>, vector<4x8x8xf32> -> vector<4x8x8xf32>
    "tpu.trace_stop"() : () -> ()
    %40 = arith.addf %39, %21 : vector<4x8x8xf32>
    %cst_23 = arith.constant dense<0xFF800000> : vector<4x8xf32>
    %41 = vector.multi_reduction <maximumf>, %40, %cst_23 [2] : vector<4x8x8xf32> to vector<4x8xf32>
    %42 = vector.shape_cast %41 : vector<4x8xf32> to vector<4x8x1xf32>
    %43 = vector.broadcast %42 : vector<4x8x1xf32> to vector<4x8x8xf32>
    %44 = arith.subf %40, %43 : vector<4x8x8xf32>
    %45 = math.exp %44 : vector<4x8x8xf32>
    %cst_24 = arith.constant dense<0.000000e+00> : vector<4x8xf32>
    %46 = vector.multi_reduction <add>, %45, %cst_24 [2] : vector<4x8x8xf32> to vector<4x8xf32>
    %47 = vector.shape_cast %46 : vector<4x8xf32> to vector<4x8x1xf32>
    %48 = tpu.reciprocal %47 {approx = true} : vector<4x8x1xf32> -> vector<4x8x1xf32>
    %49 = vector.broadcast %48 : vector<4x8x1xf32> to vector<4x8x8xf32>
    %50 = arith.mulf %45, %49 : vector<4x8x8xf32>
    %51 = arith.truncf %50 : vector<4x8x8xf32> to vector<4x8x8xbf16>
    %52 = vector.extract_strided_slice %36 {offsets = [0, 0, 0], sizes = [4, 8, 8], strides = [1, 1, 1]} : vector<4x8x32xbf16> to vector<4x8x8xbf16>
    "tpu.trace_start"() <{level = 10 : i32, message = "bqk,bke->bqe"}> : () -> ()
    %cst_25 = arith.constant dense<0.000000e+00> : vector<4x8x8xf32>
    %53 = tpu.matmul %51, %52, %cst_25 {dimension_numbers = #tpu.dot_dimension_numbers<[2], [1], [1], [2], [0, 0, 0, 1, 1, 2], [0], [0]>} : vector<4x8x8xbf16>, vector<4x8x8xbf16>, vector<4x8x8xf32> -> vector<4x8x8xf32>
    "tpu.trace_stop"() : () -> ()
    %54 = vector.extract_strided_slice %34 {offsets = [0, 0, 8], sizes = [4, 8, 8], strides = [1, 1, 1]} : vector<4x8x32xbf16> to vector<4x8x8xbf16>
    %55 = vector.extract_strided_slice %35 {offsets = [0, 0, 8], sizes = [4, 8, 8], strides = [1, 1, 1]} : vector<4x8x32xbf16> to vector<4x8x8xbf16>
    "tpu.trace_start"() <{level = 10 : i32, message = "bqe,bke->bqk"}> : () -> ()
    %cst_26 = arith.constant dense<0.000000e+00> : vector<4x8x8xf32>
    %56 = tpu.matmul %54, %55, %cst_26 {dimension_numbers = #tpu.dot_dimension_numbers<[2], [2], [1], [1], [0, 0, 0, 1, 1, 1], [0], [0]>} : vector<4x8x8xbf16>, vector<4x8x8xbf16>, vector<4x8x8xf32> -> vector<4x8x8xf32>
    "tpu.trace_stop"() : () -> ()
    %57 = arith.addf %56, %21 : vector<4x8x8xf32>
    %cst_27 = arith.constant dense<0xFF800000> : vector<4x8xf32>
    %58 = vector.multi_reduction <maximumf>, %57, %cst_27 [2] : vector<4x8x8xf32> to vector<4x8xf32>
    %59 = vector.shape_cast %58 : vector<4x8xf32> to vector<4x8x1xf32>
    %60 = vector.broadcast %59 : vector<4x8x1xf32> to vector<4x8x8xf32>
    %61 = arith.subf %57, %60 : vector<4x8x8xf32>
    %62 = math.exp %61 : vector<4x8x8xf32>
    %cst_28 = arith.constant dense<0.000000e+00> : vector<4x8xf32>
    %63 = vector.multi_reduction <add>, %62, %cst_28 [2] : vector<4x8x8xf32> to vector<4x8xf32>
    %64 = vector.shape_cast %63 : vector<4x8xf32> to vector<4x8x1xf32>
    %65 = tpu.reciprocal %64 {approx = true} : vector<4x8x1xf32> -> vector<4x8x1xf32>
    %66 = vector.broadcast %65 : vector<4x8x1xf32> to vector<4x8x8xf32>
    %67 = arith.mulf %62, %66 : vector<4x8x8xf32>
    %68 = arith.truncf %67 : vector<4x8x8xf32> to vector<4x8x8xbf16>
    %69 = vector.extract_strided_slice %36 {offsets = [0, 0, 8], sizes = [4, 8, 8], strides = [1, 1, 1]} : vector<4x8x32xbf16> to vector<4x8x8xbf16>
    "tpu.trace_start"() <{level = 10 : i32, message = "bqk,bke->bqe"}> : () -> ()
    %cst_29 = arith.constant dense<0.000000e+00> : vector<4x8x8xf32>
    %70 = tpu.matmul %68, %69, %cst_29 {dimension_numbers = #tpu.dot_dimension_numbers<[2], [1], [1], [2], [0, 0, 0, 1, 1, 2], [0], [0]>} : vector<4x8x8xbf16>, vector<4x8x8xbf16>, vector<4x8x8xf32> -> vector<4x8x8xf32>
    "tpu.trace_stop"() : () -> ()
    %71 = vector.extract_strided_slice %34 {offsets = [0, 0, 16], sizes = [4, 8, 8], strides = [1, 1, 1]} : vector<4x8x32xbf16> to vector<4x8x8xbf16>
    %72 = vector.extract_strided_slice %35 {offsets = [0, 0, 16], sizes = [4, 8, 8], strides = [1, 1, 1]} : vector<4x8x32xbf16> to vector<4x8x8xbf16>
    "tpu.trace_start"() <{level = 10 : i32, message = "bqe,bke->bqk"}> : () -> ()
    %cst_30 = arith.constant dense<0.000000e+00> : vector<4x8x8xf32>
    %73 = tpu.matmul %71, %72, %cst_30 {dimension_numbers = #tpu.dot_dimension_numbers<[2], [2], [1], [1], [0, 0, 0, 1, 1, 1], [0], [0]>} : vector<4x8x8xbf16>, vector<4x8x8xbf16>, vector<4x8x8xf32> -> vector<4x8x8xf32>
    "tpu.trace_stop"() : () -> ()
    %74 = arith.addf %73, %21 : vector<4x8x8xf32>
    %cst_31 = arith.constant dense<0xFF800000> : vector<4x8xf32>
    %75 = vector.multi_reduction <maximumf>, %74, %cst_31 [2] : vector<4x8x8xf32> to vector<4x8xf32>
    %76 = vector.shape_cast %75 : vector<4x8xf32> to vector<4x8x1xf32>
    %77 = vector.broadcast %76 : vector<4x8x1xf32> to vector<4x8x8xf32>
    %78 = arith.subf %74, %77 : vector<4x8x8xf32>
    %79 = math.exp %78 : vector<4x8x8xf32>
    %cst_32 = arith.constant dense<0.000000e+00> : vector<4x8xf32>
    %80 = vector.multi_reduction <add>, %79, %cst_32 [2] : vector<4x8x8xf32> to vector<4x8xf32>
    %81 = vector.shape_cast %80 : vector<4x8xf32> to vector<4x8x1xf32>
    %82 = tpu.reciprocal %81 {approx = true} : vector<4x8x1xf32> -> vector<4x8x1xf32>
    %83 = vector.broadcast %82 : vector<4x8x1xf32> to vector<4x8x8xf32>
    %84 = arith.mulf %79, %83 : vector<4x8x8xf32>
    %85 = arith.truncf %84 : vector<4x8x8xf32> to vector<4x8x8xbf16>
    %86 = vector.extract_strided_slice %36 {offsets = [0, 0, 16], sizes = [4, 8, 8], strides = [1, 1, 1]} : vector<4x8x32xbf16> to vector<4x8x8xbf16>
    "tpu.trace_start"() <{level = 10 : i32, message = "bqk,bke->bqe"}> : () -> ()
    %cst_33 = arith.constant dense<0.000000e+00> : vector<4x8x8xf32>
    %87 = tpu.matmul %85, %86, %cst_33 {dimension_numbers = #tpu.dot_dimension_numbers<[2], [1], [1], [2], [0, 0, 0, 1, 1, 2], [0], [0]>} : vector<4x8x8xbf16>, vector<4x8x8xbf16>, vector<4x8x8xf32> -> vector<4x8x8xf32>
    "tpu.trace_stop"() : () -> ()
    %88 = vector.extract_strided_slice %34 {offsets = [0, 0, 24], sizes = [4, 8, 8], strides = [1, 1, 1]} : vector<4x8x32xbf16> to vector<4x8x8xbf16>
    %89 = vector.extract_strided_slice %35 {offsets = [0, 0, 24], sizes = [4, 8, 8], strides = [1, 1, 1]} : vector<4x8x32xbf16> to vector<4x8x8xbf16>
    "tpu.trace_start"() <{level = 10 : i32, message = "bqe,bke->bqk"}> : () -> ()
    %cst_34 = arith.constant dense<0.000000e+00> : vector<4x8x8xf32>
    %90 = tpu.matmul %88, %89, %cst_34 {dimension_numbers = #tpu.dot_dimension_numbers<[2], [2], [1], [1], [0, 0, 0, 1, 1, 1], [0], [0]>} : vector<4x8x8xbf16>, vector<4x8x8xbf16>, vector<4x8x8xf32> -> vector<4x8x8xf32>
    "tpu.trace_stop"() : () -> ()
    %91 = arith.addf %90, %21 : vector<4x8x8xf32>
    %cst_35 = arith.constant dense<0xFF800000> : vector<4x8xf32>
    %92 = vector.multi_reduction <maximumf>, %91, %cst_35 [2] : vector<4x8x8xf32> to vector<4x8xf32>
    %93 = vector.shape_cast %92 : vector<4x8xf32> to vector<4x8x1xf32>
    %94 = vector.broadcast %93 : vector<4x8x1xf32> to vector<4x8x8xf32>
    %95 = arith.subf %91, %94 : vector<4x8x8xf32>
    %96 = math.exp %95 : vector<4x8x8xf32>
    %cst_36 = arith.constant dense<0.000000e+00> : vector<4x8xf32>
    %97 = vector.multi_reduction <add>, %96, %cst_36 [2] : vector<4x8x8xf32> to vector<4x8xf32>
    %98 = vector.shape_cast %97 : vector<4x8xf32> to vector<4x8x1xf32>
    %99 = tpu.reciprocal %98 {approx = true} : vector<4x8x1xf32> -> vector<4x8x1xf32>
    %100 = vector.broadcast %99 : vector<4x8x1xf32> to vector<4x8x8xf32>
    %101 = arith.mulf %96, %100 : vector<4x8x8xf32>
    %102 = arith.truncf %101 : vector<4x8x8xf32> to vector<4x8x8xbf16>
    %103 = vector.extract_strided_slice %36 {offsets = [0, 0, 24], sizes = [4, 8, 8], strides = [1, 1, 1]} : vector<4x8x32xbf16> to vector<4x8x8xbf16>
    "tpu.trace_start"() <{level = 10 : i32, message = "bqk,bke->bqe"}> : () -> ()
    %cst_37 = arith.constant dense<0.000000e+00> : vector<4x8x8xf32>
    %104 = tpu.matmul %102, %103, %cst_37 {dimension_numbers = #tpu.dot_dimension_numbers<[2], [1], [1], [2], [0, 0, 0, 1, 1, 2], [0], [0]>} : vector<4x8x8xbf16>, vector<4x8x8xbf16>, vector<4x8x8xf32> -> vector<4x8x8xf32>
    "tpu.trace_stop"() : () -> ()
    %105 = tpu.concatenate %53, %70, %87, %104 in 2 : vector<4x8x8xf32>, vector<4x8x8xf32>, vector<4x8x8xf32>, vector<4x8x8xf32> -> vector<4x8x32xf32>
    %106 = vector.shape_cast %105 : vector<4x8x32xf32> to vector<32x32xf32>
    %107 = arith.truncf %106 : vector<32x32xf32> to vector<32x32xbf16>
    %c0_38 = arith.constant 0 : index
    %c0_39 = arith.constant 0 : index
    %108 = vector.load %arg6[%c0_38, %c0_39] : memref<32x32xbf16, #tpu.memory_space<vmem>>, vector<32x32xbf16>
    %cst_40 = arith.constant dense<0.000000e+00> : vector<32x32xf32>
    %109 = tpu.matmul %107, %108, %cst_40 {dimension_numbers = #tpu.dot_dimension_numbers<[1], [0], [0], [1], [0, 0, 1, 1], [], []>} : vector<32x32xbf16>, vector<32x32xbf16>, vector<32x32xf32> -> vector<32x32xf32>
    %c0_41 = arith.constant 0 : index
    %c0_42 = arith.constant 0 : index
    %110 = vector.load %arg7[%c0_41, %c0_42] : memref<1x32xf32, #tpu.memory_space<vmem>>, vector<1x32xf32>
    %111 = vector.broadcast %110 : vector<1x32xf32> to vector<32x32xf32>
    %112 = arith.addf %109, %111 : vector<32x32xf32>
    %113 = arith.addf %112, %1 : vector<32x32xf32>
    %c0_43 = arith.constant 0 : index
    %c0_44 = arith.constant 0 : index
    %114 = vector.load %arg8[%c0_43, %c0_44] : memref<2x32xf32, #tpu.memory_space<vmem>>, vector<2x32xf32>
    %115 = vector.extract_strided_slice %114 {offsets = [0, 0], sizes = [1, 32], strides = [1, 1]} : vector<2x32xf32> to vector<1x32xf32>
    %116 = vector.extract_strided_slice %114 {offsets = [1, 0], sizes = [1, 32], strides = [1, 1]} : vector<2x32xf32> to vector<1x32xf32>
    %cst_45 = arith.constant dense<0.000000e+00> : vector<32xf32>
    %117 = vector.multi_reduction <add>, %113, %cst_45 [1] : vector<32x32xf32> to vector<32xf32>
    %118 = vector.shape_cast %117 : vector<32xf32> to vector<32x1xf32>
    %cst_46 = arith.constant 3.200000e+01 : f32
    %119 = vector.broadcast %cst_46 : f32 to vector<32x1xf32>
    %120 = arith.divf %118, %119 : vector<32x1xf32>
    %121 = vector.broadcast %120 : vector<32x1xf32> to vector<32x32xf32>
    %122 = arith.subf %113, %121 : vector<32x32xf32>
    %123 = arith.mulf %122, %122 : vector<32x32xf32>
    %cst_47 = arith.constant dense<0.000000e+00> : vector<32xf32>
    %124 = vector.multi_reduction <add>, %123, %cst_47 [1] : vector<32x32xf32> to vector<32xf32>
    %125 = vector.shape_cast %124 : vector<32xf32> to vector<32x1xf32>
    %cst_48 = arith.constant 3.200000e+01 : f32
    %126 = vector.broadcast %cst_48 : f32 to vector<32x1xf32>
    %127 = arith.divf %125, %126 : vector<32x1xf32>
    %128 = vector.broadcast %120 : vector<32x1xf32> to vector<32x32xf32>
    %129 = arith.subf %113, %128 : vector<32x32xf32>
    %cst_49 = arith.constant 9.99999996E-13 : f32
    %130 = vector.broadcast %cst_49 : f32 to vector<32x1xf32>
    %131 = arith.addf %127, %130 : vector<32x1xf32>
    %132 = math.rsqrt %131 : vector<32x1xf32>
    %133 = vector.broadcast %132 : vector<32x1xf32> to vector<32x32xf32>
    %134 = arith.mulf %129, %133 : vector<32x32xf32>
    %135 = vector.broadcast %115 : vector<1x32xf32> to vector<32x32xf32>
    %136 = arith.mulf %134, %135 : vector<32x32xf32>
    %137 = vector.broadcast %116 : vector<1x32xf32> to vector<32x32xf32>
    %138 = arith.addf %136, %137 : vector<32x32xf32>
    %139 = arith.truncf %138 : vector<32x32xf32> to vector<32x32xbf16>
    %c0_50 = arith.constant 0 : index
    %c0_51 = arith.constant 0 : index
    %140 = vector.load %arg9[%c0_50, %c0_51] : memref<32x32xbf16, #tpu.memory_space<vmem>>, vector<32x32xbf16>
    %cst_52 = arith.constant dense<0.000000e+00> : vector<32x32xf32>
    %141 = tpu.matmul %139, %140, %cst_52 {dimension_numbers = #tpu.dot_dimension_numbers<[1], [0], [0], [1], [0, 0, 1, 1], [], []>} : vector<32x32xbf16>, vector<32x32xbf16>, vector<32x32xf32> -> vector<32x32xf32>
    %c0_53 = arith.constant 0 : index
    %c0_54 = arith.constant 0 : index
    %142 = vector.load %arg10[%c0_53, %c0_54] : memref<1x32xf32, #tpu.memory_space<vmem>>, vector<1x32xf32>
    %143 = vector.broadcast %142 : vector<1x32xf32> to vector<32x32xf32>
    %144 = arith.addf %141, %143 : vector<32x32xf32>
    %c0_55 = arith.constant 0 : index
    %c0_56 = arith.constant 0 : index
    %145 = vector.load %arg11[%c0_55, %c0_56] : memref<32x64xbf16, #tpu.memory_space<vmem>>, vector<32x64xbf16>
    %cst_57 = arith.constant dense<0.000000e+00> : vector<32x64xf32>
    %146 = tpu.matmul %5, %145, %cst_57 {dimension_numbers = #tpu.dot_dimension_numbers<[1], [0], [0], [1], [0, 0, 1, 1], [], []>} : vector<32x32xbf16>, vector<32x64xbf16>, vector<32x64xf32> -> vector<32x64xf32>
    %c0_58 = arith.constant 0 : index
    %c0_59 = arith.constant 0 : index
    %147 = vector.load %arg12[%c0_58, %c0_59] : memref<1x64xf32, #tpu.memory_space<vmem>>, vector<1x64xf32>
    %148 = vector.broadcast %147 : vector<1x64xf32> to vector<32x64xf32>
    %149 = arith.addf %146, %148 : vector<32x64xf32>
    %150 = vector.shape_cast %149 : vector<32x64xf32> to vector<4x8x64xf32>
    %151 = vector.shape_cast %144 : vector<32x32xf32> to vector<4x8x32xf32>
    %152 = vector.extract_strided_slice %150 {offsets = [0, 0, 0], sizes = [4, 8, 32], strides = [1, 1, 1]} : vector<4x8x64xf32> to vector<4x8x32xf32>
    %153 = vector.extract_strided_slice %150 {offsets = [0, 0, 32], sizes = [4, 8, 32], strides = [1, 1, 1]} : vector<4x8x64xf32> to vector<4x8x32xf32>
    %154 = arith.truncf %151 : vector<4x8x32xf32> to vector<4x8x32xbf16>
    %155 = arith.truncf %152 : vector<4x8x32xf32> to vector<4x8x32xbf16>
    %156 = arith.truncf %153 : vector<4x8x32xf32> to vector<4x8x32xbf16>
    %157 = vector.extract_strided_slice %154 {offsets = [0, 0, 0], sizes = [4, 8, 8], strides = [1, 1, 1]} : vector<4x8x32xbf16> to vector<4x8x8xbf16>
    %158 = vector.extract_strided_slice %155 {offsets = [0, 0, 0], sizes = [4, 8, 8], strides = [1, 1, 1]} : vector<4x8x32xbf16> to vector<4x8x8xbf16>
    "tpu.trace_start"() <{level = 10 : i32, message = "bqe,bke->bqk"}> : () -> ()
    %cst_60 = arith.constant dense<0.000000e+00> : vector<4x8x8xf32>
    %159 = tpu.matmul %157, %158, %cst_60 {dimension_numbers = #tpu.dot_dimension_numbers<[2], [2], [1], [1], [0, 0, 0, 1, 1, 1], [0], [0]>} : vector<4x8x8xbf16>, vector<4x8x8xbf16>, vector<4x8x8xf32> -> vector<4x8x8xf32>
    "tpu.trace_stop"() : () -> ()
    %160 = arith.addf %159, %24 : vector<4x8x8xf32>
    %cst_61 = arith.constant dense<0xFF800000> : vector<4x8xf32>
    %161 = vector.multi_reduction <maximumf>, %160, %cst_61 [2] : vector<4x8x8xf32> to vector<4x8xf32>
    %162 = vector.shape_cast %161 : vector<4x8xf32> to vector<4x8x1xf32>
    %163 = vector.broadcast %162 : vector<4x8x1xf32> to vector<4x8x8xf32>
    %164 = arith.subf %160, %163 : vector<4x8x8xf32>
    %165 = math.exp %164 : vector<4x8x8xf32>
    %cst_62 = arith.constant dense<0.000000e+00> : vector<4x8xf32>
    %166 = vector.multi_reduction <add>, %165, %cst_62 [2] : vector<4x8x8xf32> to vector<4x8xf32>
    %167 = vector.shape_cast %166 : vector<4x8xf32> to vector<4x8x1xf32>
    %168 = tpu.reciprocal %167 {approx = true} : vector<4x8x1xf32> -> vector<4x8x1xf32>
    %169 = vector.broadcast %168 : vector<4x8x1xf32> to vector<4x8x8xf32>
    %170 = arith.mulf %165, %169 : vector<4x8x8xf32>
    %171 = arith.truncf %170 : vector<4x8x8xf32> to vector<4x8x8xbf16>
    %172 = vector.extract_strided_slice %156 {offsets = [0, 0, 0], sizes = [4, 8, 8], strides = [1, 1, 1]} : vector<4x8x32xbf16> to vector<4x8x8xbf16>
    "tpu.trace_start"() <{level = 10 : i32, message = "bqk,bke->bqe"}> : () -> ()
    %cst_63 = arith.constant dense<0.000000e+00> : vector<4x8x8xf32>
    %173 = tpu.matmul %171, %172, %cst_63 {dimension_numbers = #tpu.dot_dimension_numbers<[2], [1], [1], [2], [0, 0, 0, 1, 1, 2], [0], [0]>} : vector<4x8x8xbf16>, vector<4x8x8xbf16>, vector<4x8x8xf32> -> vector<4x8x8xf32>
    "tpu.trace_stop"() : () -> ()
    %174 = vector.extract_strided_slice %154 {offsets = [0, 0, 8], sizes = [4, 8, 8], strides = [1, 1, 1]} : vector<4x8x32xbf16> to vector<4x8x8xbf16>
    %175 = vector.extract_strided_slice %155 {offsets = [0, 0, 8], sizes = [4, 8, 8], strides = [1, 1, 1]} : vector<4x8x32xbf16> to vector<4x8x8xbf16>
    "tpu.trace_start"() <{level = 10 : i32, message = "bqe,bke->bqk"}> : () -> ()
    %cst_64 = arith.constant dense<0.000000e+00> : vector<4x8x8xf32>
    %176 = tpu.matmul %174, %175, %cst_64 {dimension_numbers = #tpu.dot_dimension_numbers<[2], [2], [1], [1], [0, 0, 0, 1, 1, 1], [0], [0]>} : vector<4x8x8xbf16>, vector<4x8x8xbf16>, vector<4x8x8xf32> -> vector<4x8x8xf32>
    "tpu.trace_stop"() : () -> ()
    %177 = arith.addf %176, %24 : vector<4x8x8xf32>
    %cst_65 = arith.constant dense<0xFF800000> : vector<4x8xf32>
    %178 = vector.multi_reduction <maximumf>, %177, %cst_65 [2] : vector<4x8x8xf32> to vector<4x8xf32>
    %179 = vector.shape_cast %178 : vector<4x8xf32> to vector<4x8x1xf32>
    %180 = vector.broadcast %179 : vector<4x8x1xf32> to vector<4x8x8xf32>
    %181 = arith.subf %177, %180 : vector<4x8x8xf32>
    %182 = math.exp %181 : vector<4x8x8xf32>
    %cst_66 = arith.constant dense<0.000000e+00> : vector<4x8xf32>
    %183 = vector.multi_reduction <add>, %182, %cst_66 [2] : vector<4x8x8xf32> to vector<4x8xf32>
    %184 = vector.shape_cast %183 : vector<4x8xf32> to vector<4x8x1xf32>
    %185 = tpu.reciprocal %184 {approx = true} : vector<4x8x1xf32> -> vector<4x8x1xf32>
    %186 = vector.broadcast %185 : vector<4x8x1xf32> to vector<4x8x8xf32>
    %187 = arith.mulf %182, %186 : vector<4x8x8xf32>
    %188 = arith.truncf %187 : vector<4x8x8xf32> to vector<4x8x8xbf16>
    %189 = vector.extract_strided_slice %156 {offsets = [0, 0, 8], sizes = [4, 8, 8], strides = [1, 1, 1]} : vector<4x8x32xbf16> to vector<4x8x8xbf16>
    "tpu.trace_start"() <{level = 10 : i32, message = "bqk,bke->bqe"}> : () -> ()
    %cst_67 = arith.constant dense<0.000000e+00> : vector<4x8x8xf32>
    %190 = tpu.matmul %188, %189, %cst_67 {dimension_numbers = #tpu.dot_dimension_numbers<[2], [1], [1], [2], [0, 0, 0, 1, 1, 2], [0], [0]>} : vector<4x8x8xbf16>, vector<4x8x8xbf16>, vector<4x8x8xf32> -> vector<4x8x8xf32>
    "tpu.trace_stop"() : () -> ()
    %191 = vector.extract_strided_slice %154 {offsets = [0, 0, 16], sizes = [4, 8, 8], strides = [1, 1, 1]} : vector<4x8x32xbf16> to vector<4x8x8xbf16>
    %192 = vector.extract_strided_slice %155 {offsets = [0, 0, 16], sizes = [4, 8, 8], strides = [1, 1, 1]} : vector<4x8x32xbf16> to vector<4x8x8xbf16>
    "tpu.trace_start"() <{level = 10 : i32, message = "bqe,bke->bqk"}> : () -> ()
    %cst_68 = arith.constant dense<0.000000e+00> : vector<4x8x8xf32>
    %193 = tpu.matmul %191, %192, %cst_68 {dimension_numbers = #tpu.dot_dimension_numbers<[2], [2], [1], [1], [0, 0, 0, 1, 1, 1], [0], [0]>} : vector<4x8x8xbf16>, vector<4x8x8xbf16>, vector<4x8x8xf32> -> vector<4x8x8xf32>
    "tpu.trace_stop"() : () -> ()
    %194 = arith.addf %193, %24 : vector<4x8x8xf32>
    %cst_69 = arith.constant dense<0xFF800000> : vector<4x8xf32>
    %195 = vector.multi_reduction <maximumf>, %194, %cst_69 [2] : vector<4x8x8xf32> to vector<4x8xf32>
    %196 = vector.shape_cast %195 : vector<4x8xf32> to vector<4x8x1xf32>
    %197 = vector.broadcast %196 : vector<4x8x1xf32> to vector<4x8x8xf32>
    %198 = arith.subf %194, %197 : vector<4x8x8xf32>
    %199 = math.exp %198 : vector<4x8x8xf32>
    %cst_70 = arith.constant dense<0.000000e+00> : vector<4x8xf32>
    %200 = vector.multi_reduction <add>, %199, %cst_70 [2] : vector<4x8x8xf32> to vector<4x8xf32>
    %201 = vector.shape_cast %200 : vector<4x8xf32> to vector<4x8x1xf32>
    %202 = tpu.reciprocal %201 {approx = true} : vector<4x8x1xf32> -> vector<4x8x1xf32>
    %203 = vector.broadcast %202 : vector<4x8x1xf32> to vector<4x8x8xf32>
    %204 = arith.mulf %199, %203 : vector<4x8x8xf32>
    %205 = arith.truncf %204 : vector<4x8x8xf32> to vector<4x8x8xbf16>
    %206 = vector.extract_strided_slice %156 {offsets = [0, 0, 16], sizes = [4, 8, 8], strides = [1, 1, 1]} : vector<4x8x32xbf16> to vector<4x8x8xbf16>
    "tpu.trace_start"() <{level = 10 : i32, message = "bqk,bke->bqe"}> : () -> ()
    %cst_71 = arith.constant dense<0.000000e+00> : vector<4x8x8xf32>
    %207 = tpu.matmul %205, %206, %cst_71 {dimension_numbers = #tpu.dot_dimension_numbers<[2], [1], [1], [2], [0, 0, 0, 1, 1, 2], [0], [0]>} : vector<4x8x8xbf16>, vector<4x8x8xbf16>, vector<4x8x8xf32> -> vector<4x8x8xf32>
    "tpu.trace_stop"() : () -> ()
    %208 = vector.extract_strided_slice %154 {offsets = [0, 0, 24], sizes = [4, 8, 8], strides = [1, 1, 1]} : vector<4x8x32xbf16> to vector<4x8x8xbf16>
    %209 = vector.extract_strided_slice %155 {offsets = [0, 0, 24], sizes = [4, 8, 8], strides = [1, 1, 1]} : vector<4x8x32xbf16> to vector<4x8x8xbf16>
    "tpu.trace_start"() <{level = 10 : i32, message = "bqe,bke->bqk"}> : () -> ()
    %cst_72 = arith.constant dense<0.000000e+00> : vector<4x8x8xf32>
    %210 = tpu.matmul %208, %209, %cst_72 {dimension_numbers = #tpu.dot_dimension_numbers<[2], [2], [1], [1], [0, 0, 0, 1, 1, 1], [0], [0]>} : vector<4x8x8xbf16>, vector<4x8x8xbf16>, vector<4x8x8xf32> -> vector<4x8x8xf32>
    "tpu.trace_stop"() : () -> ()
    %211 = arith.addf %210, %24 : vector<4x8x8xf32>
    %cst_73 = arith.constant dense<0xFF800000> : vector<4x8xf32>
    %212 = vector.multi_reduction <maximumf>, %211, %cst_73 [2] : vector<4x8x8xf32> to vector<4x8xf32>
    %213 = vector.shape_cast %212 : vector<4x8xf32> to vector<4x8x1xf32>
    %214 = vector.broadcast %213 : vector<4x8x1xf32> to vector<4x8x8xf32>
    %215 = arith.subf %211, %214 : vector<4x8x8xf32>
    %216 = math.exp %215 : vector<4x8x8xf32>
    %cst_74 = arith.constant dense<0.000000e+00> : vector<4x8xf32>
    %217 = vector.multi_reduction <add>, %216, %cst_74 [2] : vector<4x8x8xf32> to vector<4x8xf32>
    %218 = vector.shape_cast %217 : vector<4x8xf32> to vector<4x8x1xf32>
    %219 = tpu.reciprocal %218 {approx = true} : vector<4x8x1xf32> -> vector<4x8x1xf32>
    %220 = vector.broadcast %219 : vector<4x8x1xf32> to vector<4x8x8xf32>
    %221 = arith.mulf %216, %220 : vector<4x8x8xf32>
    %222 = arith.truncf %221 : vector<4x8x8xf32> to vector<4x8x8xbf16>
    %223 = vector.extract_strided_slice %156 {offsets = [0, 0, 24], sizes = [4, 8, 8], strides = [1, 1, 1]} : vector<4x8x32xbf16> to vector<4x8x8xbf16>
    "tpu.trace_start"() <{level = 10 : i32, message = "bqk,bke->bqe"}> : () -> ()
    %cst_75 = arith.constant dense<0.000000e+00> : vector<4x8x8xf32>
    %224 = tpu.matmul %222, %223, %cst_75 {dimension_numbers = #tpu.dot_dimension_numbers<[2], [1], [1], [2], [0, 0, 0, 1, 1, 2], [0], [0]>} : vector<4x8x8xbf16>, vector<4x8x8xbf16>, vector<4x8x8xf32> -> vector<4x8x8xf32>
    "tpu.trace_stop"() : () -> ()
    %225 = tpu.concatenate %173, %190, %207, %224 in 2 : vector<4x8x8xf32>, vector<4x8x8xf32>, vector<4x8x8xf32>, vector<4x8x8xf32> -> vector<4x8x32xf32>
    %226 = vector.shape_cast %225 : vector<4x8x32xf32> to vector<32x32xf32>
    %227 = arith.truncf %226 : vector<32x32xf32> to vector<32x32xbf16>
    %c0_76 = arith.constant 0 : index
    %c0_77 = arith.constant 0 : index
    %228 = vector.load %arg13[%c0_76, %c0_77] : memref<32x48xbf16, #tpu.memory_space<vmem>>, vector<32x48xbf16>
    %cst_78 = arith.constant dense<0.000000e+00> : vector<32x48xf32>
    %229 = tpu.matmul %227, %228, %cst_78 {dimension_numbers = #tpu.dot_dimension_numbers<[1], [0], [0], [1], [0, 0, 1, 1], [], []>} : vector<32x32xbf16>, vector<32x48xbf16>, vector<32x48xf32> -> vector<32x48xf32>
    %c0_79 = arith.constant 0 : index
    %c0_80 = arith.constant 0 : index
    %230 = vector.load %arg14[%c0_79, %c0_80] : memref<1x48xf32, #tpu.memory_space<vmem>>, vector<1x48xf32>
    %231 = vector.broadcast %230 : vector<1x48xf32> to vector<32x48xf32>
    %232 = arith.addf %229, %231 : vector<32x48xf32>
    %c0_81 = arith.constant 0 : index
    %c0_82 = arith.constant 0 : index
    %233 = vector.load %arg15[%c0_81, %c0_82] : memref<2x48xf32, #tpu.memory_space<vmem>>, vector<2x48xf32>
    %234 = vector.extract_strided_slice %233 {offsets = [0, 0], sizes = [1, 48], strides = [1, 1]} : vector<2x48xf32> to vector<1x48xf32>
    %235 = vector.extract_strided_slice %233 {offsets = [1, 0], sizes = [1, 48], strides = [1, 1]} : vector<2x48xf32> to vector<1x48xf32>
    %cst_83 = arith.constant dense<0.000000e+00> : vector<32xf32>
    %236 = vector.multi_reduction <add>, %232, %cst_83 [1] : vector<32x48xf32> to vector<32xf32>
    %237 = vector.shape_cast %236 : vector<32xf32> to vector<32x1xf32>
    %cst_84 = arith.constant 4.800000e+01 : f32
    %238 = vector.broadcast %cst_84 : f32 to vector<32x1xf32>
    %239 = arith.divf %237, %238 : vector<32x1xf32>
    %240 = vector.broadcast %239 : vector<32x1xf32> to vector<32x48xf32>
    %241 = arith.subf %232, %240 : vector<32x48xf32>
    %242 = arith.mulf %241, %241 : vector<32x48xf32>
    %cst_85 = arith.constant dense<0.000000e+00> : vector<32xf32>
    %243 = vector.multi_reduction <add>, %242, %cst_85 [1] : vector<32x48xf32> to vector<32xf32>
    %244 = vector.shape_cast %243 : vector<32xf32> to vector<32x1xf32>
    %cst_86 = arith.constant 4.800000e+01 : f32
    %245 = vector.broadcast %cst_86 : f32 to vector<32x1xf32>
    %246 = arith.divf %244, %245 : vector<32x1xf32>
    %247 = vector.broadcast %239 : vector<32x1xf32> to vector<32x48xf32>
    %248 = arith.subf %232, %247 : vector<32x48xf32>
    %cst_87 = arith.constant 9.99999996E-13 : f32
    %249 = vector.broadcast %cst_87 : f32 to vector<32x1xf32>
    %250 = arith.addf %246, %249 : vector<32x1xf32>
    %251 = math.rsqrt %250 : vector<32x1xf32>
    %252 = vector.broadcast %251 : vector<32x1xf32> to vector<32x48xf32>
    %253 = arith.mulf %248, %252 : vector<32x48xf32>
    %254 = vector.broadcast %234 : vector<1x48xf32> to vector<32x48xf32>
    %255 = arith.mulf %253, %254 : vector<32x48xf32>
    %256 = vector.broadcast %235 : vector<1x48xf32> to vector<32x48xf32>
    %257 = arith.addf %255, %256 : vector<32x48xf32>
    %258 = arith.truncf %257 : vector<32x48xf32> to vector<32x48xbf16>
    %c0_88 = arith.constant 0 : index
    %c0_89 = arith.constant 0 : index
    %259 = vector.load %arg18[%c0_88, %c0_89] : memref<48x64xbf16, #tpu.memory_space<vmem>>, vector<48x64xbf16>
    %cst_90 = arith.constant dense<0.000000e+00> : vector<32x64xf32>
    %260 = tpu.matmul %258, %259, %cst_90 {dimension_numbers = #tpu.dot_dimension_numbers<[1], [0], [0], [1], [0, 0, 1, 1], [], []>} : vector<32x48xbf16>, vector<48x64xbf16>, vector<32x64xf32> -> vector<32x64xf32>
    %c0_91 = arith.constant 0 : index
    %c0_92 = arith.constant 0 : index
    %261 = vector.load %arg19[%c0_91, %c0_92] : memref<1x64xf32, #tpu.memory_space<vmem>>, vector<1x64xf32>
    %262 = vector.broadcast %261 : vector<1x64xf32> to vector<32x64xf32>
    %263 = arith.addf %260, %262 : vector<32x64xf32>
    %cst_93 = arith.constant 0.000000e+00 : f32
    %264 = vector.broadcast %cst_93 : f32 to vector<32x64xf32>
    %265 = arith.maximumf %263, %264 : vector<32x64xf32>
    %266 = arith.truncf %265 : vector<32x64xf32> to vector<32x64xbf16>
    %c0_94 = arith.constant 0 : index
    %c0_95 = arith.constant 0 : index
    %267 = vector.load %arg20[%c0_94, %c0_95] : memref<64x48xbf16, #tpu.memory_space<vmem>>, vector<64x48xbf16>
    %cst_96 = arith.constant dense<0.000000e+00> : vector<32x48xf32>
    %268 = tpu.matmul %266, %267, %cst_96 {dimension_numbers = #tpu.dot_dimension_numbers<[1], [0], [0], [1], [0, 0, 1, 1], [], []>} : vector<32x64xbf16>, vector<64x48xbf16>, vector<32x48xf32> -> vector<32x48xf32>
    %c0_97 = arith.constant 0 : index
    %c0_98 = arith.constant 0 : index
    %269 = vector.load %arg21[%c0_97, %c0_98] : memref<1x48xf32, #tpu.memory_space<vmem>>, vector<1x48xf32>
    %270 = vector.broadcast %269 : vector<1x48xf32> to vector<32x48xf32>
    %271 = arith.addf %268, %270 : vector<32x48xf32>
    %272 = arith.addf %271, %257 : vector<32x48xf32>
    %c0_99 = arith.constant 0 : index
    %c0_100 = arith.constant 0 : index
    %273 = vector.load %arg22[%c0_99, %c0_100] : memref<2x48xf32, #tpu.memory_space<vmem>>, vector<2x48xf32>
    %274 = vector.extract_strided_slice %273 {offsets = [0, 0], sizes = [1, 48], strides = [1, 1]} : vector<2x48xf32> to vector<1x48xf32>
    %275 = vector.extract_strided_slice %273 {offsets = [1, 0], sizes = [1, 48], strides = [1, 1]} : vector<2x48xf32> to vector<1x48xf32>
    %cst_101 = arith.constant dense<0.000000e+00> : vector<32xf32>
    %276 = vector.multi_reduction <add>, %272, %cst_101 [1] : vector<32x48xf32> to vector<32xf32>
    %277 = vector.shape_cast %276 : vector<32xf32> to vector<32x1xf32>
    %cst_102 = arith.constant 4.800000e+01 : f32
    %278 = vector.broadcast %cst_102 : f32 to vector<32x1xf32>
    %279 = arith.divf %277, %278 : vector<32x1xf32>
    %280 = vector.broadcast %279 : vector<32x1xf32> to vector<32x48xf32>
    %281 = arith.subf %272, %280 : vector<32x48xf32>
    %282 = arith.mulf %281, %281 : vector<32x48xf32>
    %cst_103 = arith.constant dense<0.000000e+00> : vector<32xf32>
    %283 = vector.multi_reduction <add>, %282, %cst_103 [1] : vector<32x48xf32> to vector<32xf32>
    %284 = vector.shape_cast %283 : vector<32xf32> to vector<32x1xf32>
    %cst_104 = arith.constant 4.800000e+01 : f32
    %285 = vector.broadcast %cst_104 : f32 to vector<32x1xf32>
    %286 = arith.divf %284, %285 : vector<32x1xf32>
    %287 = vector.broadcast %279 : vector<32x1xf32> to vector<32x48xf32>
    %288 = arith.subf %272, %287 : vector<32x48xf32>
    %cst_105 = arith.constant 9.99999996E-13 : f32
    %289 = vector.broadcast %cst_105 : f32 to vector<32x1xf32>
    %290 = arith.addf %286, %289 : vector<32x1xf32>
    %291 = math.rsqrt %290 : vector<32x1xf32>
    %292 = vector.broadcast %291 : vector<32x1xf32> to vector<32x48xf32>
    %293 = arith.mulf %288, %292 : vector<32x48xf32>
    %294 = vector.broadcast %274 : vector<1x48xf32> to vector<32x48xf32>
    %295 = arith.mulf %293, %294 : vector<32x48xf32>
    %296 = vector.broadcast %275 : vector<1x48xf32> to vector<32x48xf32>
    %297 = arith.addf %295, %296 : vector<32x48xf32>
    %298 = vector.shape_cast %297 : vector<32x48xf32> to vector<4x8x48xf32>
    %c0_106 = arith.constant 0 : index
    %c0_107 = arith.constant 0 : index
    %c0_108 = arith.constant 0 : index
    %299 = vector.load %arg23[%c0_106, %c0_107, %c0_108] : memref<4x8x48xf32, #tpu.memory_space<vmem>>, vector<4x8x48xf32>
    tpu.vector_store %arg23[%c0_106, %c0_107, %c0_108], %298 {strides = array<i32>} : memref<4x8x48xf32, #tpu.memory_space<vmem>>, vector<4x8x48xf32>,
    return
  }
  func.func @transform_0(%arg0: i32) -> (i32, i32, i32) {
    %c0_i32 = arith.constant 0 : i32
    %c0_i32_0 = arith.constant 0 : i32
    %c0_i32_1 = arith.constant 0 : i32
    return %arg0, %c0_i32, %c0_i32_0 : i32, i32, i32
  }
  func.func @transform_1(%arg0: i32) -> (i32, i32, i32) {
    %c0_i32 = arith.constant 0 : i32
    %c0_i32_0 = arith.constant 0 : i32
    %c0_i32_1 = arith.constant 0 : i32
    return %arg0, %c0_i32, %c0_i32_0 : i32, i32, i32
  }
  func.func @transform_2(%arg0: i32) -> (i32, i32, i32) {
    %c0_i32 = arith.constant 0 : i32
    %c0_i32_0 = arith.constant 0 : i32
    %c0_i32_1 = arith.constant 0 : i32
    return %arg0, %c0_i32, %c0_i32_0 : i32, i32, i32
  }
  func.func @transform_3(%arg0: i32) -> (i32, i32) {
    %c0_i32 = arith.constant 0 : i32
    %c0_i32_0 = arith.constant 0 : i32
    %c0_i32_1 = arith.constant 0 : i32
    return %c0_i32, %c0_i32_0 : i32, i32
  }
  func.func @transform_4(%arg0: i32) -> (i32, i32) {
    %c0_i32 = arith.constant 0 : i32
    %c0_i32_0 = arith.constant 0 : i32
    %c0_i32_1 = arith.constant 0 : i32
    return %c0_i32, %c0_i32_0 : i32, i32
  }
  func.func @transform_5(%arg0: i32) -> (i32, i32) {
    %c0_i32 = arith.constant 0 : i32
    %c0_i32_0 = arith.constant 0 : i32
    %c0_i32_1 = arith.constant 0 : i32
    return %c0_i32, %c0_i32_0 : i32, i32
  }
  func.func @transform_6(%arg0: i32) -> (i32, i32) {
    %c0_i32 = arith.constant 0 : i32
    %c0_i32_0 = arith.constant 0 : i32
    %c0_i32_1 = arith.constant 0 : i32
    return %c0_i32, %c0_i32_0 : i32, i32
  }
  func.func @transform_7(%arg0: i32) -> (i32, i32) {
    %c0_i32 = arith.constant 0 : i32
    %c0_i32_0 = arith.constant 0 : i32
    %c0_i32_1 = arith.constant 0 : i32
    return %c0_i32, %c0_i32_0 : i32, i32
  }
  func.func @transform_8(%arg0: i32) -> (i32, i32) {
    %c0_i32 = arith.constant 0 : i32
    %c0_i32_0 = arith.constant 0 : i32
    %c0_i32_1 = arith.constant 0 : i32
    return %c0_i32, %c0_i32_0 : i32, i32
  }
  func.func @transform_9(%arg0: i32) -> (i32, i32) {
    %c0_i32 = arith.constant 0 : i32
    %c0_i32_0 = arith.constant 0 : i32
    %c0_i32_1 = arith.constant 0 : i32
    return %c0_i32, %c0_i32_0 : i32, i32
  }
  func.func @transform_10(%arg0: i32) -> (i32, i32) {
    %c0_i32 = arith.constant 0 : i32
    %c0_i32_0 = arith.constant 0 : i32
    %c0_i32_1 = arith.constant 0 : i32
    return %c0_i32, %c0_i32_0 : i32, i32
  }
  func.func @transform_11(%arg0: i32) -> (i32, i32) {
    %c0_i32 = arith.constant 0 : i32
    %c0_i32_0 = arith.constant 0 : i32
    %c0_i32_1 = arith.constant 0 : i32
    return %c0_i32, %c0_i32_0 : i32, i32
  }
  func.func @transform_12(%arg0: i32) -> (i32, i32) {
    %c0_i32 = arith.constant 0 : i32
    %c0_i32_0 = arith.constant 0 : i32
    %c0_i32_1 = arith.constant 0 : i32
    return %c0_i32, %c0_i32_0 : i32, i32
  }
  func.func @transform_13(%arg0: i32) -> (i32, i32) {
    %c0_i32 = arith.constant 0 : i32
    %c0_i32_0 = arith.constant 0 : i32
    %c0_i32_1 = arith.constant 0 : i32
    return %c0_i32, %c0_i32_0 : i32, i32
  }
  func.func @transform_14(%arg0: i32) -> (i32, i32) {
    %c0_i32 = arith.constant 0 : i32
    %c0_i32_0 = arith.constant 0 : i32
    %c0_i32_1 = arith.constant 0 : i32
    return %c0_i32, %c0_i32_0 : i32, i32
  }
  func.func @transform_15(%arg0: i32) -> (i32, i32) {
    %c0_i32 = arith.constant 0 : i32
    %c0_i32_0 = arith.constant 0 : i32
    %c0_i32_1 = arith.constant 0 : i32
    return %c0_i32, %c0_i32_0 : i32, i32
  }
  func.func @transform_16(%arg0: i32) -> (i32, i32) {
    %c0_i32 = arith.constant 0 : i32
    %c0_i32_0 = arith.constant 0 : i32
    %c0_i32_1 = arith.constant 0 : i32
    return %c0_i32, %c0_i32_0 : i32, i32
  }
  func.func @transform_17(%arg0: i32) -> (i32, i32) {
    %c0_i32 = arith.constant 0 : i32
    %c0_i32_0 = arith.constant 0 : i32
    %c0_i32_1 = arith.constant 0 : i32
    return %c0_i32, %c0_i32_0 : i32, i32
  }
  func.func @transform_18(%arg0: i32) -> (i32, i32) {
    %c0_i32 = arith.constant 0 : i32
    %c0_i32_0 = arith.constant 0 : i32
    %c0_i32_1 = arith.constant 0 : i32
    return %c0_i32, %c0_i32_0 : i32, i32
  }
  func.func @transform_19(%arg0: i32) -> (i32, i32) {
    %c0_i32 = arith.constant 0 : i32
    %c0_i32_0 = arith.constant 0 : i32
    %c0_i32_1 = arith.constant 0 : i32
    return %c0_i32, %c0_i32_0 : i32, i32
  }
  func.func @transform_20(%arg0: i32) -> (i32, i32) {
    %c0_i32 = arith.constant 0 : i32
    %c0_i32_0 = arith.constant 0 : i32
    %c0_i32_1 = arith.constant 0 : i32
    return %c0_i32, %c0_i32_0 : i32, i32
  }
  func.func @transform_21(%arg0: i32) -> (i32, i32) {
    %c0_i32 = arith.constant 0 : i32
    %c0_i32_0 = arith.constant 0 : i32
    %c0_i32_1 = arith.constant 0 : i32
    return %c0_i32, %c0_i32_0 : i32, i32
  }
  func.func @transform_22(%arg0: i32) -> (i32, i32, i32) {
    %c0_i32 = arith.constant 0 : i32
    %c0_i32_0 = arith.constant 0 : i32
    %c0_i32_1 = arith.constant 0 : i32
    return %arg0, %c0_i32, %c0_i32_0 : i32, i32, i32
  }
  func.func @transform_23(%arg0: i32) -> (i32, i32, i32) {
    %c0_i32 = arith.constant 0 : i32
    %c0_i32_0 = arith.constant 0 : i32
    %c0_i32_1 = arith.constant 0 : i32
    return %arg0, %c0_i32, %c0_i32_0 : i32, i32, i32
  }
}

</mosaic_0001>

<bundles_post_ra>
// kernel: tpu_custom_call.1
= control target key start
LH: loop header
LB: loop body
LE: loop exit
PB: predicated region body
PF: predicated region fallthrough
CT: control target
= control target key end

     0   :  { %s7216_s0 = inlined_call_operand.vmem [shape: f32[4,8,32], index: 0, kind: input, shape index: {}]   ;;  %s7217_s1 = inlined_call_operand.hbm [shape: f32[4,8,32], index: 1, kind: input, shape index: {}]   ;;  %s7218_s2 = inlined_call_operand.hbm [shape: f32[4,1,8], index: 2, kind: input, shape index: {}]   ;;  %s7219_s3 = inlined_call_operand.hbm [shape: bf16[32,96], index: 3, kind: input, shape index: {}]   ;;  %s7220_s4 = inlined_call_operand.vmem [shape: f32[1,96], index: 4, kind: input, shape index: {}]   ;;  %s7221_s5 = inlined_call_operand.hbm [shape: bf16[32,32], index: 5, kind: input, shape index: {}]   ;;  %s7222_s6 = inlined_call_operand.vmem [shape: f32[1,32], index: 6, kind: input, shape index: {}]   ;;  %s7223_s7 = inlined_call_operand.vmem [shape: f32[2,32], index: 7, kind: input, shape index: {}]   ;;  %s7224_s8 = inlined_call_operand.hbm [shape: bf16[32,32], index: 8, kind: input, shape index: {}]   ;;  %s7225_s9 = inlined_call_operand.vmem [shape: f32[1,32], index: 9, kind: input, shape index: {}]   ;;  %s7226_s10 = inlined_call_operand.hbm [shape: bf16[32,64], index: 10, kind: input, shape index: {}]   ;;  %s7227_s11 = inlined_call_operand.vmem [shape: f32[1,64], index: 11, kind: input, shape index: {}]   ;;  %s7228_s12 = inlined_call_operand.hbm [shape: bf16[32,48], index: 12, kind: input, shape index: {}]   ;;  %s7229_s13 = inlined_call_operand.hbm [shape: f32[1,48], index: 13, kind: input, shape index: {}]   ;;  %s7230_s14 = inlined_call_operand.vmem [shape: f32[2,48], index: 14, kind: input, shape index: {}]   ;;  %s7231_s15 = inlined_call_operand.hbm [shape: bf16[32,48], index: 15, kind: input, shape index: {}]   ;;  %s7232_s16 = inlined_call_operand.hbm [shape: f32[1,48], index: 16, kind: input, shape index: {}]   ;;  %s7233_s17 = inlined_call_operand.vmem [shape: bf16[48,64], index: 17, kind: input, shape index: {}]   ;;  %s7234_s18 = inlined_call_operand.hbm [shape: f32[1,64], index: 18, kind: input, shape index: {}]   ;;  %s7235_s19 = inlined_call_operand.vmem [shape: bf16[64,48], index: 19, kind: input, shape index: {}]   ;;  %s7236_s20 = inlined_call_operand.vmem [shape: f32[1,48], index: 20, kind: input, shape index: {}]   ;;  %s7237_s21 = inlined_call_operand.vmem [shape: f32[2,48], index: 21, kind: input, shape index: {}]   ;;  %s7238_s22 = inlined_call_operand.hbm [shape: f32[4,8,48], index: 22, kind: output, shape index: {0}]   ;;  %s7239_s23 = inlined_call_operand.hbm [shape: f32[4,8,48], index: 23, kind: output, shape index: {1}]  }
   0x1   :  { %7241 = sst [smem:[#allocation31_spill]] %s7216_s0 }
   0x2   :  { %7242 = sst [smem:[#allocation32_spill]] %s7217_s1 }
   0x3   :  { %7243 = sst [smem:[#allocation33_spill]] %s7218_s2 }
   0x4   :  { %7244 = sst [smem:[#allocation34_spill]] %s7219_s3 }
   0x5   :  { %7245 = sst [smem:[#allocation35_spill]] %s7220_s4 }
   0x6   :  { %7246 = sst [smem:[#allocation36_spill]] %s7221_s5 }
   0x7   :  { %7247 = sst [smem:[#allocation37_spill]] %s7222_s6 }
   0x8   :  { %7248 = sst [smem:[#allocation38_spill]] %s7223_s7 }
   0x9   :  { %29 = vsyncpa [#allocation3], 0 }
   0xa   :  { %30 = vsyncpa [#allocation6], 0 }
   0xb   :  { %31 = vsyncpa [#allocation9], 0 }
   0xc   :  { %32 = vsyncpa [#allocation12], 0 }
   0xd   :  { %33 = vsyncpa [#allocation15], 0 }
   0xe   :  { %34 = vsyncpa [#allocation18], 0 }
   0xf   :  { %35 = vsyncpa [#allocation4], 0 }
  0x10   :  { %36 = vsyncpa [#allocation22], 0  ;;  %s6103_s4 = smov [#allocation5]  }
  0x11   :  { %s56_s30 = sshll.u32 %s6103_s4, 4  ;;  %s57_s30 = int_to_ptr.vmem [resolvable:$true] %s56_s30 }
  0x12   :  { %s5835_s24 = scalar_lea.vmem %s57_s30, 64  ;;  %p5840_p1 = scmp.lt.s32.totalorder %s57_s30, %s57_s30 }
  0x13   :  { %p5836_p0 = scmp.ne.s32.totalorder %s57_s30, %s5835_s24  ;;  %p5841_p2 = scmp.lt.s32.totalorder %s5835_s24, %s5835_s24 }
  0x15   :  { %p5842_p3 = por %p5841_p2, %p5840_p1 }
  0x17   :  { %p5843_p4 = pnand %p5842_p3, %p5836_p0 }
  0x19   :  { %5846 = shalt.err (!%p5843_p4)
}
  0x1a   :  { %s6104_s25 = smov 16   ;;  %s6105_s5 = smov 1  }
  0x1b   :  { %s7249_s2 = sld [smem:[#allocation33_spill]]  ;;  %s6106_s6 = smov [#allocation8]  }
  0x1c   :  { %s82_s27 = sshll.u32 %s6106_s6, 4  ;;  %s6107_s7 = smov [#allocation11]   ;;  %s83_s27 = int_to_ptr.vmem [resolvable:$true] %s82_s27 }
  0x1d   :  { %s112_s28 = sshll.u32 %s6107_s7, 4  ;;  %s5855_s29 = scalar_lea.vmem %s83_s27, 256  ;;  %s113_s28 = int_to_ptr.vmem [resolvable:$true] %s112_s28 }
  0x1e   :  { %p5856_p5 = scmp.ne.s32.totalorder %s83_s27, %s5855_s29  ;;  %p5860_p6 = scmp.lt.s32.totalorder %s83_s27, %s83_s27 }
  0x1f   :  { %p5861_p7 = scmp.lt.s32.totalorder %s5855_s29, %s5855_s29 }
  0x21   :  { %62 = dma.hbm_to_vmem [thread:$0]  %s7249_s2, 64, %s57_s30, [#allocation6], %s6104_s25, %s6104_s25, %s6105_s5  }
  0x22   :  { %p5862_p8 = por %p5861_p7, %p5860_p6 }
  0x24   :  { %p5863_p9 = pnand %p5862_p8, %p5856_p5 }
  0x26   :  { %5866 = shalt.err (!%p5863_p9)
}
  0x27   :  { %s6108_s3 = smov 64   ;;  %s6109_s0 = smov 4  }
  0x28   :  { %s7250_s30 = sld [smem:[#allocation36_spill]]  ;;  %s5875_s5 = scalar_lea.vmem %s113_s28, 256 }
  0x29   :  { %p5876_p10 = scmp.ne.s32.totalorder %s113_s28, %s5875_s5  ;;  %p5880_p11 = scmp.lt.s32.totalorder %s113_s28, %s113_s28 }
  0x2a   :  { %p5881_p12 = scmp.lt.s32.totalorder %s5875_s5, %s5875_s5 }
  0x2c   :  { %p5882_p13 = por %p5881_p12, %p5880_p11 }
  0x2e   :  { %88 = dma.hbm_to_vmem [thread:$0]  %s7250_s30, 256, %s83_s27, [#allocation9], %s6108_s3, %s6108_s3, %s6109_s0  }
  0x2f   :  { %p5883_p0 = pnand %p5882_p13, %p5876_p10 }
  0x31   :  { %5886 = shalt.err (!%p5883_p0)
}
  0x32   :  { %118 = dma.hbm_to_vmem [thread:$0]  %s7226_s10, 256, %s113_s28, [#allocation12], %s6108_s3, %s6108_s3, %s6109_s0  }
  0x33   :  { %s6110_s2 = smov [#allocation14]   ;;  %s6111_s7 = smov [#allocation17]  }
  0x34   :  { %s139_s6 = sshll.u32 %s6110_s2, 4  ;;  %s163_s27 = sshll.u32 %s6111_s7, 4  ;;  %s140_s6 = int_to_ptr.vmem [resolvable:$true] %s139_s6  ;;  %s164_s27 = int_to_ptr.vmem [resolvable:$true] %s163_s27 }
  0x35   :  { %s5895_s29 = scalar_lea.vmem %s140_s6, 16  ;;  %s5899_s4 = scalar_lea.vmem %s140_s6, 32 }
  0x36   :  { %p5896_p1 = scmp.ne.s32.totalorder %s140_s6, %s5895_s29  ;;  %p5900_p2 = scmp.lt.s32.totalorder %s140_s6, %s140_s6 }
  0x37   :  { %p5901_p3 = scmp.lt.s32.totalorder %s5899_s4, %s5895_s29 }
  0x39   :  { %p5902_p4 = por %p5901_p3, %p5900_p2 }
  0x3b   :  { %p5903_p5 = pnand %p5902_p4, %p5896_p1 }
  0x3d   :  { %5906 = shalt.err (!%p5903_p5)
}
  0x3e   :  { %142 = dma.hbm_to_vmem [thread:$0]  %s7229_s13, 16, %s140_s6, [#allocation15]  }
  0x3f   :  { %s5915_s5 = scalar_lea.vmem %s164_s27, 16  ;;  %s5919_s10 = scalar_lea.vmem %s164_s27, 32 }
  0x40   :  { %p5916_p6 = scmp.ne.s32.totalorder %s164_s27, %s5915_s5  ;;  %p5920_p7 = scmp.lt.s32.totalorder %s164_s27, %s164_s27 }
  0x41   :  { %p5921_p8 = scmp.lt.s32.totalorder %s5919_s10, %s5915_s5 }
  0x43   :  { %p5922_p9 = por %p5921_p8, %p5920_p7 }
  0x45   :  { %p5923_p10 = pnand %p5922_p9, %p5916_p6 }
  0x47   :  { %5926 = shalt.err (!%p5923_p10)
}
  0x48   :  { %166 = dma.hbm_to_vmem [thread:$0]  %s7232_s16, 16, %s164_s27, [#allocation18]  }
  0x49   :  { %s6112_s26 = smov [#allocation2]  }
  0x4a   :  { %s44_s2 = sshll.u32 %s6112_s26, 4  ;;  %s45_s2 = int_to_ptr.vmem [resolvable:$true] %s44_s2 }
  0x4b   :  { %s5935_s7 = scalar_lea.vmem %s45_s2, 512  ;;  %p5940_p12 = scmp.lt.s32.totalorder %s45_s2, %s45_s2 }
  0x4c   :  { %p5936_p11 = scmp.ne.s32.totalorder %s45_s2, %s5935_s7  ;;  %p5941_p13 = scmp.lt.s32.totalorder %s5935_s7, %s5935_s7 }
  0x4e   :  { %p5942_p0 = por %p5941_p13, %p5940_p12 }
  0x50   :  { %p5943_p1 = pnand %p5942_p0, %p5936_p11 }
  0x52   :  { %5946 = shalt.err (!%p5943_p1)
}
  0x53   :  { %s6113_s13 = smov 128   ;;  %s6114_s6 = smov 8  }
  0x54   :  { %s7251_s24 = sld [smem:[#allocation32_spill]]  ;;  %s6115_s16 = smov [#allocation7]  }
  0x55   :  { %s68_s27 = sshll.u32 %s6115_s16, 4  ;;  %s6116_s30 = smov [#allocation10]   ;;  %s69_s27 = int_to_ptr.vmem [resolvable:$true] %s68_s27 }
  0x56   :  { %s98_s5 = sshll.u32 %s6116_s30, 4  ;;  %s5955_s10 = scalar_lea.vmem %s69_s27, 256  ;;  %s99_s5 = int_to_ptr.vmem [resolvable:$true] %s98_s5 }
  0x57   :  { %p5956_p2 = scmp.ne.s32.totalorder %s69_s27, %s5955_s10  ;;  %p5960_p3 = scmp.lt.s32.totalorder %s69_s27, %s69_s27 }
  0x58   :  { %p5961_p4 = scmp.lt.s32.totalorder %s5955_s10, %s5955_s10 }
  0x5a   :  { %50 = dma.hbm_to_vmem [thread:$0]  %s7251_s24, 512, %s45_s2, [#allocation3], %s6113_s13, %s6113_s13, %s6114_s6  }
  0x5b   :  { %p5962_p5 = por %p5961_p4, %p5960_p3 }
  0x5d   :  { %p5963_p6 = pnand %p5962_p5, %p5956_p2 }
  0x5f   :  { %5966 = shalt.err (!%p5963_p6)
}
  0x60   :  { %s7252_s26 = sld [smem:[#allocation34_spill]]  ;;  %s5975_s2 = scalar_lea.vmem %s99_s5, 256 }
  0x61   :  { %p5976_p7 = scmp.ne.s32.totalorder %s99_s5, %s5975_s2  ;;  %p5980_p8 = scmp.lt.s32.totalorder %s99_s5, %s99_s5 }
  0x62   :  { %p5981_p9 = scmp.lt.s32.totalorder %s5975_s2, %s5975_s2 }
  0x64   :  { %p5982_p10 = por %p5981_p9, %p5980_p8 }
  0x66   :  { %74 = dma.hbm_to_vmem [thread:$0]  %s7252_s26, 256, %s69_s27, [#allocation6], %s6108_s3, %s6108_s3, %s6109_s0  }
  0x67   :  { %p5983_p11 = pnand %p5982_p10, %p5976_p7 }
  0x69   :  { %5986 = shalt.err (!%p5983_p11)
}
  0x6a   :  { %104 = dma.hbm_to_vmem [thread:$0]  %s7224_s8, 256, %s99_s5, [#allocation9], %s6108_s3, %s6108_s3, %s6109_s0  }
  0x6b   :  { %s6117_s4 = smov [#allocation13]   ;;  %s6118_s16 = smov [#allocation16]  }
  0x6c   :  { %s126_s24 = sshll.u32 %s6117_s4, 4  ;;  %s150_s30 = sshll.u32 %s6118_s16, 4  ;;  %s127_s24 = int_to_ptr.vmem [resolvable:$true] %s126_s24  ;;  %s151_s30 = int_to_ptr.vmem [resolvable:$true] %s150_s30 }
  0x6d   :  { %s5995_s27 = scalar_lea.vmem %s127_s24, 256  ;;  %p6000_p13 = scmp.lt.s32.totalorder %s127_s24, %s127_s24 }
  0x6e   :  { %p5996_p12 = scmp.ne.s32.totalorder %s127_s24, %s5995_s27  ;;  %p6001_p0 = scmp.lt.s32.totalorder %s5995_s27, %s5995_s27 }
  0x70   :  { %p6002_p1 = por %p6001_p0, %p6000_p13 }
  0x72   :  { %p6003_p2 = pnand %p6002_p1, %p5996_p12 }
  0x74   :  { %6006 = shalt.err (!%p6003_p2)
}
  0x75   :  { %132 = dma.hbm_to_vmem [thread:$0]  %s7228_s12, 256, %s127_s24, [#allocation12], %s6108_s3, %s6108_s3, %s6109_s0  }
  0x76   :  { %s6015_s8 = scalar_lea.vmem %s151_s30, 256  ;;  %p6020_p4 = scmp.lt.s32.totalorder %s151_s30, %s151_s30 }
  0x77   :  { %p6016_p3 = scmp.ne.s32.totalorder %s151_s30, %s6015_s8  ;;  %p6021_p5 = scmp.lt.s32.totalorder %s6015_s8, %s6015_s8 }
  0x79   :  { %p6022_p6 = por %p6021_p5, %p6020_p4 }
  0x7b   :  { %p6023_p7 = pnand %p6022_p6, %p6016_p3 }
  0x7d   :  { %6026 = shalt.err (!%p6023_p7)
}
  0x7e   :  { %156 = dma.hbm_to_vmem [thread:$0]  %s7231_s15, 256, %s151_s30, [#allocation15], %s6108_s3, %s6108_s3, %s6109_s0  }
  0x7f   :  { %s6119_s26 = smov [#allocation19]  }
  0x80   :  { %s175_s2 = sshll.u32 %s6119_s26, 4  ;;  %s176_s2 = int_to_ptr.vmem [resolvable:$true] %s175_s2 }
  0x81   :  { %s6035_s7 = scalar_lea.vmem %s176_s2, 16  ;;  %s6039_s12 = scalar_lea.vmem %s176_s2, 32 }
  0x82   :  { %p6036_p8 = scmp.ne.s32.totalorder %s176_s2, %s6035_s7  ;;  %p6040_p9 = scmp.lt.s32.totalorder %s176_s2, %s176_s2 }
  0x83   :  { %p6041_p10 = scmp.lt.s32.totalorder %s6039_s12, %s6035_s7 }
  0x85   :  { %p6042_p11 = por %p6041_p10, %p6040_p9 }
  0x87   :  { %p6043_p12 = pnand %p6042_p11, %p6036_p8 }
  0x89   :  { %6046 = shalt.err (!%p6043_p12)
}
  0x8a   :  { %178 = dma.hbm_to_vmem [thread:$0]  %s7234_s18, 16, %s176_s2, [#allocation18]  }
  0x8b   :  { %6087 = dma.done.wait [#allocation3], 512  }
  0x8c   :  { %6088 = vsyncadd [#allocation3], 4294966784 }
  0x8d   :  { %6089 = dma.done.wait [#allocation6], 320  }
  0x8e   :  { %6090 = vsyncadd [#allocation6], 4294966976 }
  0x8f   :  { %6091 = dma.done.wait [#allocation9], 512  }
  0x90   :  { %6092 = vsyncadd [#allocation9], 4294966784 }
  0x91   :  { %6093 = dma.done.wait [#allocation12], 512  }
  0x92   :  { %6094 = vsyncadd [#allocation12], 4294966784 }
  0x93   :  { %6095 = dma.done.wait [#allocation15], 272  }
  0x94   :  { %6096 = vsyncadd [#allocation15], 4294967024 }
  0x95   :  { %6097 = dma.done.wait [#allocation18], 32  }
  0x96   :  { %6098 = vsyncadd [#allocation18], 4294967264  ;;  %v5652_v0 = vld [vmem:[#allocation7 + $0x8] sm:$0xff]   ;;  %v5653_v1 = vld [vmem:[#allocation7] sm:$0xff]   ;;  %s7253_s24 = sld [smem:[#allocation31_spill]]  ;;  %vm254_vm0 = vcmask 261120   ;;  %v315_v47 = vlaneseq }
  0x97   :  { %5113 = vmatprep.subr.bf16.mxu1 %v5652_v0  ;;  %v5654_v8 = vld [vmem:[#allocation16 + $0x8] sm:$0xff]   ;;  %v5655_v9 = vld [vmem:[#allocation16] sm:$0xff]   ;;  %v224_v11 = vld [vmem:[#allocation2 + $0x8] sm:$0xff]  ;;  %v6120_v16 = vmov 0.0   ;;  %s7254_s1 = sld [smem:[#allocation35_spill]]  ;;  %vm6121_vm1 = vmmov 0  }
  0x98   :  { %5114 = vmatpush3.bf16.msra.mxu1 %v5652_v0  ;;  %v223_v10 = vld [vmem:[#allocation2] sm:$0xff]  ;;  %5105 = vmatprep.subr.bf16.mxu0 %v5654_v8  ;;  %v225_v13 = vld [vmem:[#allocation2 + $0x10] sm:$0xff]  ;;  %v226_v14 = vld [vmem:[#allocation2 + $0x18] sm:$0xff]  ;;  %s6122_s26 = smov 96   ;;  %vm310_vm2 = vcmask 392192   ;;  %vm434_vm3 = vcmask 64512  }
  0x99   :  { %5115 = vmatprep.subr.bf16.mxu1 %v5653_v1  ;;  %v6326_v12 = vpack.c.bf16 %v224_v11, %v223_v10  ;;  %5106 = vmatpush3.bf16.msra.mxu0 %v5654_v8  ;;  %v6330_v15 = vpack.c.bf16 %v226_v14, %v225_v13  ;;  %v4831_v30 = vld [vmem:[#allocation17] ss:$0 sm:$0xff]  ;;  %v6387_v48 = vshrl.u32 %v315_v47, 7  ;;  %v318_v49 = vand.u32 127, %v315_v47  ;;  %s6124_s2 = smov 88   ;;  %s6126_s7 = smov 56  }
  0x9a   :  { %5107 = vmatprep.subr.bf16.mxu0 %v5655_v9  ;;  %v6123_v50 = vmov -10000.0   ;;  %vm681_vm5 = vcmask 1043456   ;;  %s6127_s12 = smov 80   ;;  %s6128_s29 = smov 112   ;;  %vm2241_vm6 = vcmask 130048   ;;  %vm2246_vm7 = vcmask 195584  }
  0x9b   :  { %5109 = vmatprep.mubr.msk.bf16.mxu0 %vm254_vm0, %v6326_v12  ;;  %vm319_vm4 = vcmp.le.s32.totalorder %v318_v49, %v6387_v48  ;;  %s6129_s4 = smov 48   ;;  %s6130_s15 = smov 72   ;;  %vm4660_vm8 = vcmask 523264  }
  0x9c   :  { %v219_v2 = vld [vmem:[%s7253_s24] sm:$0xff]  ;;  %v220_v3 = vld [vmem:[%s7253_s24 + $0x8] sm:$0xff]  ;;  %v221_v4 = vld [vmem:[%s7253_s24 + $0x10] sm:$0xff]  ;;  %5116 = vmatpush3.bf16.msra.mxu1 %v5653_v1  ;;  %v6390_v51 = vsel %vm319_vm4, 0.0, %v6123_v50  ;;  %s6131_s0 = smov 104   ;;  %s6132_s18 = smov 40  }
  0x9d   :  { %v227_v5 = vpack.c.bf16 %v220_v3, %v219_v2  ;;  %v222_v6 = vld [vmem:[%s7253_s24 + $0x18] sm:$0xff]  ;;  %5108 = vmatpush3.bf16.msra.mxu0 %v5655_v9  ;;  %5127 = vmatprep.subr.bf16.mxu1 %v6120_v16  ;;  %v4840_v17 = vld [vmem:[%s7254_s1] ss:$0 sm:$0xff]  ;;  %s6133_s16 = smov 24   ;;  %s7255_s10 = sld [smem:[#allocation37_spill]] }
  0x9e   :  { %v228_v7 = vpack.c.bf16 %v222_v6, %v221_v4  ;;  %5121 = vmatprep.subr.bf16.mxu0 %v6120_v16 }
  0x9f   :  { %5117 = vmatprep.mubr.msk.bf16.mxu1 %vm254_vm0, %v227_v5 }
  0xa0   :  { %5118 = vmatmul.mubr.msk.bf16.vlgmr.msra.gmra.mxu1 %vm254_vm0, %v228_v7  ;;  %5110 = vmatmul.mubr.msk.bf16.vlgmr.msra.gmra.mxu0 %vm254_vm0, %v6330_v15 }
  0xa1   :  { %5123 = vmatprep.mubr.msk.bf16.mxu0 %vm6121_vm1, %v6120_v16  ;;  %5129 = vmatprep.mubr.msk.bf16.mxu1 %vm6121_vm1, %v6120_v16 }
 0x160   :  { %v5119_v18 = vpop.f32.mrf.mxu1  ;;  %v5111_v31 = vpop.f32.mrf.mxu0 }
 0x161   :  { %v421_v19 = vadd.f32 %v5119_v18, %v4840_v17  ;;  %v304_v32 = vadd.f32 %v5111_v31, %v4831_v30 }
 0x162   :  { %v412_v20 = vpop.f32.mrf.mxu1  ;;  %v295_v33 = vpop.f32.mrf.mxu0 }
 0x163   :  { %v6343_v21 = vpack.c.bf16 %v421_v19, %v421_v19  ;;  %v413_v22 = vadd.f32 %v4840_v17, %v412_v20  ;;  %313 = vst.msk [vmem:[#allocation21 + $0x10] sm:$0xff] %vm310_vm2, %v304_v32  ;;  %v296_v34 = vadd.f32 %v4831_v30, %v295_v33 }
 0x164   :  { %v5120_v23 = vpop.f32.mrf.mxu1  ;;  %v5112_v35 = vpop.f32.mrf.mxu0 }
 0x165   :  { %v6345_v24 = vpack.c.bf16 %v413_v22, %v413_v22  ;;  %v424_v25 = vadd.f32 %v5120_v23, %v4840_v17  ;;  %531 = vrot.lane.b32.xlu1 %v6343_v21, %s6122_s26  ;;  %311 = vst.msk [vmem:[#allocation21] sm:$0xff] %vm310_vm2, %v296_v34  ;;  %v307_v36 = vadd.f32 %v5112_v35, %v4831_v30 }
 0x166   :  { %v415_v26 = vpop.f32.mrf.mxu1  ;;  %v298_v37 = vpop.f32.mrf.mxu0 }
 0x167   :  { %v6349_v27 = vpack.c.bf16 %v424_v25, %v424_v25  ;;  %v416_v28 = vadd.f32 %v4840_v17, %v415_v26  ;;  %432 = vrot.lane.b32.xlu0 %v6345_v24, %s6122_s26  ;;  %314 = vst.msk [vmem:[#allocation21 + $0x18] sm:$0xff] %vm310_vm2, %v307_v36  ;;  %v299_v38 = vadd.f32 %v4831_v30, %v298_v37 }
 0x169   :  { %v6353_v29 = vpack.c.bf16 %v416_v28, %v416_v28  ;;  %580 = vrot.lane.b32.xlu1 %v6349_v27, %s6122_s26  ;;  %312 = vst.msk [vmem:[#allocation21 + $0x8] sm:$0xff] %vm310_vm2, %v299_v38 }
 0x16b   :  { %482 = vrot.lane.b32.xlu0 %v6353_v29, %s6122_s26 }
 0x1d7   :  { %v532_v41 = vpop.permute.xlu1 %531 }
 0x1d8   :  { %v537_v44 = vsel %vm434_vm3, %v532_v41, 0 }
 0x1d9   :  { %v433_v39 = vpop.permute.xlu0 %432 }
 0x1da   :  { %v439_v40 = vsel %vm434_vm3, %v433_v39, 0 }
 0x1db   :  { %5122 = vmatpush3.bf16.xpose.msra.mxu0 %v439_v40  ;;  %v581_v45 = vpop.permute.xlu1 %580 }
 0x1dc   :  { %5133 = vmatprep.subr.bf16.mxu0 %v6120_v16  ;;  %v586_v46 = vsel %vm434_vm3, %v581_v45, 0 }
 0x1dd   :  { %v483_v42 = vpop.permute.xlu0 %482 }
 0x1de   :  { %v488_v43 = vsel %vm434_vm3, %v483_v42, 0 }
 0x1df   :  { %5128 = vmatpush3.bf16.xpose.msra.mxu1 %v488_v43 }
 0x1e0   :  { %5139 = vmatprep.subr.bf16.mxu1 %v6120_v16 }
 0x1e2   :  { %5124 = vmatmul.mubr.msk.bf16.vlgmr.msra.gmra.mxu0 %vm434_vm3, %v6345_v24 }
 0x1e3   :  { %5134 = vmatpush3.bf16.xpose.msra.mxu0 %v537_v44  ;;  %5135 = vmatprep.mubr.msk.bf16.mxu0 %vm6121_vm1, %v6120_v16 }
 0x1e4   :  { %5145 = vmatprep.subr.bf16.mxu0 %v6120_v16 }
 0x1e6   :  { %5130 = vmatmul.mubr.msk.bf16.vlgmr.msra.gmra.mxu1 %vm434_vm3, %v6353_v29 }
 0x1e7   :  { %5140 = vmatpush3.bf16.xpose.msra.mxu1 %v586_v46  ;;  %5141 = vmatprep.mubr.msk.bf16.mxu1 %vm6121_vm1, %v6120_v16 }
 0x1e8   :  { %5151 = vmatprep.subr.bf16.mxu1 %v6120_v16 }
 0x1ea   :  { %5136 = vmatmul.mubr.msk.bf16.vlgmr.msra.gmra.mxu0 %vm434_vm3, %v6343_v21 }
 0x1eb   :  { %5147 = vmatprep.mubr.msk.bf16.mxu0 %vm6121_vm1, %v6120_v16 }
 0x1ee   :  { %5142 = vmatmul.mubr.msk.bf16.vlgmr.msra.gmra.mxu1 %vm434_vm3, %v6349_v27 }
 0x1ef   :  { %5153 = vmatprep.mubr.msk.bf16.mxu1 %vm6121_vm1, %v6120_v16 }
 0x2a2   :  { %v475_v52 = vpop.f32.mrf.mxu0 }
 0x2a3   :  { %v476_v53 = vadd.f32 %v475_v52, %v6390_v51 }
 0x2a4   :  { %v5125_v54 = vpop.f32.mrf.mxu0 }
 0x2a5   :  { %v628_v55 = vsel %vm434_vm3, %v476_v53, -inf }
 0x2a6   :  { %629 = vmax.xlane.f32.xlu0 %v628_v55  ;;  %v478_v56 = vpop.f32.mrf.mxu0  ;;  %v524_v57 = vpop.f32.mrf.mxu1 }
 0x2a7   :  { %v525_v58 = vadd.f32 %v524_v57, %v6390_v51 }
 0x2a8   :  { %v5126_v59 = vpop.f32.mrf.mxu0  ;;  %v5131_v60 = vpop.f32.mrf.mxu1 }
 0x2a9   :  { %v631_v61 = vsel %vm434_vm3, %v525_v58, -inf }
 0x2aa   :  { %v573_v62 = vpop.f32.mrf.mxu0  ;;  %632 = vmax.xlane.f32.xlu1 %v631_v61  ;;  %v527_v63 = vpop.f32.mrf.mxu1 }
 0x2ab   :  { %v574_v0 = vadd.f32 %v573_v62, %v6390_v51 }
 0x2ac   :  { %v5132_v1 = vpop.f32.mrf.mxu1  ;;  %v5137_v2 = vpop.f32.mrf.mxu0 }
 0x2ad   :  { %v634_v3 = vsel %vm434_vm3, %v574_v0, -inf }
 0x2ae   :  { %635 = vmax.xlane.f32.xlu0 %v634_v3  ;;  %v576_v4 = vpop.f32.mrf.mxu0  ;;  %v622_v5 = vpop.f32.mrf.mxu1 }
 0x2af   :  { %v623_v6 = vadd.f32 %v622_v5, %v6390_v51 }
 0x2b0   :  { %v5138_v7 = vpop.f32.mrf.mxu0  ;;  %v5143_v8 = vpop.f32.mrf.mxu1 }
 0x2b1   :  { %v637_v9 = vsel %vm434_vm3, %v623_v6, -inf }
 0x2b2   :  { %638 = vmax.xlane.f32.xlu0 %v637_v9  ;;  %v625_v10 = vpop.f32.mrf.mxu1 }
 0x2b4   :  { %v5144_v11 = vpop.f32.mrf.mxu1 }
 0x2bb   :  { %676 = vrot.lane.b32.xlu1 %v6345_v24, %s6108_s3 }
 0x32f   :  { %v630_v13 = vpop.xlane.xlu0 %629 }
 0x330   :  { %v640_v14 = vsub.f32 %v476_v53, %v630_v13 }
 0x332   :  { %v644_v17 = vmul.f32 1.442695, %v640_v14 }
 0x333   :  { %v633_v18 = vpop.xlane.xlu1 %632 }
 0x334   :  { %5671 = vpow2.f32 %v644_v17  ;;  %v641_v19 = vsub.f32 %v525_v58, %v633_v18 }
 0x336   :  { %v646_v20 = vmul.f32 1.442695, %v641_v19 }
 0x337   :  { %v677_v22 = vpop.permute.xlu1 %676  ;;  %v636_v31 = vpop.xlane.xlu0 %635 }
 0x338   :  { %5673 = vpow2.f32 %v646_v20  ;;  %v683_v23 = vsel %vm681_vm5, %v677_v22, 0  ;;  %v642_v33 = vsub.f32 %v574_v0, %v636_v31 }
 0x339   :  { %5146 = vmatpush3.bf16.msra.mxu0 %v683_v23 }
 0x33a   :  { %5157 = vmatprep.subr.bf16.mxu0 %v6120_v16  ;;  %v648_v35 = vmul.f32 1.442695, %v642_v33 }
 0x33b   :  { %v639_v32 = vpop.xlane.xlu0 %638 }
 0x33c   :  { %v643_v34 = vsub.f32 %v623_v6, %v639_v32  ;;  %5675 = vpow2.f32 %v648_v35 }
 0x33e   :  { %v650_v36 = vmul.f32 1.442695, %v643_v34 }
 0x340   :  { %5677 = vpow2.f32 %v650_v36 }
 0x341   :  { %v5672_v25 = vpop.eup %5671 }
 0x342   :  { %v652_v26 = vsel %vm434_vm3, %v5672_v25, 0.0 }
 0x343   :  { %653 = vadd.xlane.f32.xlu1 %v652_v26 }
 0x345   :  { %v5674_v28 = vpop.eup %5673 }
 0x346   :  { %v655_v30 = vsel %vm434_vm3, %v5674_v28, 0.0 }
 0x347   :  { %656 = vadd.xlane.f32.xlu0 %v655_v30 }
 0x349   :  { %v5676_v37 = vpop.eup %5675 }
 0x34a   :  { %v658_v39 = vsel %vm434_vm3, %v5676_v37, 0.0 }
 0x34d   :  { %v5678_v38 = vpop.eup %5677 }
 0x34e   :  { %v661_v40 = vsel %vm434_vm3, %v5678_v38, 0.0 }
 0x354   :  { %773 = vrot.lane.b32.xlu1 %v6343_v21, %s6108_s3 }
 0x358   :  { %821 = vrot.lane.b32.xlu1 %v6349_v27, %s6108_s3 }
 0x35d   :  { %725 = vrot.lane.b32.xlu0 %v6353_v29, %s6108_s3  ;;  %s6125_s3 = smov 120  }
 0x37c   :  { %659 = vadd.xlane.f32.xlu1 %v658_v39  ;;  %662 = vadd.xlane.f32.xlu0 %v661_v40 }
 0x38d   :  { %921 = vrot.lane.b32.xlu1 %v6353_v29, %s6124_s2 }
 0x391   :  { %919 = vrot.lane.b32.xlu1 %v6353_v29, %s6125_s3 }
 0x392   :  { %871 = vrot.lane.b32.xlu0 %v6345_v24, %s6124_s2 }
 0x395   :  { %1021 = vrot.lane.b32.xlu1 %v6349_v27, %s6124_s2 }
 0x396   :  { %869 = vrot.lane.b32.xlu0 %v6345_v24, %s6125_s3 }
 0x399   :  { %1019 = vrot.lane.b32.xlu1 %v6349_v27, %s6125_s3 }
 0x39a   :  { %971 = vrot.lane.b32.xlu0 %v6343_v21, %s6124_s2 }
 0x39e   :  { %969 = vrot.lane.b32.xlu0 %v6343_v21, %s6125_s3 }
 0x3cc   :  { %v654_v41 = vpop.xlane.xlu1 %653 }
 0x3cd   :  { %5679 = vrcp.f32 %v654_v41 }
 0x3d0   :  { %v657_v42 = vpop.xlane.xlu0 %656  ;;  %v774_v46 = vpop.permute.xlu1 %773 }
 0x3d1   :  { %5681 = vrcp.f32 %v657_v42  ;;  %v779_v52 = vsel %vm681_vm5, %v774_v46, 0 }
 0x3d4   :  { %v726_v43 = vpop.permute.xlu0 %725  ;;  %v822_v54 = vpop.permute.xlu1 %821 }
 0x3d5   :  { %v731_v44 = vsel %vm681_vm5, %v726_v43, 0  ;;  %v827_v56 = vsel %vm681_vm5, %v822_v54, 0 }
 0x3d6   :  { %5152 = vmatpush3.bf16.msra.mxu1 %v731_v44 }
 0x3d7   :  { %5163 = vmatprep.subr.bf16.mxu1 %v6120_v16 }
 0x3da   :  { %v5680_v45 = vpop.eup %5679 }
 0x3db   :  { %v668_v47 = vmul.f32 %v5680_v45, %v5672_v25 }
 0x3dd   :  { %v672_v49 = vpack.c.bf16 %v668_v47, %v668_v47 }
 0x3de   :  { %v5682_v50 = vpop.eup %5681 }
 0x3df   :  { %5148 = vmatmul.mubr.msk.bf16.vlgmr.msra.gmra.mxu0 %vm434_vm3, %v672_v49  ;;  %v669_v53 = vmul.f32 %v5682_v50, %v5674_v28 }
 0x3e0   :  { %5158 = vmatpush3.bf16.msra.mxu0 %v779_v52  ;;  %5159 = vmatprep.mubr.msk.bf16.mxu0 %vm6121_vm1, %v6120_v16 }
 0x3e1   :  { %v673_v55 = vpack.c.bf16 %v669_v53, %v669_v53  ;;  %5169 = vmatprep.subr.bf16.mxu0 %v6120_v16 }
 0x3e3   :  { %5154 = vmatmul.mubr.msk.bf16.vlgmr.msra.gmra.mxu1 %vm434_vm3, %v673_v55 }
 0x3e4   :  { %5164 = vmatpush3.bf16.msra.mxu1 %v827_v56  ;;  %5165 = vmatprep.mubr.msk.bf16.mxu1 %vm6121_vm1, %v6120_v16 }
 0x3e5   :  { %5175 = vmatprep.subr.bf16.mxu1 %v6120_v16 }
 0x405   :  { %v660_v57 = vpop.xlane.xlu1 %659  ;;  %v663_v58 = vpop.xlane.xlu0 %662 }
 0x406   :  { %5683 = vrcp.f32 %v660_v57 }
 0x407   :  { %5685 = vrcp.f32 %v663_v58 }
 0x409   :  { %v872_v59 = vpop.permute.xlu0 %871  ;;  %v922_v60 = vpop.permute.xlu1 %921 }
 0x40a   :  { %v877_v4 = vsel %vm434_vm3, %v872_v59, 0  ;;  %v927_v6 = vsel %vm434_vm3, %v922_v60, 0 }
 0x40d   :  { %v870_v2 = vpop.permute.xlu0 %869  ;;  %v920_v5 = vpop.permute.xlu1 %919 }
 0x411   :  { %v972_v7 = vpop.permute.xlu0 %971  ;;  %v1022_v8 = vpop.permute.xlu1 %1021 }
 0x412   :  { %v977_v9 = vsel %vm434_vm3, %v972_v7, 0  ;;  %v1027_v10 = vsel %vm434_vm3, %v1022_v8, 0 }
 0x413   :  { %v5684_v61 = vpop.eup %5683 }
 0x414   :  { %v5686_v62 = vpop.eup %5685  ;;  %v670_v63 = vmul.f32 %v5684_v61, %v5676_v37 }
 0x415   :  { %v671_v0 = vmul.f32 %v5686_v62, %v5678_v38  ;;  %v970_v11 = vpop.permute.xlu0 %969  ;;  %v1020_v13 = vpop.permute.xlu1 %1019 }
 0x416   :  { %v674_v1 = vpack.c.bf16 %v670_v63, %v670_v63 }
 0x417   :  { %v675_v3 = vpack.c.bf16 %v671_v0, %v671_v0 }
 0x418   :  { %5160 = vmatmul.mubr.msk.bf16.vlgmr.msra.gmra.mxu0 %vm434_vm3, %v674_v1 }
 0x419   :  { %5166 = vmatmul.mubr.msk.bf16.vlgmr.msra.gmra.mxu1 %vm434_vm3, %v675_v3  ;;  %5170 = vmatpush3.bf16.xpose.msra.mxu0 %v877_v4 }
 0x41a   :  { %5176 = vmatpush3.bf16.xpose.msra.mxu1 %v927_v6  ;;  %5171 = vmatprep.mubr.msk.bf16.mxu0 %vm6121_vm1, %v6120_v16 }
 0x41b   :  { %5177 = vmatprep.mubr.msk.bf16.mxu1 %vm6121_vm1, %v6120_v16  ;;  %5181 = vmatprep.subr.bf16.mxu0 %v6120_v16 }
 0x41c   :  { %5187 = vmatprep.subr.bf16.mxu1 %v6120_v16 }
 0x420   :  { %5172 = vmatmul.mubr.msk.bf16.vlgmr.msra.gmra.mxu0 %vm434_vm3, %v870_v2 }
 0x421   :  { %5178 = vmatmul.mubr.msk.bf16.vlgmr.msra.gmra.mxu1 %vm434_vm3, %v920_v5  ;;  %5182 = vmatpush3.bf16.xpose.msra.mxu0 %v977_v9 }
 0x422   :  { %5188 = vmatpush3.bf16.xpose.msra.mxu1 %v1027_v10  ;;  %5183 = vmatprep.mubr.msk.bf16.mxu0 %vm6121_vm1, %v6120_v16 }
 0x423   :  { %5189 = vmatprep.mubr.msk.bf16.mxu1 %vm6121_vm1, %v6120_v16  ;;  %5193 = vmatprep.subr.bf16.mxu0 %v6120_v16 }
 0x424   :  { %5199 = vmatprep.subr.bf16.mxu1 %v6120_v16 }
 0x428   :  { %5184 = vmatmul.mubr.msk.bf16.vlgmr.msra.gmra.mxu0 %vm434_vm3, %v970_v11 }
 0x429   :  { %5190 = vmatmul.mubr.msk.bf16.vlgmr.msra.gmra.mxu1 %vm434_vm3, %v1020_v13  ;;  %5195 = vmatprep.mubr.msk.bf16.mxu0 %vm6121_vm1, %v6120_v16 }
 0x42a   :  { %5201 = vmatprep.mubr.msk.bf16.mxu1 %vm6121_vm1, %v6120_v16 }
 0x49f   :  { %v6468_v14 = vpop.f32.mrf.mxu0 }
 0x4a1   :  { %v5149_v17 = vpop.f32.mrf.mxu0 }
 0x4a3   :  { %v722_v18 = vpop.f32.mrf.mxu0  ;;  %v6470_v19 = vpop.f32.mrf.mxu1 }
 0x4a5   :  { %v5150_v20 = vpop.f32.mrf.mxu0  ;;  %v5155_v22 = vpop.f32.mrf.mxu1 }
 0x4a7   :  { %v770_v23 = vpop.f32.mrf.mxu1 }
 0x4a9   :  { %v5156_v25 = vpop.f32.mrf.mxu1 }
 0x4d8   :  { %v6472_v26 = vpop.f32.mrf.mxu0 }
 0x4d9   :  { %v6474_v28 = vpop.f32.mrf.mxu1 }
 0x4da   :  { %v5161_v30 = vpop.f32.mrf.mxu0 }
 0x4db   :  { %v5167_v31 = vpop.f32.mrf.mxu1 }
 0x4dc   :  { %v818_v32 = vpop.f32.mrf.mxu0 }
 0x4dd   :  { %v866_v33 = vpop.f32.mrf.mxu1 }
 0x4de   :  { %v5162_v34 = vpop.f32.mrf.mxu0 }
 0x4df   :  { %v5168_v35 = vpop.f32.mrf.mxu1 }
 0x4e0   :  { %v913_v36 = vpop.f32.mrf.mxu0 }
 0x4e1   :  { %v914_v37 = vadd.f32 %v913_v36, %v6390_v51  ;;  %v963_v38 = vpop.f32.mrf.mxu1 }
 0x4e2   :  { %v964_v39 = vadd.f32 %v963_v38, %v6390_v51  ;;  %v5173_v40 = vpop.f32.mrf.mxu0 }
 0x4e3   :  { %v5179_v41 = vpop.f32.mrf.mxu1  ;;  %v1069_v42 = vsel %vm434_vm3, %v914_v37, -inf }
 0x4e4   :  { %v1072_v43 = vsel %vm434_vm3, %v964_v39, -inf  ;;  %1070 = vmax.xlane.f32.xlu0 %v1069_v42  ;;  %v916_v44 = vpop.f32.mrf.mxu0 }
 0x4e5   :  { %1073 = vmax.xlane.f32.xlu1 %v1072_v43  ;;  %v966_v45 = vpop.f32.mrf.mxu1 }
 0x4e6   :  { %v5174_v46 = vpop.f32.mrf.mxu0 }
 0x4e7   :  { %v5180_v47 = vpop.f32.mrf.mxu1 }
 0x4e8   :  { %v1013_v49 = vpop.f32.mrf.mxu0 }
 0x4e9   :  { %v1014_v50 = vadd.f32 %v1013_v49, %v6390_v51  ;;  %v1063_v52 = vpop.f32.mrf.mxu1 }
 0x4ea   :  { %v5185_v53 = vpop.f32.mrf.mxu0  ;;  %v1064_v54 = vadd.f32 %v1063_v52, %v6390_v51 }
 0x4eb   :  { %v5191_v55 = vpop.f32.mrf.mxu1  ;;  %v1075_v56 = vsel %vm434_vm3, %v1014_v50, -inf }
 0x4ec   :  { %1076 = vmax.xlane.f32.xlu0 %v1075_v56  ;;  %v1016_v57 = vpop.f32.mrf.mxu0  ;;  %v1078_v61 = vsel %vm434_vm3, %v1064_v54, -inf }
 0x4ed   :  { %v1066_v58 = vpop.f32.mrf.mxu1 }
 0x4ee   :  { %v5186_v59 = vpop.f32.mrf.mxu0 }
 0x4ef   :  { %v5192_v60 = vpop.f32.mrf.mxu1 }
 0x4f0   :  { %1079 = vmax.xlane.f32.xlu0 %v1078_v61 }
 0x4f6   :  { %1117 = vrot.lane.b32.xlu1 %v6345_v24, %s6126_s7 }
 0x56d   :  { %v1071_v62 = vpop.xlane.xlu0 %1070 }
 0x56e   :  { %v1074_v63 = vpop.xlane.xlu1 %1073  ;;  %v1081_v0 = vsub.f32 %v914_v37, %v1071_v62 }
 0x56f   :  { %v1082_v1 = vsub.f32 %v964_v39, %v1074_v63 }
 0x570   :  { %v1085_v2 = vmul.f32 1.442695, %v1081_v0 }
 0x571   :  { %v1087_v3 = vmul.f32 1.442695, %v1082_v1 }
 0x572   :  { %5687 = vpow2.f32 %v1085_v2  ;;  %v1118_v4 = vpop.permute.xlu1 %1117 }
 0x573   :  { %5689 = vpow2.f32 %v1087_v3  ;;  %v1123_v5 = vsel %vm681_vm5, %v1118_v4, 0 }
 0x574   :  { %5194 = vmatpush3.bf16.msra.mxu0 %v1123_v5 }
 0x575   :  { %5205 = vmatprep.subr.bf16.mxu0 %v6120_v16  ;;  %v1077_v10 = vpop.xlane.xlu0 %1076 }
 0x576   :  { %v1083_v17 = vsub.f32 %v1014_v50, %v1077_v10 }
 0x578   :  { %v1089_v20 = vmul.f32 1.442695, %v1083_v17 }
 0x579   :  { %v1080_v11 = vpop.xlane.xlu0 %1079 }
 0x57a   :  { %v1084_v13 = vsub.f32 %v1064_v54, %v1080_v11 }
 0x57c   :  { %v1091_v18 = vmul.f32 1.442695, %v1084_v13 }
 0x57e   :  { %5691 = vpow2.f32 %v1091_v18 }
 0x57f   :  { %v5688_v6 = vpop.eup %5687  ;;  %5693 = vpow2.f32 %v1089_v20 }
 0x580   :  { %v5690_v7 = vpop.eup %5689  ;;  %v1093_v8 = vsel %vm434_vm3, %v5688_v6, 0.0 }
 0x581   :  { %v1096_v9 = vsel %vm434_vm3, %v5690_v7, 0.0  ;;  %1094 = vadd.xlane.f32.xlu1 %v1093_v8 }
 0x582   :  { %1097 = vadd.xlane.f32.xlu0 %v1096_v9 }
 0x58b   :  { %v5692_v22 = vpop.eup %5691 }
 0x58c   :  { %v5694_v23 = vpop.eup %5693  ;;  %v1102_v25 = vsel %vm434_vm3, %v5692_v22, 0.0 }
 0x58d   :  { %v1099_v30 = vsel %vm434_vm3, %v5694_v23, 0.0 }
 0x592   :  { %1213 = vrot.lane.b32.xlu1 %v6343_v21, %s6126_s7 }
 0x596   :  { %1261 = vrot.lane.b32.xlu1 %v6349_v27, %s6126_s7 }
 0x598   :  { %1165 = vrot.lane.b32.xlu0 %v6353_v29, %s6126_s7 }
 0x5b7   :  { %1103 = vadd.xlane.f32.xlu0 %v1102_v25 }
 0x5ba   :  { %1100 = vadd.xlane.f32.xlu1 %v1099_v30 }
 0x5cb   :  { %1361 = vrot.lane.b32.xlu1 %v6353_v29, %s6127_s12 }
 0x5cd   :  { %1311 = vrot.lane.b32.xlu0 %v6345_v24, %s6127_s12 }
 0x5cf   :  { %1359 = vrot.lane.b32.xlu1 %v6353_v29, %s6128_s29 }
 0x5d1   :  { %1309 = vrot.lane.b32.xlu0 %v6345_v24, %s6128_s29 }
 0x5d3   :  { %1461 = vrot.lane.b32.xlu1 %v6349_v27, %s6127_s12 }
 0x5d5   :  { %1411 = vrot.lane.b32.xlu0 %v6343_v21, %s6127_s12 }
 0x5d7   :  { %1459 = vrot.lane.b32.xlu1 %v6349_v27, %s6128_s29 }
 0x5d9   :  { %1409 = vrot.lane.b32.xlu0 %v6343_v21, %s6128_s29 }
 0x60a   :  { %v1095_v31 = vpop.xlane.xlu1 %1094 }
 0x60b   :  { %5695 = vrcp.f32 %v1095_v31  ;;  %v1098_v32 = vpop.xlane.xlu0 %1097 }
 0x60c   :  { %5697 = vrcp.f32 %v1098_v32 }
 0x60e   :  { %v1214_v35 = vpop.permute.xlu1 %1213 }
 0x60f   :  { %v1166_v33 = vpop.permute.xlu0 %1165  ;;  %v1219_v43 = vsel %vm681_vm5, %v1214_v35, 0 }
 0x610   :  { %v1171_v34 = vsel %vm681_vm5, %v1166_v33, 0 }
 0x611   :  { %5200 = vmatpush3.bf16.msra.mxu1 %v1171_v34 }
 0x612   :  { %5211 = vmatprep.subr.bf16.mxu1 %v6120_v16  ;;  %v1262_v40 = vpop.permute.xlu1 %1261 }
 0x613   :  { %v1267_v44 = vsel %vm681_vm5, %v1262_v40, 0 }
 0x618   :  { %v5696_v36 = vpop.eup %5695 }
 0x619   :  { %v5698_v37 = vpop.eup %5697  ;;  %v1109_v38 = vmul.f32 %v5696_v36, %v5688_v6 }
 0x61a   :  { %v1110_v39 = vmul.f32 %v5698_v37, %v5690_v7 }
 0x61b   :  { %v1113_v41 = vpack.c.bf16 %v1109_v38, %v1109_v38 }
 0x61c   :  { %v1114_v42 = vpack.c.bf16 %v1110_v39, %v1110_v39 }
 0x61d   :  { %5196 = vmatmul.mubr.msk.bf16.vlgmr.msra.gmra.mxu0 %vm434_vm3, %v1113_v41 }
 0x61e   :  { %5202 = vmatmul.mubr.msk.bf16.vlgmr.msra.gmra.mxu1 %vm434_vm3, %v1114_v42  ;;  %5206 = vmatpush3.bf16.msra.mxu0 %v1219_v43 }
 0x61f   :  { %5212 = vmatpush3.bf16.msra.mxu1 %v1267_v44  ;;  %5213 = vmatprep.mubr.msk.bf16.mxu1 %vm6121_vm1, %v6120_v16 }
 0x620   :  { %5223 = vmatprep.subr.bf16.mxu1 %v6120_v16  ;;  %5207 = vmatprep.mubr.msk.bf16.mxu0 %vm6121_vm1, %v6120_v16 }
 0x621   :  { %5217 = vmatprep.subr.bf16.mxu0 %v6120_v16 }
 0x640   :  { %v1104_v45 = vpop.xlane.xlu0 %1103 }
 0x641   :  { %5699 = vrcp.f32 %v1104_v45 }
 0x643   :  { %v1101_v46 = vpop.xlane.xlu1 %1100 }
 0x644   :  { %5701 = vrcp.f32 %v1101_v46  ;;  %v1312_v50 = vpop.permute.xlu0 %1311 }
 0x645   :  { %v1317_v60 = vsel %vm434_vm3, %v1312_v50, 0 }
 0x647   :  { %v1362_v47 = vpop.permute.xlu1 %1361 }
 0x648   :  { %v1367_v57 = vsel %vm434_vm3, %v1362_v47, 0  ;;  %v1310_v59 = vpop.permute.xlu0 %1309 }
 0x64b   :  { %v1360_v55 = vpop.permute.xlu1 %1359 }
 0x64c   :  { %v1412_v62 = vpop.permute.xlu0 %1411 }
 0x64d   :  { %v1417_v0 = vsel %vm434_vm3, %v1412_v62, 0 }
 0x64e   :  { %v5700_v49 = vpop.eup %5699 }
 0x64f   :  { %v1112_v52 = vmul.f32 %v5700_v49, %v5692_v22  ;;  %v1462_v61 = vpop.permute.xlu1 %1461 }
 0x650   :  { %v1467_v63 = vsel %vm434_vm3, %v1462_v61, 0  ;;  %v1410_v2 = vpop.permute.xlu0 %1409 }
 0x651   :  { %v5702_v53 = vpop.eup %5701  ;;  %v1116_v54 = vpack.c.bf16 %v1112_v52, %v1112_v52 }
 0x652   :  { %v1111_v56 = vmul.f32 %v5702_v53, %v5694_v23 }
 0x653   :  { %5214 = vmatmul.mubr.msk.bf16.vlgmr.msra.gmra.mxu1 %vm434_vm3, %v1116_v54  ;;  %v1460_v1 = vpop.permute.xlu1 %1459 }
 0x654   :  { %5224 = vmatpush3.bf16.xpose.msra.mxu1 %v1367_v57  ;;  %v1115_v58 = vpack.c.bf16 %v1111_v56, %v1111_v56  ;;  %5225 = vmatprep.mubr.msk.bf16.mxu1 %vm6121_vm1, %v6120_v16 }
 0x655   :  { %5235 = vmatprep.subr.bf16.mxu1 %v6120_v16 }
 0x656   :  { %5208 = vmatmul.mubr.msk.bf16.vlgmr.msra.gmra.mxu0 %vm434_vm3, %v1115_v58 }
 0x657   :  { %5218 = vmatpush3.bf16.xpose.msra.mxu0 %v1317_v60  ;;  %5219 = vmatprep.mubr.msk.bf16.mxu0 %vm6121_vm1, %v6120_v16 }
 0x658   :  { %5229 = vmatprep.subr.bf16.mxu0 %v6120_v16 }
 0x65b   :  { %5226 = vmatmul.mubr.msk.bf16.vlgmr.msra.gmra.mxu1 %vm434_vm3, %v1360_v55 }
 0x65c   :  { %5236 = vmatpush3.bf16.xpose.msra.mxu1 %v1467_v63  ;;  %5237 = vmatprep.mubr.msk.bf16.mxu1 %vm6121_vm1, %v6120_v16 }
 0x65d   :  { %5247 = vmatprep.subr.bf16.mxu1 %v6120_v16 }
 0x65e   :  { %5220 = vmatmul.mubr.msk.bf16.vlgmr.msra.gmra.mxu0 %vm434_vm3, %v1310_v59 }
 0x65f   :  { %5230 = vmatpush3.bf16.xpose.msra.mxu0 %v1417_v0  ;;  %5231 = vmatprep.mubr.msk.bf16.mxu0 %vm6121_vm1, %v6120_v16 }
 0x660   :  { %5241 = vmatprep.subr.bf16.mxu0 %v6120_v16 }
 0x663   :  { %5238 = vmatmul.mubr.msk.bf16.vlgmr.msra.gmra.mxu1 %vm434_vm3, %v1460_v1 }
 0x664   :  { %5249 = vmatprep.mubr.msk.bf16.mxu1 %vm6121_vm1, %v6120_v16 }
 0x666   :  { %5232 = vmatmul.mubr.msk.bf16.vlgmr.msra.gmra.mxu0 %vm434_vm3, %v1410_v2 }
 0x667   :  { %5243 = vmatprep.mubr.msk.bf16.mxu0 %vm6121_vm1, %v6120_v16 }
 0x6dd   :  { %v6548_v3 = vpop.f32.mrf.mxu0 }
 0x6de   :  { %v6550_v4 = vpop.f32.mrf.mxu1 }
 0x6df   :  { %v5592_v5 = vpack.i.bf16 %v6550_v4, %v6548_v3  ;;  %v5197_v6 = vpop.f32.mrf.mxu0 }
 0x6e0   :  { %v5203_v7 = vpop.f32.mrf.mxu1 }
 0x6e1   :  { %v1162_v8 = vpop.f32.mrf.mxu0 }
 0x6e2   :  { %v1210_v9 = vpop.f32.mrf.mxu1 }
 0x6e3   :  { %v5198_v10 = vpop.f32.mrf.mxu0 }
 0x6e4   :  { %v5204_v11 = vpop.f32.mrf.mxu1 }
 0x713   :  { %v6554_v13 = vpop.f32.mrf.mxu1 }
 0x715   :  { %v5215_v17 = vpop.f32.mrf.mxu1 }
 0x716   :  { %v6556_v18 = vpop.f32.mrf.mxu0 }
 0x717   :  { %v5597_v20 = vpack.i.bf16 %v6554_v13, %v6556_v18  ;;  %v1306_v22 = vpop.f32.mrf.mxu1 }
 0x718   :  { %v5209_v23 = vpop.f32.mrf.mxu0 }
 0x719   :  { %v5216_v25 = vpop.f32.mrf.mxu1 }
 0x71a   :  { %v1258_v30 = vpop.f32.mrf.mxu0 }
 0x71b   :  { %v1403_v31 = vpop.f32.mrf.mxu1 }
 0x71c   :  { %v1404_v32 = vadd.f32 %v1403_v31, %v6390_v51  ;;  %v5210_v33 = vpop.f32.mrf.mxu0 }
 0x71d   :  { %v5227_v34 = vpop.f32.mrf.mxu1 }
 0x71e   :  { %v1512_v35 = vsel %vm434_vm3, %v1404_v32, -inf  ;;  %v1353_v36 = vpop.f32.mrf.mxu0 }
 0x71f   :  { %1513 = vmax.xlane.f32.xlu1 %v1512_v35  ;;  %v1354_v37 = vadd.f32 %v1353_v36, %v6390_v51  ;;  %v1406_v38 = vpop.f32.mrf.mxu1 }
 0x720   :  { %v5221_v39 = vpop.f32.mrf.mxu0 }
 0x721   :  { %v5228_v40 = vpop.f32.mrf.mxu1  ;;  %v1509_v41 = vsel %vm434_vm3, %v1354_v37, -inf }
 0x722   :  { %1510 = vmax.xlane.f32.xlu0 %v1509_v41  ;;  %v1356_v42 = vpop.f32.mrf.mxu0 }
 0x723   :  { %v1503_v43 = vpop.f32.mrf.mxu1 }
 0x724   :  { %v5222_v44 = vpop.f32.mrf.mxu0  ;;  %v1504_v52 = vadd.f32 %v1503_v43, %v6390_v51 }
 0x725   :  { %v5239_v45 = vpop.f32.mrf.mxu1 }
 0x726   :  { %v1453_v46 = vpop.f32.mrf.mxu0  ;;  %v1518_v57 = vsel %vm434_vm3, %v1504_v52, -inf }
 0x727   :  { %v1454_v47 = vadd.f32 %v1453_v46, %v6390_v51  ;;  %v1506_v49 = vpop.f32.mrf.mxu1 }
 0x728   :  { %v5233_v50 = vpop.f32.mrf.mxu0 }
 0x729   :  { %v5240_v53 = vpop.f32.mrf.mxu1  ;;  %v1515_v54 = vsel %vm434_vm3, %v1454_v47, -inf }
 0x72a   :  { %1516 = vmax.xlane.f32.xlu0 %v1515_v54  ;;  %v1456_v55 = vpop.f32.mrf.mxu0 }
 0x72c   :  { %v5234_v56 = vpop.f32.mrf.mxu0 }
 0x72e   :  { %1519 = vmax.xlane.f32.xlu0 %v1518_v57 }
 0x730   :  { %1557 = vrot.lane.b32.xlu1 %v6345_v24, %s6129_s4 }
 0x7a8   :  { %v1514_v58 = vpop.xlane.xlu1 %1513 }
 0x7a9   :  { %v1522_v59 = vsub.f32 %v1404_v32, %v1514_v58 }
 0x7ab   :  { %v1527_v60 = vmul.f32 1.442695, %v1522_v59  ;;  %v1511_v61 = vpop.xlane.xlu0 %1510 }
 0x7ac   :  { %v1558_v62 = vpop.permute.xlu1 %1557  ;;  %v1521_v63 = vsub.f32 %v1354_v37, %v1511_v61 }
 0x7ad   :  { %5703 = vpow2.f32 %v1527_v60  ;;  %v1563_v0 = vsel %vm681_vm5, %v1558_v62, 0 }
 0x7ae   :  { %v1525_v1 = vmul.f32 1.442695, %v1521_v63  ;;  %5242 = vmatpush3.bf16.msra.mxu0 %v1563_v0 }
 0x7af   :  { %5253 = vmatprep.subr.bf16.mxu0 %v6120_v16 }
 0x7b0   :  { %5705 = vpow2.f32 %v1525_v1 }
 0x7b3   :  { %v1517_v9 = vpop.xlane.xlu0 %1516 }
 0x7b4   :  { %v1523_v22 = vsub.f32 %v1454_v47, %v1517_v9 }
 0x7b6   :  { %v1529_v23 = vmul.f32 1.442695, %v1523_v22 }
 0x7b7   :  { %v1520_v10 = vpop.xlane.xlu0 %1519 }
 0x7b8   :  { %v1524_v11 = vsub.f32 %v1504_v52, %v1520_v10 }
 0x7ba   :  { %v5704_v2 = vpop.eup %5703  ;;  %v1531_v17 = vmul.f32 1.442695, %v1524_v11 }
 0x7bb   :  { %v1536_v6 = vsel %vm434_vm3, %v5704_v2, 0.0 }
 0x7bc   :  { %1537 = vadd.xlane.f32.xlu0 %v1536_v6  ;;  %5707 = vpow2.f32 %v1531_v17 }
 0x7bd   :  { %v5706_v7 = vpop.eup %5705  ;;  %5709 = vpow2.f32 %v1529_v23 }
 0x7be   :  { %v1533_v8 = vsel %vm434_vm3, %v5706_v7, 0.0 }
 0x7bf   :  { %1534 = vadd.xlane.f32.xlu1 %v1533_v8 }
 0x7c9   :  { %v5708_v25 = vpop.eup %5707 }
 0x7ca   :  { %v1542_v30 = vsel %vm434_vm3, %v5708_v25, 0.0  ;;  %v5710_v31 = vpop.eup %5709 }
 0x7cb   :  { %v1539_v32 = vsel %vm434_vm3, %v5710_v31, 0.0 }
 0x7d0   :  { %1653 = vrot.lane.b32.xlu1 %v6343_v21, %s6129_s4 }
 0x7d2   :  { %1605 = vrot.lane.b32.xlu0 %v6353_v29, %s6129_s4 }
 0x7d4   :  { %1701 = vrot.lane.b32.xlu1 %v6349_v27, %s6129_s4 }
 0x7f1   :  { %1543 = vadd.xlane.f32.xlu0 %v1542_v30 }
 0x7f8   :  { %1540 = vadd.xlane.f32.xlu1 %v1539_v32 }
 0x807   :  { %1751 = vrot.lane.b32.xlu0 %v6345_v24, %s6130_s15 }
 0x809   :  { %1801 = vrot.lane.b32.xlu1 %v6353_v29, %s6130_s15 }
 0x80b   :  { %1749 = vrot.lane.b32.xlu0 %v6345_v24, %s6131_s0 }
 0x80d   :  { %1799 = vrot.lane.b32.xlu1 %v6353_v29, %s6131_s0 }
 0x80f   :  { %1851 = vrot.lane.b32.xlu0 %v6343_v21, %s6130_s15 }
 0x811   :  { %1901 = vrot.lane.b32.xlu1 %v6349_v27, %s6130_s15 }
 0x813   :  { %1849 = vrot.lane.b32.xlu0 %v6343_v21, %s6131_s0 }
 0x815   :  { %1899 = vrot.lane.b32.xlu1 %v6349_v27, %s6131_s0 }
 0x845   :  { %v1538_v33 = vpop.xlane.xlu0 %1537 }
 0x846   :  { %5711 = vrcp.f32 %v1538_v33 }
 0x848   :  { %v1535_v34 = vpop.xlane.xlu1 %1534 }
 0x849   :  { %5713 = vrcp.f32 %v1535_v34  ;;  %v1606_v35 = vpop.permute.xlu0 %1605 }
 0x84a   :  { %v1611_v36 = vsel %vm681_vm5, %v1606_v35, 0 }
 0x84b   :  { %5248 = vmatpush3.bf16.msra.mxu1 %v1611_v36 }
 0x84c   :  { %5259 = vmatprep.subr.bf16.mxu1 %v6120_v16  ;;  %v1654_v37 = vpop.permute.xlu1 %1653 }
 0x84d   :  { %v1659_v46 = vsel %vm681_vm5, %v1654_v37, 0 }
 0x850   :  { %v1702_v40 = vpop.permute.xlu1 %1701 }
 0x851   :  { %v1707_v44 = vsel %vm681_vm5, %v1702_v40, 0 }
 0x853   :  { %v5712_v38 = vpop.eup %5711 }
 0x854   :  { %v1550_v39 = vmul.f32 %v5712_v38, %v5704_v2 }
 0x856   :  { %v5714_v41 = vpop.eup %5713  ;;  %v1554_v42 = vpack.c.bf16 %v1550_v39, %v1550_v39 }
 0x857   :  { %v1549_v43 = vmul.f32 %v5714_v41, %v5706_v7 }
 0x858   :  { %5250 = vmatmul.mubr.msk.bf16.vlgmr.msra.gmra.mxu1 %vm434_vm3, %v1554_v42 }
 0x859   :  { %5260 = vmatpush3.bf16.msra.mxu1 %v1707_v44  ;;  %v1553_v45 = vpack.c.bf16 %v1549_v43, %v1549_v43  ;;  %5261 = vmatprep.mubr.msk.bf16.mxu1 %vm6121_vm1, %v6120_v16 }
 0x85a   :  { %5271 = vmatprep.subr.bf16.mxu1 %v6120_v16 }
 0x85b   :  { %5244 = vmatmul.mubr.msk.bf16.vlgmr.msra.gmra.mxu0 %vm434_vm3, %v1553_v45 }
 0x85c   :  { %5254 = vmatpush3.bf16.msra.mxu0 %v1659_v46  ;;  %5255 = vmatprep.mubr.msk.bf16.mxu0 %vm6121_vm1, %v6120_v16 }
 0x85d   :  { %5265 = vmatprep.subr.bf16.mxu0 %v6120_v16 }
 0x87a   :  { %v1544_v47 = vpop.xlane.xlu0 %1543 }
 0x87b   :  { %5715 = vrcp.f32 %v1544_v47 }
 0x87e   :  { %v1752_v56 = vpop.permute.xlu0 %1751 }
 0x87f   :  { %v1757_v63 = vsel %vm434_vm3, %v1752_v56, 0 }
 0x881   :  { %v1541_v49 = vpop.xlane.xlu1 %1540 }
 0x882   :  { %5717 = vrcp.f32 %v1541_v49  ;;  %v1750_v62 = vpop.permute.xlu0 %1749 }
 0x885   :  { %v1802_v50 = vpop.permute.xlu1 %1801 }
 0x886   :  { %v1807_v57 = vsel %vm434_vm3, %v1802_v50, 0  ;;  %v1852_v1 = vpop.permute.xlu0 %1851 }
 0x887   :  { %v1857_v2 = vsel %vm434_vm3, %v1852_v1, 0 }
 0x888   :  { %v5716_v52 = vpop.eup %5715 }
 0x889   :  { %v1552_v53 = vmul.f32 %v5716_v52, %v5708_v25  ;;  %v1800_v55 = vpop.permute.xlu1 %1799 }
 0x88a   :  { %v1850_v7 = vpop.permute.xlu0 %1849 }
 0x88b   :  { %v1556_v54 = vpack.c.bf16 %v1552_v53, %v1552_v53 }
 0x88d   :  { %5262 = vmatmul.mubr.msk.bf16.vlgmr.msra.gmra.mxu1 %vm434_vm3, %v1556_v54  ;;  %v1902_v60 = vpop.permute.xlu1 %1901 }
 0x88e   :  { %5272 = vmatpush3.bf16.xpose.msra.mxu1 %v1807_v57  ;;  %5273 = vmatprep.mubr.msk.bf16.mxu1 %vm6121_vm1, %v6120_v16  ;;  %v1907_v0 = vsel %vm434_vm3, %v1902_v60, 0 }
 0x88f   :  { %v5718_v58 = vpop.eup %5717  ;;  %5283 = vmatprep.subr.bf16.mxu1 %v6120_v16 }
 0x890   :  { %v1551_v59 = vmul.f32 %v5718_v58, %v5710_v31 }
 0x891   :  { %v1900_v6 = vpop.permute.xlu1 %1899 }
 0x892   :  { %v1555_v61 = vpack.c.bf16 %v1551_v59, %v1551_v59 }
 0x894   :  { %5256 = vmatmul.mubr.msk.bf16.vlgmr.msra.gmra.mxu0 %vm434_vm3, %v1555_v61 }
 0x895   :  { %5266 = vmatpush3.bf16.xpose.msra.mxu0 %v1757_v63  ;;  %5274 = vmatmul.mubr.msk.bf16.vlgmr.msra.gmra.mxu1 %vm434_vm3, %v1800_v55 }
 0x896   :  { %5284 = vmatpush3.bf16.xpose.msra.mxu1 %v1907_v0  ;;  %5267 = vmatprep.mubr.msk.bf16.mxu0 %vm6121_vm1, %v6120_v16 }
 0x897   :  { %5277 = vmatprep.subr.bf16.mxu0 %v6120_v16  ;;  %5285 = vmatprep.mubr.msk.bf16.mxu1 %vm6121_vm1, %v6120_v16 }
 0x898   :  { %5295 = vmatprep.subr.bf16.mxu1 %v6120_v16 }
 0x89c   :  { %5268 = vmatmul.mubr.msk.bf16.vlgmr.msra.gmra.mxu0 %vm434_vm3, %v1750_v62 }
 0x89d   :  { %5278 = vmatpush3.bf16.xpose.msra.mxu0 %v1857_v2  ;;  %5286 = vmatmul.mubr.msk.bf16.vlgmr.msra.gmra.mxu1 %vm434_vm3, %v1900_v6 }
 0x89e   :  { %5279 = vmatprep.mubr.msk.bf16.mxu0 %vm6121_vm1, %v6120_v16  ;;  %5289 = vmatprep.subr.bf16.mxu0 %v6120_v16 }
 0x89f   :  { %5297 = vmatprep.mubr.msk.bf16.mxu1 %vm6121_vm1, %v6120_v16 }
 0x8a4   :  { %5280 = vmatmul.mubr.msk.bf16.vlgmr.msra.gmra.mxu0 %vm434_vm3, %v1850_v7 }
 0x8a5   :  { %5291 = vmatprep.mubr.msk.bf16.mxu0 %vm6121_vm1, %v6120_v16 }
 0x918   :  { %v6632_v8 = vpop.f32.mrf.mxu1 }
 0x91a   :  { %v5251_v9 = vpop.f32.mrf.mxu1 }
 0x91b   :  { %v6634_v10 = vpop.f32.mrf.mxu0 }
 0x91c   :  { %v5602_v11 = vpack.i.bf16 %v6632_v8, %v6634_v10  ;;  %v1650_v17 = vpop.f32.mrf.mxu1 }
 0x91d   :  { %v5245_v22 = vpop.f32.mrf.mxu0 }
 0x91e   :  { %v5252_v23 = vpop.f32.mrf.mxu1 }
 0x91f   :  { %v1602_v25 = vpop.f32.mrf.mxu0 }
 0x921   :  { %v5246_v30 = vpop.f32.mrf.mxu0 }
 0x94d   :  { %v6638_v31 = vpop.f32.mrf.mxu1 }
 0x94f   :  { %v5263_v32 = vpop.f32.mrf.mxu1 }
 0x951   :  { %v1746_v33 = vpop.f32.mrf.mxu1 }
 0x953   :  { %v5264_v34 = vpop.f32.mrf.mxu1 }
 0x954   :  { %v6640_v35 = vpop.f32.mrf.mxu0 }
 0x955   :  { %v5607_v36 = vpack.i.bf16 %v6638_v31, %v6640_v35  ;;  %v1843_v37 = vpop.f32.mrf.mxu1 }
 0x956   :  { %v1844_v38 = vadd.f32 %v1843_v37, %v6390_v51  ;;  %v5257_v39 = vpop.f32.mrf.mxu0 }
 0x957   :  { %v5275_v40 = vpop.f32.mrf.mxu1 }
 0x958   :  { %v1698_v41 = vpop.f32.mrf.mxu0  ;;  %v1952_v42 = vsel %vm434_vm3, %v1844_v38, -inf }
 0x959   :  { %1953 = vmax.xlane.f32.xlu1 %v1952_v42  ;;  %v1846_v43 = vpop.f32.mrf.mxu1 }
 0x95a   :  { %v5258_v44 = vpop.f32.mrf.mxu0 }
 0x95b   :  { %v5276_v45 = vpop.f32.mrf.mxu1 }
 0x95c   :  { %v1793_v46 = vpop.f32.mrf.mxu0 }
 0x95d   :  { %v1794_v47 = vadd.f32 %v1793_v46, %v6390_v51  ;;  %v1943_v49 = vpop.f32.mrf.mxu1 }
 0x95e   :  { %v5269_v50 = vpop.f32.mrf.mxu0  ;;  %v1944_v61 = vadd.f32 %v1943_v49, %v6390_v51 }
 0x95f   :  { %v5287_v52 = vpop.f32.mrf.mxu1  ;;  %v1949_v53 = vsel %vm434_vm3, %v1794_v47, -inf }
 0x960   :  { %1950 = vmax.xlane.f32.xlu0 %v1949_v53  ;;  %v1796_v54 = vpop.f32.mrf.mxu0  ;;  %v1958_v1 = vsel %vm434_vm3, %v1944_v61, -inf }
 0x961   :  { %v1946_v55 = vpop.f32.mrf.mxu1  ;;  %v5656_v54 = vld [vmem:[#allocation8 + $0x8] sm:$0xff]  }
 0x962   :  { %v5270_v56 = vpop.f32.mrf.mxu0 }
 0x963   :  { %v5288_v57 = vpop.f32.mrf.mxu1 }
 0x964   :  { %v1893_v58 = vpop.f32.mrf.mxu0 }
 0x965   :  { %v1894_v59 = vadd.f32 %v1893_v58, %v6390_v51 }
 0x966   :  { %v5281_v60 = vpop.f32.mrf.mxu0 }
 0x967   :  { %v1955_v62 = vsel %vm434_vm3, %v1894_v59, -inf }
 0x968   :  { %1956 = vmax.xlane.f32.xlu0 %v1955_v62  ;;  %v1896_v63 = vpop.f32.mrf.mxu0 }
 0x96a   :  { %1997 = vrot.lane.b32.xlu1 %v6345_v24, %s6132_s18  ;;  %v5282_v0 = vpop.f32.mrf.mxu0 }
 0x96c   :  { %1959 = vmax.xlane.f32.xlu0 %v1958_v1 }
 0x9e2   :  { %v1954_v2 = vpop.xlane.xlu1 %1953 }
 0x9e3   :  { %v1962_v6 = vsub.f32 %v1844_v38, %v1954_v2 }
 0x9e5   :  { %v1967_v7 = vmul.f32 1.442695, %v1962_v6 }
 0x9e6   :  { %v1998_v9 = vpop.permute.xlu1 %1997 }
 0x9e7   :  { %5719 = vpow2.f32 %v1967_v7  ;;  %v2003_v17 = vsel %vm681_vm5, %v1998_v9, 0 }
 0x9e8   :  { %5290 = vmatpush3.bf16.msra.mxu0 %v2003_v17 }
 0x9e9   :  { %v1951_v51 = vpop.xlane.xlu0 %1950  ;;  %5301 = vmatprep.subr.bf16.mxu0 %v6120_v16 }
 0x9ea   :  { %v1961_v22 = vsub.f32 %v1794_v47, %v1951_v51 }
 0x9ec   :  { %v1965_v23 = vmul.f32 1.442695, %v1961_v22 }
 0x9ee   :  { %5721 = vpow2.f32 %v1965_v23 }
 0x9f1   :  { %v1957_v25 = vpop.xlane.xlu0 %1956 }
 0x9f2   :  { %v1963_v24 = vsub.f32 %v1894_v59, %v1957_v25  ;;  %v5657_v59 = vld [vmem:[#allocation8] sm:$0xff]  }
 0x9f4   :  { %v5720_v30 = vpop.eup %5719  ;;  %v1969_v32 = vmul.f32 1.442695, %v1963_v24 }
 0x9f5   :  { %v1976_v33 = vsel %vm434_vm3, %v5720_v30, 0.0  ;;  %v1960_v34 = vpop.xlane.xlu0 %1959 }
 0x9f6   :  { %5723 = vpow2.f32 %v1969_v32  ;;  %1977 = vadd.xlane.f32.xlu0 %v1976_v33  ;;  %v1964_v37 = vsub.f32 %v1944_v61, %v1960_v34 }
 0x9f8   :  { %v1971_v38 = vmul.f32 1.442695, %v1964_v37 }
 0x9fa   :  { %5725 = vpow2.f32 %v1971_v38 }
 0x9fb   :  { %v5722_v39 = vpop.eup %5721 }
 0x9fc   :  { %v1973_v40 = vsel %vm434_vm3, %v5722_v39, 0.0 }
 0x9fd   :  { %1974 = vadd.xlane.f32.xlu1 %v1973_v40 }
 0xa03   :  { %v5724_v41 = vpop.eup %5723 }
 0xa04   :  { %v1979_v42 = vsel %vm434_vm3, %v5724_v41, 0.0 }
 0xa05   :  { %1980 = vadd.xlane.f32.xlu1 %v1979_v42 }
 0xa07   :  { %v5726_v43 = vpop.eup %5725 }
 0xa08   :  { %v1982_v44 = vsel %vm434_vm3, %v5726_v43, 0.0 }
 0xa09   :  { %1983 = vadd.xlane.f32.xlu0 %v1982_v44 }
 0xa16   :  { %2093 = vrot.lane.b32.xlu1 %v6343_v21, %s6132_s18 }
 0xa1a   :  { %2141 = vrot.lane.b32.xlu1 %v6349_v27, %s6132_s18 }
 0xa1e   :  { %5598 = vrot.lane.b32.xlu1 %v5597_v20, %s6114_s6 }
 0xa1f   :  { %2045 = vrot.lane.b32.xlu0 %v6353_v29, %s6132_s18 }
 0xa22   :  { %5608 = vrot.lane.b32.xlu1 %v5607_v36, %s6104_s25 }
 0xa23   :  { %5593 = vrot.lane.b32.xlu0 %v5592_v5, %s6114_s6 }
 0xa27   :  { %5603 = vrot.lane.b32.xlu0 %v5602_v11, %s6104_s25 }
 0xa7f   :  { %v1978_v21 = vpop.xlane.xlu0 %1977 }
 0xa80   :  { %5727 = vrcp.f32 %v1978_v21 }
 0xa86   :  { %v1975_v27 = vpop.xlane.xlu1 %1974 }
 0xa87   :  { %5729 = vrcp.f32 %v1975_v27 }
 0xa8d   :  { %v5728_v13 = vpop.eup %5727 }
 0xa8e   :  { %v1981_v29 = vpop.xlane.xlu1 %1980  ;;  %v1990_v36 = vmul.f32 %v5728_v13, %v5720_v30 }
 0xa8f   :  { %5731 = vrcp.f32 %v1981_v29 }
 0xa90   :  { %v1994_v10 = vpack.c.bf16 %v1990_v36, %v1990_v36 }
 0xa92   :  { %v2094_v18 = vpop.permute.xlu1 %2093  ;;  %v1984_v20 = vpop.xlane.xlu0 %1983 }
 0xa93   :  { %5733 = vrcp.f32 %v1984_v20  ;;  %v2099_v8 = vsel %vm681_vm5, %v2094_v18, 0 }
 0xa94   :  { %v5730_v31 = vpop.eup %5729 }
 0xa95   :  { %v1989_v35 = vmul.f32 %v5730_v31, %v5722_v39 }
 0xa96   :  { %v2046_v3 = vpop.permute.xlu0 %2045  ;;  %v2142_v45 = vpop.permute.xlu1 %2141 }
 0xa97   :  { %v2051_v4 = vsel %vm681_vm5, %v2046_v3, 0  ;;  %v1993_v5 = vpack.c.bf16 %v1989_v35, %v1989_v35  ;;  %v2147_v11 = vsel %vm681_vm5, %v2142_v45, 0 }
 0xa98   :  { %5296 = vmatpush3.bf16.msra.mxu1 %v2051_v4 }
 0xa99   :  { %5292 = vmatmul.mubr.msk.bf16.vlgmr.msra.gmra.mxu0 %vm434_vm3, %v1993_v5  ;;  %5307 = vmatprep.subr.bf16.mxu1 %v6120_v16 }
 0xa9a   :  { %5302 = vmatpush3.bf16.msra.mxu0 %v2099_v8  ;;  %5303 = vmatprep.mubr.msk.bf16.mxu0 %vm6121_vm1, %v6120_v16  ;;  %v5594_v25 = vpop.permute.xlu0 %5593  ;;  %v5599_v37 = vpop.permute.xlu1 %5598 }
 0xa9b   :  { %5298 = vmatmul.mubr.msk.bf16.vlgmr.msra.gmra.mxu1 %vm434_vm3, %v1994_v10  ;;  %5313 = vmatprep.subr.bf16.mxu0 %v5656_v54  ;;  %v5596_v30 = vunpack.i.h.bf16 %v5594_v25  ;;  %v5595_v32 = vunpack.i.l.bf16 %v5594_v25  ;;  %v5601_v18 = vunpack.i.h.bf16 %v5599_v37  ;;  %v5600_v20 = vunpack.i.l.bf16 %v5599_v37 }
 0xa9c   :  { %v5732_v46 = vpop.eup %5731  ;;  %5308 = vmatpush3.bf16.msra.mxu1 %v2147_v11  ;;  %5309 = vmatprep.mubr.msk.bf16.mxu1 %vm6121_vm1, %v6120_v16 }
 0xa9d   :  { %v1991_v47 = vmul.f32 %v5732_v46, %v5724_v41  ;;  %v2238_v39 = vsel %vm434_vm3, %v6470_v19, %v5596_v30  ;;  %v2237_v40 = vsel %vm434_vm3, %v6468_v14, %v5595_v32  ;;  %v2240_v14 = vsel %vm434_vm3, %v6474_v28, %v5601_v18 }
 0xa9e   :  { %v5604_v24 = vpop.permute.xlu0 %5603  ;;  %v5609_v13 = vpop.permute.xlu1 %5608  ;;  %v2239_v36 = vsel %vm434_vm3, %v6472_v26, %v5600_v20  ;;  %v4877_v26 = vld [vmem:[%s7255_s10] ss:$0 sm:$0xff]  ;;  %s7256_s10 = sld [smem:[#allocation38_spill]] }
 0xa9f   :  { %v1995_v50 = vpack.c.bf16 %v1991_v47, %v1991_v47  ;;  %v5606_v33 = vunpack.i.h.bf16 %v5604_v24  ;;  %v5605_v34 = vunpack.i.l.bf16 %v5604_v24  ;;  %v5611_v19 = vunpack.i.h.bf16 %v5609_v13 }
 0xaa0   :  { %v5734_v49 = vpop.eup %5733  ;;  %v5610_v31 = vunpack.i.l.bf16 %v5609_v13 }
 0xaa1   :  { %5304 = vmatmul.mubr.msk.bf16.vlgmr.msra.gmra.mxu0 %vm434_vm3, %v1995_v50  ;;  %v1992_v52 = vmul.f32 %v5734_v49, %v5726_v43  ;;  %v2242_v43 = vsel %vm2241_vm6, %v2237_v40, %v5605_v34  ;;  %v2243_v44 = vsel %vm2241_vm6, %v2238_v39, %v5606_v33  ;;  %v2245_v45 = vsel %vm2241_vm6, %v2240_v14, %v5611_v19 }
 0xaa2   :  { %5314 = vmatpush3.bf16.msra.mxu0 %v5656_v54  ;;  %v2244_v5 = vsel %vm2241_vm6, %v2239_v36, %v5610_v31 }
 0xaa3   :  { %v1996_v53 = vpack.c.bf16 %v1992_v52, %v1992_v52  ;;  %5315 = vmatprep.subr.bf16.mxu0 %v5657_v59  ;;  %v5823_v52 = vld [vmem:[%s7253_s24] sm:$0xff] }
 0xaa5   :  { %5310 = vmatmul.mubr.msk.bf16.vlgmr.msra.gmra.mxu1 %vm434_vm3, %v1996_v53 }
 0xaa6   :  { %5316 = vmatpush3.bf16.msra.mxu0 %v5657_v59  ;;  %v5825_v59 = vld [vmem:[%s7253_s24 + $0x8] sm:$0xff] }
 0xb59   :  { %v2039_v55 = vpop.f32.mrf.mxu0 }
 0xb5b   :  { %v5293_v56 = vpop.f32.mrf.mxu0  ;;  %v2087_v57 = vpop.f32.mrf.mxu1 }
 0xb5c   :  { %v5612_v58 = vpack.i.bf16 %v2087_v57, %v2039_v55 }
 0xb5d   :  { %v2042_v60 = vpop.f32.mrf.mxu0  ;;  %v5299_v61 = vpop.f32.mrf.mxu1 }
 0xb5e   :  { %5613 = vrot.lane.b32.xlu0 %v5612_v58, %s6133_s16 }
 0xb5f   :  { %v5294_v62 = vpop.f32.mrf.mxu0  ;;  %v2090_v63 = vpop.f32.mrf.mxu1 }
 0xb60   :  { %v5826_v63 = vld [vmem:[%s7253_s24 + $0x18] sm:$0xff] }
 0xb61   :  { %v5300_v0 = vpop.f32.mrf.mxu1  ;;  %v2135_v1 = vpop.f32.mrf.mxu0 }
 0xb63   :  { %v5305_v2 = vpop.f32.mrf.mxu0 }
 0xb65   :  { %v2138_v6 = vpop.f32.mrf.mxu0  ;;  %v2183_v7 = vpop.f32.mrf.mxu1 }
 0xb66   :  { %v5617_v9 = vpack.i.bf16 %v2183_v7, %v2135_v1 }
 0xb67   :  { %v5306_v17 = vpop.f32.mrf.mxu0  ;;  %v5311_v51 = vpop.f32.mrf.mxu1 }
 0xb68   :  { %5618 = vrot.lane.b32.xlu1 %v5617_v9, %s6133_s16 }
 0xb69   :  { %v2186_v22 = vpop.f32.mrf.mxu1 }
 0xb6b   :  { %v5312_v23 = vpop.f32.mrf.mxu1 }
 0xbd0   :  { %v5614_v38 = vpop.permute.xlu0 %5613 }
 0xbd1   :  { %v5616_v41 = vunpack.i.h.bf16 %v5614_v38  ;;  %v5615_v42 = vunpack.i.l.bf16 %v5614_v38 }
 0xbd3   :  { %v2247_v21 = vsel %vm2246_vm7, %v2242_v43, %v5615_v42  ;;  %v2248_v27 = vsel %vm2246_vm7, %v2243_v44, %v5616_v41  ;;  %v5658_v43 = vld [vmem:[#allocation11 + $0x8] sm:$0xff]   ;;  %v5659_v44 = vld [vmem:[#allocation11] sm:$0xff]  }
 0xbd4   :  { %v2251_v29 = vpack.c.bf16 %v2248_v27, %v2247_v21  ;;  %5329 = vmatprep.subr.bf16.mxu0 %v5658_v43  ;;  %v5660_v21 = vld [vmem:[#allocation10 + $0x8] sm:$0xff]   ;;  %v5661_v27 = vld [vmem:[#allocation10] sm:$0xff]  }
 0xbd5   :  { %5321 = vmatprep.subr.bf16.mxu1 %v5660_v21 }
 0xbd6   :  { %5317 = vmatprep.mubr.msk.bf16.mxu0 %vm254_vm0, %v2251_v29  ;;  %5322 = vmatpush3.bf16.msra.mxu1 %v5660_v21 }
 0xbd7   :  { %5323 = vmatprep.subr.bf16.mxu1 %v5661_v27 }
 0xbda   :  { %v5619_v35 = vpop.permute.xlu1 %5618  ;;  %5324 = vmatpush3.bf16.msra.mxu1 %v5661_v27 }
 0xbdb   :  { %v5621_v3 = vunpack.i.h.bf16 %v5619_v35  ;;  %v5620_v4 = vunpack.i.l.bf16 %v5619_v35  ;;  %5337 = vmatprep.subr.bf16.mxu1 %v6120_v16 }
 0xbdd   :  { %v2250_v8 = vsel %vm2246_vm7, %v2245_v45, %v5621_v3  ;;  %v2249_v10 = vsel %vm2246_vm7, %v2244_v5, %v5620_v4  ;;  %v6746_v5 = vsub.s32 0, %v6387_v48  ;;  %v2335_v45 = vld [vmem:[%s7256_s10] sm:$0x3] }
 0xbde   :  { %v2252_v11 = vpack.c.bf16 %v2250_v8, %v2249_v10 }
 0xbe0   :  { %5318 = vmatmul.mubr.msk.bf16.vlgmr.msra.gmra.mxu0 %vm254_vm0, %v2252_v11  ;;  %v2392_v11 = vrot.slane %v2335_v45, %v6746_v5 }
 0xbe1   :  { %5333 = vmatprep.mubr.msk.bf16.mxu0 %vm254_vm0, %v6326_v12  ;;  %v5824_v12 = vld [vmem:[%s7253_s24 + $0x10] sm:$0xff]  ;;  %5330 = vmatpush3.bf16.msra.mxu0 %v5658_v43 }
 0xbe2   :  { %5331 = vmatprep.subr.bf16.mxu0 %v5659_v44 }
 0xbe5   :  { %5332 = vmatpush3.bf16.msra.mxu0 %v5659_v44 }
 0xbe6   :  { %5343 = vmatprep.subr.bf16.mxu0 %v6120_v16 }
 0xbe8   :  { %5334 = vmatmul.mubr.msk.bf16.vlgmr.msra.gmra.mxu0 %vm254_vm0, %v6330_v15 }
 0xbe9   :  { %5345 = vmatprep.mubr.msk.bf16.mxu0 %vm6121_vm1, %v6120_v16 }
 0xca0   :  { %v5319_v28 = vpop.f32.mrf.mxu0 }
 0xca1   :  { %v2325_v47 = vadd.f32 %v5319_v28, %v4877_v26  ;;  %v6753_v28 = vsub.s32 1, %v6387_v48 }
 0xca2   :  { %v2316_v46 = vpop.f32.mrf.mxu0 }
 0xca3   :  { %v2317_v49 = vadd.f32 %v4877_v26, %v2316_v46  ;;  %v2333_v58 = vadd.f32 %v5824_v12, %v2325_v47 }
 0xca4   :  { %v5320_v50 = vpop.f32.mrf.mxu0 }
 0xca5   :  { %v2331_v53 = vadd.f32 %v5823_v52, %v2317_v49  ;;  %v2328_v55 = vadd.f32 %v5320_v50, %v4877_v26  ;;  %v2342_v62 = vsel %vm254_vm0, %v2333_v58, 0.0  ;;  %v2400_v52 = vrot.slane %v2335_v45, %v6753_v28 }
 0xca6   :  { %v2319_v54 = vpop.f32.mrf.mxu0 }
 0xca7   :  { %v2320_v56 = vadd.f32 %v4877_v26, %v2319_v54  ;;  %v2336_v57 = vsel %vm254_vm0, %v2331_v53, 0.0  ;;  %v2334_v0 = vadd.f32 %v5826_v63, %v2328_v55 }
 0xca8   :  { %2337 = vadd.xlane.f32.xlu0 %v2336_v57  ;;  %v5335_v63 = vpop.f32.mrf.mxu0 }
 0xca9   :  { %v2332_v60 = vadd.f32 %v5825_v59, %v2320_v56  ;;  %v2345_v1 = vsel %vm254_vm0, %v2334_v0, 0.0 }
 0xcab   :  { %v2339_v61 = vsel %vm254_vm0, %v2332_v60, 0.0 }
 0xcac   :  { %2340 = vadd.xlane.f32.xlu1 %v2339_v61  ;;  %2343 = vadd.xlane.f32.xlu0 %v2342_v62  ;;  %v4887_v62 = vld [vmem:[%s7227_s11] ss:$0 sm:$0xff] }
 0xcb0   :  { %2346 = vadd.xlane.f32.xlu0 %v2345_v1  ;;  %v2542_v1 = vpop.f32.mrf.mxu0 }
 0xd31   :  { %v2338_v2 = vpop.xlane.xlu0 %2337 }
 0xd32   :  { %v2349_v6 = vmul.f32 0.03125, %v2338_v2  ;;  %v2543_v2 = vadd.f32 %v4887_v62, %v2542_v1 }
 0xd34   :  { %v2353_v7 = vsub.f32 %v2331_v53, %v2349_v6  ;;  %v5336_v6 = vpop.f32.mrf.mxu0 }
 0xd35   :  { %v2341_v9 = vpop.xlane.xlu1 %2340  ;;  %v2344_v17 = vpop.xlane.xlu0 %2343 }
 0xd36   :  { %v2350_v51 = vmul.f32 0.03125, %v2341_v9  ;;  %v2351_v22 = vmul.f32 0.03125, %v2344_v17  ;;  %v2357_v23 = vmul.f32 %v2353_v7, %v2353_v7  ;;  %v2554_v9 = vadd.f32 %v5336_v6, %v4887_v62  ;;  %v2545_v17 = vpop.f32.mrf.mxu0 }
 0xd38   :  { %v2354_v25 = vsub.f32 %v2332_v60, %v2350_v51  ;;  %v2355_v24 = vsub.f32 %v2333_v58, %v2351_v22  ;;  %v2361_v30 = vsel %vm254_vm0, %v2357_v23, 0.0  ;;  %v2546_v51 = vadd.f32 %v4887_v62, %v2545_v17 }
 0xd39   :  { %2362 = vadd.xlane.f32.xlu1 %v2361_v30  ;;  %v2347_v32 = vpop.xlane.xlu0 %2346  ;;  %v4882_v30 = vld [vmem:[%s7225_s9] ss:$0 sm:$0xff] }
 0xd3a   :  { %v2352_v33 = vmul.f32 0.03125, %v2347_v32  ;;  %v2358_v34 = vmul.f32 %v2354_v25, %v2354_v25  ;;  %v2359_v37 = vmul.f32 %v2355_v24, %v2355_v24  ;;  %v6767_v23 = vpack.c.bf16 %v2546_v51, %v2546_v51 }
 0xd3c   :  { %v2356_v38 = vsub.f32 %v2334_v0, %v2352_v33  ;;  %v2364_v39 = vsel %vm254_vm0, %v2358_v34, 0.0  ;;  %v2367_v40 = vsel %vm254_vm0, %v2359_v37, 0.0  ;;  %v2551_v0 = vadd.f32 %v5335_v63, %v4887_v62 }
 0xd3d   :  { %2365 = vadd.xlane.f32.xlu0 %v2364_v39  ;;  %2368 = vadd.xlane.f32.xlu1 %v2367_v40  ;;  %v6780_v40 = vpack.c.bf16 %v2554_v9, %v2554_v9 }
 0xd3e   :  { %v2360_v41 = vmul.f32 %v2356_v38, %v2356_v38  ;;  %v6776_v33 = vpack.c.bf16 %v2551_v0, %v2551_v0 }
 0xd3f   :  { %v2707_v21 = vsel %vm434_vm3, %v6780_v40, 0 }
 0xd40   :  { %v2370_v42 = vsel %vm254_vm0, %v2360_v41, 0.0 }
 0xd41   :  { %2371 = vadd.xlane.f32.xlu0 %v2370_v42  ;;  %v2661_v42 = vsel %vm434_vm3, %v6776_v33, 0 }
 0xdc2   :  { %v2363_v29 = vpop.xlane.xlu1 %2362 }
 0xdc3   :  { %v2373_v13 = vmul.f32 0.03125, %v2363_v29 }
 0xdc5   :  { %v2377_v18 = vadd.f32 1e-12, %v2373_v13 }
 0xdc6   :  { %v2369_v20 = vpop.xlane.xlu1 %2368  ;;  %v2366_v19 = vpop.xlane.xlu0 %2365 }
 0xdc7   :  { %5735 = vrsqrt.f32 %v2377_v18  ;;  %v2375_v31 = vmul.f32 0.03125, %v2369_v20  ;;  %v2374_v35 = vmul.f32 0.03125, %v2366_v19  ;;  %v6810_v18 = vld [vmem:[#allocation5] ss:$0 sm:$0xff] }
 0xdc9   :  { %v2379_v15 = vadd.f32 1e-12, %v2375_v31  ;;  %v2378_v14 = vadd.f32 1e-12, %v2374_v35  ;;  %v6813_v35 = vld [vmem:[#allocation5 + $0x1] ss:$0 sm:$0xff] }
 0xdca   :  { %v2372_v36 = vpop.xlane.xlu0 %2371 }
 0xdcb   :  { %5737 = vrsqrt.f32 %v2379_v15  ;;  %v2376_v3 = vmul.f32 0.03125, %v2372_v36 }
 0xdcc   :  { %5739 = vrsqrt.f32 %v2378_v14 }
 0xdcd   :  { %v2380_v4 = vadd.f32 1e-12, %v2376_v3 }
 0xdcf   :  { %5741 = vrsqrt.f32 %v2380_v4 }
 0xdd4   :  { %v5736_v8 = vpop.eup %5735 }
 0xdd5   :  { %v2385_v10 = vmul.f32 %v5736_v8, %v2353_v7  ;;  %v6763_v7 = vpack.c.bf16 %v2543_v2, %v2543_v2  ;;  %v6817_v8 = vld [vmem:[#allocation5 + $0x2] ss:$0 sm:$0xff] }
 0xdd7   :  { %v2393_v50 = vmul.f32 %v2392_v11, %v2385_v10  ;;  %v2569_v22 = vsel %vm434_vm3, %v6763_v7, 0 }
 0xdd8   :  { %v5738_v26 = vpop.eup %5737 }
 0xdd9   :  { %v5740_v46 = vpop.eup %5739  ;;  %v2387_v47 = vmul.f32 %v5738_v26, %v2355_v24  ;;  %v2401_v57 = vadd.f32 %v2400_v52, %v2393_v50  ;;  %v6821_v50 = vld [vmem:[#allocation5 + $0x3] ss:$0 sm:$0xff] }
 0xdda   :  { %v2386_v49 = vmul.f32 %v5740_v46, %v2354_v25  ;;  %v2615_v25 = vsel %vm434_vm3, %v6767_v23, 0 }
 0xddb   :  { %v2395_v56 = vmul.f32 %v2392_v11, %v2387_v47  ;;  %5344 = vmatpush3.bf16.xpose.msra.mxu0 %v2615_v25 }
 0xddc   :  { %v5742_v53 = vpop.eup %5741  ;;  %v2394_v54 = vmul.f32 %v2392_v11, %v2386_v49  ;;  %5355 = vmatprep.subr.bf16.mxu0 %v6120_v16 }
 0xddd   :  { %v2388_v55 = vmul.f32 %v5742_v53, %v2356_v38  ;;  %v2403_v60 = vadd.f32 %v2400_v52, %v2395_v56 }
 0xdde   :  { %v2402_v12 = vadd.f32 %v2400_v52, %v2394_v54 }
 0xddf   :  { %v2396_v58 = vmul.f32 %v2392_v11, %v2388_v55 }
 0xde0   :  { %v2405_v59 = vpack.c.bf16 %v2402_v12, %v2401_v57 }
 0xde1   :  { %v2404_v61 = vadd.f32 %v2400_v52, %v2396_v58 }
 0xde2   :  { %5325 = vmatprep.mubr.msk.bf16.mxu1 %vm254_vm0, %v2405_v59 }
 0xde3   :  { %v2406_v48 = vpack.c.bf16 %v2404_v61, %v2403_v60 }
 0xde5   :  { %5326 = vmatmul.mubr.msk.bf16.vlgmr.msra.gmra.mxu1 %vm254_vm0, %v2406_v48 }
 0xde6   :  { %5339 = vmatprep.mubr.msk.bf16.mxu1 %vm6121_vm1, %v6120_v16  ;;  %5338 = vmatpush3.bf16.xpose.msra.mxu1 %v2569_v22 }
 0xde7   :  { %5349 = vmatprep.subr.bf16.mxu1 %v6120_v16 }
 0xea5   :  { %v5327_v24 = vpop.f32.mrf.mxu1 }
 0xea6   :  { %v2479_v43 = vadd.f32 %v5327_v24, %v4882_v30 }
 0xea7   :  { %v2470_v32 = vpop.f32.mrf.mxu1 }
 0xea8   :  { %v2471_v34 = vadd.f32 %v4882_v30, %v2470_v32  ;;  %v6797_v27 = vpack.c.bf16 %v2479_v43, %v2479_v43 }
 0xea9   :  { %v5328_v37 = vpop.f32.mrf.mxu1 }
 0xeaa   :  { %v6778_v38 = vpack.c.bf16 %v2471_v34, %v2471_v34  ;;  %v2482_v29 = vadd.f32 %v5328_v37, %v4882_v30 }
 0xeab   :  { %v2473_v39 = vpop.f32.mrf.mxu1 }
 0xeac   :  { %v2474_v41 = vadd.f32 %v4882_v30, %v2473_v39  ;;  %5340 = vmatmul.mubr.msk.bf16.vlgmr.msra.gmra.mxu1 %vm434_vm3, %v6778_v38  ;;  %v6804_v13 = vpack.c.bf16 %v2482_v29, %v2482_v29 }
 0xead   :  { %5350 = vmatpush3.bf16.xpose.msra.mxu1 %v2661_v42  ;;  %5351 = vmatprep.mubr.msk.bf16.mxu1 %vm6121_vm1, %v6120_v16 }
 0xeae   :  { %v6788_v44 = vpack.c.bf16 %v2474_v41, %v2474_v41  ;;  %5361 = vmatprep.subr.bf16.mxu1 %v6120_v16 }
 0xeb0   :  { %5346 = vmatmul.mubr.msk.bf16.vlgmr.msra.gmra.mxu0 %vm434_vm3, %v6788_v44 }
 0xeb1   :  { %5356 = vmatpush3.bf16.xpose.msra.mxu0 %v2707_v21  ;;  %5357 = vmatprep.mubr.msk.bf16.mxu0 %vm6121_vm1, %v6120_v16 }
 0xeb2   :  { %5367 = vmatprep.subr.bf16.mxu0 %v6120_v16 }
 0xeb4   :  { %5352 = vmatmul.mubr.msk.bf16.vlgmr.msra.gmra.mxu1 %vm434_vm3, %v6797_v27 }
 0xeb5   :  { %5363 = vmatprep.mubr.msk.bf16.mxu1 %vm6121_vm1, %v6120_v16 }
 0xeb8   :  { %5358 = vmatmul.mubr.msk.bf16.vlgmr.msra.gmra.mxu0 %vm434_vm3, %v6804_v13 }
 0xeb9   :  { %5369 = vmatprep.mubr.msk.bf16.mxu0 %vm6121_vm1, %v6120_v16 }
 0xf6c   :  { %v2605_v20 = vpop.f32.mrf.mxu1 }
 0xf6d   :  { %v2606_v19 = vadd.f32 %v6810_v18, %v2605_v20 }
 0xf6e   :  { %v5341_v31 = vpop.f32.mrf.mxu1 }
 0xf6f   :  { %v2749_v15 = vsel %vm434_vm3, %v2606_v19, -inf }
 0xf70   :  { %v2651_v14 = vpop.f32.mrf.mxu0  ;;  %2750 = vmax.xlane.f32.xlu1 %v2749_v15  ;;  %v2608_v36 = vpop.f32.mrf.mxu1 }
 0xf71   :  { %v2652_v3 = vadd.f32 %v6813_v35, %v2651_v14 }
 0xf72   :  { %v5342_v4 = vpop.f32.mrf.mxu1  ;;  %v5347_v45 = vpop.f32.mrf.mxu0 }
 0xf73   :  { %v2752_v10 = vsel %vm434_vm3, %v2652_v3, -inf }
 0xf74   :  { %2753 = vmax.xlane.f32.xlu0 %v2752_v10  ;;  %v2654_v11 = vpop.f32.mrf.mxu0  ;;  %v2697_v26 = vpop.f32.mrf.mxu1 }
 0xf75   :  { %v2698_v46 = vadd.f32 %v6817_v8, %v2697_v26 }
 0xf76   :  { %v5348_v47 = vpop.f32.mrf.mxu0  ;;  %v5353_v49 = vpop.f32.mrf.mxu1 }
 0xf77   :  { %v2755_v52 = vsel %vm434_vm3, %v2698_v46, -inf }
 0xf78   :  { %v2743_v53 = vpop.f32.mrf.mxu0  ;;  %2756 = vmax.xlane.f32.xlu1 %v2755_v52  ;;  %v2700_v54 = vpop.f32.mrf.mxu1 }
 0xf79   :  { %v2744_v55 = vadd.f32 %v6821_v50, %v2743_v53 }
 0xf7a   :  { %v5354_v56 = vpop.f32.mrf.mxu1  ;;  %v5359_v57 = vpop.f32.mrf.mxu0 }
 0xf7b   :  { %v2758_v12 = vsel %vm434_vm3, %v2744_v55, -inf }
 0xf7c   :  { %2759 = vmax.xlane.f32.xlu0 %v2758_v12  ;;  %v2746_v58 = vpop.f32.mrf.mxu0 }
 0xf7e   :  { %v5360_v59 = vpop.f32.mrf.mxu0 }
 0xf89   :  { %2798 = vrot.lane.b32.xlu1 %v6763_v7, %s6122_s26 }
 0xff9   :  { %v2751_v60 = vpop.xlane.xlu1 %2750 }
 0xffa   :  { %v2761_v61 = vsub.f32 %v2606_v19, %v2751_v60 }
 0xffc   :  { %v2765_v48 = vmul.f32 1.442695, %v2761_v61 }
 0xffd   :  { %v2754_v62 = vpop.xlane.xlu0 %2753 }
 0xffe   :  { %5743 = vpow2.f32 %v2765_v48  ;;  %v2762_v63 = vsub.f32 %v2652_v3, %v2754_v62 }
0x1000   :  { %v2767_v0 = vmul.f32 1.442695, %v2762_v63 }
0x1001   :  { %v2757_v1 = vpop.xlane.xlu1 %2756 }
0x1002   :  { %5745 = vpow2.f32 %v2767_v0  ;;  %v2763_v24 = vsub.f32 %v2698_v46, %v2757_v1 }
0x1004   :  { %v2769_v32 = vmul.f32 1.442695, %v2763_v24 }
0x1005   :  { %v2799_v2 = vpop.permute.xlu1 %2798  ;;  %v2760_v25 = vpop.xlane.xlu0 %2759 }
0x1006   :  { %v2804_v6 = vsel %vm681_vm5, %v2799_v2, 0  ;;  %v2764_v30 = vsub.f32 %v2744_v55, %v2760_v25  ;;  %5747 = vpow2.f32 %v2769_v32 }
0x1007   :  { %5362 = vmatpush3.bf16.msra.mxu1 %v2804_v6 }
0x1008   :  { %5373 = vmatprep.subr.bf16.mxu1 %v6120_v16  ;;  %v2771_v34 = vmul.f32 1.442695, %v2764_v30 }
0x100a   :  { %5749 = vpow2.f32 %v2771_v34 }
0x100b   :  { %v5744_v9 = vpop.eup %5743 }
0x100c   :  { %v2773_v17 = vsel %vm434_vm3, %v5744_v9, 0.0 }
0x100d   :  { %2774 = vadd.xlane.f32.xlu1 %v2773_v17 }
0x100f   :  { %v5746_v51 = vpop.eup %5745 }
0x1010   :  { %v2776_v22 = vsel %vm434_vm3, %v5746_v51, 0.0 }
0x1011   :  { %2777 = vadd.xlane.f32.xlu0 %v2776_v22 }
0x1013   :  { %v5748_v37 = vpop.eup %5747 }
0x1014   :  { %v2779_v42 = vsel %vm434_vm3, %v5748_v37, 0.0 }
0x1017   :  { %v5750_v39 = vpop.eup %5749 }
0x1018   :  { %v2782_v41 = vsel %vm434_vm3, %v5750_v39, 0.0 }
0x101e   :  { %2896 = vrot.lane.b32.xlu1 %v6776_v33, %s6122_s26 }
0x1022   :  { %2945 = vrot.lane.b32.xlu1 %v6780_v40, %s6122_s26 }
0x1027   :  { %2847 = vrot.lane.b32.xlu0 %v6767_v23, %s6122_s26 }
0x1046   :  { %2783 = vadd.xlane.f32.xlu0 %v2782_v41  ;;  %2780 = vadd.xlane.f32.xlu1 %v2779_v42 }
0x1057   :  { %3047 = vrot.lane.b32.xlu1 %v6767_v23, %s6125_s3 }
0x105b   :  { %3045 = vrot.lane.b32.xlu1 %v6788_v44, %s6125_s3 }
0x105c   :  { %2996 = vrot.lane.b32.xlu0 %v6763_v7, %s6125_s3 }
0x105f   :  { %3149 = vrot.lane.b32.xlu1 %v6780_v40, %s6125_s3 }
0x1060   :  { %2994 = vrot.lane.b32.xlu0 %v6778_v38, %s6125_s3 }
0x1063   :  { %3147 = vrot.lane.b32.xlu1 %v6804_v13, %s6125_s3 }
0x1064   :  { %3098 = vrot.lane.b32.xlu0 %v6776_v33, %s6125_s3 }
0x1068   :  { %3096 = vrot.lane.b32.xlu0 %v6797_v27, %s6125_s3 }
0x1096   :  { %v2775_v43 = vpop.xlane.xlu1 %2774 }
0x1097   :  { %5751 = vrcp.f32 %v2775_v43 }
0x109a   :  { %v2778_v21 = vpop.xlane.xlu0 %2777  ;;  %v2897_v31 = vpop.permute.xlu1 %2896 }
0x109b   :  { %5753 = vrcp.f32 %v2778_v21  ;;  %v2902_v3 = vsel %vm681_vm5, %v2897_v31, 0 }
0x109e   :  { %v2848_v29 = vpop.permute.xlu0 %2847  ;;  %v2946_v45 = vpop.permute.xlu1 %2945 }
0x109f   :  { %v2853_v20 = vsel %vm681_vm5, %v2848_v29, 0  ;;  %v2951_v11 = vsel %vm681_vm5, %v2946_v45, 0 }
0x10a0   :  { %5368 = vmatpush3.bf16.msra.mxu0 %v2853_v20 }
0x10a1   :  { %5379 = vmatprep.subr.bf16.mxu0 %v6120_v16 }
0x10a4   :  { %v5752_v19 = vpop.eup %5751 }
0x10a5   :  { %v2789_v15 = vmul.f32 %v5752_v19, %v5744_v9 }
0x10a7   :  { %v2793_v14 = vpack.c.bf16 %v2789_v15, %v2789_v15 }
0x10a8   :  { %v5754_v36 = vpop.eup %5753 }
0x10a9   :  { %5364 = vmatmul.mubr.msk.bf16.vlgmr.msra.gmra.mxu1 %vm434_vm3, %v2793_v14  ;;  %v2790_v4 = vmul.f32 %v5754_v36, %v5746_v51 }
0x10aa   :  { %5374 = vmatpush3.bf16.msra.mxu1 %v2902_v3  ;;  %5375 = vmatprep.mubr.msk.bf16.mxu1 %vm6121_vm1, %v6120_v16 }
0x10ab   :  { %v2794_v10 = vpack.c.bf16 %v2790_v4, %v2790_v4  ;;  %5385 = vmatprep.subr.bf16.mxu1 %v6120_v16 }
0x10ad   :  { %5370 = vmatmul.mubr.msk.bf16.vlgmr.msra.gmra.mxu0 %vm434_vm3, %v2794_v10 }
0x10ae   :  { %5380 = vmatpush3.bf16.msra.mxu0 %v2951_v11  ;;  %5381 = vmatprep.mubr.msk.bf16.mxu0 %vm6121_vm1, %v6120_v16 }
0x10af   :  { %5391 = vmatprep.subr.bf16.mxu0 %v6120_v16 }
0x10cf   :  { %v2784_v26 = vpop.xlane.xlu0 %2783  ;;  %v2781_v46 = vpop.xlane.xlu1 %2780 }
0x10d0   :  { %5755 = vrcp.f32 %v2784_v26 }
0x10d1   :  { %5757 = vrcp.f32 %v2781_v46 }
0x10d3   :  { %v3048_v47 = vpop.permute.xlu1 %3047  ;;  %v2997_v49 = vpop.permute.xlu0 %2996 }
0x10d4   :  { %v3053_v58 = vsel %vm434_vm3, %v3048_v47, 0  ;;  %v3002_v60 = vsel %vm434_vm3, %v2997_v49, 0 }
0x10d7   :  { %v3046_v57 = vpop.permute.xlu1 %3045  ;;  %v2995_v59 = vpop.permute.xlu0 %2994 }
0x10db   :  { %v3150_v61 = vpop.permute.xlu1 %3149  ;;  %v3099_v48 = vpop.permute.xlu0 %3098 }
0x10dc   :  { %v3155_v62 = vsel %vm434_vm3, %v3150_v61, 0  ;;  %v3104_v63 = vsel %vm434_vm3, %v3099_v48, 0 }
0x10dd   :  { %v5756_v52 = vpop.eup %5755 }
0x10de   :  { %v5758_v53 = vpop.eup %5757  ;;  %v2792_v54 = vmul.f32 %v5756_v52, %v5750_v39 }
0x10df   :  { %v2791_v55 = vmul.f32 %v5758_v53, %v5748_v37  ;;  %v3148_v0 = vpop.permute.xlu1 %3147  ;;  %v3097_v1 = vpop.permute.xlu0 %3096 }
0x10e0   :  { %v2796_v56 = vpack.c.bf16 %v2792_v54, %v2792_v54 }
0x10e1   :  { %v2795_v12 = vpack.c.bf16 %v2791_v55, %v2791_v55 }
0x10e2   :  { %5382 = vmatmul.mubr.msk.bf16.vlgmr.msra.gmra.mxu0 %vm434_vm3, %v2796_v56 }
0x10e3   :  { %5376 = vmatmul.mubr.msk.bf16.vlgmr.msra.gmra.mxu1 %vm434_vm3, %v2795_v12  ;;  %5392 = vmatpush3.bf16.xpose.msra.mxu0 %v3053_v58 }
0x10e4   :  { %5386 = vmatpush3.bf16.xpose.msra.mxu1 %v3002_v60  ;;  %5387 = vmatprep.mubr.msk.bf16.mxu1 %vm6121_vm1, %v6120_v16 }
0x10e5   :  { %5393 = vmatprep.mubr.msk.bf16.mxu0 %vm6121_vm1, %v6120_v16  ;;  %5397 = vmatprep.subr.bf16.mxu1 %v6120_v16 }
0x10e6   :  { %5403 = vmatprep.subr.bf16.mxu0 %v6120_v16 }
0x10ea   :  { %5394 = vmatmul.mubr.msk.bf16.vlgmr.msra.gmra.mxu0 %vm434_vm3, %v3046_v57 }
0x10eb   :  { %5388 = vmatmul.mubr.msk.bf16.vlgmr.msra.gmra.mxu1 %vm434_vm3, %v2995_v59  ;;  %5404 = vmatpush3.bf16.xpose.msra.mxu0 %v3155_v62 }
0x10ec   :  { %5398 = vmatpush3.bf16.xpose.msra.mxu1 %v3104_v63  ;;  %5399 = vmatprep.mubr.msk.bf16.mxu1 %vm6121_vm1, %v6120_v16 }
0x10ed   :  { %5405 = vmatprep.mubr.msk.bf16.mxu0 %vm6121_vm1, %v6120_v16  ;;  %5409 = vmatprep.subr.bf16.mxu1 %v6120_v16 }
0x10ee   :  { %5415 = vmatprep.subr.bf16.mxu0 %v6120_v16 }
0x10f2   :  { %5406 = vmatmul.mubr.msk.bf16.vlgmr.msra.gmra.mxu0 %vm434_vm3, %v3148_v0 }
0x10f3   :  { %5400 = vmatmul.mubr.msk.bf16.vlgmr.msra.gmra.mxu1 %vm434_vm3, %v3097_v1  ;;  %5417 = vmatprep.mubr.msk.bf16.mxu0 %vm6121_vm1, %v6120_v16 }
0x10f4   :  { %5411 = vmatprep.mubr.msk.bf16.mxu1 %vm6121_vm1, %v6120_v16 }
0x1169   :  { %v6894_v2 = vpop.f32.mrf.mxu1 }
0x116b   :  { %v5365_v6 = vpop.f32.mrf.mxu1 }
0x116d   :  { %v2843_v9 = vpop.f32.mrf.mxu1  ;;  %v6896_v17 = vpop.f32.mrf.mxu0 }
0x116f   :  { %v5366_v51 = vpop.f32.mrf.mxu1  ;;  %v5371_v22 = vpop.f32.mrf.mxu0 }
0x1171   :  { %v2892_v25 = vpop.f32.mrf.mxu0 }
0x1173   :  { %v5372_v24 = vpop.f32.mrf.mxu0 }
0x11a2   :  { %v6898_v30 = vpop.f32.mrf.mxu0 }
0x11a3   :  { %v6900_v32 = vpop.f32.mrf.mxu1 }
0x11a4   :  { %v5383_v34 = vpop.f32.mrf.mxu0 }
0x11a5   :  { %v5377_v37 = vpop.f32.mrf.mxu1 }
0x11a6   :  { %v2990_v39 = vpop.f32.mrf.mxu0 }
0x11a7   :  { %v2941_v41 = vpop.f32.mrf.mxu1 }
0x11a8   :  { %v5384_v42 = vpop.f32.mrf.mxu0 }
0x11a9   :  { %v5378_v43 = vpop.f32.mrf.mxu1 }
0x11aa   :  { %v3089_v21 = vpop.f32.mrf.mxu0 }
0x11ab   :  { %v3038_v29 = vpop.f32.mrf.mxu1  ;;  %v3090_v20 = vadd.f32 %v6813_v35, %v3089_v21 }
0x11ac   :  { %v3039_v19 = vadd.f32 %v6810_v18, %v3038_v29  ;;  %v5395_v31 = vpop.f32.mrf.mxu0 }
0x11ad   :  { %v5389_v15 = vpop.f32.mrf.mxu1  ;;  %v3200_v14 = vsel %vm434_vm3, %v3090_v20, -inf }
0x11ae   :  { %3201 = vmax.xlane.f32.xlu1 %v3200_v14  ;;  %v3092_v36 = vpop.f32.mrf.mxu0  ;;  %v3197_v3 = vsel %vm434_vm3, %v3039_v19, -inf }
0x11af   :  { %3198 = vmax.xlane.f32.xlu0 %v3197_v3  ;;  %v3041_v4 = vpop.f32.mrf.mxu1 }
0x11b0   :  { %v5396_v45 = vpop.f32.mrf.mxu0 }
0x11b1   :  { %v5390_v10 = vpop.f32.mrf.mxu1 }
0x11b2   :  { %v3191_v11 = vpop.f32.mrf.mxu0 }
0x11b3   :  { %v3140_v26 = vpop.f32.mrf.mxu1  ;;  %v3192_v52 = vadd.f32 %v6821_v50, %v3191_v11 }
0x11b4   :  { %v3141_v46 = vadd.f32 %v6817_v8, %v3140_v26  ;;  %v5407_v47 = vpop.f32.mrf.mxu0 }
0x11b5   :  { %v5401_v49 = vpop.f32.mrf.mxu1  ;;  %v3206_v12 = vsel %vm434_vm3, %v3192_v52, -inf }
0x11b6   :  { %v3194_v53 = vpop.f32.mrf.mxu0  ;;  %v3203_v54 = vsel %vm434_vm3, %v3141_v46, -inf }
0x11b7   :  { %3204 = vmax.xlane.f32.xlu0 %v3203_v54  ;;  %v3143_v55 = vpop.f32.mrf.mxu1 }
0x11b8   :  { %v5408_v56 = vpop.f32.mrf.mxu0 }
0x11b9   :  { %v5402_v57 = vpop.f32.mrf.mxu1 }
0x11bb   :  { %3207 = vmax.xlane.f32.xlu0 %v3206_v12 }
0x11bf   :  { %3245 = vrot.lane.b32.xlu1 %v6763_v7, %s6124_s2 }
0x1237   :  { %v3202_v58 = vpop.xlane.xlu1 %3201 }
0x1238   :  { %v3210_v59 = vsub.f32 %v3090_v20, %v3202_v58  ;;  %v3199_v60 = vpop.xlane.xlu0 %3198 }
0x1239   :  { %v3209_v61 = vsub.f32 %v3039_v19, %v3199_v60 }
0x123a   :  { %v3215_v48 = vmul.f32 1.442695, %v3210_v59 }
0x123b   :  { %v3213_v62 = vmul.f32 1.442695, %v3209_v61  ;;  %v3246_v63 = vpop.permute.xlu1 %3245 }
0x123c   :  { %5759 = vpow2.f32 %v3215_v48  ;;  %v3251_v0 = vsel %vm681_vm5, %v3246_v63, 0 }
0x123d   :  { %5761 = vpow2.f32 %v3213_v62  ;;  %5410 = vmatpush3.bf16.msra.mxu1 %v3251_v0 }
0x123e   :  { %5421 = vmatprep.subr.bf16.mxu1 %v6120_v16 }
0x1240   :  { %v3205_v22 = vpop.xlane.xlu0 %3204 }
0x1241   :  { %v3211_v37 = vsub.f32 %v3141_v46, %v3205_v22 }
0x1243   :  { %v3217_v39 = vmul.f32 1.442695, %v3211_v37 }
0x1244   :  { %v3208_v25 = vpop.xlane.xlu0 %3207 }
0x1245   :  { %v3212_v24 = vsub.f32 %v3192_v52, %v3208_v25 }
0x1247   :  { %v3219_v34 = vmul.f32 1.442695, %v3212_v24 }
0x1249   :  { %v5760_v1 = vpop.eup %5759  ;;  %5763 = vpow2.f32 %v3219_v34 }
0x124a   :  { %v5762_v6 = vpop.eup %5761  ;;  %v3224_v9 = vsel %vm434_vm3, %v5760_v1, 0.0  ;;  %5765 = vpow2.f32 %v3217_v39 }
0x124b   :  { %v3221_v51 = vsel %vm434_vm3, %v5762_v6, 0.0  ;;  %3225 = vadd.xlane.f32.xlu0 %v3224_v9 }
0x124c   :  { %3222 = vadd.xlane.f32.xlu1 %v3221_v51 }
0x1256   :  { %v5764_v41 = vpop.eup %5763 }
0x1257   :  { %v3230_v42 = vsel %vm434_vm3, %v5764_v41, 0.0  ;;  %v5766_v43 = vpop.eup %5765 }
0x1258   :  { %v3227_v21 = vsel %vm434_vm3, %v5766_v43, 0.0 }
0x125d   :  { %3341 = vrot.lane.b32.xlu1 %v6776_v33, %s6124_s2 }
0x1261   :  { %3389 = vrot.lane.b32.xlu1 %v6780_v40, %s6124_s2  ;;  %3293 = vrot.lane.b32.xlu0 %v6767_v23, %s6124_s2 }
0x1280   :  { %3231 = vadd.xlane.f32.xlu0 %v3230_v42 }
0x1285   :  { %3228 = vadd.xlane.f32.xlu1 %v3227_v21 }
0x1296   :  { %3489 = vrot.lane.b32.xlu1 %v6767_v23, %s6128_s29  ;;  %3439 = vrot.lane.b32.xlu0 %v6763_v7, %s6128_s29 }
0x129a   :  { %3487 = vrot.lane.b32.xlu1 %v6788_v44, %s6128_s29  ;;  %3437 = vrot.lane.b32.xlu0 %v6778_v38, %s6128_s29 }
0x129e   :  { %3589 = vrot.lane.b32.xlu1 %v6780_v40, %s6128_s29  ;;  %3539 = vrot.lane.b32.xlu0 %v6776_v33, %s6128_s29 }
0x12a2   :  { %3587 = vrot.lane.b32.xlu1 %v6804_v13, %s6128_s29  ;;  %3537 = vrot.lane.b32.xlu0 %v6797_v27, %s6128_s29 }
0x12d4   :  { %v3226_v29 = vpop.xlane.xlu0 %3225 }
0x12d5   :  { %v3223_v20 = vpop.xlane.xlu1 %3222  ;;  %5767 = vrcp.f32 %v3226_v29 }
0x12d6   :  { %5769 = vrcp.f32 %v3223_v20 }
0x12d8   :  { %v3294_v19 = vpop.permute.xlu0 %3293 }
0x12d9   :  { %v3299_v31 = vsel %vm681_vm5, %v3294_v19, 0  ;;  %v3342_v15 = vpop.permute.xlu1 %3341 }
0x12da   :  { %5416 = vmatpush3.bf16.msra.mxu0 %v3299_v31  ;;  %v3347_v46 = vsel %vm681_vm5, %v3342_v15, 0 }
0x12db   :  { %5427 = vmatprep.subr.bf16.mxu0 %v6120_v16 }
0x12dd   :  { %v3390_v4 = vpop.permute.xlu1 %3389 }
0x12de   :  { %v3395_v26 = vsel %vm681_vm5, %v3390_v4, 0 }
0x12e2   :  { %v5768_v14 = vpop.eup %5767 }
0x12e3   :  { %v5770_v36 = vpop.eup %5769  ;;  %v3238_v3 = vmul.f32 %v5768_v14, %v5760_v1 }
0x12e4   :  { %v3237_v45 = vmul.f32 %v5770_v36, %v5762_v6 }
0x12e5   :  { %v3242_v10 = vpack.c.bf16 %v3238_v3, %v3238_v3 }
0x12e6   :  { %v3241_v11 = vpack.c.bf16 %v3237_v45, %v3237_v45 }
0x12e7   :  { %5418 = vmatmul.mubr.msk.bf16.vlgmr.msra.gmra.mxu0 %vm434_vm3, %v3242_v10 }
0x12e8   :  { %5412 = vmatmul.mubr.msk.bf16.vlgmr.msra.gmra.mxu1 %vm434_vm3, %v3241_v11  ;;  %5428 = vmatpush3.bf16.msra.mxu0 %v3395_v26 }
0x12e9   :  { %5422 = vmatpush3.bf16.msra.mxu1 %v3347_v46  ;;  %5429 = vmatprep.mubr.msk.bf16.mxu0 %vm6121_vm1, %v6120_v16 }
0x12ea   :  { %5439 = vmatprep.subr.bf16.mxu0 %v6120_v16  ;;  %5423 = vmatprep.mubr.msk.bf16.mxu1 %vm6121_vm1, %v6120_v16 }
0x12eb   :  { %5433 = vmatprep.subr.bf16.mxu1 %v6120_v16 }
0x1309   :  { %v3232_v47 = vpop.xlane.xlu0 %3231 }
0x130a   :  { %5771 = vrcp.f32 %v3232_v47 }
0x130d   :  { %v3440_v55 = vpop.permute.xlu0 %3439 }
0x130e   :  { %v3229_v49 = vpop.xlane.xlu1 %3228  ;;  %v3445_v48 = vsel %vm434_vm3, %v3440_v55, 0 }
0x130f   :  { %5773 = vrcp.f32 %v3229_v49 }
0x1311   :  { %v3438_v61 = vpop.permute.xlu0 %3437 }
0x1312   :  { %v3490_v52 = vpop.permute.xlu1 %3489 }
0x1313   :  { %v3495_v58 = vsel %vm434_vm3, %v3490_v52, 0 }
0x1315   :  { %v3540_v0 = vpop.permute.xlu0 %3539 }
0x1316   :  { %v3488_v57 = vpop.permute.xlu1 %3487  ;;  %v3545_v1 = vsel %vm434_vm3, %v3540_v0, 0 }
0x1317   :  { %v5772_v53 = vpop.eup %5771 }
0x1318   :  { %v3240_v54 = vmul.f32 %v5772_v53, %v5764_v41 }
0x1319   :  { %v3538_v9 = vpop.permute.xlu0 %3537 }
0x131a   :  { %v3244_v56 = vpack.c.bf16 %v3240_v54, %v3240_v54  ;;  %v3590_v62 = vpop.permute.xlu1 %3589 }
0x131b   :  { %v3595_v63 = vsel %vm434_vm3, %v3590_v62, 0 }
0x131c   :  { %v5774_v12 = vpop.eup %5773  ;;  %5430 = vmatmul.mubr.msk.bf16.vlgmr.msra.gmra.mxu0 %vm434_vm3, %v3244_v56 }
0x131d   :  { %5440 = vmatpush3.bf16.xpose.msra.mxu0 %v3495_v58  ;;  %v3239_v59 = vmul.f32 %v5774_v12, %v5766_v43  ;;  %5441 = vmatprep.mubr.msk.bf16.mxu0 %vm6121_vm1, %v6120_v16 }
0x131e   :  { %5451 = vmatprep.subr.bf16.mxu0 %v6120_v16  ;;  %v3588_v6 = vpop.permute.xlu1 %3587 }
0x131f   :  { %v3243_v60 = vpack.c.bf16 %v3239_v59, %v3239_v59 }
0x1321   :  { %5424 = vmatmul.mubr.msk.bf16.vlgmr.msra.gmra.mxu1 %vm434_vm3, %v3243_v60 }
0x1322   :  { %5434 = vmatpush3.bf16.xpose.msra.mxu1 %v3445_v48  ;;  %5435 = vmatprep.mubr.msk.bf16.mxu1 %vm6121_vm1, %v6120_v16 }
0x1323   :  { %5445 = vmatprep.subr.bf16.mxu1 %v6120_v16 }
0x1324   :  { %5442 = vmatmul.mubr.msk.bf16.vlgmr.msra.gmra.mxu0 %vm434_vm3, %v3488_v57 }
0x1325   :  { %5452 = vmatpush3.bf16.xpose.msra.mxu0 %v3595_v63  ;;  %5453 = vmatprep.mubr.msk.bf16.mxu0 %vm6121_vm1, %v6120_v16 }
0x1326   :  { %5463 = vmatprep.subr.bf16.mxu0 %v6120_v16 }
0x1329   :  { %5436 = vmatmul.mubr.msk.bf16.vlgmr.msra.gmra.mxu1 %vm434_vm3, %v3438_v61 }
0x132a   :  { %5446 = vmatpush3.bf16.xpose.msra.mxu1 %v3545_v1  ;;  %5447 = vmatprep.mubr.msk.bf16.mxu1 %vm6121_vm1, %v6120_v16 }
0x132b   :  { %5457 = vmatprep.subr.bf16.mxu1 %v6120_v16 }
0x132c   :  { %5454 = vmatmul.mubr.msk.bf16.vlgmr.msra.gmra.mxu0 %vm434_vm3, %v3588_v6 }
0x132d   :  { %5465 = vmatprep.mubr.msk.bf16.mxu0 %vm6121_vm1, %v6120_v16 }
0x1331   :  { %5448 = vmatmul.mubr.msk.bf16.vlgmr.msra.gmra.mxu1 %vm434_vm3, %v3538_v9 }
0x1332   :  { %5459 = vmatprep.mubr.msk.bf16.mxu1 %vm6121_vm1, %v6120_v16 }
0x13a7   :  { %v6978_v51 = vpop.f32.mrf.mxu0 }
0x13a8   :  { %v6980_v22 = vpop.f32.mrf.mxu1 }
0x13a9   :  { %v5622_v25 = vpack.i.bf16 %v6978_v51, %v6980_v22  ;;  %v5419_v24 = vpop.f32.mrf.mxu0 }
0x13aa   :  { %v5413_v34 = vpop.f32.mrf.mxu1 }
0x13ab   :  { %v3338_v37 = vpop.f32.mrf.mxu0 }
0x13ac   :  { %v3290_v39 = vpop.f32.mrf.mxu1 }
0x13ad   :  { %v5420_v41 = vpop.f32.mrf.mxu0 }
0x13ae   :  { %v5414_v42 = vpop.f32.mrf.mxu1 }
0x13dc   :  { %v6984_v43 = vpop.f32.mrf.mxu0 }
0x13de   :  { %v5431_v21 = vpop.f32.mrf.mxu0 }
0x13e0   :  { %v3434_v29 = vpop.f32.mrf.mxu0 }
0x13e1   :  { %v6986_v20 = vpop.f32.mrf.mxu1 }
0x13e2   :  { %v5627_v19 = vpack.i.bf16 %v6984_v43, %v6986_v20  ;;  %v5432_v31 = vpop.f32.mrf.mxu0 }
0x13e3   :  { %v5425_v15 = vpop.f32.mrf.mxu1 }
0x13e4   :  { %v3531_v14 = vpop.f32.mrf.mxu0 }
0x13e5   :  { %v3386_v36 = vpop.f32.mrf.mxu1  ;;  %v3532_v3 = vadd.f32 %v6813_v35, %v3531_v14 }
0x13e6   :  { %v5443_v4 = vpop.f32.mrf.mxu0 }
0x13e7   :  { %v5426_v45 = vpop.f32.mrf.mxu1  ;;  %v3640_v10 = vsel %vm434_vm3, %v3532_v3, -inf }
0x13e8   :  { %3641 = vmax.xlane.f32.xlu1 %v3640_v10  ;;  %v3534_v11 = vpop.f32.mrf.mxu0 }
0x13e9   :  { %v3481_v26 = vpop.f32.mrf.mxu1 }
0x13ea   :  { %v3482_v46 = vadd.f32 %v6810_v18, %v3481_v26  ;;  %v5444_v47 = vpop.f32.mrf.mxu0 }
0x13eb   :  { %v5437_v49 = vpop.f32.mrf.mxu1 }
0x13ec   :  { %v3631_v52 = vpop.f32.mrf.mxu0  ;;  %v3637_v53 = vsel %vm434_vm3, %v3482_v46, -inf }
0x13ed   :  { %3638 = vmax.xlane.f32.xlu0 %v3637_v53  ;;  %v3484_v54 = vpop.f32.mrf.mxu1  ;;  %v3632_v61 = vadd.f32 %v6821_v50, %v3631_v52 }
0x13ee   :  { %v5455_v55 = vpop.f32.mrf.mxu0 }
0x13ef   :  { %v5438_v56 = vpop.f32.mrf.mxu1  ;;  %v3646_v0 = vsel %vm434_vm3, %v3632_v61, -inf }
0x13f0   :  { %v3634_v57 = vpop.f32.mrf.mxu0 }
0x13f1   :  { %v3581_v12 = vpop.f32.mrf.mxu1 }
0x13f2   :  { %v3582_v58 = vadd.f32 %v6817_v8, %v3581_v12  ;;  %v5456_v59 = vpop.f32.mrf.mxu0 }
0x13f3   :  { %v5449_v60 = vpop.f32.mrf.mxu1 }
0x13f4   :  { %v3643_v48 = vsel %vm434_vm3, %v3582_v58, -inf }
0x13f5   :  { %3644 = vmax.xlane.f32.xlu0 %v3643_v48  ;;  %v3584_v62 = vpop.f32.mrf.mxu1 }
0x13f7   :  { %v5450_v63 = vpop.f32.mrf.mxu1 }
0x13f9   :  { %3647 = vmax.xlane.f32.xlu0 %v3646_v0  ;;  %3685 = vrot.lane.b32.xlu1 %v6763_v7, %s6127_s12 }
0x1471   :  { %v3642_v1 = vpop.xlane.xlu1 %3641 }
0x1472   :  { %v3650_v6 = vsub.f32 %v3532_v3, %v3642_v1 }
0x1474   :  { %v3655_v9 = vmul.f32 1.442695, %v3650_v6 }
0x1475   :  { %v3686_v24 = vpop.permute.xlu1 %3685 }
0x1476   :  { %5775 = vpow2.f32 %v3655_v9  ;;  %v3691_v34 = vsel %vm681_vm5, %v3686_v24, 0  ;;  %v3639_v37 = vpop.xlane.xlu0 %3638 }
0x1477   :  { %v3649_v39 = vsub.f32 %v3482_v46, %v3639_v37  ;;  %5458 = vmatpush3.bf16.msra.mxu1 %v3691_v34 }
0x1478   :  { %5469 = vmatprep.subr.bf16.mxu1 %v6120_v16 }
0x1479   :  { %v3653_v41 = vmul.f32 1.442695, %v3649_v39 }
0x147b   :  { %5777 = vpow2.f32 %v3653_v41 }
0x147e   :  { %v3645_v15 = vpop.xlane.xlu0 %3644 }
0x147f   :  { %v3651_v4 = vsub.f32 %v3582_v58, %v3645_v15 }
0x1481   :  { %v3657_v45 = vmul.f32 1.442695, %v3651_v4 }
0x1482   :  { %v3648_v14 = vpop.xlane.xlu0 %3647 }
0x1483   :  { %v5776_v42 = vpop.eup %5775  ;;  %v3652_v36 = vsub.f32 %v3632_v61, %v3648_v14 }
0x1484   :  { %v3664_v21 = vsel %vm434_vm3, %v5776_v42, 0.0 }
0x1485   :  { %3665 = vadd.xlane.f32.xlu0 %v3664_v21  ;;  %v3659_v3 = vmul.f32 1.442695, %v3652_v36 }
0x1487   :  { %5779 = vpow2.f32 %v3659_v3 }
0x1488   :  { %v5778_v29 = vpop.eup %5777  ;;  %5781 = vpow2.f32 %v3657_v45 }
0x1489   :  { %v3661_v31 = vsel %vm434_vm3, %v5778_v29, 0.0 }
0x148a   :  { %3662 = vadd.xlane.f32.xlu1 %v3661_v31 }
0x1494   :  { %v5780_v10 = vpop.eup %5779 }
0x1495   :  { %v3670_v11 = vsel %vm434_vm3, %v5780_v10, 0.0  ;;  %v5782_v26 = vpop.eup %5781 }
0x1496   :  { %v3667_v46 = vsel %vm434_vm3, %v5782_v26, 0.0 }
0x149b   :  { %3781 = vrot.lane.b32.xlu1 %v6776_v33, %s6127_s12  ;;  %3733 = vrot.lane.b32.xlu0 %v6767_v23, %s6127_s12 }
0x149f   :  { %3829 = vrot.lane.b32.xlu1 %v6780_v40, %s6127_s12 }
0x14ba   :  { %3671 = vadd.xlane.f32.xlu0 %v3670_v11 }
0x14c3   :  { %3668 = vadd.xlane.f32.xlu1 %v3667_v46 }
0x14d0   :  { %3879 = vrot.lane.b32.xlu0 %v6763_v7, %s6131_s0 }
0x14d4   :  { %3929 = vrot.lane.b32.xlu1 %v6767_v23, %s6131_s0  ;;  %3877 = vrot.lane.b32.xlu0 %v6778_v38, %s6131_s0 }
0x14d8   :  { %3927 = vrot.lane.b32.xlu1 %v6788_v44, %s6131_s0  ;;  %3979 = vrot.lane.b32.xlu0 %v6776_v33, %s6131_s0 }
0x14dc   :  { %4029 = vrot.lane.b32.xlu1 %v6780_v40, %s6131_s0  ;;  %3977 = vrot.lane.b32.xlu0 %v6797_v27, %s6131_s0 }
0x14e0   :  { %4027 = vrot.lane.b32.xlu1 %v6804_v13, %s6131_s0 }
0x150e   :  { %v3666_v47 = vpop.xlane.xlu0 %3665 }
0x150f   :  { %5783 = vrcp.f32 %v3666_v47 }
0x1512   :  { %v3734_v49 = vpop.permute.xlu0 %3733 }
0x1513   :  { %v3663_v52 = vpop.xlane.xlu1 %3662  ;;  %v3739_v38 = vsel %vm681_vm5, %v3734_v49, 0 }
0x1514   :  { %5785 = vrcp.f32 %v3663_v52  ;;  %5464 = vmatpush3.bf16.msra.mxu0 %v3739_v38 }
0x1515   :  { %5475 = vmatprep.subr.bf16.mxu0 %v6120_v16 }
0x1517   :  { %v3782_v44 = vpop.permute.xlu1 %3781 }
0x1518   :  { %v3787_v58 = vsel %vm681_vm5, %v3782_v44, 0 }
0x151b   :  { %v3830_v55 = vpop.permute.xlu1 %3829 }
0x151c   :  { %v5784_v53 = vpop.eup %5783  ;;  %v3835_v27 = vsel %vm681_vm5, %v3830_v55, 0 }
0x151d   :  { %v3678_v54 = vmul.f32 %v5784_v53, %v5776_v42 }
0x151f   :  { %v3682_v56 = vpack.c.bf16 %v3678_v54, %v3678_v54 }
0x1521   :  { %v5786_v57 = vpop.eup %5785  ;;  %5466 = vmatmul.mubr.msk.bf16.vlgmr.msra.gmra.mxu0 %vm434_vm3, %v3682_v56 }
0x1522   :  { %v3677_v13 = vmul.f32 %v5786_v57, %v5778_v29  ;;  %5476 = vmatpush3.bf16.msra.mxu0 %v3835_v27  ;;  %5477 = vmatprep.mubr.msk.bf16.mxu0 %vm6121_vm1, %v6120_v16 }
0x1523   :  { %5487 = vmatprep.subr.bf16.mxu0 %v6120_v16 }
0x1524   :  { %v3681_v12 = vpack.c.bf16 %v3677_v13, %v3677_v13 }
0x1526   :  { %5460 = vmatmul.mubr.msk.bf16.vlgmr.msra.gmra.mxu1 %vm434_vm3, %v3681_v12 }
0x1527   :  { %5470 = vmatpush3.bf16.msra.mxu1 %v3787_v58  ;;  %5471 = vmatprep.mubr.msk.bf16.mxu1 %vm6121_vm1, %v6120_v16 }
0x1528   :  { %5481 = vmatprep.subr.bf16.mxu1 %v6120_v16 }
0x1543   :  { %v3672_v59 = vpop.xlane.xlu0 %3671 }
0x1544   :  { %5787 = vrcp.f32 %v3672_v59 }
0x1547   :  { %v3880_v6 = vpop.permute.xlu0 %3879 }
0x1548   :  { %v3885_v42 = vsel %vm434_vm3, %v3880_v6, 0 }
0x154b   :  { %v3878_v39 = vpop.permute.xlu0 %3877 }
0x154c   :  { %v3669_v60 = vpop.xlane.xlu1 %3668 }
0x154d   :  { %5789 = vrcp.f32 %v3669_v60 }
0x154f   :  { %v3980_v21 = vpop.permute.xlu0 %3979 }
0x1550   :  { %v3930_v61 = vpop.permute.xlu1 %3929  ;;  %v3985_v31 = vsel %vm434_vm3, %v3980_v21, 0 }
0x1551   :  { %v5788_v48 = vpop.eup %5787  ;;  %v3935_v1 = vsel %vm434_vm3, %v3930_v61, 0 }
0x1552   :  { %v3680_v62 = vmul.f32 %v5788_v48, %v5780_v10 }
0x1553   :  { %v3978_v15 = vpop.permute.xlu0 %3977 }
0x1554   :  { %v3684_v63 = vpack.c.bf16 %v3680_v62, %v3680_v62  ;;  %v3928_v0 = vpop.permute.xlu1 %3927 }
0x1556   :  { %5478 = vmatmul.mubr.msk.bf16.vlgmr.msra.gmra.mxu0 %vm434_vm3, %v3684_v63 }
0x1557   :  { %5488 = vmatpush3.bf16.xpose.msra.mxu0 %v3935_v1  ;;  %5489 = vmatprep.mubr.msk.bf16.mxu0 %vm6121_vm1, %v6120_v16 }
0x1558   :  { %5499 = vmatprep.subr.bf16.mxu0 %v6120_v16  ;;  %v4030_v34 = vpop.permute.xlu1 %4029 }
0x1559   :  { %v4035_v41 = vsel %vm434_vm3, %v4030_v34, 0 }
0x155a   :  { %v5790_v9 = vpop.eup %5789 }
0x155b   :  { %v3679_v24 = vmul.f32 %v5790_v9, %v5782_v26 }
0x155c   :  { %v4028_v29 = vpop.permute.xlu1 %4027 }
0x155d   :  { %v3683_v37 = vpack.c.bf16 %v3679_v24, %v3679_v24 }
0x155e   :  { %5490 = vmatmul.mubr.msk.bf16.vlgmr.msra.gmra.mxu0 %vm434_vm3, %v3928_v0 }
0x155f   :  { %5472 = vmatmul.mubr.msk.bf16.vlgmr.msra.gmra.mxu1 %vm434_vm3, %v3683_v37  ;;  %5500 = vmatpush3.bf16.xpose.msra.mxu0 %v4035_v41 }
0x1560   :  { %5482 = vmatpush3.bf16.xpose.msra.mxu1 %v3885_v42  ;;  %5483 = vmatprep.mubr.msk.bf16.mxu1 %vm6121_vm1, %v6120_v16 }
0x1561   :  { %5493 = vmatprep.subr.bf16.mxu1 %v6120_v16  ;;  %5501 = vmatprep.mubr.msk.bf16.mxu0 %vm6121_vm1, %v6120_v16 }
0x1562   :  { %5511 = vmatprep.subr.bf16.mxu0 %v6120_v16 }
0x1566   :  { %5502 = vmatmul.mubr.msk.bf16.vlgmr.msra.gmra.mxu0 %vm434_vm3, %v4028_v29 }
0x1567   :  { %5484 = vmatmul.mubr.msk.bf16.vlgmr.msra.gmra.mxu1 %vm434_vm3, %v3878_v39  ;;  %5513 = vmatprep.mubr.msk.bf16.mxu0 %vm6121_vm1, %v6120_v16 }
0x1568   :  { %5494 = vmatpush3.bf16.xpose.msra.mxu1 %v3985_v31  ;;  %5495 = vmatprep.mubr.msk.bf16.mxu1 %vm6121_vm1, %v6120_v16 }
0x1569   :  { %5505 = vmatprep.subr.bf16.mxu1 %v6120_v16 }
0x156f   :  { %5496 = vmatmul.mubr.msk.bf16.vlgmr.msra.gmra.mxu1 %vm434_vm3, %v3978_v15 }
0x1570   :  { %5507 = vmatprep.mubr.msk.bf16.mxu1 %vm6121_vm1, %v6120_v16 }
0x15e1   :  { %v7066_v14 = vpop.f32.mrf.mxu0 }
0x15e3   :  { %v5467_v36 = vpop.f32.mrf.mxu0 }
0x15e5   :  { %v3778_v3 = vpop.f32.mrf.mxu0 }
0x15e6   :  { %v7068_v4 = vpop.f32.mrf.mxu1 }
0x15e7   :  { %v5632_v45 = vpack.i.bf16 %v7066_v14, %v7068_v4  ;;  %v5468_v10 = vpop.f32.mrf.mxu0 }
0x15e8   :  { %v5461_v11 = vpop.f32.mrf.mxu1 }
0x15ea   :  { %v3730_v26 = vpop.f32.mrf.mxu1 }
0x15ec   :  { %v5462_v46 = vpop.f32.mrf.mxu1 }
0x1616   :  { %v7072_v47 = vpop.f32.mrf.mxu0 }
0x1618   :  { %v5479_v49 = vpop.f32.mrf.mxu0 }
0x161a   :  { %v3874_v52 = vpop.f32.mrf.mxu0 }
0x161c   :  { %v5480_v38 = vpop.f32.mrf.mxu0 }
0x161e   :  { %v3971_v44 = vpop.f32.mrf.mxu0 }
0x161f   :  { %v7074_v53 = vpop.f32.mrf.mxu1  ;;  %v3972_v54 = vadd.f32 %v6813_v35, %v3971_v44 }
0x1620   :  { %v5637_v55 = vpack.i.bf16 %v7072_v47, %v7074_v53  ;;  %v5491_v56 = vpop.f32.mrf.mxu0 }
0x1621   :  { %v5473_v57 = vpop.f32.mrf.mxu1  ;;  %v4080_v27 = vsel %vm434_vm3, %v3972_v54, -inf }
0x1622   :  { %4081 = vmax.xlane.f32.xlu1 %v4080_v27  ;;  %v3974_v13 = vpop.f32.mrf.mxu0 }
0x1623   :  { %v3826_v12 = vpop.f32.mrf.mxu1 }
0x1624   :  { %v5492_v58 = vpop.f32.mrf.mxu0 }
0x1625   :  { %v5474_v59 = vpop.f32.mrf.mxu1 }
0x1626   :  { %v4071_v60 = vpop.f32.mrf.mxu0 }
0x1627   :  { %v3921_v61 = vpop.f32.mrf.mxu1  ;;  %v4072_v39 = vadd.f32 %v6821_v50, %v4071_v60 }
0x1628   :  { %v3922_v48 = vadd.f32 %v6810_v18, %v3921_v61  ;;  %v5503_v62 = vpop.f32.mrf.mxu0 }
0x1629   :  { %v5485_v63 = vpop.f32.mrf.mxu1  ;;  %v4086_v21 = vsel %vm434_vm3, %v4072_v39, -inf }
0x162a   :  { %v4074_v0 = vpop.f32.mrf.mxu0  ;;  %v4077_v35 = vsel %vm434_vm3, %v3922_v48, -inf }
0x162b   :  { %4078 = vmax.xlane.f32.xlu0 %v4077_v35  ;;  %v3924_v1 = vpop.f32.mrf.mxu1  ;;  %v5662_v0 = vld [vmem:[#allocation13 + $0x8] sm:$0xff]  }
0x162c   :  { %v5504_v6 = vpop.f32.mrf.mxu0 }
0x162d   :  { %v5486_v9 = vpop.f32.mrf.mxu1 }
0x162e   :  { %v5663_v9 = vld [vmem:[#allocation13] sm:$0xff]  }
0x162f   :  { %v4021_v24 = vpop.f32.mrf.mxu1 }
0x1630   :  { %v4022_v34 = vadd.f32 %v6817_v8, %v4021_v24 }
0x1631   :  { %v5497_v37 = vpop.f32.mrf.mxu1 }
0x1632   :  { %v4083_v41 = vsel %vm434_vm3, %v4022_v34, -inf }
0x1633   :  { %4084 = vmax.xlane.f32.xlu0 %v4083_v41  ;;  %v4024_v42 = vpop.f32.mrf.mxu1  ;;  %4125 = vrot.lane.b32.xlu1 %v6763_v7, %s6130_s15 }
0x1635   :  { %v5498_v18 = vpop.f32.mrf.mxu1 }
0x1637   :  { %4087 = vmax.xlane.f32.xlu0 %v4086_v21 }
0x16ab   :  { %v4082_v29 = vpop.xlane.xlu1 %4081 }
0x16ac   :  { %v4090_v31 = vsub.f32 %v3972_v54, %v4082_v29 }
0x16ae   :  { %v4095_v15 = vmul.f32 1.442695, %v4090_v31 }
0x16af   :  { %v4126_v36 = vpop.permute.xlu1 %4125 }
0x16b0   :  { %5791 = vpow2.f32 %v4095_v15  ;;  %v4131_v8 = vsel %vm681_vm5, %v4126_v36, 0 }
0x16b1   :  { %5506 = vmatpush3.bf16.msra.mxu1 %v4131_v8 }
0x16b2   :  { %5517 = vmatprep.subr.bf16.mxu1 %v6120_v16 }
0x16b4   :  { %v4079_v50 = vpop.xlane.xlu0 %4078 }
0x16b5   :  { %v4089_v3 = vsub.f32 %v3922_v48, %v4079_v50 }
0x16b7   :  { %v4093_v10 = vmul.f32 1.442695, %v4089_v3 }
0x16b9   :  { %5793 = vpow2.f32 %v4093_v10 }
0x16bc   :  { %v4085_v11 = vpop.xlane.xlu0 %4084 }
0x16bd   :  { %v5792_v7 = vpop.eup %5791  ;;  %v4091_v26 = vsub.f32 %v4022_v34, %v4085_v11 }
0x16be   :  { %v4104_v46 = vsel %vm434_vm3, %v5792_v7, 0.0 }
0x16bf   :  { %v4097_v49 = vmul.f32 1.442695, %v4091_v26  ;;  %4105 = vadd.xlane.f32.xlu0 %v4104_v46 }
0x16c0   :  { %v4088_v52 = vpop.xlane.xlu0 %4087 }
0x16c1   :  { %5795 = vpow2.f32 %v4097_v49  ;;  %v4092_v38 = vsub.f32 %v4072_v39, %v4088_v52 }
0x16c3   :  { %v4099_v44 = vmul.f32 1.442695, %v4092_v38 }
0x16c5   :  { %5797 = vpow2.f32 %v4099_v44 }
0x16c6   :  { %v5794_v54 = vpop.eup %5793 }
0x16c7   :  { %v4101_v56 = vsel %vm434_vm3, %v5794_v54, 0.0 }
0x16c8   :  { %4102 = vadd.xlane.f32.xlu1 %v4101_v56 }
0x16ce   :  { %v5796_v57 = vpop.eup %5795 }
0x16cf   :  { %v4107_v27 = vsel %vm434_vm3, %v5796_v57, 0.0 }
0x16d0   :  { %4108 = vadd.xlane.f32.xlu1 %v4107_v27 }
0x16d2   :  { %v5798_v13 = vpop.eup %5797 }
0x16d3   :  { %v4110_v12 = vsel %vm434_vm3, %v5798_v13, 0.0 }
0x16d4   :  { %4111 = vadd.xlane.f32.xlu0 %v4110_v12 }
0x16e1   :  { %4221 = vrot.lane.b32.xlu1 %v6776_v33, %s6130_s15 }
0x16e5   :  { %4269 = vrot.lane.b32.xlu1 %v6780_v40, %s6130_s15 }
0x16e9   :  { %5628 = vrot.lane.b32.xlu1 %v5627_v19, %s6114_s6 }
0x16ea   :  { %4173 = vrot.lane.b32.xlu0 %v6767_v23, %s6130_s15 }
0x16ed   :  { %5638 = vrot.lane.b32.xlu1 %v5637_v55, %s6104_s25 }
0x16ee   :  { %5623 = vrot.lane.b32.xlu0 %v5622_v25, %s6114_s6 }
0x16f2   :  { %5633 = vrot.lane.b32.xlu0 %v5632_v45, %s6104_s25 }
0x1748   :  { %v4106_v33 = vpop.xlane.xlu0 %4105 }
0x1749   :  { %5799 = vrcp.f32 %v4106_v33 }
0x1751   :  { %v4103_v40 = vpop.xlane.xlu1 %4102 }
0x1752   :  { %5801 = vrcp.f32 %v4103_v40 }
0x1756   :  { %v5800_v43 = vpop.eup %5799 }
0x1757   :  { %v4118_v53 = vmul.f32 %v5800_v43, %v5792_v7 }
0x1759   :  { %v4109_v23 = vpop.xlane.xlu1 %4108  ;;  %v4122_v14 = vpack.c.bf16 %v4118_v53, %v4118_v53 }
0x175a   :  { %5803 = vrcp.f32 %v4109_v23 }
0x175d   :  { %v4222_v20 = vpop.permute.xlu1 %4221  ;;  %v4112_v19 = vpop.xlane.xlu0 %4111 }
0x175e   :  { %5805 = vrcp.f32 %v4112_v19  ;;  %v4227_v4 = vsel %vm681_vm5, %v4222_v20, 0 }
0x175f   :  { %v5802_v47 = vpop.eup %5801 }
0x1760   :  { %v4117_v55 = vmul.f32 %v5802_v47, %v5794_v54 }
0x1761   :  { %v4174_v51 = vpop.permute.xlu0 %4173  ;;  %v4270_v58 = vpop.permute.xlu1 %4269 }
0x1762   :  { %v4121_v22 = vpack.c.bf16 %v4117_v55, %v4117_v55  ;;  %v4179_v25 = vsel %vm681_vm5, %v4174_v51, 0  ;;  %v4275_v45 = vsel %vm681_vm5, %v4270_v58, 0 }
0x1763   :  { %5512 = vmatpush3.bf16.msra.mxu0 %v4179_v25 }
0x1764   :  { %5508 = vmatmul.mubr.msk.bf16.vlgmr.msra.gmra.mxu1 %vm434_vm3, %v4121_v22  ;;  %5523 = vmatprep.subr.bf16.mxu0 %v6120_v16 }
0x1765   :  { %5518 = vmatpush3.bf16.msra.mxu1 %v4227_v4  ;;  %5519 = vmatprep.mubr.msk.bf16.mxu1 %vm6121_vm1, %v6120_v16  ;;  %v5624_v3 = vpop.permute.xlu0 %5623  ;;  %v5629_v49 = vpop.permute.xlu1 %5628 }
0x1766   :  { %5514 = vmatmul.mubr.msk.bf16.vlgmr.msra.gmra.mxu0 %vm434_vm3, %v4122_v14  ;;  %5529 = vmatprep.subr.bf16.mxu1 %v5662_v0  ;;  %v5626_v11 = vunpack.i.h.bf16 %v5624_v3  ;;  %v5625_v7 = vunpack.i.l.bf16 %v5624_v3  ;;  %v5631_v23 = vunpack.i.h.bf16 %v5629_v49  ;;  %v5630_v43 = vunpack.i.l.bf16 %v5629_v49  ;;  %v5667_v49 = vld [vmem:[%s7235_s19 + $0x18] sm:$0xff]  }
0x1767   :  { %v5804_v59 = vpop.eup %5803  ;;  %5524 = vmatpush3.bf16.msra.mxu0 %v4275_v45  ;;  %5525 = vmatprep.mubr.msk.bf16.mxu0 %vm6121_vm1, %v6120_v16  ;;  %v4924_v45 = vld [vmem:[#allocation14] ss:$0 sm:$0xff] }
0x1768   :  { %v4119_v60 = vmul.f32 %v5804_v59, %v5796_v57  ;;  %v4366_v38 = vsel %vm434_vm3, %v6896_v17, %v5626_v11  ;;  %v4365_v44 = vsel %vm434_vm3, %v6894_v2, %v5625_v7  ;;  %v4368_v2 = vsel %vm434_vm3, %v6898_v30, %v5631_v23  ;;  %v5664_v7 = vld [vmem:[%s7233_s17 + $0x10] sm:$0xff]  }
0x1769   :  { %v5634_v10 = vpop.permute.xlu0 %5633  ;;  %v5639_v40 = vpop.permute.xlu1 %5638  ;;  %v4367_v47 = vsel %vm434_vm3, %v6900_v32, %v5630_v43  ;;  %5537 = vmatprep.subr.bf16.mxu0 %v5664_v7  ;;  %v4457_v43 = vld [vmem:[%s7230_s14] sm:$0x3] }
0x176a   :  { %v4123_v61 = vpack.c.bf16 %v4119_v60, %v4119_v60  ;;  %v5636_v26 = vunpack.i.h.bf16 %v5634_v10  ;;  %v5635_v46 = vunpack.i.l.bf16 %v5634_v10  ;;  %v5641_v17 = vunpack.i.h.bf16 %v5639_v40 }
0x176b   :  { %v5806_v48 = vpop.eup %5805  ;;  %v5640_v20 = vunpack.i.l.bf16 %v5639_v40 }
0x176c   :  { %v4120_v62 = vmul.f32 %v5806_v48, %v5798_v13  ;;  %5520 = vmatmul.mubr.msk.bf16.vlgmr.msra.gmra.mxu1 %vm434_vm3, %v4123_v61  ;;  %v4369_v57 = vsel %vm2241_vm6, %v4365_v44, %v5635_v46  ;;  %v4370_v27 = vsel %vm2241_vm6, %v4366_v38, %v5636_v26  ;;  %v4372_v22 = vsel %vm2241_vm6, %v4368_v2, %v5641_v17  ;;  %v5665_v26 = vld [vmem:[%s7233_s17 + $0x8] sm:$0xff]   ;;  %v5666_v46 = vld [vmem:[%s7233_s17] sm:$0xff]  }
0x176d   :  { %5530 = vmatpush3.bf16.msra.mxu1 %v5662_v0  ;;  %v4371_v51 = vsel %vm2241_vm6, %v4367_v47, %v5640_v20  ;;  %v4514_v20 = vrot.slane %v4457_v43, %v6746_v5 }
0x176e   :  { %v4124_v63 = vpack.c.bf16 %v4120_v62, %v4120_v62  ;;  %5531 = vmatprep.subr.bf16.mxu1 %v5663_v9 }
0x1770   :  { %5526 = vmatmul.mubr.msk.bf16.vlgmr.msra.gmra.mxu0 %vm434_vm3, %v4124_v63 }
0x1771   :  { %5532 = vmatpush3.bf16.msra.mxu1 %v5663_v9  ;;  %5538 = vmatpush3.bf16.msra.mxu0 %v5664_v7 }
0x1772   :  { %5539 = vmatprep.subr.bf16.mxu0 %v5665_v26  ;;  %5547 = vmatprep.subr.bf16.mxu1 %v5667_v49 }
0x1775   :  { %5540 = vmatpush3.bf16.msra.mxu0 %v5665_v26 }
0x1776   :  { %5541 = vmatprep.subr.bf16.mxu0 %v5666_v46 }
0x1779   :  { %5542 = vmatpush3.bf16.msra.mxu0 %v5666_v46 }
0x1824   :  { %v4167_v35 = vpop.f32.mrf.mxu1 }
0x1826   :  { %v5509_v1 = vpop.f32.mrf.mxu1  ;;  %v4215_v6 = vpop.f32.mrf.mxu0 }
0x1827   :  { %v5642_v24 = vpack.i.bf16 %v4215_v6, %v4167_v35 }
0x1828   :  { %v4170_v34 = vpop.f32.mrf.mxu1  ;;  %v5515_v37 = vpop.f32.mrf.mxu0 }
0x1829   :  { %5643 = vrot.lane.b32.xlu0 %v5642_v24, %s6133_s16 }
0x182a   :  { %v5510_v16 = vpop.f32.mrf.mxu1  ;;  %v4218_v39 = vpop.f32.mrf.mxu0 }
0x182c   :  { %v5516_v41 = vpop.f32.mrf.mxu0  ;;  %v4263_v42 = vpop.f32.mrf.mxu1 }
0x182e   :  { %v5521_v18 = vpop.f32.mrf.mxu1 }
0x1830   :  { %v4266_v21 = vpop.f32.mrf.mxu1  ;;  %v4311_v29 = vpop.f32.mrf.mxu0 }
0x1831   :  { %v5647_v31 = vpack.i.bf16 %v4311_v29, %v4263_v42 }
0x1832   :  { %v5522_v15 = vpop.f32.mrf.mxu1  ;;  %v5527_v36 = vpop.f32.mrf.mxu0 }
0x1833   :  { %5648 = vrot.lane.b32.xlu1 %v5647_v31, %s6133_s16 }
0x1834   :  { %v4314_v8 = vpop.f32.mrf.mxu0 }
0x1836   :  { %v5528_v50 = vpop.f32.mrf.mxu0 }
0x189b   :  { %v5644_v52 = vpop.permute.xlu0 %5643 }
0x189c   :  { %v5646_v54 = vunpack.i.h.bf16 %v5644_v52  ;;  %v5645_v56 = vunpack.i.l.bf16 %v5644_v52 }
0x189e   :  { %v4374_v13 = vsel %vm2246_vm7, %v4370_v27, %v5646_v54  ;;  %v4373_v12 = vsel %vm2246_vm7, %v4369_v57, %v5645_v56 }
0x189f   :  { %v4377_v33 = vpack.c.bf16 %v4374_v13, %v4373_v12 }
0x18a1   :  { %5533 = vmatprep.mubr.msk.bf16.mxu1 %vm254_vm0, %v4377_v33 }
0x18a5   :  { %v5649_v19 = vpop.permute.xlu1 %5648 }
0x18a6   :  { %v5651_v53 = vunpack.i.h.bf16 %v5649_v19  ;;  %v5650_v55 = vunpack.i.l.bf16 %v5649_v19 }
0x18a8   :  { %v4376_v25 = vsel %vm2246_vm7, %v4372_v22, %v5651_v53  ;;  %v4375_v58 = vsel %vm2246_vm7, %v4371_v51, %v5650_v55  ;;  %v4522_v22 = vrot.slane %v4457_v43, %v6753_v28 }
0x18a9   :  { %v4378_v14 = vpack.c.bf16 %v4376_v25, %v4375_v58 }
0x18ab   :  { %5534 = vmatmul.mubr.msk.bf16.vlgmr.msra.gmra.mxu1 %vm254_vm0, %v4378_v14 }
0x18ac   :  { %5548 = vmatpush3.bf16.msra.mxu1 %v5667_v49 }
0x196b   :  { %v5535_v4 = vpop.f32.mrf.mxu1 }
0x196c   :  { %v4451_v61 = vadd.f32 %v5535_v4, %v4924_v45 }
0x196d   :  { %v4442_v59 = vpop.f32.mrf.mxu1 }
0x196e   :  { %v4443_v30 = vadd.f32 %v4924_v45, %v4442_v59  ;;  %v4464_v35 = vsel %vm310_vm2, %v4451_v61, 0.0 }
0x196f   :  { %v5536_v60 = vpop.f32.mrf.mxu1 }
0x1970   :  { %v4458_v32 = vsel %vm310_vm2, %v4443_v30, 0.0  ;;  %v4454_v63 = vadd.f32 %v5536_v60, %v4924_v45 }
0x1971   :  { %v4445_v48 = vpop.f32.mrf.mxu1  ;;  %4459 = vadd.xlane.f32.xlu0 %v4458_v32 }
0x1972   :  { %v4446_v62 = vadd.f32 %v4924_v45, %v4445_v48  ;;  %v4467_v1 = vsel %vm310_vm2, %v4454_v63, 0.0 }
0x1974   :  { %v4461_v0 = vsel %vm310_vm2, %v4446_v62, 0.0 }
0x1975   :  { %4462 = vadd.xlane.f32.xlu1 %v4461_v0  ;;  %4465 = vadd.xlane.f32.xlu0 %v4464_v35  ;;  %v5670_v0 = vld [vmem:[%s7235_s19] sm:$0xff]  }
0x1979   :  { %4468 = vadd.xlane.f32.xlu0 %v4467_v1 }
0x19fa   :  { %v4460_v6 = vpop.xlane.xlu0 %4459 }
0x19fb   :  { %v4471_v9 = vmul.f32 0.020833334, %v4460_v6  ;;  %v4929_v6 = vld [vmem:[#allocation19] ss:$0 sm:$0xff] }
0x19fd   :  { %v4475_v24 = vsub.f32 %v4443_v30, %v4471_v9 }
0x19fe   :  { %v4463_v34 = vpop.xlane.xlu1 %4462  ;;  %v4466_v37 = vpop.xlane.xlu0 %4465 }
0x19ff   :  { %v4472_v16 = vmul.f32 0.020833334, %v4463_v34  ;;  %v4473_v39 = vmul.f32 0.020833334, %v4466_v37  ;;  %v4479_v41 = vmul.f32 %v4475_v24, %v4475_v24 }
0x1a01   :  { %v4476_v42 = vsub.f32 %v4446_v62, %v4472_v16  ;;  %v4477_v18 = vsub.f32 %v4451_v61, %v4473_v39  ;;  %v4483_v21 = vsel %vm310_vm2, %v4479_v41, 0.0  ;;  %v5668_v62 = vld [vmem:[%s7235_s19 + $0x10] sm:$0xff]  }
0x1a02   :  { %4484 = vadd.xlane.f32.xlu1 %v4483_v21  ;;  %v4469_v29 = vpop.xlane.xlu0 %4468  ;;  %5549 = vmatprep.subr.bf16.mxu1 %v5668_v62 }
0x1a03   :  { %v4474_v31 = vmul.f32 0.020833334, %v4469_v29  ;;  %v4480_v15 = vmul.f32 %v4476_v42, %v4476_v42  ;;  %v4481_v36 = vmul.f32 %v4477_v18, %v4477_v18  ;;  %5550 = vmatpush3.bf16.msra.mxu1 %v5668_v62 }
0x1a05   :  { %v4478_v8 = vsub.f32 %v4454_v63, %v4474_v31  ;;  %v4486_v50 = vsel %vm310_vm2, %v4480_v15, 0.0  ;;  %v4489_v3 = vsel %vm310_vm2, %v4481_v36, 0.0  ;;  %v5669_v63 = vld [vmem:[%s7235_s19 + $0x8] sm:$0xff]   ;;  %v4935_v36 = vld [vmem:[%s7236_s20] ss:$0 sm:$0xff]  ;;  %s6134_s20 = smov [#allocation21]  }
0x1a06   :  { %4487 = vadd.xlane.f32.xlu0 %v4486_v50  ;;  %4490 = vadd.xlane.f32.xlu1 %v4489_v3  ;;  %s4810_s24 = sshll.u32 %s6134_s20, 4  ;;  %s4811_s24 = int_to_ptr.vmem [resolvable:$true] %s4810_s24 }
0x1a07   :  { %v4482_v10 = vmul.f32 %v4478_v8, %v4478_v8  ;;  %5551 = vmatprep.subr.bf16.mxu1 %v5669_v63  ;;  %s6047_s27 = scalar_lea.vmem %s4811_s24, 512  ;;  %p6052_p0 = scmp.lt.s32.totalorder %s4811_s24, %s4811_s24 }
0x1a08   :  { %5552 = vmatpush3.bf16.msra.mxu1 %v5669_v63  ;;  %p6048_p13 = scmp.ne.s32.totalorder %s4811_s24, %s6047_s27  ;;  %p6053_p1 = scmp.lt.s32.totalorder %s6047_s27, %s6047_s27 }
0x1a09   :  { %v4492_v11 = vsel %vm310_vm2, %v4482_v10, 0.0  ;;  %5553 = vmatprep.subr.bf16.mxu1 %v5670_v0 }
0x1a0a   :  { %4493 = vadd.xlane.f32.xlu0 %v4492_v11  ;;  %p6054_p2 = por %p6053_p1, %p6052_p0 }
0x1a0c   :  { %5554 = vmatpush3.bf16.msra.mxu1 %v5670_v0  ;;  %p6055_p3 = pnand %p6054_p2, %p6048_p13 }
0x1a8b   :  { %v4485_v52 = vpop.xlane.xlu1 %4484 }
0x1a8c   :  { %v4495_v38 = vmul.f32 0.020833334, %v4485_v52 }
0x1a8e   :  { %v4499_v44 = vadd.f32 1e-12, %v4495_v38 }
0x1a8f   :  { %v4491_v54 = vpop.xlane.xlu1 %4490  ;;  %v4488_v56 = vpop.xlane.xlu0 %4487 }
0x1a90   :  { %5807 = vrsqrt.f32 %v4499_v44  ;;  %v4497_v57 = vmul.f32 0.020833334, %v4491_v54  ;;  %v4496_v27 = vmul.f32 0.020833334, %v4488_v56 }
0x1a92   :  { %v4501_v13 = vadd.f32 1e-12, %v4497_v57  ;;  %v4500_v12 = vadd.f32 1e-12, %v4496_v27 }
0x1a93   :  { %v4494_v33 = vpop.xlane.xlu0 %4493 }
0x1a94   :  { %5809 = vrsqrt.f32 %v4501_v13  ;;  %v4498_v40 = vmul.f32 0.020833334, %v4494_v33 }
0x1a95   :  { %5811 = vrsqrt.f32 %v4500_v12 }
0x1a96   :  { %v4502_v23 = vadd.f32 1e-12, %v4498_v40 }
0x1a98   :  { %5813 = vrsqrt.f32 %v4502_v23 }
0x1a9d   :  { %v5808_v17 = vpop.eup %5807 }
0x1a9e   :  { %v4507_v19 = vmul.f32 %v5808_v17, %v4475_v24 }
0x1aa0   :  { %v4515_v51 = vmul.f32 %v4514_v20, %v4507_v19 }
0x1aa1   :  { %v5810_v2 = vpop.eup %5809 }
0x1aa2   :  { %v5812_v47 = vpop.eup %5811  ;;  %v4509_v53 = vmul.f32 %v5810_v2, %v4477_v18  ;;  %v4523_v45 = vadd.f32 %v4522_v22, %v4515_v51 }
0x1aa3   :  { %v4508_v55 = vmul.f32 %v5812_v47, %v4476_v42 }
0x1aa4   :  { %v4517_v14 = vmul.f32 %v4514_v20, %v4509_v53 }
0x1aa5   :  { %v5814_v25 = vpop.eup %5813  ;;  %v4516_v58 = vmul.f32 %v4514_v20, %v4508_v55 }
0x1aa6   :  { %v4510_v4 = vmul.f32 %v5814_v25, %v4478_v8  ;;  %v4525_v61 = vadd.f32 %v4522_v22, %v4517_v14 }
0x1aa7   :  { %v4524_v59 = vadd.f32 %v4522_v22, %v4516_v58 }
0x1aa8   :  { %v4518_v30 = vmul.f32 %v4514_v20, %v4510_v4 }
0x1aa9   :  { %v4527_v60 = vpack.c.bf16 %v4524_v59, %v4523_v45 }
0x1aaa   :  { %v4526_v32 = vadd.f32 %v4522_v22, %v4518_v30 }
0x1aab   :  { %5543 = vmatprep.mubr.msk.bf16.mxu0 %vm310_vm2, %v4527_v60 }
0x1aac   :  { %v4528_v48 = vpack.c.bf16 %v4526_v32, %v4525_v61 }
0x1aae   :  { %5544 = vmatmul.mubr.msk.bf16.vlgmr.msra.gmra.mxu0 %vm310_vm2, %v4528_v48 }
0x1b6e   :  { %v5545_v35 = vpop.f32.mrf.mxu0 }
0x1b6f   :  { %v4609_v37 = vadd.f32 %v5545_v35, %v4929_v6 }
0x1b70   :  { %v4600_v1 = vpop.f32.mrf.mxu0 }
0x1b71   :  { %v4601_v24 = vadd.f32 %v4929_v6, %v4600_v1  ;;  %v4617_v21 = vmax.f32 %v4609_v37, 0.0 }
0x1b72   :  { %v5546_v9 = vpop.f32.mrf.mxu0 }
0x1b73   :  { %v4612_v34 = vadd.f32 %v5546_v9, %v4929_v6  ;;  %v4615_v42 = vmax.f32 %v4601_v24, 0.0 }
0x1b74   :  { %v4603_v16 = vpop.f32.mrf.mxu0 }
0x1b75   :  { %v4604_v39 = vadd.f32 %v4929_v6, %v4603_v16  ;;  %v4618_v41 = vmax.f32 %v4612_v34, 0.0 }
0x1b77   :  { %v4616_v18 = vmax.f32 %v4604_v39, 0.0  ;;  %v4620_v31 = vpack.c.bf16 %v4618_v41, %v4617_v21 }
0x1b79   :  { %v4619_v29 = vpack.c.bf16 %v4616_v18, %v4615_v42 }
0x1b7b   :  { %5555 = vmatprep.mubr.msk.bf16.mxu1 %vm4660_vm8, %v4619_v29 }
0x1b7c   :  { %5556 = vmatmul.mubr.msk.bf16.vlgmr.msra.gmra.mxu1 %vm4660_vm8, %v4620_v31 }
0x1c3c   :  { %v5557_v15 = vpop.f32.mrf.mxu1 }
0x1c3d   :  { %v4710_v50 = vadd.f32 %v5557_v15, %v4935_v36 }
0x1c3e   :  { %v4701_v8 = vpop.f32.mrf.mxu1 }
0x1c3f   :  { %v4702_v3 = vadd.f32 %v4935_v36, %v4701_v8  ;;  %v4718_v26 = vadd.f32 %v4710_v50, %v4525_v61 }
0x1c40   :  { %v5558_v10 = vpop.f32.mrf.mxu1 }
0x1c41   :  { %v4716_v11 = vadd.f32 %v4702_v3, %v4523_v45  ;;  %v4713_v46 = vadd.f32 %v5558_v10, %v4935_v36  ;;  %v4727_v56 = vsel %vm310_vm2, %v4718_v26, 0.0 }
0x1c42   :  { %v4704_v7 = vpop.f32.mrf.mxu1 }
0x1c43   :  { %v4705_v49 = vadd.f32 %v4935_v36, %v4704_v7  ;;  %v4721_v52 = vsel %vm310_vm2, %v4716_v11, 0.0  ;;  %v4719_v44 = vadd.f32 %v4713_v46, %v4526_v32 }
0x1c44   :  { %4722 = vadd.xlane.f32.xlu1 %v4721_v52 }
0x1c45   :  { %v4717_v38 = vadd.f32 %v4705_v49, %v4524_v59  ;;  %v4730_v57 = vsel %vm310_vm2, %v4719_v44, 0.0 }
0x1c47   :  { %v4724_v54 = vsel %vm310_vm2, %v4717_v38, 0.0 }
0x1c48   :  { %4725 = vadd.xlane.f32.xlu0 %v4724_v54  ;;  %4728 = vadd.xlane.f32.xlu1 %v4727_v56 }
0x1c4c   :  { %4731 = vadd.xlane.f32.xlu0 %v4730_v57 }
0x1ccd   :  { %v4723_v27 = vpop.xlane.xlu1 %4722 }
0x1cce   :  { %v4733_v13 = vmul.f32 0.020833334, %v4723_v27 }
0x1cd0   :  { %v4737_v12 = vsub.f32 %v4716_v11, %v4733_v13 }
0x1cd1   :  { %v4726_v33 = vpop.xlane.xlu0 %4725  ;;  %v4729_v40 = vpop.xlane.xlu1 %4728 }
0x1cd2   :  { %v4734_v23 = vmul.f32 0.020833334, %v4726_v33  ;;  %v4735_v43 = vmul.f32 0.020833334, %v4729_v40  ;;  %v4741_v17 = vmul.f32 %v4737_v12, %v4737_v12 }
0x1cd4   :  { %v4738_v20 = vsub.f32 %v4717_v38, %v4734_v23  ;;  %v4739_v19 = vsub.f32 %v4718_v26, %v4735_v43  ;;  %v4745_v2 = vsel %vm310_vm2, %v4741_v17, 0.0 }
0x1cd5   :  { %v4732_v47 = vpop.xlane.xlu0 %4731  ;;  %4746 = vadd.xlane.f32.xlu1 %v4745_v2 }
0x1cd6   :  { %v4736_v53 = vmul.f32 0.020833334, %v4732_v47  ;;  %v4742_v55 = vmul.f32 %v4738_v20, %v4738_v20  ;;  %v4743_v51 = vmul.f32 %v4739_v19, %v4739_v19 }
0x1cd8   :  { %v4740_v22 = vsub.f32 %v4719_v44, %v4736_v53  ;;  %v4748_v25 = vsel %vm310_vm2, %v4742_v55, 0.0  ;;  %v4751_v58 = vsel %vm310_vm2, %v4743_v51, 0.0 }
0x1cd9   :  { %4749 = vadd.xlane.f32.xlu0 %v4748_v25  ;;  %4752 = vadd.xlane.f32.xlu1 %v4751_v58 }
0x1cda   :  { %v4744_v14 = vmul.f32 %v4740_v22, %v4740_v22 }
0x1cdc   :  { %v4754_v4 = vsel %vm310_vm2, %v4744_v14, 0.0 }
0x1cdd   :  { %4755 = vadd.xlane.f32.xlu0 %v4754_v4 }
0x1cde   :  { %6058 = shalt.err (!%p6055_p3)
}
0x1cdf   :  { %4816 = dma.vmem_to_hbm [thread:$0]  %s4811_s24, 512, %s7239_s23, [#allocation22], %s6113_s13, %s6113_s13, %s6114_s6  }
0x1ce0   :  { %v4720_v6 = vld [vmem:[%s7237_s21] sm:$0x3]  ;;  %s6135_s21 = smov [#allocation20]  }
0x1ce1   :  { %v4776_v9 = vrot.slane %v4720_v6, %v6746_v5  ;;  %v4784_v37 = vrot.slane %v4720_v6, %v6753_v28  ;;  %s4798_s23 = sshll.u32 %s6135_s21, 4  ;;  %s4799_s23 = int_to_ptr.vmem [resolvable:$true] %s4798_s23 }
0x1ce2   :  { %s6067_s5 = scalar_lea.vmem %s4799_s23, 512  ;;  %p6072_p5 = scmp.lt.s32.totalorder %s4799_s23, %s4799_s23 }
0x1ce3   :  { %p6068_p4 = scmp.ne.s32.totalorder %s4799_s23, %s6067_s5  ;;  %p6073_p6 = scmp.lt.s32.totalorder %s6067_s5, %s6067_s5 }
0x1ce5   :  { %p6074_p7 = por %p6073_p6, %p6072_p5 }
0x1ce7   :  { %p6075_p8 = pnand %p6074_p7, %p6068_p4 }
0x1d5e   :  { %v4747_v45 = vpop.xlane.xlu1 %4746 }
0x1d5f   :  { %v4757_v59 = vmul.f32 0.020833334, %v4747_v45 }
0x1d61   :  { %v4761_v30 = vadd.f32 1e-12, %v4757_v59 }
0x1d62   :  { %v4750_v60 = vpop.xlane.xlu0 %4749  ;;  %v4753_v61 = vpop.xlane.xlu1 %4752 }
0x1d63   :  { %5815 = vrsqrt.f32 %v4761_v30  ;;  %v4758_v32 = vmul.f32 0.020833334, %v4750_v60  ;;  %v4759_v48 = vmul.f32 0.020833334, %v4753_v61 }
0x1d65   :  { %v4762_v62 = vadd.f32 1e-12, %v4758_v32  ;;  %v4763_v63 = vadd.f32 1e-12, %v4759_v48 }
0x1d66   :  { %v4756_v0 = vpop.xlane.xlu0 %4755 }
0x1d67   :  { %5817 = vrsqrt.f32 %v4762_v62  ;;  %v4760_v35 = vmul.f32 0.020833334, %v4756_v0 }
0x1d68   :  { %5819 = vrsqrt.f32 %v4763_v63 }
0x1d69   :  { %v4764_v1 = vadd.f32 1e-12, %v4760_v35 }
0x1d6b   :  { %5821 = vrsqrt.f32 %v4764_v1 }
0x1d70   :  { %v5816_v24 = vpop.eup %5815 }
0x1d71   :  { %v4769_v34 = vmul.f32 %v5816_v24, %v4737_v12 }
0x1d73   :  { %v4777_v16 = vmul.f32 %v4776_v9, %v4769_v34 }
0x1d74   :  { %v5818_v39 = vpop.eup %5817 }
0x1d75   :  { %v5820_v41 = vpop.eup %5819  ;;  %v4770_v42 = vmul.f32 %v5818_v39, %v4738_v20  ;;  %v4785_v18 = vadd.f32 %v4784_v37, %v4777_v16 }
0x1d76   :  { %v4771_v21 = vmul.f32 %v5820_v41, %v4739_v19 }
0x1d77   :  { %v4778_v29 = vmul.f32 %v4776_v9, %v4770_v42  ;;  %4789 = vst.msk [vmem:[#allocation20] sm:$0xff] %vm310_vm2, %v4785_v18 }
0x1d78   :  { %v5822_v31 = vpop.eup %5821  ;;  %v4779_v15 = vmul.f32 %v4776_v9, %v4771_v21 }
0x1d79   :  { %v4772_v36 = vmul.f32 %v5822_v31, %v4740_v22  ;;  %v4786_v8 = vadd.f32 %v4784_v37, %v4778_v29 }
0x1d7a   :  { %v4787_v50 = vadd.f32 %v4784_v37, %v4779_v15 }
0x1d7b   :  { %v4780_v5 = vmul.f32 %v4776_v9, %v4772_v36  ;;  %4790 = vst.msk [vmem:[#allocation20 + $0x8] sm:$0xff] %vm310_vm2, %v4786_v8 }
0x1d7c   :  { %4791 = vst.msk [vmem:[#allocation20 + $0x10] sm:$0xff] %vm310_vm2, %v4787_v50 }
0x1d7d   :  { %v4788_v28 = vadd.f32 %v4784_v37, %v4780_v5 }
0x1d7f   :  { %4792 = vst.msk [vmem:[#allocation20 + $0x18] sm:$0xff] %vm310_vm2, %v4788_v28 }
0x1d80   :  { %6078 = shalt.err (!%p6075_p8)
}
0x1d81   :  { %4804 = dma.vmem_to_hbm [thread:$0]  %s4799_s23, 512, %s7238_s22, [#allocation4], %s6113_s13, %s6113_s13, %s6114_s6  }
0x1d82   :  { %6099 = dma.done.wait [#allocation4], 512  }
0x1d83   :  { %6100 = vsyncadd [#allocation4], 4294966784 }
0x1d84   :  { %6101 = dma.done.wait [#allocation22], 512  }
0x1d85   :  { %6102 = vsyncadd [#allocation22], 4294966784 }
0x1d86   :  { %4823 = vsyncpa [#allocation3], 1 }
0x1d87   :  { %4824 = vsyncpa [#allocation6], 1 }
0x1d88   :  { %4825 = vsyncpa [#allocation9], 1 }
0x1d89   :  { %4826 = vsyncpa [#allocation12], 1 }
0x1d8a   :  { %4827 = vsyncpa [#allocation15], 1 }
0x1d8b   :  { %4828 = vsyncpa [#allocation18], 1 }
0x1d8c   :  { %4829 = vsyncpa [#allocation4], 1 }
0x1d8d   :  { %4830 = vsyncpa [#allocation22], 1 }

// kernel: tpu_custom_call.1
= control target key start
LH: loop header
LB: loop body
LE: loop exit
PB: predicated region body
PF: predicated region fallthrough
CT: control target
= control target key end

     0   :  { %s7216_s0 = inlined_call_operand.vmem [shape: f32[4,8,32], index: 0, kind: input, shape index: {}]   ;;  %s7217_s1 = inlined_call_operand.hbm [shape: f32[4,8,32], index: 1, kind: input, shape index: {}]   ;;  %s7218_s2 = inlined_call_operand.hbm [shape: f32[4,1,8], index: 2, kind: input, shape index: {}]   ;;  %s7219_s3 = inlined_call_operand.hbm [shape: bf16[32,96], index: 3, kind: input, shape index: {}]   ;;  %s7220_s4 = inlined_call_operand.vmem [shape: f32[1,96], index: 4, kind: input, shape index: {}]   ;;  %s7221_s5 = inlined_call_operand.hbm [shape: bf16[32,32], index: 5, kind: input, shape index: {}]   ;;  %s7222_s6 = inlined_call_operand.vmem [shape: f32[1,32], index: 6, kind: input, shape index: {}]   ;;  %s7223_s7 = inlined_call_operand.vmem [shape: f32[2,32], index: 7, kind: input, shape index: {}]   ;;  %s7224_s8 = inlined_call_operand.hbm [shape: bf16[32,32], index: 8, kind: input, shape index: {}]   ;;  %s7225_s9 = inlined_call_operand.vmem [shape: f32[1,32], index: 9, kind: input, shape index: {}]   ;;  %s7226_s10 = inlined_call_operand.hbm [shape: bf16[32,64], index: 10, kind: input, shape index: {}]   ;;  %s7227_s11 = inlined_call_operand.vmem [shape: f32[1,64], index: 11, kind: input, shape index: {}]   ;;  %s7228_s12 = inlined_call_operand.hbm [shape: bf16[32,48], index: 12, kind: input, shape index: {}]   ;;  %s7229_s13 = inlined_call_operand.hbm [shape: f32[1,48], index: 13, kind: input, shape index: {}]   ;;  %s7230_s14 = inlined_call_operand.vmem [shape: f32[2,48], index: 14, kind: input, shape index: {}]   ;;  %s7231_s15 = inlined_call_operand.hbm [shape: bf16[32,48], index: 15, kind: input, shape index: {}]   ;;  %s7232_s16 = inlined_call_operand.hbm [shape: f32[1,48], index: 16, kind: input, shape index: {}]   ;;  %s7233_s17 = inlined_call_operand.vmem [shape: bf16[48,64], index: 17, kind: input, shape index: {}]   ;;  %s7234_s18 = inlined_call_operand.hbm [shape: f32[1,64], index: 18, kind: input, shape index: {}]   ;;  %s7235_s19 = inlined_call_operand.vmem [shape: bf16[64,48], index: 19, kind: input, shape index: {}]   ;;  %s7236_s20 = inlined_call_operand.vmem [shape: f32[1,48], index: 20, kind: input, shape index: {}]   ;;  %s7237_s21 = inlined_call_operand.vmem [shape: f32[2,48], index: 21, kind: input, shape index: {}]   ;;  %s7238_s22 = inlined_call_operand.hbm [shape: f32[4,8,48], index: 22, kind: output, shape index: {0}]   ;;  %s7239_s23 = inlined_call_operand.hbm [shape: f32[4,8,48], index: 23, kind: output, shape index: {1}]  }
   0x1   :  { %7241 = sst [smem:[#allocation31_spill]] %s7216_s0 }
   0x2   :  { %7242 = sst [smem:[#allocation32_spill]] %s7217_s1 }
   0x3   :  { %7243 = sst [smem:[#allocation33_spill]] %s7218_s2 }
   0x4   :  { %7244 = sst [smem:[#allocation34_spill]] %s7219_s3 }
   0x5   :  { %7245 = sst [smem:[#allocation35_spill]] %s7220_s4 }
   0x6   :  { %7246 = sst [smem:[#allocation36_spill]] %s7221_s5 }
   0x7   :  { %7247 = sst [smem:[#allocation37_spill]] %s7222_s6 }
   0x8   :  { %7248 = sst [smem:[#allocation38_spill]] %s7223_s7 }
   0x9   :  { %29 = vsyncpa [#allocation3], 0 }
   0xa   :  { %30 = vsyncpa [#allocation6], 0 }
   0xb   :  { %31 = vsyncpa [#allocation9], 0 }
   0xc   :  { %32 = vsyncpa [#allocation12], 0 }
   0xd   :  { %33 = vsyncpa [#allocation15], 0 }
   0xe   :  { %34 = vsyncpa [#allocation18], 0 }
   0xf   :  { %35 = vsyncpa [#allocation4], 0 }
  0x10   :  { %36 = vsyncpa [#allocation22], 0  ;;  %s6103_s4 = smov [#allocation5]  }
  0x11   :  { %s56_s30 = sshll.u32 %s6103_s4, 4  ;;  %s57_s30 = int_to_ptr.vmem [resolvable:$true] %s56_s30 }
  0x12   :  { %s5835_s24 = scalar_lea.vmem %s57_s30, 64  ;;  %p5840_p1 = scmp.lt.s32.totalorder %s57_s30, %s57_s30 }
  0x13   :  { %p5836_p0 = scmp.ne.s32.totalorder %s57_s30, %s5835_s24  ;;  %p5841_p2 = scmp.lt.s32.totalorder %s5835_s24, %s5835_s24 }
  0x15   :  { %p5842_p3 = por %p5841_p2, %p5840_p1 }
  0x17   :  { %p5843_p4 = pnand %p5842_p3, %p5836_p0 }
  0x19   :  { %5846 = shalt.err (!%p5843_p4)
}
  0x1a   :  { %s6104_s25 = smov 16   ;;  %s6105_s5 = smov 1  }
  0x1b   :  { %s7249_s2 = sld [smem:[#allocation33_spill]]  ;;  %s6106_s6 = smov [#allocation8]  }
  0x1c   :  { %s82_s27 = sshll.u32 %s6106_s6, 4  ;;  %s6107_s7 = smov [#allocation11]   ;;  %s83_s27 = int_to_ptr.vmem [resolvable:$true] %s82_s27 }
  0x1d   :  { %s112_s28 = sshll.u32 %s6107_s7, 4  ;;  %s5855_s29 = scalar_lea.vmem %s83_s27, 256  ;;  %s113_s28 = int_to_ptr.vmem [resolvable:$true] %s112_s28 }
  0x1e   :  { %p5856_p5 = scmp.ne.s32.totalorder %s83_s27, %s5855_s29  ;;  %p5860_p6 = scmp.lt.s32.totalorder %s83_s27, %s83_s27 }
  0x1f   :  { %p5861_p7 = scmp.lt.s32.totalorder %s5855_s29, %s5855_s29 }
  0x21   :  { %62 = dma.hbm_to_vmem [thread:$0]  %s7249_s2, 64, %s57_s30, [#allocation6], %s6104_s25, %s6104_s25, %s6105_s5  }
  0x22   :  { %p5862_p8 = por %p5861_p7, %p5860_p6 }
  0x24   :  { %p5863_p9 = pnand %p5862_p8, %p5856_p5 }
  0x26   :  { %5866 = shalt.err (!%p5863_p9)
}
  0x27   :  { %s6108_s3 = smov 64   ;;  %s6109_s0 = smov 4  }
  0x28   :  { %s7250_s30 = sld [smem:[#allocation36_spill]]  ;;  %s5875_s5 = scalar_lea.vmem %s113_s28, 256 }
  0x29   :  { %p5876_p10 = scmp.ne.s32.totalorder %s113_s28, %s5875_s5  ;;  %p5880_p11 = scmp.lt.s32.totalorder %s113_s28, %s113_s28 }
  0x2a   :  { %p5881_p12 = scmp.lt.s32.totalorder %s5875_s5, %s5875_s5 }
  0x2c   :  { %p5882_p13 = por %p5881_p12, %p5880_p11 }
  0x2e   :  { %88 = dma.hbm_to_vmem [thread:$0]  %s7250_s30, 256, %s83_s27, [#allocation9], %s6108_s3, %s6108_s3, %s6109_s0  }
  0x2f   :  { %p5883_p0 = pnand %p5882_p13, %p5876_p10 }
  0x31   :  { %5886 = shalt.err (!%p5883_p0)
}
  0x32   :  { %118 = dma.hbm_to_vmem [thread:$0]  %s7226_s10, 256, %s113_s28, [#allocation12], %s6108_s3, %s6108_s3, %s6109_s0  }
  0x33   :  { %s6110_s2 = smov [#allocation14]   ;;  %s6111_s7 = smov [#allocation17]  }
  0x34   :  { %s139_s6 = sshll.u32 %s6110_s2, 4  ;;  %s163_s27 = sshll.u32 %s6111_s7, 4  ;;  %s140_s6 = int_to_ptr.vmem [resolvable:$true] %s139_s6  ;;  %s164_s27 = int_to_ptr.vmem [resolvable:$true] %s163_s27 }
  0x35   :  { %s5895_s29 = scalar_lea.vmem %s140_s6, 16  ;;  %s5899_s4 = scalar_lea.vmem %s140_s6, 32 }
  0x36   :  { %p5896_p1 = scmp.ne.s32.totalorder %s140_s6, %s5895_s29  ;;  %p5900_p2 = scmp.lt.s32.totalorder %s140_s6, %s140_s6 }
  0x37   :  { %p5901_p3 = scmp.lt.s32.totalorder %s5899_s4, %s5895_s29 }
  0x39   :  { %p5902_p4 = por %p5901_p3, %p5900_p2 }
  0x3b   :  { %p5903_p5 = pnand %p5902_p4, %p5896_p1 }
  0x3d   :  { %5906 = shalt.err (!%p5903_p5)
}
  0x3e   :  { %142 = dma.hbm_to_vmem [thread:$0]  %s7229_s13, 16, %s140_s6, [#allocation15]  }
  0x3f   :  { %s5915_s5 = scalar_lea.vmem %s164_s27, 16  ;;  %s5919_s10 = scalar_lea.vmem %s164_s27, 32 }
  0x40   :  { %p5916_p6 = scmp.ne.s32.totalorder %s164_s27, %s5915_s5  ;;  %p5920_p7 = scmp.lt.s32.totalorder %s164_s27, %s164_s27 }
  0x41   :  { %p5921_p8 = scmp.lt.s32.totalorder %s5919_s10, %s5915_s5 }
  0x43   :  { %p5922_p9 = por %p5921_p8, %p5920_p7 }
  0x45   :  { %p5923_p10 = pnand %p5922_p9, %p5916_p6 }
  0x47   :  { %5926 = shalt.err (!%p5923_p10)
}
  0x48   :  { %166 = dma.hbm_to_vmem [thread:$0]  %s7232_s16, 16, %s164_s27, [#allocation18]  }
  0x49   :  { %s6112_s26 = smov [#allocation2]  }
  0x4a   :  { %s44_s2 = sshll.u32 %s6112_s26, 4  ;;  %s45_s2 = int_to_ptr.vmem [resolvable:$true] %s44_s2 }
  0x4b   :  { %s5935_s7 = scalar_lea.vmem %s45_s2, 512  ;;  %p5940_p12 = scmp.lt.s32.totalorder %s45_s2, %s45_s2 }
  0x4c   :  { %p5936_p11 = scmp.ne.s32.totalorder %s45_s2, %s5935_s7  ;;  %p5941_p13 = scmp.lt.s32.totalorder %s5935_s7, %s5935_s7 }
  0x4e   :  { %p5942_p0 = por %p5941_p13, %p5940_p12 }
  0x50   :  { %p5943_p1 = pnand %p5942_p0, %p5936_p11 }
  0x52   :  { %5946 = shalt.err (!%p5943_p1)
}
  0x53   :  { %s6113_s13 = smov 128   ;;  %s6114_s6 = smov 8  }
  0x54   :  { %s7251_s24 = sld [smem:[#allocation32_spill]]  ;;  %s6115_s16 = smov [#allocation7]  }
  0x55   :  { %s68_s27 = sshll.u32 %s6115_s16, 4  ;;  %s6116_s30 = smov [#allocation10]   ;;  %s69_s27 = int_to_ptr.vmem [resolvable:$true] %s68_s27 }
  0x56   :  { %s98_s5 = sshll.u32 %s6116_s30, 4  ;;  %s5955_s10 = scalar_lea.vmem %s69_s27, 256  ;;  %s99_s5 = int_to_ptr.vmem [resolvable:$true] %s98_s5 }
  0x57   :  { %p5956_p2 = scmp.ne.s32.totalorder %s69_s27, %s5955_s10  ;;  %p5960_p3 = scmp.lt.s32.totalorder %s69_s27, %s69_s27 }
  0x58   :  { %p5961_p4 = scmp.lt.s32.totalorder %s5955_s10, %s5955_s10 }
  0x5a   :  { %50 = dma.hbm_to_vmem [thread:$0]  %s7251_s24, 512, %s45_s2, [#allocation3], %s6113_s13, %s6113_s13, %s6114_s6  }
  0x5b   :  { %p5962_p5 = por %p5961_p4, %p5960_p3 }
  0x5d   :  { %p5963_p6 = pnand %p5962_p5, %p5956_p2 }
  0x5f   :  { %5966 = shalt.err (!%p5963_p6)
}
  0x60   :  { %s7252_s26 = sld [smem:[#allocation34_spill]]  ;;  %s5975_s2 = scalar_lea.vmem %s99_s5, 256 }
  0x61   :  { %p5976_p7 = scmp.ne.s32.totalorder %s99_s5, %s5975_s2  ;;  %p5980_p8 = scmp.lt.s32.totalorder %s99_s5, %s99_s5 }
  0x62   :  { %p5981_p9 = scmp.lt.s32.totalorder %s5975_s2, %s5975_s2 }
  0x64   :  { %p5982_p10 = por %p5981_p9, %p5980_p8 }
  0x66   :  { %74 = dma.hbm_to_vmem [thread:$0]  %s7252_s26, 256, %s69_s27, [#allocation6], %s6108_s3, %s6108_s3, %s6109_s0  }
  0x67   :  { %p5983_p11 = pnand %p5982_p10, %p5976_p7 }
  0x69   :  { %5986 = shalt.err (!%p5983_p11)
}
  0x6a   :  { %104 = dma.hbm_to_vmem [thread:$0]  %s7224_s8, 256, %s99_s5, [#allocation9], %s6108_s3, %s6108_s3, %s6109_s0  }
  0x6b   :  { %s6117_s4 = smov [#allocation13]   ;;  %s6118_s16 = smov [#allocation16]  }
  0x6c   :  { %s126_s24 = sshll.u32 %s6117_s4, 4  ;;  %s150_s30 = sshll.u32 %s6118_s16, 4  ;;  %s127_s24 = int_to_ptr.vmem [resolvable:$true] %s126_s24  ;;  %s151_s30 = int_to_ptr.vmem [resolvable:$true] %s150_s30 }
  0x6d   :  { %s5995_s27 = scalar_lea.vmem %s127_s24, 256  ;;  %p6000_p13 = scmp.lt.s32.totalorder %s127_s24, %s127_s24 }
  0x6e   :  { %p5996_p12 = scmp.ne.s32.totalorder %s127_s24, %s5995_s27  ;;  %p6001_p0 = scmp.lt.s32.totalorder %s5995_s27, %s5995_s27 }
  0x70   :  { %p6002_p1 = por %p6001_p0, %p6000_p13 }
  0x72   :  { %p6003_p2 = pnand %p6002_p1, %p5996_p12 }
  0x74   :  { %6006 = shalt.err (!%p6003_p2)
}
  0x75   :  { %132 = dma.hbm_to_vmem [thread:$0]  %s7228_s12, 256, %s127_s24, [#allocation12], %s6108_s3, %s6108_s3, %s6109_s0  }
  0x76   :  { %s6015_s8 = scalar_lea.vmem %s151_s30, 256  ;;  %p6020_p4 = scmp.lt.s32.totalorder %s151_s30, %s151_s30 }
  0x77   :  { %p6016_p3 = scmp.ne.s32.totalorder %s151_s30, %s6015_s8  ;;  %p6021_p5 = scmp.lt.s32.totalorder %s6015_s8, %s6015_s8 }
  0x79   :  { %p6022_p6 = por %p6021_p5, %p6020_p4 }
  0x7b   :  { %p6023_p7 = pnand %p6022_p6, %p6016_p3 }
  0x7d   :  { %6026 = shalt.err (!%p6023_p7)
}
  0x7e   :  { %156 = dma.hbm_to_vmem [thread:$0]  %s7231_s15, 256, %s151_s30, [#allocation15], %s6108_s3, %s6108_s3, %s6109_s0  }
  0x7f   :  { %s6119_s26 = smov [#allocation19]  }
  0x80   :  { %s175_s2 = sshll.u32 %s6119_s26, 4  ;;  %s176_s2 = int_to_ptr.vmem [resolvable:$true] %s175_s2 }
  0x81   :  { %s6035_s7 = scalar_lea.vmem %s176_s2, 16  ;;  %s6039_s12 = scalar_lea.vmem %s176_s2, 32 }
  0x82   :  { %p6036_p8 = scmp.ne.s32.totalorder %s176_s2, %s6035_s7  ;;  %p6040_p9 = scmp.lt.s32.totalorder %s176_s2, %s176_s2 }
  0x83   :  { %p6041_p10 = scmp.lt.s32.totalorder %s6039_s12, %s6035_s7 }
  0x85   :  { %p6042_p11 = por %p6041_p10, %p6040_p9 }
  0x87   :  { %p6043_p12 = pnand %p6042_p11, %p6036_p8 }
  0x89   :  { %6046 = shalt.err (!%p6043_p12)
}
  0x8a   :  { %178 = dma.hbm_to_vmem [thread:$0]  %s7234_s18, 16, %s176_s2, [#allocation18]  }
  0x8b   :  { %6087 = dma.done.wait [#allocation3], 512  }
  0x8c   :  { %6088 = vsyncadd [#allocation3], 4294966784 }
  0x8d   :  { %6089 = dma.done.wait [#allocation6], 320  }
  0x8e   :  { %6090 = vsyncadd [#allocation6], 4294966976 }
  0x8f   :  { %6091 = dma.done.wait [#allocation9], 512  }
  0x90   :  { %6092 = vsyncadd [#allocation9], 4294966784 }
  0x91   :  { %6093 = dma.done.wait [#allocation12], 512  }
  0x92   :  { %6094 = vsyncadd [#allocation12], 4294966784 }
  0x93   :  { %6095 = dma.done.wait [#allocation15], 272  }
  0x94   :  { %6096 = vsyncadd [#allocation15], 4294967024 }
  0x95   :  { %6097 = dma.done.wait [#allocation18], 32  }
  0x96   :  { %6098 = vsyncadd [#allocation18], 4294967264  ;;  %v5652_v0 = vld [vmem:[#allocation7 + $0x8] sm:$0xff]   ;;  %v5653_v1 = vld [vmem:[#allocation7] sm:$0xff]   ;;  %s7253_s24 = sld [smem:[#allocation31_spill]]  ;;  %vm254_vm0 = vcmask 261120   ;;  %v315_v47 = vlaneseq }
  0x97   :  { %5113 = vmatprep.subr.bf16.mxu1 %v5652_v0  ;;  %v5654_v8 = vld [vmem:[#allocation16 + $0x8] sm:$0xff]   ;;  %v5655_v9 = vld [vmem:[#allocation16] sm:$0xff]   ;;  %v224_v11 = vld [vmem:[#allocation2 + $0x8] sm:$0xff]  ;;  %v6120_v16 = vmov 0.0   ;;  %s7254_s1 = sld [smem:[#allocation35_spill]]  ;;  %vm6121_vm1 = vmmov 0  }
  0x98   :  { %5114 = vmatpush3.bf16.msra.mxu1 %v5652_v0  ;;  %v223_v10 = vld [vmem:[#allocation2] sm:$0xff]  ;;  %5105 = vmatprep.subr.bf16.mxu0 %v5654_v8  ;;  %v225_v13 = vld [vmem:[#allocation2 + $0x10] sm:$0xff]  ;;  %v226_v14 = vld [vmem:[#allocation2 + $0x18] sm:$0xff]  ;;  %s6122_s26 = smov 96   ;;  %vm310_vm2 = vcmask 392192   ;;  %vm434_vm3 = vcmask 64512  }
  0x99   :  { %5115 = vmatprep.subr.bf16.mxu1 %v5653_v1  ;;  %v6326_v12 = vpack.c.bf16 %v224_v11, %v223_v10  ;;  %5106 = vmatpush3.bf16.msra.mxu0 %v5654_v8  ;;  %v6330_v15 = vpack.c.bf16 %v226_v14, %v225_v13  ;;  %v4831_v30 = vld [vmem:[#allocation17] ss:$0 sm:$0xff]  ;;  %v6387_v48 = vshrl.u32 %v315_v47, 7  ;;  %v318_v49 = vand.u32 127, %v315_v47  ;;  %s6124_s2 = smov 88   ;;  %s6126_s7 = smov 56  }
  0x9a   :  { %5107 = vmatprep.subr.bf16.mxu0 %v5655_v9  ;;  %v6123_v50 = vmov -10000.0   ;;  %vm681_vm5 = vcmask 1043456   ;;  %s6127_s12 = smov 80   ;;  %s6128_s29 = smov 112   ;;  %vm2241_vm6 = vcmask 130048   ;;  %vm2246_vm7 = vcmask 195584  }
  0x9b   :  { %5109 = vmatprep.mubr.msk.bf16.mxu0 %vm254_vm0, %v6326_v12  ;;  %vm319_vm4 = vcmp.le.s32.totalorder %v318_v49, %v6387_v48  ;;  %s6129_s4 = smov 48   ;;  %s6130_s15 = smov 72   ;;  %vm4660_vm8 = vcmask 523264  }
  0x9c   :  { %v219_v2 = vld [vmem:[%s7253_s24] sm:$0xff]  ;;  %v220_v3 = vld [vmem:[%s7253_s24 + $0x8] sm:$0xff]  ;;  %v221_v4 = vld [vmem:[%s7253_s24 + $0x10] sm:$0xff]  ;;  %5116 = vmatpush3.bf16.msra.mxu1 %v5653_v1  ;;  %v6390_v51 = vsel %vm319_vm4, 0.0, %v6123_v50  ;;  %s6131_s0 = smov 104   ;;  %s6132_s18 = smov 40  }
  0x9d   :  { %v227_v5 = vpack.c.bf16 %v220_v3, %v219_v2  ;;  %v222_v6 = vld [vmem:[%s7253_s24 + $0x18] sm:$0xff]  ;;  %5108 = vmatpush3.bf16.msra.mxu0 %v5655_v9  ;;  %5127 = vmatprep.subr.bf16.mxu1 %v6120_v16  ;;  %v4840_v17 = vld [vmem:[%s7254_s1] ss:$0 sm:$0xff]  ;;  %s6133_s16 = smov 24   ;;  %s7255_s10 = sld [smem:[#allocation37_spill]] }
  0x9e   :  { %v228_v7 = vpack.c.bf16 %v222_v6, %v221_v4  ;;  %5121 = vmatprep.subr.bf16.mxu0 %v6120_v16 }
  0x9f   :  { %5117 = vmatprep.mubr.msk.bf16.mxu1 %vm254_vm0, %v227_v5 }
  0xa0   :  { %5118 = vmatmul.mubr.msk.bf16.vlgmr.msra.gmra.mxu1 %vm254_vm0, %v228_v7  ;;  %5110 = vmatmul.mubr.msk.bf16.vlgmr.msra.gmra.mxu0 %vm254_vm0, %v6330_v15 }
  0xa1   :  { %5123 = vmatprep.mubr.msk.bf16.mxu0 %vm6121_vm1, %v6120_v16  ;;  %5129 = vmatprep.mubr.msk.bf16.mxu1 %vm6121_vm1, %v6120_v16 }
 0x160   :  { %v5119_v18 = vpop.f32.mrf.mxu1  ;;  %v5111_v31 = vpop.f32.mrf.mxu0 }
 0x161   :  { %v421_v19 = vadd.f32 %v5119_v18, %v4840_v17  ;;  %v304_v32 = vadd.f32 %v5111_v31, %v4831_v30 }
 0x162   :  { %v412_v20 = vpop.f32.mrf.mxu1  ;;  %v295_v33 = vpop.f32.mrf.mxu0 }
 0x163   :  { %v6343_v21 = vpack.c.bf16 %v421_v19, %v421_v19  ;;  %v413_v22 = vadd.f32 %v4840_v17, %v412_v20  ;;  %313 = vst.msk [vmem:[#allocation21 + $0x10] sm:$0xff] %vm310_vm2, %v304_v32  ;;  %v296_v34 = vadd.f32 %v4831_v30, %v295_v33 }
 0x164   :  { %v5120_v23 = vpop.f32.mrf.mxu1  ;;  %v5112_v35 = vpop.f32.mrf.mxu0 }
 0x165   :  { %v6345_v24 = vpack.c.bf16 %v413_v22, %v413_v22  ;;  %v424_v25 = vadd.f32 %v5120_v23, %v4840_v17  ;;  %531 = vrot.lane.b32.xlu1 %v6343_v21, %s6122_s26  ;;  %311 = vst.msk [vmem:[#allocation21] sm:$0xff] %vm310_vm2, %v296_v34  ;;  %v307_v36 = vadd.f32 %v5112_v35, %v4831_v30 }
 0x166   :  { %v415_v26 = vpop.f32.mrf.mxu1  ;;  %v298_v37 = vpop.f32.mrf.mxu0 }
 0x167   :  { %v6349_v27 = vpack.c.bf16 %v424_v25, %v424_v25  ;;  %v416_v28 = vadd.f32 %v4840_v17, %v415_v26  ;;  %432 = vrot.lane.b32.xlu0 %v6345_v24, %s6122_s26  ;;  %314 = vst.msk [vmem:[#allocation21 + $0x18] sm:$0xff] %vm310_vm2, %v307_v36  ;;  %v299_v38 = vadd.f32 %v4831_v30, %v298_v37 }
 0x169   :  { %v6353_v29 = vpack.c.bf16 %v416_v28, %v416_v28  ;;  %580 = vrot.lane.b32.xlu1 %v6349_v27, %s6122_s26  ;;  %312 = vst.msk [vmem:[#allocation21 + $0x8] sm:$0xff] %vm310_vm2, %v299_v38 }
 0x16b   :  { %482 = vrot.lane.b32.xlu0 %v6353_v29, %s6122_s26 }
 0x1d7   :  { %v532_v41 = vpop.permute.xlu1 %531 }
 0x1d8   :  { %v537_v44 = vsel %vm434_vm3, %v532_v41, 0 }
 0x1d9   :  { %v433_v39 = vpop.permute.xlu0 %432 }
 0x1da   :  { %v439_v40 = vsel %vm434_vm3, %v433_v39, 0 }
 0x1db   :  { %5122 = vmatpush3.bf16.xpose.msra.mxu0 %v439_v40  ;;  %v581_v45 = vpop.permute.xlu1 %580 }
 0x1dc   :  { %5133 = vmatprep.subr.bf16.mxu0 %v6120_v16  ;;  %v586_v46 = vsel %vm434_vm3, %v581_v45, 0 }
 0x1dd   :  { %v483_v42 = vpop.permute.xlu0 %482 }
 0x1de   :  { %v488_v43 = vsel %vm434_vm3, %v483_v42, 0 }
 0x1df   :  { %5128 = vmatpush3.bf16.xpose.msra.mxu1 %v488_v43 }
 0x1e0   :  { %5139 = vmatprep.subr.bf16.mxu1 %v6120_v16 }
 0x1e2   :  { %5124 = vmatmul.mubr.msk.bf16.vlgmr.msra.gmra.mxu0 %vm434_vm3, %v6345_v24 }
 0x1e3   :  { %5134 = vmatpush3.bf16.xpose.msra.mxu0 %v537_v44  ;;  %5135 = vmatprep.mubr.msk.bf16.mxu0 %vm6121_vm1, %v6120_v16 }
 0x1e4   :  { %5145 = vmatprep.subr.bf16.mxu0 %v6120_v16 }
 0x1e6   :  { %5130 = vmatmul.mubr.msk.bf16.vlgmr.msra.gmra.mxu1 %vm434_vm3, %v6353_v29 }
 0x1e7   :  { %5140 = vmatpush3.bf16.xpose.msra.mxu1 %v586_v46  ;;  %5141 = vmatprep.mubr.msk.bf16.mxu1 %vm6121_vm1, %v6120_v16 }
 0x1e8   :  { %5151 = vmatprep.subr.bf16.mxu1 %v6120_v16 }
 0x1ea   :  { %5136 = vmatmul.mubr.msk.bf16.vlgmr.msra.gmra.mxu0 %vm434_vm3, %v6343_v21 }
 0x1eb   :  { %5147 = vmatprep.mubr.msk.bf16.mxu0 %vm6121_vm1, %v6120_v16 }
 0x1ee   :  { %5142 = vmatmul.mubr.msk.bf16.vlgmr.msra.gmra.mxu1 %vm434_vm3, %v6349_v27 }
 0x1ef   :  { %5153 = vmatprep.mubr.msk.bf16.mxu1 %vm6121_vm1, %v6120_v16 }
 0x2a2   :  { %v475_v52 = vpop.f32.mrf.mxu0 }
 0x2a3   :  { %v476_v53 = vadd.f32 %v475_v52, %v6390_v51 }
 0x2a4   :  { %v5125_v54 = vpop.f32.mrf.mxu0 }
 0x2a5   :  { %v628_v55 = vsel %vm434_vm3, %v476_v53, -inf }
 0x2a6   :  { %629 = vmax.xlane.f32.xlu0 %v628_v55  ;;  %v478_v56 = vpop.f32.mrf.mxu0  ;;  %v524_v57 = vpop.f32.mrf.mxu1 }
 0x2a7   :  { %v525_v58 = vadd.f32 %v524_v57, %v6390_v51 }
 0x2a8   :  { %v5126_v59 = vpop.f32.mrf.mxu0  ;;  %v5131_v60 = vpop.f32.mrf.mxu1 }
 0x2a9   :  { %v631_v61 = vsel %vm434_vm3, %v525_v58, -inf }
 0x2aa   :  { %v573_v62 = vpop.f32.mrf.mxu0  ;;  %632 = vmax.xlane.f32.xlu1 %v631_v61  ;;  %v527_v63 = vpop.f32.mrf.mxu1 }
 0x2ab   :  { %v574_v0 = vadd.f32 %v573_v62, %v6390_v51 }
 0x2ac   :  { %v5132_v1 = vpop.f32.mrf.mxu1  ;;  %v5137_v2 = vpop.f32.mrf.mxu0 }
 0x2ad   :  { %v634_v3 = vsel %vm434_vm3, %v574_v0, -inf }
 0x2ae   :  { %635 = vmax.xlane.f32.xlu0 %v634_v3  ;;  %v576_v4 = vpop.f32.mrf.mxu0  ;;  %v622_v5 = vpop.f32.mrf.mxu1 }
 0x2af   :  { %v623_v6 = vadd.f32 %v622_v5, %v6390_v51 }
 0x2b0   :  { %v5138_v7 = vpop.f32.mrf.mxu0  ;;  %v5143_v8 = vpop.f32.mrf.mxu1 }
 0x2b1   :  { %v637_v9 = vsel %vm434_vm3, %v623_v6, -inf }
 0x2b2   :  { %638 = vmax.xlane.f32.xlu0 %v637_v9  ;;  %v625_v10 = vpop.f32.mrf.mxu1 }
 0x2b4   :  { %v5144_v11 = vpop.f32.mrf.mxu1 }
 0x2bb   :  { %676 = vrot.lane.b32.xlu1 %v6345_v24, %s6108_s3 }
 0x32f   :  { %v630_v13 = vpop.xlane.xlu0 %629 }
 0x330   :  { %v640_v14 = vsub.f32 %v476_v53, %v630_v13 }
 0x332   :  { %v644_v17 = vmul.f32 1.442695, %v640_v14 }
 0x333   :  { %v633_v18 = vpop.xlane.xlu1 %632 }
 0x334   :  { %5671 = vpow2.f32 %v644_v17  ;;  %v641_v19 = vsub.f32 %v525_v58, %v633_v18 }
 0x336   :  { %v646_v20 = vmul.f32 1.442695, %v641_v19 }
 0x337   :  { %v677_v22 = vpop.permute.xlu1 %676  ;;  %v636_v31 = vpop.xlane.xlu0 %635 }
 0x338   :  { %5673 = vpow2.f32 %v646_v20  ;;  %v683_v23 = vsel %vm681_vm5, %v677_v22, 0  ;;  %v642_v33 = vsub.f32 %v574_v0, %v636_v31 }
 0x339   :  { %5146 = vmatpush3.bf16.msra.mxu0 %v683_v23 }
 0x33a   :  { %5157 = vmatprep.subr.bf16.mxu0 %v6120_v16  ;;  %v648_v35 = vmul.f32 1.442695, %v642_v33 }
 0x33b   :  { %v639_v32 = vpop.xlane.xlu0 %638 }
 0x33c   :  { %v643_v34 = vsub.f32 %v623_v6, %v639_v32  ;;  %5675 = vpow2.f32 %v648_v35 }
 0x33e   :  { %v650_v36 = vmul.f32 1.442695, %v643_v34 }
 0x340   :  { %5677 = vpow2.f32 %v650_v36 }
 0x341   :  { %v5672_v25 = vpop.eup %5671 }
 0x342   :  { %v652_v26 = vsel %vm434_vm3, %v5672_v25, 0.0 }
 0x343   :  { %653 = vadd.xlane.f32.xlu1 %v652_v26 }
 0x345   :  { %v5674_v28 = vpop.eup %5673 }
 0x346   :  { %v655_v30 = vsel %vm434_vm3, %v5674_v28, 0.0 }
 0x347   :  { %656 = vadd.xlane.f32.xlu0 %v655_v30 }
 0x349   :  { %v5676_v37 = vpop.eup %5675 }
 0x34a   :  { %v658_v39 = vsel %vm434_vm3, %v5676_v37, 0.0 }
 0x34d   :  { %v5678_v38 = vpop.eup %5677 }
 0x34e   :  { %v661_v40 = vsel %vm434_vm3, %v5678_v38, 0.0 }
 0x354   :  { %773 = vrot.lane.b32.xlu1 %v6343_v21, %s6108_s3 }
 0x358   :  { %821 = vrot.lane.b32.xlu1 %v6349_v27, %s6108_s3 }
 0x35d   :  { %725 = vrot.lane.b32.xlu0 %v6353_v29, %s6108_s3  ;;  %s6125_s3 = smov 120  }
 0x37c   :  { %659 = vadd.xlane.f32.xlu1 %v658_v39  ;;  %662 = vadd.xlane.f32.xlu0 %v661_v40 }
 0x38d   :  { %921 = vrot.lane.b32.xlu1 %v6353_v29, %s6124_s2 }
 0x391   :  { %919 = vrot.lane.b32.xlu1 %v6353_v29, %s6125_s3 }
 0x392   :  { %871 = vrot.lane.b32.xlu0 %v6345_v24, %s6124_s2 }
 0x395   :  { %1021 = vrot.lane.b32.xlu1 %v6349_v27, %s6124_s2 }
 0x396   :  { %869 = vrot.lane.b32.xlu0 %v6345_v24, %s6125_s3 }
 0x399   :  { %1019 = vrot.lane.b32.xlu1 %v6349_v27, %s6125_s3 }
 0x39a   :  { %971 = vrot.lane.b32.xlu0 %v6343_v21, %s6124_s2 }
 0x39e   :  { %969 = vrot.lane.b32.xlu0 %v6343_v21, %s6125_s3 }
 0x3cc   :  { %v654_v41 = vpop.xlane.xlu1 %653 }
 0x3cd   :  { %5679 = vrcp.f32 %v654_v41 }
 0x3d0   :  { %v657_v42 = vpop.xlane.xlu0 %656  ;;  %v774_v46 = vpop.permute.xlu1 %773 }
 0x3d1   :  { %5681 = vrcp.f32 %v657_v42  ;;  %v779_v52 = vsel %vm681_vm5, %v774_v46, 0 }
 0x3d4   :  { %v726_v43 = vpop.permute.xlu0 %725  ;;  %v822_v54 = vpop.permute.xlu1 %821 }
 0x3d5   :  { %v731_v44 = vsel %vm681_vm5, %v726_v43, 0  ;;  %v827_v56 = vsel %vm681_vm5, %v822_v54, 0 }
 0x3d6   :  { %5152 = vmatpush3.bf16.msra.mxu1 %v731_v44 }
 0x3d7   :  { %5163 = vmatprep.subr.bf16.mxu1 %v6120_v16 }
 0x3da   :  { %v5680_v45 = vpop.eup %5679 }
 0x3db   :  { %v668_v47 = vmul.f32 %v5680_v45, %v5672_v25 }
 0x3dd   :  { %v672_v49 = vpack.c.bf16 %v668_v47, %v668_v47 }
 0x3de   :  { %v5682_v50 = vpop.eup %5681 }
 0x3df   :  { %5148 = vmatmul.mubr.msk.bf16.vlgmr.msra.gmra.mxu0 %vm434_vm3, %v672_v49  ;;  %v669_v53 = vmul.f32 %v5682_v50, %v5674_v28 }
 0x3e0   :  { %5158 = vmatpush3.bf16.msra.mxu0 %v779_v52  ;;  %5159 = vmatprep.mubr.msk.bf16.mxu0 %vm6121_vm1, %v6120_v16 }
 0x3e1   :  { %v673_v55 = vpack.c.bf16 %v669_v53, %v669_v53  ;;  %5169 = vmatprep.subr.bf16.mxu0 %v6120_v16 }
 0x3e3   :  { %5154 = vmatmul.mubr.msk.bf16.vlgmr.msra.gmra.mxu1 %vm434_vm3, %v673_v55 }
 0x3e4   :  { %5164 = vmatpush3.bf16.msra.mxu1 %v827_v56  ;;  %5165 = vmatprep.mubr.msk.bf16.mxu1 %vm6121_vm1, %v6120_v16 }
 0x3e5   :  { %5175 = vmatprep.subr.bf16.mxu1 %v6120_v16 }
 0x405   :  { %v660_v57 = vpop.xlane.xlu1 %659  ;;  %v663_v58 = vpop.xlane.xlu0 %662 }
 0x406   :  { %5683 = vrcp.f32 %v660_v57 }
 0x407   :  { %5685 = vrcp.f32 %v663_v58 }
 0x409   :  { %v872_v59 = vpop.permute.xlu0 %871  ;;  %v922_v60 = vpop.permute.xlu1 %921 }
 0x40a   :  { %v877_v4 = vsel %vm434_vm3, %v872_v59, 0  ;;  %v927_v6 = vsel %vm434_vm3, %v922_v60, 0 }
 0x40d   :  { %v870_v2 = vpop.permute.xlu0 %869  ;;  %v920_v5 = vpop.permute.xlu1 %919 }
 0x411   :  { %v972_v7 = vpop.permute.xlu0 %971  ;;  %v1022_v8 = vpop.permute.xlu1 %1021 }
 0x412   :  { %v977_v9 = vsel %vm434_vm3, %v972_v7, 0  ;;  %v1027_v10 = vsel %vm434_vm3, %v1022_v8, 0 }
 0x413   :  { %v5684_v61 = vpop.eup %5683 }
 0x414   :  { %v5686_v62 = vpop.eup %5685  ;;  %v670_v63 = vmul.f32 %v5684_v61, %v5676_v37 }
 0x415   :  { %v671_v0 = vmul.f32 %v5686_v62, %v5678_v38  ;;  %v970_v11 = vpop.permute.xlu0 %969  ;;  %v1020_v13 = vpop.permute.xlu1 %1019 }
 0x416   :  { %v674_v1 = vpack.c.bf16 %v670_v63, %v670_v63 }
 0x417   :  { %v675_v3 = vpack.c.bf16 %v671_v0, %v671_v0 }
 0x418   :  { %5160 = vmatmul.mubr.msk.bf16.vlgmr.msra.gmra.mxu0 %vm434_vm3, %v674_v1 }
 0x419   :  { %5166 = vmatmul.mubr.msk.bf16.vlgmr.msra.gmra.mxu1 %vm434_vm3, %v675_v3  ;;  %5170 = vmatpush3.bf16.xpose.msra.mxu0 %v877_v4 }
 0x41a   :  { %5176 = vmatpush3.bf16.xpose.msra.mxu1 %v927_v6  ;;  %5171 = vmatprep.mubr.msk.bf16.mxu0 %vm6121_vm1, %v6120_v16 }
 0x41b   :  { %5177 = vmatprep.mubr.msk.bf16.mxu1 %vm6121_vm1, %v6120_v16  ;;  %5181 = vmatprep.subr.bf16.mxu0 %v6120_v16 }
 0x41c   :  { %5187 = vmatprep.subr.bf16.mxu1 %v6120_v16 }
 0x420   :  { %5172 = vmatmul.mubr.msk.bf16.vlgmr.msra.gmra.mxu0 %vm434_vm3, %v870_v2 }
 0x421   :  { %5178 = vmatmul.mubr.msk.bf16.vlgmr.msra.gmra.mxu1 %vm434_vm3, %v920_v5  ;;  %5182 = vmatpush3.bf16.xpose.msra.mxu0 %v977_v9 }
 0x422   :  { %5188 = vmatpush3.bf16.xpose.msra.mxu1 %v1027_v10  ;;  %5183 = vmatprep.mubr.msk.bf16.mxu0 %vm6121_vm1, %v6120_v16 }
 0x423   :  { %5189 = vmatprep.mubr.msk.bf16.mxu1 %vm6121_vm1, %v6120_v16  ;;  %5193 = vmatprep.subr.bf16.mxu0 %v6120_v16 }
 0x424   :  { %5199 = vmatprep.subr.bf16.mxu1 %v6120_v16 }
 0x428   :  { %5184 = vmatmul.mubr.msk.bf16.vlgmr.msra.gmra.mxu0 %vm434_vm3, %v970_v11 }
 0x429   :  { %5190 = vmatmul.mubr.msk.bf16.vlgmr.msra.gmra.mxu1 %vm434_vm3, %v1020_v13  ;;  %5195 = vmatprep.mubr.msk.bf16.mxu0 %vm6121_vm1, %v6120_v16 }
 0x42a   :  { %5201 = vmatprep.mubr.msk.bf16.mxu1 %vm6121_vm1, %v6120_v16 }
 0x49f   :  { %v6468_v14 = vpop.f32.mrf.mxu0 }
 0x4a1   :  { %v5149_v17 = vpop.f32.mrf.mxu0 }
 0x4a3   :  { %v722_v18 = vpop.f32.mrf.mxu0  ;;  %v6470_v19 = vpop.f32.mrf.mxu1 }
 0x4a5   :  { %v5150_v20 = vpop.f32.mrf.mxu0  ;;  %v5155_v22 = vpop.f32.mrf.mxu1 }
 0x4a7   :  { %v770_v23 = vpop.f32.mrf.mxu1 }
 0x4a9   :  { %v5156_v25 = vpop.f32.mrf.mxu1 }
 0x4d8   :  { %v6472_v26 = vpop.f32.mrf.mxu0 }
 0x4d9   :  { %v6474_v28 = vpop.f32.mrf.mxu1 }
 0x4da   :  { %v5161_v30 = vpop.f32.mrf.mxu0 }
 0x4db   :  { %v5167_v31 = vpop.f32.mrf.mxu1 }
 0x4dc   :  { %v818_v32 = vpop.f32.mrf.mxu0 }
 0x4dd   :  { %v866_v33 = vpop.f32.mrf.mxu1 }
 0x4de   :  { %v5162_v34 = vpop.f32.mrf.mxu0 }
 0x4df   :  { %v5168_v35 = vpop.f32.mrf.mxu1 }
 0x4e0   :  { %v913_v36 = vpop.f32.mrf.mxu0 }
 0x4e1   :  { %v914_v37 = vadd.f32 %v913_v36, %v6390_v51  ;;  %v963_v38 = vpop.f32.mrf.mxu1 }
 0x4e2   :  { %v964_v39 = vadd.f32 %v963_v38, %v6390_v51  ;;  %v5173_v40 = vpop.f32.mrf.mxu0 }
 0x4e3   :  { %v5179_v41 = vpop.f32.mrf.mxu1  ;;  %v1069_v42 = vsel %vm434_vm3, %v914_v37, -inf }
 0x4e4   :  { %v1072_v43 = vsel %vm434_vm3, %v964_v39, -inf  ;;  %1070 = vmax.xlane.f32.xlu0 %v1069_v42  ;;  %v916_v44 = vpop.f32.mrf.mxu0 }
 0x4e5   :  { %1073 = vmax.xlane.f32.xlu1 %v1072_v43  ;;  %v966_v45 = vpop.f32.mrf.mxu1 }
 0x4e6   :  { %v5174_v46 = vpop.f32.mrf.mxu0 }
 0x4e7   :  { %v5180_v47 = vpop.f32.mrf.mxu1 }
 0x4e8   :  { %v1013_v49 = vpop.f32.mrf.mxu0 }
 0x4e9   :  { %v1014_v50 = vadd.f32 %v1013_v49, %v6390_v51  ;;  %v1063_v52 = vpop.f32.mrf.mxu1 }
 0x4ea   :  { %v5185_v53 = vpop.f32.mrf.mxu0  ;;  %v1064_v54 = vadd.f32 %v1063_v52, %v6390_v51 }
 0x4eb   :  { %v5191_v55 = vpop.f32.mrf.mxu1  ;;  %v1075_v56 = vsel %vm434_vm3, %v1014_v50, -inf }
 0x4ec   :  { %1076 = vmax.xlane.f32.xlu0 %v1075_v56  ;;  %v1016_v57 = vpop.f32.mrf.mxu0  ;;  %v1078_v61 = vsel %vm434_vm3, %v1064_v54, -inf }
 0x4ed   :  { %v1066_v58 = vpop.f32.mrf.mxu1 }
 0x4ee   :  { %v5186_v59 = vpop.f32.mrf.mxu0 }
 0x4ef   :  { %v5192_v60 = vpop.f32.mrf.mxu1 }
 0x4f0   :  { %1079 = vmax.xlane.f32.xlu0 %v1078_v61 }
 0x4f6   :  { %1117 = vrot.lane.b32.xlu1 %v6345_v24, %s6126_s7 }
 0x56d   :  { %v1071_v62 = vpop.xlane.xlu0 %1070 }
 0x56e   :  { %v1074_v63 = vpop.xlane.xlu1 %1073  ;;  %v1081_v0 = vsub.f32 %v914_v37, %v1071_v62 }
 0x56f   :  { %v1082_v1 = vsub.f32 %v964_v39, %v1074_v63 }
 0x570   :  { %v1085_v2 = vmul.f32 1.442695, %v1081_v0 }
 0x571   :  { %v1087_v3 = vmul.f32 1.442695, %v1082_v1 }
 0x572   :  { %5687 = vpow2.f32 %v1085_v2  ;;  %v1118_v4 = vpop.permute.xlu1 %1117 }
 0x573   :  { %5689 = vpow2.f32 %v1087_v3  ;;  %v1123_v5 = vsel %vm681_vm5, %v1118_v4, 0 }
 0x574   :  { %5194 = vmatpush3.bf16.msra.mxu0 %v1123_v5 }
 0x575   :  { %5205 = vmatprep.subr.bf16.mxu0 %v6120_v16  ;;  %v1077_v10 = vpop.xlane.xlu0 %1076 }
 0x576   :  { %v1083_v17 = vsub.f32 %v1014_v50, %v1077_v10 }
 0x578   :  { %v1089_v20 = vmul.f32 1.442695, %v1083_v17 }
 0x579   :  { %v1080_v11 = vpop.xlane.xlu0 %1079 }
 0x57a   :  { %v1084_v13 = vsub.f32 %v1064_v54, %v1080_v11 }
 0x57c   :  { %v1091_v18 = vmul.f32 1.442695, %v1084_v13 }
 0x57e   :  { %5691 = vpow2.f32 %v1091_v18 }
 0x57f   :  { %v5688_v6 = vpop.eup %5687  ;;  %5693 = vpow2.f32 %v1089_v20 }
 0x580   :  { %v5690_v7 = vpop.eup %5689  ;;  %v1093_v8 = vsel %vm434_vm3, %v5688_v6, 0.0 }
 0x581   :  { %v1096_v9 = vsel %vm434_vm3, %v5690_v7, 0.0  ;;  %1094 = vadd.xlane.f32.xlu1 %v1093_v8 }
 0x582   :  { %1097 = vadd.xlane.f32.xlu0 %v1096_v9 }
 0x58b   :  { %v5692_v22 = vpop.eup %5691 }
 0x58c   :  { %v5694_v23 = vpop.eup %5693  ;;  %v1102_v25 = vsel %vm434_vm3, %v5692_v22, 0.0 }
 0x58d   :  { %v1099_v30 = vsel %vm434_vm3, %v5694_v23, 0.0 }
 0x592   :  { %1213 = vrot.lane.b32.xlu1 %v6343_v21, %s6126_s7 }
 0x596   :  { %1261 = vrot.lane.b32.xlu1 %v6349_v27, %s6126_s7 }
 0x598   :  { %1165 = vrot.lane.b32.xlu0 %v6353_v29, %s6126_s7 }
 0x5b7   :  { %1103 = vadd.xlane.f32.xlu0 %v1102_v25 }
 0x5ba   :  { %1100 = vadd.xlane.f32.xlu1 %v1099_v30 }
 0x5cb   :  { %1361 = vrot.lane.b32.xlu1 %v6353_v29, %s6127_s12 }
 0x5cd   :  { %1311 = vrot.lane.b32.xlu0 %v6345_v24, %s6127_s12 }
 0x5cf   :  { %1359 = vrot.lane.b32.xlu1 %v6353_v29, %s6128_s29 }
 0x5d1   :  { %1309 = vrot.lane.b32.xlu0 %v6345_v24, %s6128_s29 }
 0x5d3   :  { %1461 = vrot.lane.b32.xlu1 %v6349_v27, %s6127_s12 }
 0x5d5   :  { %1411 = vrot.lane.b32.xlu0 %v6343_v21, %s6127_s12 }
 0x5d7   :  { %1459 = vrot.lane.b32.xlu1 %v6349_v27, %s6128_s29 }
 0x5d9   :  { %1409 = vrot.lane.b32.xlu0 %v6343_v21, %s6128_s29 }
 0x60a   :  { %v1095_v31 = vpop.xlane.xlu1 %1094 }
 0x60b   :  { %5695 = vrcp.f32 %v1095_v31  ;;  %v1098_v32 = vpop.xlane.xlu0 %1097 }
 0x60c   :  { %5697 = vrcp.f32 %v1098_v32 }
 0x60e   :  { %v1214_v35 = vpop.permute.xlu1 %1213 }
 0x60f   :  { %v1166_v33 = vpop.permute.xlu0 %1165  ;;  %v1219_v43 = vsel %vm681_vm5, %v1214_v35, 0 }
 0x610   :  { %v1171_v34 = vsel %vm681_vm5, %v1166_v33, 0 }
 0x611   :  { %5200 = vmatpush3.bf16.msra.mxu1 %v1171_v34 }
 0x612   :  { %5211 = vmatprep.subr.bf16.mxu1 %v6120_v16  ;;  %v1262_v40 = vpop.permute.xlu1 %1261 }
 0x613   :  { %v1267_v44 = vsel %vm681_vm5, %v1262_v40, 0 }
 0x618   :  { %v5696_v36 = vpop.eup %5695 }
 0x619   :  { %v5698_v37 = vpop.eup %5697  ;;  %v1109_v38 = vmul.f32 %v5696_v36, %v5688_v6 }
 0x61a   :  { %v1110_v39 = vmul.f32 %v5698_v37, %v5690_v7 }
 0x61b   :  { %v1113_v41 = vpack.c.bf16 %v1109_v38, %v1109_v38 }
 0x61c   :  { %v1114_v42 = vpack.c.bf16 %v1110_v39, %v1110_v39 }
 0x61d   :  { %5196 = vmatmul.mubr.msk.bf16.vlgmr.msra.gmra.mxu0 %vm434_vm3, %v1113_v41 }
 0x61e   :  { %5202 = vmatmul.mubr.msk.bf16.vlgmr.msra.gmra.mxu1 %vm434_vm3, %v1114_v42  ;;  %5206 = vmatpush3.bf16.msra.mxu0 %v1219_v43 }
 0x61f   :  { %5212 = vmatpush3.bf16.msra.mxu1 %v1267_v44  ;;  %5213 = vmatprep.mubr.msk.bf16.mxu1 %vm6121_vm1, %v6120_v16 }
 0x620   :  { %5223 = vmatprep.subr.bf16.mxu1 %v6120_v16  ;;  %5207 = vmatprep.mubr.msk.bf16.mxu0 %vm6121_vm1, %v6120_v16 }
 0x621   :  { %5217 = vmatprep.subr.bf16.mxu0 %v6120_v16 }
 0x640   :  { %v1104_v45 = vpop.xlane.xlu0 %1103 }
 0x641   :  { %5699 = vrcp.f32 %v1104_v45 }
 0x643   :  { %v1101_v46 = vpop.xlane.xlu1 %1100 }
 0x644   :  { %5701 = vrcp.f32 %v1101_v46  ;;  %v1312_v50 = vpop.permute.xlu0 %1311 }
 0x645   :  { %v1317_v60 = vsel %vm434_vm3, %v1312_v50, 0 }
 0x647   :  { %v1362_v47 = vpop.permute.xlu1 %1361 }
 0x648   :  { %v1367_v57 = vsel %vm434_vm3, %v1362_v47, 0  ;;  %v1310_v59 = vpop.permute.xlu0 %1309 }
 0x64b   :  { %v1360_v55 = vpop.permute.xlu1 %1359 }
 0x64c   :  { %v1412_v62 = vpop.permute.xlu0 %1411 }
 0x64d   :  { %v1417_v0 = vsel %vm434_vm3, %v1412_v62, 0 }
 0x64e   :  { %v5700_v49 = vpop.eup %5699 }
 0x64f   :  { %v1112_v52 = vmul.f32 %v5700_v49, %v5692_v22  ;;  %v1462_v61 = vpop.permute.xlu1 %1461 }
 0x650   :  { %v1467_v63 = vsel %vm434_vm3, %v1462_v61, 0  ;;  %v1410_v2 = vpop.permute.xlu0 %1409 }
 0x651   :  { %v5702_v53 = vpop.eup %5701  ;;  %v1116_v54 = vpack.c.bf16 %v1112_v52, %v1112_v52 }
 0x652   :  { %v1111_v56 = vmul.f32 %v5702_v53, %v5694_v23 }
 0x653   :  { %5214 = vmatmul.mubr.msk.bf16.vlgmr.msra.gmra.mxu1 %vm434_vm3, %v1116_v54  ;;  %v1460_v1 = vpop.permute.xlu1 %1459 }
 0x654   :  { %5224 = vmatpush3.bf16.xpose.msra.mxu1 %v1367_v57  ;;  %v1115_v58 = vpack.c.bf16 %v1111_v56, %v1111_v56  ;;  %5225 = vmatprep.mubr.msk.bf16.mxu1 %vm6121_vm1, %v6120_v16 }
 0x655   :  { %5235 = vmatprep.subr.bf16.mxu1 %v6120_v16 }
 0x656   :  { %5208 = vmatmul.mubr.msk.bf16.vlgmr.msra.gmra.mxu0 %vm434_vm3, %v1115_v58 }
 0x657   :  { %5218 = vmatpush3.bf16.xpose.msra.mxu0 %v1317_v60  ;;  %5219 = vmatprep.mubr.msk.bf16.mxu0 %vm6121_vm1, %v6120_v16 }
 0x658   :  { %5229 = vmatprep.subr.bf16.mxu0 %v6120_v16 }
 0x65b   :  { %5226 = vmatmul.mubr.msk.bf16.vlgmr.msra.gmra.mxu1 %vm434_vm3, %v1360_v55 }
 0x65c   :  { %5236 = vmatpush3.bf16.xpose.msra.mxu1 %v1467_v63  ;;  %5237 = vmatprep.mubr.msk.bf16.mxu1 %vm6121_vm1, %v6120_v16 }
 0x65d   :  { %5247 = vmatprep.subr.bf16.mxu1 %v6120_v16 }
 0x65e   :  { %5220 = vmatmul.mubr.msk.bf16.vlgmr.msra.gmra.mxu0 %vm434_vm3, %v1310_v59 }
 0x65f   :  { %5230 = vmatpush3.bf16.xpose.msra.mxu0 %v1417_v0  ;;  %5231 = vmatprep.mubr.msk.bf16.mxu0 %vm6121_vm1, %v6120_v16 }
 0x660   :  { %5241 = vmatprep.subr.bf16.mxu0 %v6120_v16 }
 0x663   :  { %5238 = vmatmul.mubr.msk.bf16.vlgmr.msra.gmra.mxu1 %vm434_vm3, %v1460_v1 }
 0x664   :  { %5249 = vmatprep.mubr.msk.bf16.mxu1 %vm6121_vm1, %v6120_v16 }
 0x666   :  { %5232 = vmatmul.mubr.msk.bf16.vlgmr.msra.gmra.mxu0 %vm434_vm3, %v1410_v2 }
 0x667   :  { %5243 = vmatprep.mubr.msk.bf16.mxu0 %vm6121_vm1, %v6120_v16 }
 0x6dd   :  { %v6548_v3 = vpop.f32.mrf.mxu0 }
 0x6de   :  { %v6550_v4 = vpop.f32.mrf.mxu1 }
 0x6df   :  { %v5592_v5 = vpack.i.bf16 %v6550_v4, %v6548_v3  ;;  %v5197_v6 = vpop.f32.mrf.mxu0 }
 0x6e0   :  { %v5203_v7 = vpop.f32.mrf.mxu1 }
 0x6e1   :  { %v1162_v8 = vpop.f32.mrf.mxu0 }
 0x6e2   :  { %v1210_v9 = vpop.f32.mrf.mxu1 }
 0x6e3   :  { %v5198_v10 = vpop.f32.mrf.mxu0 }
 0x6e4   :  { %v5204_v11 = vpop.f32.mrf.mxu1 }
 0x713   :  { %v6554_v13 = vpop.f32.mrf.mxu1 }
 0x715   :  { %v5215_v17 = vpop.f32.mrf.mxu1 }
 0x716   :  { %v6556_v18 = vpop.f32.mrf.mxu0 }
 0x717   :  { %v5597_v20 = vpack.i.bf16 %v6554_v13, %v6556_v18  ;;  %v1306_v22 = vpop.f32.mrf.mxu1 }
 0x718   :  { %v5209_v23 = vpop.f32.mrf.mxu0 }
 0x719   :  { %v5216_v25 = vpop.f32.mrf.mxu1 }
 0x71a   :  { %v1258_v30 = vpop.f32.mrf.mxu0 }
 0x71b   :  { %v1403_v31 = vpop.f32.mrf.mxu1 }
 0x71c   :  { %v1404_v32 = vadd.f32 %v1403_v31, %v6390_v51  ;;  %v5210_v33 = vpop.f32.mrf.mxu0 }
 0x71d   :  { %v5227_v34 = vpop.f32.mrf.mxu1 }
 0x71e   :  { %v1512_v35 = vsel %vm434_vm3, %v1404_v32, -inf  ;;  %v1353_v36 = vpop.f32.mrf.mxu0 }
 0x71f   :  { %1513 = vmax.xlane.f32.xlu1 %v1512_v35  ;;  %v1354_v37 = vadd.f32 %v1353_v36, %v6390_v51  ;;  %v1406_v38 = vpop.f32.mrf.mxu1 }
 0x720   :  { %v5221_v39 = vpop.f32.mrf.mxu0 }
 0x721   :  { %v5228_v40 = vpop.f32.mrf.mxu1  ;;  %v1509_v41 = vsel %vm434_vm3, %v1354_v37, -inf }
 0x722   :  { %1510 = vmax.xlane.f32.xlu0 %v1509_v41  ;;  %v1356_v42 = vpop.f32.mrf.mxu0 }
 0x723   :  { %v1503_v43 = vpop.f32.mrf.mxu1 }
 0x724   :  { %v5222_v44 = vpop.f32.mrf.mxu0  ;;  %v1504_v52 = vadd.f32 %v1503_v43, %v6390_v51 }
 0x725   :  { %v5239_v45 = vpop.f32.mrf.mxu1 }
 0x726   :  { %v1453_v46 = vpop.f32.mrf.mxu0  ;;  %v1518_v57 = vsel %vm434_vm3, %v1504_v52, -inf }
 0x727   :  { %v1454_v47 = vadd.f32 %v1453_v46, %v6390_v51  ;;  %v1506_v49 = vpop.f32.mrf.mxu1 }
 0x728   :  { %v5233_v50 = vpop.f32.mrf.mxu0 }
 0x729   :  { %v5240_v53 = vpop.f32.mrf.mxu1  ;;  %v1515_v54 = vsel %vm434_vm3, %v1454_v47, -inf }
 0x72a   :  { %1516 = vmax.xlane.f32.xlu0 %v1515_v54  ;;  %v1456_v55 = vpop.f32.mrf.mxu0 }
 0x72c   :  { %v5234_v56 = vpop.f32.mrf.mxu0 }
 0x72e   :  { %1519 = vmax.xlane.f32.xlu0 %v1518_v57 }
 0x730   :  { %1557 = vrot.lane.b32.xlu1 %v6345_v24, %s6129_s4 }
 0x7a8   :  { %v1514_v58 = vpop.xlane.xlu1 %1513 }
 0x7a9   :  { %v1522_v59 = vsub.f32 %v1404_v32, %v1514_v58 }
 0x7ab   :  { %v1527_v60 = vmul.f32 1.442695, %v1522_v59  ;;  %v1511_v61 = vpop.xlane.xlu0 %1510 }
 0x7ac   :  { %v1558_v62 = vpop.permute.xlu1 %1557  ;;  %v1521_v63 = vsub.f32 %v1354_v37, %v1511_v61 }
 0x7ad   :  { %5703 = vpow2.f32 %v1527_v60  ;;  %v1563_v0 = vsel %vm681_vm5, %v1558_v62, 0 }
 0x7ae   :  { %v1525_v1 = vmul.f32 1.442695, %v1521_v63  ;;  %5242 = vmatpush3.bf16.msra.mxu0 %v1563_v0 }
 0x7af   :  { %5253 = vmatprep.subr.bf16.mxu0 %v6120_v16 }
 0x7b0   :  { %5705 = vpow2.f32 %v1525_v1 }
 0x7b3   :  { %v1517_v9 = vpop.xlane.xlu0 %1516 }
 0x7b4   :  { %v1523_v22 = vsub.f32 %v1454_v47, %v1517_v9 }
 0x7b6   :  { %v1529_v23 = vmul.f32 1.442695, %v1523_v22 }
 0x7b7   :  { %v1520_v10 = vpop.xlane.xlu0 %1519 }
 0x7b8   :  { %v1524_v11 = vsub.f32 %v1504_v52, %v1520_v10 }
 0x7ba   :  { %v5704_v2 = vpop.eup %5703  ;;  %v1531_v17 = vmul.f32 1.442695, %v1524_v11 }
 0x7bb   :  { %v1536_v6 = vsel %vm434_vm3, %v5704_v2, 0.0 }
 0x7bc   :  { %1537 = vadd.xlane.f32.xlu0 %v1536_v6  ;;  %5707 = vpow2.f32 %v1531_v17 }
 0x7bd   :  { %v5706_v7 = vpop.eup %5705  ;;  %5709 = vpow2.f32 %v1529_v23 }
 0x7be   :  { %v1533_v8 = vsel %vm434_vm3, %v5706_v7, 0.0 }
 0x7bf   :  { %1534 = vadd.xlane.f32.xlu1 %v1533_v8 }
 0x7c9   :  { %v5708_v25 = vpop.eup %5707 }
 0x7ca   :  { %v1542_v30 = vsel %vm434_vm3, %v5708_v25, 0.0  ;;  %v5710_v31 = vpop.eup %5709 }
 0x7cb   :  { %v1539_v32 = vsel %vm434_vm3, %v5710_v31, 0.0 }
 0x7d0   :  { %1653 = vrot.lane.b32.xlu1 %v6343_v21, %s6129_s4 }
 0x7d2   :  { %1605 = vrot.lane.b32.xlu0 %v6353_v29, %s6129_s4 }
 0x7d4   :  { %1701 = vrot.lane.b32.xlu1 %v6349_v27, %s6129_s4 }
 0x7f1   :  { %1543 = vadd.xlane.f32.xlu0 %v1542_v30 }
 0x7f8   :  { %1540 = vadd.xlane.f32.xlu1 %v1539_v32 }
 0x807   :  { %1751 = vrot.lane.b32.xlu0 %v6345_v24, %s6130_s15 }
 0x809   :  { %1801 = vrot.lane.b32.xlu1 %v6353_v29, %s6130_s15 }
 0x80b   :  { %1749 = vrot.lane.b32.xlu0 %v6345_v24, %s6131_s0 }
 0x80d   :  { %1799 = vrot.lane.b32.xlu1 %v6353_v29, %s6131_s0 }
 0x80f   :  { %1851 = vrot.lane.b32.xlu0 %v6343_v21, %s6130_s15 }
 0x811   :  { %1901 = vrot.lane.b32.xlu1 %v6349_v27, %s6130_s15 }
 0x813   :  { %1849 = vrot.lane.b32.xlu0 %v6343_v21, %s6131_s0 }
 0x815   :  { %1899 = vrot.lane.b32.xlu1 %v6349_v27, %s6131_s0 }
 0x845   :  { %v1538_v33 = vpop.xlane.xlu0 %1537 }
 0x846   :  { %5711 = vrcp.f32 %v1538_v33 }
 0x848   :  { %v1535_v34 = vpop.xlane.xlu1 %1534 }
 0x849   :  { %5713 = vrcp.f32 %v1535_v34  ;;  %v1606_v35 = vpop.permute.xlu0 %1605 }
 0x84a   :  { %v1611_v36 = vsel %vm681_vm5, %v1606_v35, 0 }
 0x84b   :  { %5248 = vmatpush3.bf16.msra.mxu1 %v1611_v36 }
 0x84c   :  { %5259 = vmatprep.subr.bf16.mxu1 %v6120_v16  ;;  %v1654_v37 = vpop.permute.xlu1 %1653 }
 0x84d   :  { %v1659_v46 = vsel %vm681_vm5, %v1654_v37, 0 }
 0x850   :  { %v1702_v40 = vpop.permute.xlu1 %1701 }
 0x851   :  { %v1707_v44 = vsel %vm681_vm5, %v1702_v40, 0 }
 0x853   :  { %v5712_v38 = vpop.eup %5711 }
 0x854   :  { %v1550_v39 = vmul.f32 %v5712_v38, %v5704_v2 }
 0x856   :  { %v5714_v41 = vpop.eup %5713  ;;  %v1554_v42 = vpack.c.bf16 %v1550_v39, %v1550_v39 }
 0x857   :  { %v1549_v43 = vmul.f32 %v5714_v41, %v5706_v7 }
 0x858   :  { %5250 = vmatmul.mubr.msk.bf16.vlgmr.msra.gmra.mxu1 %vm434_vm3, %v1554_v42 }
 0x859   :  { %5260 = vmatpush3.bf16.msra.mxu1 %v1707_v44  ;;  %v1553_v45 = vpack.c.bf16 %v1549_v43, %v1549_v43  ;;  %5261 = vmatprep.mubr.msk.bf16.mxu1 %vm6121_vm1, %v6120_v16 }
 0x85a   :  { %5271 = vmatprep.subr.bf16.mxu1 %v6120_v16 }
 0x85b   :  { %5244 = vmatmul.mubr.msk.bf16.vlgmr.msra.gmra.mxu0 %vm434_vm3, %v1553_v45 }
 0x85c   :  { %5254 = vmatpush3.bf16.msra.mxu0 %v1659_v46  ;;  %5255 = vmatprep.mubr.msk.bf16.mxu0 %vm6121_vm1, %v6120_v16 }
 0x85d   :  { %5265 = vmatprep.subr.bf16.mxu0 %v6120_v16 }
 0x87a   :  { %v1544_v47 = vpop.xlane.xlu0 %1543 }
 0x87b   :  { %5715 = vrcp.f32 %v1544_v47 }
 0x87e   :  { %v1752_v56 = vpop.permute.xlu0 %1751 }
 0x87f   :  { %v1757_v63 = vsel %vm434_vm3, %v1752_v56, 0 }
 0x881   :  { %v1541_v49 = vpop.xlane.xlu1 %1540 }
 0x882   :  { %5717 = vrcp.f32 %v1541_v49  ;;  %v1750_v62 = vpop.permute.xlu0 %1749 }
 0x885   :  { %v1802_v50 = vpop.permute.xlu1 %1801 }
 0x886   :  { %v1807_v57 = vsel %vm434_vm3, %v1802_v50, 0  ;;  %v1852_v1 = vpop.permute.xlu0 %1851 }
 0x887   :  { %v1857_v2 = vsel %vm434_vm3, %v1852_v1, 0 }
 0x888   :  { %v5716_v52 = vpop.eup %5715 }
 0x889   :  { %v1552_v53 = vmul.f32 %v5716_v52, %v5708_v25  ;;  %v1800_v55 = vpop.permute.xlu1 %1799 }
 0x88a   :  { %v1850_v7 = vpop.permute.xlu0 %1849 }
 0x88b   :  { %v1556_v54 = vpack.c.bf16 %v1552_v53, %v1552_v53 }
 0x88d   :  { %5262 = vmatmul.mubr.msk.bf16.vlgmr.msra.gmra.mxu1 %vm434_vm3, %v1556_v54  ;;  %v1902_v60 = vpop.permute.xlu1 %1901 }
 0x88e   :  { %5272 = vmatpush3.bf16.xpose.msra.mxu1 %v1807_v57  ;;  %5273 = vmatprep.mubr.msk.bf16.mxu1 %vm6121_vm1, %v6120_v16  ;;  %v1907_v0 = vsel %vm434_vm3, %v1902_v60, 0 }
 0x88f   :  { %v5718_v58 = vpop.eup %5717  ;;  %5283 = vmatprep.subr.bf16.mxu1 %v6120_v16 }
 0x890   :  { %v1551_v59 = vmul.f32 %v5718_v58, %v5710_v31 }
 0x891   :  { %v1900_v6 = vpop.permute.xlu1 %1899 }
 0x892   :  { %v1555_v61 = vpack.c.bf16 %v1551_v59, %v1551_v59 }
 0x894   :  { %5256 = vmatmul.mubr.msk.bf16.vlgmr.msra.gmra.mxu0 %vm434_vm3, %v1555_v61 }
 0x895   :  { %5266 = vmatpush3.bf16.xpose.msra.mxu0 %v1757_v63  ;;  %5274 = vmatmul.mubr.msk.bf16.vlgmr.msra.gmra.mxu1 %vm434_vm3, %v1800_v55 }
 0x896   :  { %5284 = vmatpush3.bf16.xpose.msra.mxu1 %v1907_v0  ;;  %5267 = vmatprep.mubr.msk.bf16.mxu0 %vm6121_vm1, %v6120_v16 }
 0x897   :  { %5277 = vmatprep.subr.bf16.mxu0 %v6120_v16  ;;  %5285 = vmatprep.mubr.msk.bf16.mxu1 %vm6121_vm1, %v6120_v16 }
 0x898   :  { %5295 = vmatprep.subr.bf16.mxu1 %v6120_v16 }
 0x89c   :  { %5268 = vmatmul.mubr.msk.bf16.vlgmr.msra.gmra.mxu0 %vm434_vm3, %v1750_v62 }
 0x89d   :  { %5278 = vmatpush3.bf16.xpose.msra.mxu0 %v1857_v2  ;;  %5286 = vmatmul.mubr.msk.bf16.vlgmr.msra.gmra.mxu1 %vm434_vm3, %v1900_v6 }
 0x89e   :  { %5279 = vmatprep.mubr.msk.bf16.mxu0 %vm6121_vm1, %v6120_v16  ;;  %5289 = vmatprep.subr.bf16.mxu0 %v6120_v16 }
 0x89f   :  { %5297 = vmatprep.mubr.msk.bf16.mxu1 %vm6121_vm1, %v6120_v16 }
 0x8a4   :  { %5280 = vmatmul.mubr.msk.bf16.vlgmr.msra.gmra.mxu0 %vm434_vm3, %v1850_v7 }
 0x8a5   :  { %5291 = vmatprep.mubr.msk.bf16.mxu0 %vm6121_vm1, %v6120_v16 }
 0x918   :  { %v6632_v8 = vpop.f32.mrf.mxu1 }
 0x91a   :  { %v5251_v9 = vpop.f32.mrf.mxu1 }
 0x91b   :  { %v6634_v10 = vpop.f32.mrf.mxu0 }
 0x91c   :  { %v5602_v11 = vpack.i.bf16 %v6632_v8, %v6634_v10  ;;  %v1650_v17 = vpop.f32.mrf.mxu1 }
 0x91d   :  { %v5245_v22 = vpop.f32.mrf.mxu0 }
 0x91e   :  { %v5252_v23 = vpop.f32.mrf.mxu1 }
 0x91f   :  { %v1602_v25 = vpop.f32.mrf.mxu0 }
 0x921   :  { %v5246_v30 = vpop.f32.mrf.mxu0 }
 0x94d   :  { %v6638_v31 = vpop.f32.mrf.mxu1 }
 0x94f   :  { %v5263_v32 = vpop.f32.mrf.mxu1 }
 0x951   :  { %v1746_v33 = vpop.f32.mrf.mxu1 }
 0x953   :  { %v5264_v34 = vpop.f32.mrf.mxu1 }
 0x954   :  { %v6640_v35 = vpop.f32.mrf.mxu0 }
 0x955   :  { %v5607_v36 = vpack.i.bf16 %v6638_v31, %v6640_v35  ;;  %v1843_v37 = vpop.f32.mrf.mxu1 }
 0x956   :  { %v1844_v38 = vadd.f32 %v1843_v37, %v6390_v51  ;;  %v5257_v39 = vpop.f32.mrf.mxu0 }
 0x957   :  { %v5275_v40 = vpop.f32.mrf.mxu1 }
 0x958   :  { %v1698_v41 = vpop.f32.mrf.mxu0  ;;  %v1952_v42 = vsel %vm434_vm3, %v1844_v38, -inf }
 0x959   :  { %1953 = vmax.xlane.f32.xlu1 %v1952_v42  ;;  %v1846_v43 = vpop.f32.mrf.mxu1 }
 0x95a   :  { %v5258_v44 = vpop.f32.mrf.mxu0 }
 0x95b   :  { %v5276_v45 = vpop.f32.mrf.mxu1 }
 0x95c   :  { %v1793_v46 = vpop.f32.mrf.mxu0 }
 0x95d   :  { %v1794_v47 = vadd.f32 %v1793_v46, %v6390_v51  ;;  %v1943_v49 = vpop.f32.mrf.mxu1 }
 0x95e   :  { %v5269_v50 = vpop.f32.mrf.mxu0  ;;  %v1944_v61 = vadd.f32 %v1943_v49, %v6390_v51 }
 0x95f   :  { %v5287_v52 = vpop.f32.mrf.mxu1  ;;  %v1949_v53 = vsel %vm434_vm3, %v1794_v47, -inf }
 0x960   :  { %1950 = vmax.xlane.f32.xlu0 %v1949_v53  ;;  %v1796_v54 = vpop.f32.mrf.mxu0  ;;  %v1958_v1 = vsel %vm434_vm3, %v1944_v61, -inf }
 0x961   :  { %v1946_v55 = vpop.f32.mrf.mxu1  ;;  %v5656_v54 = vld [vmem:[#allocation8 + $0x8] sm:$0xff]  }
 0x962   :  { %v5270_v56 = vpop.f32.mrf.mxu0 }
 0x963   :  { %v5288_v57 = vpop.f32.mrf.mxu1 }
 0x964   :  { %v1893_v58 = vpop.f32.mrf.mxu0 }
 0x965   :  { %v1894_v59 = vadd.f32 %v1893_v58, %v6390_v51 }
 0x966   :  { %v5281_v60 = vpop.f32.mrf.mxu0 }
 0x967   :  { %v1955_v62 = vsel %vm434_vm3, %v1894_v59, -inf }
 0x968   :  { %1956 = vmax.xlane.f32.xlu0 %v1955_v62  ;;  %v1896_v63 = vpop.f32.mrf.mxu0 }
 0x96a   :  { %1997 = vrot.lane.b32.xlu1 %v6345_v24, %s6132_s18  ;;  %v5282_v0 = vpop.f32.mrf.mxu0 }
 0x96c   :  { %1959 = vmax.xlane.f32.xlu0 %v1958_v1 }
 0x9e2   :  { %v1954_v2 = vpop.xlane.xlu1 %1953 }
 0x9e3   :  { %v1962_v6 = vsub.f32 %v1844_v38, %v1954_v2 }
 0x9e5   :  { %v1967_v7 = vmul.f32 1.442695, %v1962_v6 }
 0x9e6   :  { %v1998_v9 = vpop.permute.xlu1 %1997 }
 0x9e7   :  { %5719 = vpow2.f32 %v1967_v7  ;;  %v2003_v17 = vsel %vm681_vm5, %v1998_v9, 0 }
 0x9e8   :  { %5290 = vmatpush3.bf16.msra.mxu0 %v2003_v17 }
 0x9e9   :  { %v1951_v51 = vpop.xlane.xlu0 %1950  ;;  %5301 = vmatprep.subr.bf16.mxu0 %v6120_v16 }
 0x9ea   :  { %v1961_v22 = vsub.f32 %v1794_v47, %v1951_v51 }
 0x9ec   :  { %v1965_v23 = vmul.f32 1.442695, %v1961_v22 }
 0x9ee   :  { %5721 = vpow2.f32 %v1965_v23 }
 0x9f1   :  { %v1957_v25 = vpop.xlane.xlu0 %1956 }
 0x9f2   :  { %v1963_v24 = vsub.f32 %v1894_v59, %v1957_v25  ;;  %v5657_v59 = vld [vmem:[#allocation8] sm:$0xff]  }
 0x9f4   :  { %v5720_v30 = vpop.eup %5719  ;;  %v1969_v32 = vmul.f32 1.442695, %v1963_v24 }
 0x9f5   :  { %v1976_v33 = vsel %vm434_vm3, %v5720_v30, 0.0  ;;  %v1960_v34 = vpop.xlane.xlu0 %1959 }
 0x9f6   :  { %5723 = vpow2.f32 %v1969_v32  ;;  %1977 = vadd.xlane.f32.xlu0 %v1976_v33  ;;  %v1964_v37 = vsub.f32 %v1944_v61, %v1960_v34 }
 0x9f8   :  { %v1971_v38 = vmul.f32 1.442695, %v1964_v37 }
 0x9fa   :  { %5725 = vpow2.f32 %v1971_v38 }
 0x9fb   :  { %v5722_v39 = vpop.eup %5721 }
 0x9fc   :  { %v1973_v40 = vsel %vm434_vm3, %v5722_v39, 0.0 }
 0x9fd   :  { %1974 = vadd.xlane.f32.xlu1 %v1973_v40 }
 0xa03   :  { %v5724_v41 = vpop.eup %5723 }
 0xa04   :  { %v1979_v42 = vsel %vm434_vm3, %v5724_v41, 0.0 }
 0xa05   :  { %1980 = vadd.xlane.f32.xlu1 %v1979_v42 }
 0xa07   :  { %v5726_v43 = vpop.eup %5725 }
 0xa08   :  { %v1982_v44 = vsel %vm434_vm3, %v5726_v43, 0.0 }
 0xa09   :  { %1983 = vadd.xlane.f32.xlu0 %v1982_v44 }
 0xa16   :  { %2093 = vrot.lane.b32.xlu1 %v6343_v21, %s6132_s18 }
 0xa1a   :  { %2141 = vrot.lane.b32.xlu1 %v6349_v27, %s6132_s18 }
 0xa1e   :  { %5598 = vrot.lane.b32.xlu1 %v5597_v20, %s6114_s6 }
 0xa1f   :  { %2045 = vrot.lane.b32.xlu0 %v6353_v29, %s6132_s18 }
 0xa22   :  { %5608 = vrot.lane.b32.xlu1 %v5607_v36, %s6104_s25 }
 0xa23   :  { %5593 = vrot.lane.b32.xlu0 %v5592_v5, %s6114_s6 }
 0xa27   :  { %5603 = vrot.lane.b32.xlu0 %v5602_v11, %s6104_s25 }
 0xa7f   :  { %v1978_v21 = vpop.xlane.xlu0 %1977 }
 0xa80   :  { %5727 = vrcp.f32 %v1978_v21 }
 0xa86   :  { %v1975_v27 = vpop.xlane.xlu1 %1974 }
 0xa87   :  { %5729 = vrcp.f32 %v1975_v27 }
 0xa8d   :  { %v5728_v13 = vpop.eup %5727 }
 0xa8e   :  { %v1981_v29 = vpop.xlane.xlu1 %1980  ;;  %v1990_v36 = vmul.f32 %v5728_v13, %v5720_v30 }
 0xa8f   :  { %5731 = vrcp.f32 %v1981_v29 }
 0xa90   :  { %v1994_v10 = vpack.c.bf16 %v1990_v36, %v1990_v36 }
 0xa92   :  { %v2094_v18 = vpop.permute.xlu1 %2093  ;;  %v1984_v20 = vpop.xlane.xlu0 %1983 }
 0xa93   :  { %5733 = vrcp.f32 %v1984_v20  ;;  %v2099_v8 = vsel %vm681_vm5, %v2094_v18, 0 }
 0xa94   :  { %v5730_v31 = vpop.eup %5729 }
 0xa95   :  { %v1989_v35 = vmul.f32 %v5730_v31, %v5722_v39 }
 0xa96   :  { %v2046_v3 = vpop.permute.xlu0 %2045  ;;  %v2142_v45 = vpop.permute.xlu1 %2141 }
 0xa97   :  { %v2051_v4 = vsel %vm681_vm5, %v2046_v3, 0  ;;  %v1993_v5 = vpack.c.bf16 %v1989_v35, %v1989_v35  ;;  %v2147_v11 = vsel %vm681_vm5, %v2142_v45, 0 }
 0xa98   :  { %5296 = vmatpush3.bf16.msra.mxu1 %v2051_v4 }
 0xa99   :  { %5292 = vmatmul.mubr.msk.bf16.vlgmr.msra.gmra.mxu0 %vm434_vm3, %v1993_v5  ;;  %5307 = vmatprep.subr.bf16.mxu1 %v6120_v16 }
 0xa9a   :  { %5302 = vmatpush3.bf16.msra.mxu0 %v2099_v8  ;;  %5303 = vmatprep.mubr.msk.bf16.mxu0 %vm6121_vm1, %v6120_v16  ;;  %v5594_v25 = vpop.permute.xlu0 %5593  ;;  %v5599_v37 = vpop.permute.xlu1 %5598 }
 0xa9b   :  { %5298 = vmatmul.mubr.msk.bf16.vlgmr.msra.gmra.mxu1 %vm434_vm3, %v1994_v10  ;;  %5313 = vmatprep.subr.bf16.mxu0 %v5656_v54  ;;  %v5596_v30 = vunpack.i.h.bf16 %v5594_v25  ;;  %v5595_v32 = vunpack.i.l.bf16 %v5594_v25  ;;  %v5601_v18 = vunpack.i.h.bf16 %v5599_v37  ;;  %v5600_v20 = vunpack.i.l.bf16 %v5599_v37 }
 0xa9c   :  { %v5732_v46 = vpop.eup %5731  ;;  %5308 = vmatpush3.bf16.msra.mxu1 %v2147_v11  ;;  %5309 = vmatprep.mubr.msk.bf16.mxu1 %vm6121_vm1, %v6120_v16 }
 0xa9d   :  { %v1991_v47 = vmul.f32 %v5732_v46, %v5724_v41  ;;  %v2238_v39 = vsel %vm434_vm3, %v6470_v19, %v5596_v30  ;;  %v2237_v40 = vsel %vm434_vm3, %v6468_v14, %v5595_v32  ;;  %v2240_v14 = vsel %vm434_vm3, %v6474_v28, %v5601_v18 }
 0xa9e   :  { %v5604_v24 = vpop.permute.xlu0 %5603  ;;  %v5609_v13 = vpop.permute.xlu1 %5608  ;;  %v2239_v36 = vsel %vm434_vm3, %v6472_v26, %v5600_v20  ;;  %v4877_v26 = vld [vmem:[%s7255_s10] ss:$0 sm:$0xff]  ;;  %s7256_s10 = sld [smem:[#allocation38_spill]] }
 0xa9f   :  { %v1995_v50 = vpack.c.bf16 %v1991_v47, %v1991_v47  ;;  %v5606_v33 = vunpack.i.h.bf16 %v5604_v24  ;;  %v5605_v34 = vunpack.i.l.bf16 %v5604_v24  ;;  %v5611_v19 = vunpack.i.h.bf16 %v5609_v13 }
 0xaa0   :  { %v5734_v49 = vpop.eup %5733  ;;  %v5610_v31 = vunpack.i.l.bf16 %v5609_v13 }
 0xaa1   :  { %5304 = vmatmul.mubr.msk.bf16.vlgmr.msra.gmra.mxu0 %vm434_vm3, %v1995_v50  ;;  %v1992_v52 = vmul.f32 %v5734_v49, %v5726_v43  ;;  %v2242_v43 = vsel %vm2241_vm6, %v2237_v40, %v5605_v34  ;;  %v2243_v44 = vsel %vm2241_vm6, %v2238_v39, %v5606_v33  ;;  %v2245_v45 = vsel %vm2241_vm6, %v2240_v14, %v5611_v19 }
 0xaa2   :  { %5314 = vmatpush3.bf16.msra.mxu0 %v5656_v54  ;;  %v2244_v5 = vsel %vm2241_vm6, %v2239_v36, %v5610_v31 }
 0xaa3   :  { %v1996_v53 = vpack.c.bf16 %v1992_v52, %v1992_v52  ;;  %5315 = vmatprep.subr.bf16.mxu0 %v5657_v59  ;;  %v5823_v52 = vld [vmem:[%s7253_s24] sm:$0xff] }
 0xaa5   :  { %5310 = vmatmul.mubr.msk.bf16.vlgmr.msra.gmra.mxu1 %vm434_vm3, %v1996_v53 }
 0xaa6   :  { %5316 = vmatpush3.bf16.msra.mxu0 %v5657_v59  ;;  %v5825_v59 = vld [vmem:[%s7253_s24 + $0x8] sm:$0xff] }
 0xb59   :  { %v2039_v55 = vpop.f32.mrf.mxu0 }
 0xb5b   :  { %v5293_v56 = vpop.f32.mrf.mxu0  ;;  %v2087_v57 = vpop.f32.mrf.mxu1 }
 0xb5c   :  { %v5612_v58 = vpack.i.bf16 %v2087_v57, %v2039_v55 }
 0xb5d   :  { %v2042_v60 = vpop.f32.mrf.mxu0  ;;  %v5299_v61 = vpop.f32.mrf.mxu1 }
 0xb5e   :  { %5613 = vrot.lane.b32.xlu0 %v5612_v58, %s6133_s16 }
 0xb5f   :  { %v5294_v62 = vpop.f32.mrf.mxu0  ;;  %v2090_v63 = vpop.f32.mrf.mxu1 }
 0xb60   :  { %v5826_v63 = vld [vmem:[%s7253_s24 + $0x18] sm:$0xff] }
 0xb61   :  { %v5300_v0 = vpop.f32.mrf.mxu1  ;;  %v2135_v1 = vpop.f32.mrf.mxu0 }
 0xb63   :  { %v5305_v2 = vpop.f32.mrf.mxu0 }
 0xb65   :  { %v2138_v6 = vpop.f32.mrf.mxu0  ;;  %v2183_v7 = vpop.f32.mrf.mxu1 }
 0xb66   :  { %v5617_v9 = vpack.i.bf16 %v2183_v7, %v2135_v1 }
 0xb67   :  { %v5306_v17 = vpop.f32.mrf.mxu0  ;;  %v5311_v51 = vpop.f32.mrf.mxu1 }
 0xb68   :  { %5618 = vrot.lane.b32.xlu1 %v5617_v9, %s6133_s16 }
 0xb69   :  { %v2186_v22 = vpop.f32.mrf.mxu1 }
 0xb6b   :  { %v5312_v23 = vpop.f32.mrf.mxu1 }
 0xbd0   :  { %v5614_v38 = vpop.permute.xlu0 %5613 }
 0xbd1   :  { %v5616_v41 = vunpack.i.h.bf16 %v5614_v38  ;;  %v5615_v42 = vunpack.i.l.bf16 %v5614_v38 }
 0xbd3   :  { %v2247_v21 = vsel %vm2246_vm7, %v2242_v43, %v5615_v42  ;;  %v2248_v27 = vsel %vm2246_vm7, %v2243_v44, %v5616_v41  ;;  %v5658_v43 = vld [vmem:[#allocation11 + $0x8] sm:$0xff]   ;;  %v5659_v44 = vld [vmem:[#allocation11] sm:$0xff]  }
 0xbd4   :  { %v2251_v29 = vpack.c.bf16 %v2248_v27, %v2247_v21  ;;  %5329 = vmatprep.subr.bf16.mxu0 %v5658_v43  ;;  %v5660_v21 = vld [vmem:[#allocation10 + $0x8] sm:$0xff]   ;;  %v5661_v27 = vld [vmem:[#allocation10] sm:$0xff]  }
 0xbd5   :  { %5321 = vmatprep.subr.bf16.mxu1 %v5660_v21 }
 0xbd6   :  { %5317 = vmatprep.mubr.msk.bf16.mxu0 %vm254_vm0, %v2251_v29  ;;  %5322 = vmatpush3.bf16.msra.mxu1 %v5660_v21 }
 0xbd7   :  { %5323 = vmatprep.subr.bf16.mxu1 %v5661_v27 }
 0xbda   :  { %v5619_v35 = vpop.permute.xlu1 %5618  ;;  %5324 = vmatpush3.bf16.msra.mxu1 %v5661_v27 }
 0xbdb   :  { %v5621_v3 = vunpack.i.h.bf16 %v5619_v35  ;;  %v5620_v4 = vunpack.i.l.bf16 %v5619_v35  ;;  %5337 = vmatprep.subr.bf16.mxu1 %v6120_v16 }
 0xbdd   :  { %v2250_v8 = vsel %vm2246_vm7, %v2245_v45, %v5621_v3  ;;  %v2249_v10 = vsel %vm2246_vm7, %v2244_v5, %v5620_v4  ;;  %v6746_v5 = vsub.s32 0, %v6387_v48  ;;  %v2335_v45 = vld [vmem:[%s7256_s10] sm:$0x3] }
 0xbde   :  { %v2252_v11 = vpack.c.bf16 %v2250_v8, %v2249_v10 }
 0xbe0   :  { %5318 = vmatmul.mubr.msk.bf16.vlgmr.msra.gmra.mxu0 %vm254_vm0, %v2252_v11  ;;  %v2392_v11 = vrot.slane %v2335_v45, %v6746_v5 }
 0xbe1   :  { %5333 = vmatprep.mubr.msk.bf16.mxu0 %vm254_vm0, %v6326_v12  ;;  %v5824_v12 = vld [vmem:[%s7253_s24 + $0x10] sm:$0xff]  ;;  %5330 = vmatpush3.bf16.msra.mxu0 %v5658_v43 }
 0xbe2   :  { %5331 = vmatprep.subr.bf16.mxu0 %v5659_v44 }
 0xbe5   :  { %5332 = vmatpush3.bf16.msra.mxu0 %v5659_v44 }
 0xbe6   :  { %5343 = vmatprep.subr.bf16.mxu0 %v6120_v16 }
 0xbe8   :  { %5334 = vmatmul.mubr.msk.bf16.vlgmr.msra.gmra.mxu0 %vm254_vm0, %v6330_v15 }
 0xbe9   :  { %5345 = vmatprep.mubr.msk.bf16.mxu0 %vm6121_vm1, %v6120_v16 }
 0xca0   :  { %v5319_v28 = vpop.f32.mrf.mxu0 }
 0xca1   :  { %v2325_v47 = vadd.f32 %v5319_v28, %v4877_v26  ;;  %v6753_v28 = vsub.s32 1, %v6387_v48 }
 0xca2   :  { %v2316_v46 = vpop.f32.mrf.mxu0 }
 0xca3   :  { %v2317_v49 = vadd.f32 %v4877_v26, %v2316_v46  ;;  %v2333_v58 = vadd.f32 %v5824_v12, %v2325_v47 }
 0xca4   :  { %v5320_v50 = vpop.f32.mrf.mxu0 }
 0xca5   :  { %v2331_v53 = vadd.f32 %v5823_v52, %v2317_v49  ;;  %v2328_v55 = vadd.f32 %v5320_v50, %v4877_v26  ;;  %v2342_v62 = vsel %vm254_vm0, %v2333_v58, 0.0  ;;  %v2400_v52 = vrot.slane %v2335_v45, %v6753_v28 }
 0xca6   :  { %v2319_v54 = vpop.f32.mrf.mxu0 }
 0xca7   :  { %v2320_v56 = vadd.f32 %v4877_v26, %v2319_v54  ;;  %v2336_v57 = vsel %vm254_vm0, %v2331_v53, 0.0  ;;  %v2334_v0 = vadd.f32 %v5826_v63, %v2328_v55 }
 0xca8   :  { %2337 = vadd.xlane.f32.xlu0 %v2336_v57  ;;  %v5335_v63 = vpop.f32.mrf.mxu0 }
 0xca9   :  { %v2332_v60 = vadd.f32 %v5825_v59, %v2320_v56  ;;  %v2345_v1 = vsel %vm254_vm0, %v2334_v0, 0.0 }
 0xcab   :  { %v2339_v61 = vsel %vm254_vm0, %v2332_v60, 0.0 }
 0xcac   :  { %2340 = vadd.xlane.f32.xlu1 %v2339_v61  ;;  %2343 = vadd.xlane.f32.xlu0 %v2342_v62  ;;  %v4887_v62 = vld [vmem:[%s7227_s11] ss:$0 sm:$0xff] }
 0xcb0   :  { %2346 = vadd.xlane.f32.xlu0 %v2345_v1  ;;  %v2542_v1 = vpop.f32.mrf.mxu0 }
 0xd31   :  { %v2338_v2 = vpop.xlane.xlu0 %2337 }
 0xd32   :  { %v2349_v6 = vmul.f32 0.03125, %v2338_v2  ;;  %v2543_v2 = vadd.f32 %v4887_v62, %v2542_v1 }
 0xd34   :  { %v2353_v7 = vsub.f32 %v2331_v53, %v2349_v6  ;;  %v5336_v6 = vpop.f32.mrf.mxu0 }
 0xd35   :  { %v2341_v9 = vpop.xlane.xlu1 %2340  ;;  %v2344_v17 = vpop.xlane.xlu0 %2343 }
 0xd36   :  { %v2350_v51 = vmul.f32 0.03125, %v2341_v9  ;;  %v2351_v22 = vmul.f32 0.03125, %v2344_v17  ;;  %v2357_v23 = vmul.f32 %v2353_v7, %v2353_v7  ;;  %v2554_v9 = vadd.f32 %v5336_v6, %v4887_v62  ;;  %v2545_v17 = vpop.f32.mrf.mxu0 }
 0xd38   :  { %v2354_v25 = vsub.f32 %v2332_v60, %v2350_v51  ;;  %v2355_v24 = vsub.f32 %v2333_v58, %v2351_v22  ;;  %v2361_v30 = vsel %vm254_vm0, %v2357_v23, 0.0  ;;  %v2546_v51 = vadd.f32 %v4887_v62, %v2545_v17 }
 0xd39   :  { %2362 = vadd.xlane.f32.xlu1 %v2361_v30  ;;  %v2347_v32 = vpop.xlane.xlu0 %2346  ;;  %v4882_v30 = vld [vmem:[%s7225_s9] ss:$0 sm:$0xff] }
 0xd3a   :  { %v2352_v33 = vmul.f32 0.03125, %v2347_v32  ;;  %v2358_v34 = vmul.f32 %v2354_v25, %v2354_v25  ;;  %v2359_v37 = vmul.f32 %v2355_v24, %v2355_v24  ;;  %v6767_v23 = vpack.c.bf16 %v2546_v51, %v2546_v51 }
 0xd3c   :  { %v2356_v38 = vsub.f32 %v2334_v0, %v2352_v33  ;;  %v2364_v39 = vsel %vm254_vm0, %v2358_v34, 0.0  ;;  %v2367_v40 = vsel %vm254_vm0, %v2359_v37, 0.0  ;;  %v2551_v0 = vadd.f32 %v5335_v63, %v4887_v62 }
 0xd3d   :  { %2365 = vadd.xlane.f32.xlu0 %v2364_v39  ;;  %2368 = vadd.xlane.f32.xlu1 %v2367_v40  ;;  %v6780_v40 = vpack.c.bf16 %v2554_v9, %v2554_v9 }
 0xd3e   :  { %v2360_v41 = vmul.f32 %v2356_v38, %v2356_v38  ;;  %v6776_v33 = vpack.c.bf16 %v2551_v0, %v2551_v0 }
 0xd3f   :  { %v2707_v21 = vsel %vm434_vm3, %v6780_v40, 0 }
 0xd40   :  { %v2370_v42 = vsel %vm254_vm0, %v2360_v41, 0.0 }
 0xd41   :  { %2371 = vadd.xlane.f32.xlu0 %v2370_v42  ;;  %v2661_v42 = vsel %vm434_vm3, %v6776_v33, 0 }
 0xdc2   :  { %v2363_v29 = vpop.xlane.xlu1 %2362 }
 0xdc3   :  { %v2373_v13 = vmul.f32 0.03125, %v2363_v29 }
 0xdc5   :  { %v2377_v18 = vadd.f32 1e-12, %v2373_v13 }
 0xdc6   :  { %v2369_v20 = vpop.xlane.xlu1 %2368  ;;  %v2366_v19 = vpop.xlane.xlu0 %2365 }
 0xdc7   :  { %5735 = vrsqrt.f32 %v2377_v18  ;;  %v2375_v31 = vmul.f32 0.03125, %v2369_v20  ;;  %v2374_v35 = vmul.f32 0.03125, %v2366_v19  ;;  %v6810_v18 = vld [vmem:[#allocation5] ss:$0 sm:$0xff] }
 0xdc9   :  { %v2379_v15 = vadd.f32 1e-12, %v2375_v31  ;;  %v2378_v14 = vadd.f32 1e-12, %v2374_v35  ;;  %v6813_v35 = vld [vmem:[#allocation5 + $0x1] ss:$0 sm:$0xff] }
 0xdca   :  { %v2372_v36 = vpop.xlane.xlu0 %2371 }
 0xdcb   :  { %5737 = vrsqrt.f32 %v2379_v15  ;;  %v2376_v3 = vmul.f32 0.03125, %v2372_v36 }
 0xdcc   :  { %5739 = vrsqrt.f32 %v2378_v14 }
 0xdcd   :  { %v2380_v4 = vadd.f32 1e-12, %v2376_v3 }
 0xdcf   :  { %5741 = vrsqrt.f32 %v2380_v4 }
 0xdd4   :  { %v5736_v8 = vpop.eup %5735 }
 0xdd5   :  { %v2385_v10 = vmul.f32 %v5736_v8, %v2353_v7  ;;  %v6763_v7 = vpack.c.bf16 %v2543_v2, %v2543_v2  ;;  %v6817_v8 = vld [vmem:[#allocation5 + $0x2] ss:$0 sm:$0xff] }
 0xdd7   :  { %v2393_v50 = vmul.f32 %v2392_v11, %v2385_v10  ;;  %v2569_v22 = vsel %vm434_vm3, %v6763_v7, 0 }
 0xdd8   :  { %v5738_v26 = vpop.eup %5737 }
 0xdd9   :  { %v5740_v46 = vpop.eup %5739  ;;  %v2387_v47 = vmul.f32 %v5738_v26, %v2355_v24  ;;  %v2401_v57 = vadd.f32 %v2400_v52, %v2393_v50  ;;  %v6821_v50 = vld [vmem:[#allocation5 + $0x3] ss:$0 sm:$0xff] }
 0xdda   :  { %v2386_v49 = vmul.f32 %v5740_v46, %v2354_v25  ;;  %v2615_v25 = vsel %vm434_vm3, %v6767_v23, 0 }
 0xddb   :  { %v2395_v56 = vmul.f32 %v2392_v11, %v2387_v47  ;;  %5344 = vmatpush3.bf16.xpose.msra.mxu0 %v2615_v25 }
 0xddc   :  { %v5742_v53 = vpop.eup %5741  ;;  %v2394_v54 = vmul.f32 %v2392_v11, %v2386_v49  ;;  %5355 = vmatprep.subr.bf16.mxu0 %v6120_v16 }
 0xddd   :  { %v2388_v55 = vmul.f32 %v5742_v53, %v2356_v38  ;;  %v2403_v60 = vadd.f32 %v2400_v52, %v2395_v56 }
 0xdde   :  { %v2402_v12 = vadd.f32 %v2400_v52, %v2394_v54 }
 0xddf   :  { %v2396_v58 = vmul.f32 %v2392_v11, %v2388_v55 }
 0xde0   :  { %v2405_v59 = vpack.c.bf16 %v2402_v12, %v2401_v57 }
 0xde1   :  { %v2404_v61 = vadd.f32 %v2400_v52, %v2396_v58 }
 0xde2   :  { %5325 = vmatprep.mubr.msk.bf16.mxu1 %vm254_vm0, %v2405_v59 }
 0xde3   :  { %v2406_v48 = vpack.c.bf16 %v2404_v61, %v2403_v60 }
 0xde5   :  { %5326 = vmatmul.mubr.msk.bf16.vlgmr.msra.gmra.mxu1 %vm254_vm0, %v2406_v48 }
 0xde6   :  { %5339 = vmatprep.mubr.msk.bf16.mxu1 %vm6121_vm1, %v6120_v16  ;;  %5338 = vmatpush3.bf16.xpose.msra.mxu1 %v2569_v22 }
 0xde7   :  { %5349 = vmatprep.subr.bf16.mxu1 %v6120_v16 }
 0xea5   :  { %v5327_v24 = vpop.f32.mrf.mxu1 }
 0xea6   :  { %v2479_v43 = vadd.f32 %v5327_v24, %v4882_v30 }
 0xea7   :  { %v2470_v32 = vpop.f32.mrf.mxu1 }
 0xea8   :  { %v2471_v34 = vadd.f32 %v4882_v30, %v2470_v32  ;;  %v6797_v27 = vpack.c.bf16 %v2479_v43, %v2479_v43 }
 0xea9   :  { %v5328_v37 = vpop.f32.mrf.mxu1 }
 0xeaa   :  { %v6778_v38 = vpack.c.bf16 %v2471_v34, %v2471_v34  ;;  %v2482_v29 = vadd.f32 %v5328_v37, %v4882_v30 }
 0xeab   :  { %v2473_v39 = vpop.f32.mrf.mxu1 }
 0xeac   :  { %v2474_v41 = vadd.f32 %v4882_v30, %v2473_v39  ;;  %5340 = vmatmul.mubr.msk.bf16.vlgmr.msra.gmra.mxu1 %vm434_vm3, %v6778_v38  ;;  %v6804_v13 = vpack.c.bf16 %v2482_v29, %v2482_v29 }
 0xead   :  { %5350 = vmatpush3.bf16.xpose.msra.mxu1 %v2661_v42  ;;  %5351 = vmatprep.mubr.msk.bf16.mxu1 %vm6121_vm1, %v6120_v16 }
 0xeae   :  { %v6788_v44 = vpack.c.bf16 %v2474_v41, %v2474_v41  ;;  %5361 = vmatprep.subr.bf16.mxu1 %v6120_v16 }
 0xeb0   :  { %5346 = vmatmul.mubr.msk.bf16.vlgmr.msra.gmra.mxu0 %vm434_vm3, %v6788_v44 }
 0xeb1   :  { %5356 = vmatpush3.bf16.xpose.msra.mxu0 %v2707_v21  ;;  %5357 = vmatprep.mubr.msk.bf16.mxu0 %vm6121_vm1, %v6120_v16 }
 0xeb2   :  { %5367 = vmatprep.subr.bf16.mxu0 %v6120_v16 }
 0xeb4   :  { %5352 = vmatmul.mubr.msk.bf16.vlgmr.msra.gmra.mxu1 %vm434_vm3, %v6797_v27 }
 0xeb5   :  { %5363 = vmatprep.mubr.msk.bf16.mxu1 %vm6121_vm1, %v6120_v16 }
 0xeb8   :  { %5358 = vmatmul.mubr.msk.bf16.vlgmr.msra.gmra.mxu0 %vm434_vm3, %v6804_v13 }
 0xeb9   :  { %5369 = vmatprep.mubr.msk.bf16.mxu0 %vm6121_vm1, %v6120_v16 }
 0xf6c   :  { %v2605_v20 = vpop.f32.mrf.mxu1 }
 0xf6d   :  { %v2606_v19 = vadd.f32 %v6810_v18, %v2605_v20 }
 0xf6e   :  { %v5341_v31 = vpop.f32.mrf.mxu1 }
 0xf6f   :  { %v2749_v15 = vsel %vm434_vm3, %v2606_v19, -inf }
 0xf70   :  { %v2651_v14 = vpop.f32.mrf.mxu0  ;;  %2750 = vmax.xlane.f32.xlu1 %v2749_v15  ;;  %v2608_v36 = vpop.f32.mrf.mxu1 }
 0xf71   :  { %v2652_v3 = vadd.f32 %v6813_v35, %v2651_v14 }
 0xf72   :  { %v5342_v4 = vpop.f32.mrf.mxu1  ;;  %v5347_v45 = vpop.f32.mrf.mxu0 }
 0xf73   :  { %v2752_v10 = vsel %vm434_vm3, %v2652_v3, -inf }
 0xf74   :  { %2753 = vmax.xlane.f32.xlu0 %v2752_v10  ;;  %v2654_v11 = vpop.f32.mrf.mxu0  ;;  %v2697_v26 = vpop.f32.mrf.mxu1 }
 0xf75   :  { %v2698_v46 = vadd.f32 %v6817_v8, %v2697_v26 }
 0xf76   :  { %v5348_v47 = vpop.f32.mrf.mxu0  ;;  %v5353_v49 = vpop.f32.mrf.mxu1 }
 0xf77   :  { %v2755_v52 = vsel %vm434_vm3, %v2698_v46, -inf }
 0xf78   :  { %v2743_v53 = vpop.f32.mrf.mxu0  ;;  %2756 = vmax.xlane.f32.xlu1 %v2755_v52  ;;  %v2700_v54 = vpop.f32.mrf.mxu1 }
 0xf79   :  { %v2744_v55 = vadd.f32 %v6821_v50, %v2743_v53 }
 0xf7a   :  { %v5354_v56 = vpop.f32.mrf.mxu1  ;;  %v5359_v57 = vpop.f32.mrf.mxu0 }
 0xf7b   :  { %v2758_v12 = vsel %vm434_vm3, %v2744_v55, -inf }
 0xf7c   :  { %2759 = vmax.xlane.f32.xlu0 %v2758_v12  ;;  %v2746_v58 = vpop.f32.mrf.mxu0 }
 0xf7e   :  { %v5360_v59 = vpop.f32.mrf.mxu0 }
 0xf89   :  { %2798 = vrot.lane.b32.xlu1 %v6763_v7, %s6122_s26 }
 0xff9   :  { %v2751_v60 = vpop.xlane.xlu1 %2750 }
 0xffa   :  { %v2761_v61 = vsub.f32 %v2606_v19, %v2751_v60 }
 0xffc   :  { %v2765_v48 = vmul.f32 1.442695, %v2761_v61 }
 0xffd   :  { %v2754_v62 = vpop.xlane.xlu0 %2753 }
 0xffe   :  { %5743 = vpow2.f32 %v2765_v48  ;;  %v2762_v63 = vsub.f32 %v2652_v3, %v2754_v62 }
0x1000   :  { %v2767_v0 = vmul.f32 1.442695, %v2762_v63 }
0x1001   :  { %v2757_v1 = vpop.xlane.xlu1 %2756 }
0x1002   :  { %5745 = vpow2.f32 %v2767_v0  ;;  %v2763_v24 = vsub.f32 %v2698_v46, %v2757_v1 }
0x1004   :  { %v2769_v32 = vmul.f32 1.442695, %v2763_v24 }
0x1005   :  { %v2799_v2 = vpop.permute.xlu1 %2798  ;;  %v2760_v25 = vpop.xlane.xlu0 %2759 }
0x1006   :  { %v2804_v6 = vsel %vm681_vm5, %v2799_v2, 0  ;;  %v2764_v30 = vsub.f32 %v2744_v55, %v2760_v25  ;;  %5747 = vpow2.f32 %v2769_v32 }
0x1007   :  { %5362 = vmatpush3.bf16.msra.mxu1 %v2804_v6 }
0x1008   :  { %5373 = vmatprep.subr.bf16.mxu1 %v6120_v16  ;;  %v2771_v34 = vmul.f32 1.442695, %v2764_v30 }
0x100a   :  { %5749 = vpow2.f32 %v2771_v34 }
0x100b   :  { %v5744_v9 = vpop.eup %5743 }
0x100c   :  { %v2773_v17 = vsel %vm434_vm3, %v5744_v9, 0.0 }
0x100d   :  { %2774 = vadd.xlane.f32.xlu1 %v2773_v17 }
0x100f   :  { %v5746_v51 = vpop.eup %5745 }
0x1010   :  { %v2776_v22 = vsel %vm434_vm3, %v5746_v51, 0.0 }
0x1011   :  { %2777 = vadd.xlane.f32.xlu0 %v2776_v22 }
0x1013   :  { %v5748_v37 = vpop.eup %5747 }
0x1014   :  { %v2779_v42 = vsel %vm434_vm3, %v5748_v37, 0.0 }
0x1017   :  { %v5750_v39 = vpop.eup %5749 }
0x1018   :  { %v2782_v41 = vsel %vm434_vm3, %v5750_v39, 0.0 }
0x101e   :  { %2896 = vrot.lane.b32.xlu1 %v6776_v33, %s6122_s26 }
0x1022   :  { %2945 = vrot.lane.b32.xlu1 %v6780_v40, %s6122_s26 }
0x1027   :  { %2847 = vrot.lane.b32.xlu0 %v6767_v23, %s6122_s26 }
0x1046   :  { %2783 = vadd.xlane.f32.xlu0 %v2782_v41  ;;  %2780 = vadd.xlane.f32.xlu1 %v2779_v42 }
0x1057   :  { %3047 = vrot.lane.b32.xlu1 %v6767_v23, %s6125_s3 }
0x105b   :  { %3045 = vrot.lane.b32.xlu1 %v6788_v44, %s6125_s3 }
0x105c   :  { %2996 = vrot.lane.b32.xlu0 %v6763_v7, %s6125_s3 }
0x105f   :  { %3149 = vrot.lane.b32.xlu1 %v6780_v40, %s6125_s3 }
0x1060   :  { %2994 = vrot.lane.b32.xlu0 %v6778_v38, %s6125_s3 }
0x1063   :  { %3147 = vrot.lane.b32.xlu1 %v6804_v13, %s6125_s3 }
0x1064   :  { %3098 = vrot.lane.b32.xlu0 %v6776_v33, %s6125_s3 }
0x1068   :  { %3096 = vrot.lane.b32.xlu0 %v6797_v27, %s6125_s3 }
0x1096   :  { %v2775_v43 = vpop.xlane.xlu1 %2774 }
0x1097   :  { %5751 = vrcp.f32 %v2775_v43 }
0x109a   :  { %v2778_v21 = vpop.xlane.xlu0 %2777  ;;  %v2897_v31 = vpop.permute.xlu1 %2896 }
0x109b   :  { %5753 = vrcp.f32 %v2778_v21  ;;  %v2902_v3 = vsel %vm681_vm5, %v2897_v31, 0 }
0x109e   :  { %v2848_v29 = vpop.permute.xlu0 %2847  ;;  %v2946_v45 = vpop.permute.xlu1 %2945 }
0x109f   :  { %v2853_v20 = vsel %vm681_vm5, %v2848_v29, 0  ;;  %v2951_v11 = vsel %vm681_vm5, %v2946_v45, 0 }
0x10a0   :  { %5368 = vmatpush3.bf16.msra.mxu0 %v2853_v20 }
0x10a1   :  { %5379 = vmatprep.subr.bf16.mxu0 %v6120_v16 }
0x10a4   :  { %v5752_v19 = vpop.eup %5751 }
0x10a5   :  { %v2789_v15 = vmul.f32 %v5752_v19, %v5744_v9 }
0x10a7   :  { %v2793_v14 = vpack.c.bf16 %v2789_v15, %v2789_v15 }
0x10a8   :  { %v5754_v36 = vpop.eup %5753 }
0x10a9   :  { %5364 = vmatmul.mubr.msk.bf16.vlgmr.msra.gmra.mxu1 %vm434_vm3, %v2793_v14  ;;  %v2790_v4 = vmul.f32 %v5754_v36, %v5746_v51 }
0x10aa   :  { %5374 = vmatpush3.bf16.msra.mxu1 %v2902_v3  ;;  %5375 = vmatprep.mubr.msk.bf16.mxu1 %vm6121_vm1, %v6120_v16 }
0x10ab   :  { %v2794_v10 = vpack.c.bf16 %v2790_v4, %v2790_v4  ;;  %5385 = vmatprep.subr.bf16.mxu1 %v6120_v16 }
0x10ad   :  { %5370 = vmatmul.mubr.msk.bf16.vlgmr.msra.gmra.mxu0 %vm434_vm3, %v2794_v10 }
0x10ae   :  { %5380 = vmatpush3.bf16.msra.mxu0 %v2951_v11  ;;  %5381 = vmatprep.mubr.msk.bf16.mxu0 %vm6121_vm1, %v6120_v16 }
0x10af   :  { %5391 = vmatprep.subr.bf16.mxu0 %v6120_v16 }
0x10cf   :  { %v2784_v26 = vpop.xlane.xlu0 %2783  ;;  %v2781_v46 = vpop.xlane.xlu1 %2780 }
0x10d0   :  { %5755 = vrcp.f32 %v2784_v26 }
0x10d1   :  { %5757 = vrcp.f32 %v2781_v46 }
0x10d3   :  { %v3048_v47 = vpop.permute.xlu1 %3047  ;;  %v2997_v49 = vpop.permute.xlu0 %2996 }
0x10d4   :  { %v3053_v58 = vsel %vm434_vm3, %v3048_v47, 0  ;;  %v3002_v60 = vsel %vm434_vm3, %v2997_v49, 0 }
0x10d7   :  { %v3046_v57 = vpop.permute.xlu1 %3045  ;;  %v2995_v59 = vpop.permute.xlu0 %2994 }
0x10db   :  { %v3150_v61 = vpop.permute.xlu1 %3149  ;;  %v3099_v48 = vpop.permute.xlu0 %3098 }
0x10dc   :  { %v3155_v62 = vsel %vm434_vm3, %v3150_v61, 0  ;;  %v3104_v63 = vsel %vm434_vm3, %v3099_v48, 0 }
0x10dd   :  { %v5756_v52 = vpop.eup %5755 }
0x10de   :  { %v5758_v53 = vpop.eup %5757  ;;  %v2792_v54 = vmul.f32 %v5756_v52, %v5750_v39 }
0x10df   :  { %v2791_v55 = vmul.f32 %v5758_v53, %v5748_v37  ;;  %v3148_v0 = vpop.permute.xlu1 %3147  ;;  %v3097_v1 = vpop.permute.xlu0 %3096 }
0x10e0   :  { %v2796_v56 = vpack.c.bf16 %v2792_v54, %v2792_v54 }
0x10e1   :  { %v2795_v12 = vpack.c.bf16 %v2791_v55, %v2791_v55 }
0x10e2   :  { %5382 = vmatmul.mubr.msk.bf16.vlgmr.msra.gmra.mxu0 %vm434_vm3, %v2796_v56 }
0x10e3   :  { %5376 = vmatmul.mubr.msk.bf16.vlgmr.msra.gmra.mxu1 %vm434_vm3, %v2795_v12  ;;  %5392 = vmatpush3.bf16.xpose.msra.mxu0 %v3053_v58 }
0x10e4   :  { %5386 = vmatpush3.bf16.xpose.msra.mxu1 %v3002_v60  ;;  %5387 = vmatprep.mubr.msk.bf16.mxu1 %vm6121_vm1, %v6120_v16 }
0x10e5   :  { %5393 = vmatprep.mubr.msk.bf16.mxu0 %vm6121_vm1, %v6120_v16  ;;  %5397 = vmatprep.subr.bf16.mxu1 %v6120_v16 }
0x10e6   :  { %5403 = vmatprep.subr.bf16.mxu0 %v6120_v16 }
0x10ea   :  { %5394 = vmatmul.mubr.msk.bf16.vlgmr.msra.gmra.mxu0 %vm434_vm3, %v3046_v57 }
0x10eb   :  { %5388 = vmatmul.mubr.msk.bf16.vlgmr.msra.gmra.mxu1 %vm434_vm3, %v2995_v59  ;;  %5404 = vmatpush3.bf16.xpose.msra.mxu0 %v3155_v62 }
0x10ec   :  { %5398 = vmatpush3.bf16.xpose.msra.mxu1 %v3104_v63  ;;  %5399 = vmatprep.mubr.msk.bf16.mxu1 %vm6121_vm1, %v6120_v16 }
0x10ed   :  { %5405 = vmatprep.mubr.msk.bf16.mxu0 %vm6121_vm1, %v6120_v16  ;;  %5409 = vmatprep.subr.bf16.mxu1 %v6120_v16 }
0x10ee   :  { %5415 = vmatprep.subr.bf16.mxu0 %v6120_v16 }
0x10f2   :  { %5406 = vmatmul.mubr.msk.bf16.vlgmr.msra.gmra.mxu0 %vm434_vm3, %v3148_v0 }
0x10f3   :  { %5400 = vmatmul.mubr.msk.bf16.vlgmr.msra.gmra.mxu1 %vm434_vm3, %v3097_v1  ;;  %5417 = vmatprep.mubr.msk.bf16.mxu0 %vm6121_vm1, %v6120_v16 }
0x10f4   :  { %5411 = vmatprep.mubr.msk.bf16.mxu1 %vm6121_vm1, %v6120_v16 }
0x1169   :  { %v6894_v2 = vpop.f32.mrf.mxu1 }
0x116b   :  { %v5365_v6 = vpop.f32.mrf.mxu1 }
0x116d   :  { %v2843_v9 = vpop.f32.mrf.mxu1  ;;  %v6896_v17 = vpop.f32.mrf.mxu0 }
0x116f   :  { %v5366_v51 = vpop.f32.mrf.mxu1  ;;  %v5371_v22 = vpop.f32.mrf.mxu0 }
0x1171   :  { %v2892_v25 = vpop.f32.mrf.mxu0 }
0x1173   :  { %v5372_v24 = vpop.f32.mrf.mxu0 }
0x11a2   :  { %v6898_v30 = vpop.f32.mrf.mxu0 }
0x11a3   :  { %v6900_v32 = vpop.f32.mrf.mxu1 }
0x11a4   :  { %v5383_v34 = vpop.f32.mrf.mxu0 }
0x11a5   :  { %v5377_v37 = vpop.f32.mrf.mxu1 }
0x11a6   :  { %v2990_v39 = vpop.f32.mrf.mxu0 }
0x11a7   :  { %v2941_v41 = vpop.f32.mrf.mxu1 }
0x11a8   :  { %v5384_v42 = vpop.f32.mrf.mxu0 }
0x11a9   :  { %v5378_v43 = vpop.f32.mrf.mxu1 }
0x11aa   :  { %v3089_v21 = vpop.f32.mrf.mxu0 }
0x11ab   :  { %v3038_v29 = vpop.f32.mrf.mxu1  ;;  %v3090_v20 = vadd.f32 %v6813_v35, %v3089_v21 }
0x11ac   :  { %v3039_v19 = vadd.f32 %v6810_v18, %v3038_v29  ;;  %v5395_v31 = vpop.f32.mrf.mxu0 }
0x11ad   :  { %v5389_v15 = vpop.f32.mrf.mxu1  ;;  %v3200_v14 = vsel %vm434_vm3, %v3090_v20, -inf }
0x11ae   :  { %3201 = vmax.xlane.f32.xlu1 %v3200_v14  ;;  %v3092_v36 = vpop.f32.mrf.mxu0  ;;  %v3197_v3 = vsel %vm434_vm3, %v3039_v19, -inf }
0x11af   :  { %3198 = vmax.xlane.f32.xlu0 %v3197_v3  ;;  %v3041_v4 = vpop.f32.mrf.mxu1 }
0x11b0   :  { %v5396_v45 = vpop.f32.mrf.mxu0 }
0x11b1   :  { %v5390_v10 = vpop.f32.mrf.mxu1 }
0x11b2   :  { %v3191_v11 = vpop.f32.mrf.mxu0 }
0x11b3   :  { %v3140_v26 = vpop.f32.mrf.mxu1  ;;  %v3192_v52 = vadd.f32 %v6821_v50, %v3191_v11 }
0x11b4   :  { %v3141_v46 = vadd.f32 %v6817_v8, %v3140_v26  ;;  %v5407_v47 = vpop.f32.mrf.mxu0 }
0x11b5   :  { %v5401_v49 = vpop.f32.mrf.mxu1  ;;  %v3206_v12 = vsel %vm434_vm3, %v3192_v52, -inf }
0x11b6   :  { %v3194_v53 = vpop.f32.mrf.mxu0  ;;  %v3203_v54 = vsel %vm434_vm3, %v3141_v46, -inf }
0x11b7   :  { %3204 = vmax.xlane.f32.xlu0 %v3203_v54  ;;  %v3143_v55 = vpop.f32.mrf.mxu1 }
0x11b8   :  { %v5408_v56 = vpop.f32.mrf.mxu0 }
0x11b9   :  { %v5402_v57 = vpop.f32.mrf.mxu1 }
0x11bb   :  { %3207 = vmax.xlane.f32.xlu0 %v3206_v12 }
0x11bf   :  { %3245 = vrot.lane.b32.xlu1 %v6763_v7, %s6124_s2 }
0x1237   :  { %v3202_v58 = vpop.xlane.xlu1 %3201 }
0x1238   :  { %v3210_v59 = vsub.f32 %v3090_v20, %v3202_v58  ;;  %v3199_v60 = vpop.xlane.xlu0 %3198 }
0x1239   :  { %v3209_v61 = vsub.f32 %v3039_v19, %v3199_v60 }
0x123a   :  { %v3215_v48 = vmul.f32 1.442695, %v3210_v59 }
0x123b   :  { %v3213_v62 = vmul.f32 1.442695, %v3209_v61  ;;  %v3246_v63 = vpop.permute.xlu1 %3245 }
0x123c   :  { %5759 = vpow2.f32 %v3215_v48  ;;  %v3251_v0 = vsel %vm681_vm5, %v3246_v63, 0 }
0x123d   :  { %5761 = vpow2.f32 %v3213_v62  ;;  %5410 = vmatpush3.bf16.msra.mxu1 %v3251_v0 }
0x123e   :  { %5421 = vmatprep.subr.bf16.mxu1 %v6120_v16 }
0x1240   :  { %v3205_v22 = vpop.xlane.xlu0 %3204 }
0x1241   :  { %v3211_v37 = vsub.f32 %v3141_v46, %v3205_v22 }
0x1243   :  { %v3217_v39 = vmul.f32 1.442695, %v3211_v37 }
0x1244   :  { %v3208_v25 = vpop.xlane.xlu0 %3207 }
0x1245   :  { %v3212_v24 = vsub.f32 %v3192_v52, %v3208_v25 }
0x1247   :  { %v3219_v34 = vmul.f32 1.442695, %v3212_v24 }
0x1249   :  { %v5760_v1 = vpop.eup %5759  ;;  %5763 = vpow2.f32 %v3219_v34 }
0x124a   :  { %v5762_v6 = vpop.eup %5761  ;;  %v3224_v9 = vsel %vm434_vm3, %v5760_v1, 0.0  ;;  %5765 = vpow2.f32 %v3217_v39 }
0x124b   :  { %v3221_v51 = vsel %vm434_vm3, %v5762_v6, 0.0  ;;  %3225 = vadd.xlane.f32.xlu0 %v3224_v9 }
0x124c   :  { %3222 = vadd.xlane.f32.xlu1 %v3221_v51 }
0x1256   :  { %v5764_v41 = vpop.eup %5763 }
0x1257   :  { %v3230_v42 = vsel %vm434_vm3, %v5764_v41, 0.0  ;;  %v5766_v43 = vpop.eup %5765 }
0x1258   :  { %v3227_v21 = vsel %vm434_vm3, %v5766_v43, 0.0 }
0x125d   :  { %3341 = vrot.lane.b32.xlu1 %v6776_v33, %s6124_s2 }
0x1261   :  { %3389 = vrot.lane.b32.xlu1 %v6780_v40, %s6124_s2  ;;  %3293 = vrot.lane.b32.xlu0 %v6767_v23, %s6124_s2 }
0x1280   :  { %3231 = vadd.xlane.f32.xlu0 %v3230_v42 }
0x1285   :  { %3228 = vadd.xlane.f32.xlu1 %v3227_v21 }
0x1296   :  { %3489 = vrot.lane.b32.xlu1 %v6767_v23, %s6128_s29  ;;  %3439 = vrot.lane.b32.xlu0 %v6763_v7, %s6128_s29 }
0x129a   :  { %3487 = vrot.lane.b32.xlu1 %v6788_v44, %s6128_s29  ;;  %3437 = vrot.lane.b32.xlu0 %v6778_v38, %s6128_s29 }
0x129e   :  { %3589 = vrot.lane.b32.xlu1 %v6780_v40, %s6128_s29  ;;  %3539 = vrot.lane.b32.xlu0 %v6776_v33, %s6128_s29 }
0x12a2   :  { %3587 = vrot.lane.b32.xlu1 %v6804_v13, %s6128_s29  ;;  %3537 = vrot.lane.b32.xlu0 %v6797_v27, %s6128_s29 }
0x12d4   :  { %v3226_v29 = vpop.xlane.xlu0 %3225 }
0x12d5   :  { %v3223_v20 = vpop.xlane.xlu1 %3222  ;;  %5767 = vrcp.f32 %v3226_v29 }
0x12d6   :  { %5769 = vrcp.f32 %v3223_v20 }
0x12d8   :  { %v3294_v19 = vpop.permute.xlu0 %3293 }
0x12d9   :  { %v3299_v31 = vsel %vm681_vm5, %v3294_v19, 0  ;;  %v3342_v15 = vpop.permute.xlu1 %3341 }
0x12da   :  { %5416 = vmatpush3.bf16.msra.mxu0 %v3299_v31  ;;  %v3347_v46 = vsel %vm681_vm5, %v3342_v15, 0 }
0x12db   :  { %5427 = vmatprep.subr.bf16.mxu0 %v6120_v16 }
0x12dd   :  { %v3390_v4 = vpop.permute.xlu1 %3389 }
0x12de   :  { %v3395_v26 = vsel %vm681_vm5, %v3390_v4, 0 }
0x12e2   :  { %v5768_v14 = vpop.eup %5767 }
0x12e3   :  { %v5770_v36 = vpop.eup %5769  ;;  %v3238_v3 = vmul.f32 %v5768_v14, %v5760_v1 }
0x12e4   :  { %v3237_v45 = vmul.f32 %v5770_v36, %v5762_v6 }
0x12e5   :  { %v3242_v10 = vpack.c.bf16 %v3238_v3, %v3238_v3 }
0x12e6   :  { %v3241_v11 = vpack.c.bf16 %v3237_v45, %v3237_v45 }
0x12e7   :  { %5418 = vmatmul.mubr.msk.bf16.vlgmr.msra.gmra.mxu0 %vm434_vm3, %v3242_v10 }
0x12e8   :  { %5412 = vmatmul.mubr.msk.bf16.vlgmr.msra.gmra.mxu1 %vm434_vm3, %v3241_v11  ;;  %5428 = vmatpush3.bf16.msra.mxu0 %v3395_v26 }
0x12e9   :  { %5422 = vmatpush3.bf16.msra.mxu1 %v3347_v46  ;;  %5429 = vmatprep.mubr.msk.bf16.mxu0 %vm6121_vm1, %v6120_v16 }
0x12ea   :  { %5439 = vmatprep.subr.bf16.mxu0 %v6120_v16  ;;  %5423 = vmatprep.mubr.msk.bf16.mxu1 %vm6121_vm1, %v6120_v16 }
0x12eb   :  { %5433 = vmatprep.subr.bf16.mxu1 %v6120_v16 }
0x1309   :  { %v3232_v47 = vpop.xlane.xlu0 %3231 }
0x130a   :  { %5771 = vrcp.f32 %v3232_v47 }
0x130d   :  { %v3440_v55 = vpop.permute.xlu0 %3439 }
0x130e   :  { %v3229_v49 = vpop.xlane.xlu1 %3228  ;;  %v3445_v48 = vsel %vm434_vm3, %v3440_v55, 0 }
0x130f   :  { %5773 = vrcp.f32 %v3229_v49 }
0x1311   :  { %v3438_v61 = vpop.permute.xlu0 %3437 }
0x1312   :  { %v3490_v52 = vpop.permute.xlu1 %3489 }
0x1313   :  { %v3495_v58 = vsel %vm434_vm3, %v3490_v52, 0 }
0x1315   :  { %v3540_v0 = vpop.permute.xlu0 %3539 }
0x1316   :  { %v3488_v57 = vpop.permute.xlu1 %3487  ;;  %v3545_v1 = vsel %vm434_vm3, %v3540_v0, 0 }
0x1317   :  { %v5772_v53 = vpop.eup %5771 }
0x1318   :  { %v3240_v54 = vmul.f32 %v5772_v53, %v5764_v41 }
0x1319   :  { %v3538_v9 = vpop.permute.xlu0 %3537 }
0x131a   :  { %v3244_v56 = vpack.c.bf16 %v3240_v54, %v3240_v54  ;;  %v3590_v62 = vpop.permute.xlu1 %3589 }
0x131b   :  { %v3595_v63 = vsel %vm434_vm3, %v3590_v62, 0 }
0x131c   :  { %v5774_v12 = vpop.eup %5773  ;;  %5430 = vmatmul.mubr.msk.bf16.vlgmr.msra.gmra.mxu0 %vm434_vm3, %v3244_v56 }
0x131d   :  { %5440 = vmatpush3.bf16.xpose.msra.mxu0 %v3495_v58  ;;  %v3239_v59 = vmul.f32 %v5774_v12, %v5766_v43  ;;  %5441 = vmatprep.mubr.msk.bf16.mxu0 %vm6121_vm1, %v6120_v16 }
0x131e   :  { %5451 = vmatprep.subr.bf16.mxu0 %v6120_v16  ;;  %v3588_v6 = vpop.permute.xlu1 %3587 }
0x131f   :  { %v3243_v60 = vpack.c.bf16 %v3239_v59, %v3239_v59 }
0x1321   :  { %5424 = vmatmul.mubr.msk.bf16.vlgmr.msra.gmra.mxu1 %vm434_vm3, %v3243_v60 }
0x1322   :  { %5434 = vmatpush3.bf16.xpose.msra.mxu1 %v3445_v48  ;;  %5435 = vmatprep.mubr.msk.bf16.mxu1 %vm6121_vm1, %v6120_v16 }
0x1323   :  { %5445 = vmatprep.subr.bf16.mxu1 %v6120_v16 }
0x1324   :  { %5442 = vmatmul.mubr.msk.bf16.vlgmr.msra.gmra.mxu0 %vm434_vm3, %v3488_v57 }
0x1325   :  { %5452 = vmatpush3.bf16.xpose.msra.mxu0 %v3595_v63  ;;  %5453 = vmatprep.mubr.msk.bf16.mxu0 %vm6121_vm1, %v6120_v16 }
0x1326   :  { %5463 = vmatprep.subr.bf16.mxu0 %v6120_v16 }
0x1329   :  { %5436 = vmatmul.mubr.msk.bf16.vlgmr.msra.gmra.mxu1 %vm434_vm3, %v3438_v61 }
0x132a   :  { %5446 = vmatpush3.bf16.xpose.msra.mxu1 %v3545_v1  ;;  %5447 = vmatprep.mubr.msk.bf16.mxu1 %vm6121_vm1, %v6120_v16 }
0x132b   :  { %5457 = vmatprep.subr.bf16.mxu1 %v6120_v16 }
0x132c   :  { %5454 = vmatmul.mubr.msk.bf16.vlgmr.msra.gmra.mxu0 %vm434_vm3, %v3588_v6 }
0x132d   :  { %5465 = vmatprep.mubr.msk.bf16.mxu0 %vm6121_vm1, %v6120_v16 }
0x1331   :  { %5448 = vmatmul.mubr.msk.bf16.vlgmr.msra.gmra.mxu1 %vm434_vm3, %v3538_v9 }
0x1332   :  { %5459 = vmatprep.mubr.msk.bf16.mxu1 %vm6121_vm1, %v6120_v16 }
0x13a7   :  { %v6978_v51 = vpop.f32.mrf.mxu0 }
0x13a8   :  { %v6980_v22 = vpop.f32.mrf.mxu1 }
0x13a9   :  { %v5622_v25 = vpack.i.bf16 %v6978_v51, %v6980_v22  ;;  %v5419_v24 = vpop.f32.mrf.mxu0 }
0x13aa   :  { %v5413_v34 = vpop.f32.mrf.mxu1 }
0x13ab   :  { %v3338_v37 = vpop.f32.mrf.mxu0 }
0x13ac   :  { %v3290_v39 = vpop.f32.mrf.mxu1 }
0x13ad   :  { %v5420_v41 = vpop.f32.mrf.mxu0 }
0x13ae   :  { %v5414_v42 = vpop.f32.mrf.mxu1 }
0x13dc   :  { %v6984_v43 = vpop.f32.mrf.mxu0 }
0x13de   :  { %v5431_v21 = vpop.f32.mrf.mxu0 }
0x13e0   :  { %v3434_v29 = vpop.f32.mrf.mxu0 }
0x13e1   :  { %v6986_v20 = vpop.f32.mrf.mxu1 }
0x13e2   :  { %v5627_v19 = vpack.i.bf16 %v6984_v43, %v6986_v20  ;;  %v5432_v31 = vpop.f32.mrf.mxu0 }
0x13e3   :  { %v5425_v15 = vpop.f32.mrf.mxu1 }
0x13e4   :  { %v3531_v14 = vpop.f32.mrf.mxu0 }
0x13e5   :  { %v3386_v36 = vpop.f32.mrf.mxu1  ;;  %v3532_v3 = vadd.f32 %v6813_v35, %v3531_v14 }
0x13e6   :  { %v5443_v4 = vpop.f32.mrf.mxu0 }
0x13e7   :  { %v5426_v45 = vpop.f32.mrf.mxu1  ;;  %v3640_v10 = vsel %vm434_vm3, %v3532_v3, -inf }
0x13e8   :  { %3641 = vmax.xlane.f32.xlu1 %v3640_v10  ;;  %v3534_v11 = vpop.f32.mrf.mxu0 }
0x13e9   :  { %v3481_v26 = vpop.f32.mrf.mxu1 }
0x13ea   :  { %v3482_v46 = vadd.f32 %v6810_v18, %v3481_v26  ;;  %v5444_v47 = vpop.f32.mrf.mxu0 }
0x13eb   :  { %v5437_v49 = vpop.f32.mrf.mxu1 }
0x13ec   :  { %v3631_v52 = vpop.f32.mrf.mxu0  ;;  %v3637_v53 = vsel %vm434_vm3, %v3482_v46, -inf }
0x13ed   :  { %3638 = vmax.xlane.f32.xlu0 %v3637_v53  ;;  %v3484_v54 = vpop.f32.mrf.mxu1  ;;  %v3632_v61 = vadd.f32 %v6821_v50, %v3631_v52 }
0x13ee   :  { %v5455_v55 = vpop.f32.mrf.mxu0 }
0x13ef   :  { %v5438_v56 = vpop.f32.mrf.mxu1  ;;  %v3646_v0 = vsel %vm434_vm3, %v3632_v61, -inf }
0x13f0   :  { %v3634_v57 = vpop.f32.mrf.mxu0 }
0x13f1   :  { %v3581_v12 = vpop.f32.mrf.mxu1 }
0x13f2   :  { %v3582_v58 = vadd.f32 %v6817_v8, %v3581_v12  ;;  %v5456_v59 = vpop.f32.mrf.mxu0 }
0x13f3   :  { %v5449_v60 = vpop.f32.mrf.mxu1 }
0x13f4   :  { %v3643_v48 = vsel %vm434_vm3, %v3582_v58, -inf }
0x13f5   :  { %3644 = vmax.xlane.f32.xlu0 %v3643_v48  ;;  %v3584_v62 = vpop.f32.mrf.mxu1 }
0x13f7   :  { %v5450_v63 = vpop.f32.mrf.mxu1 }
0x13f9   :  { %3647 = vmax.xlane.f32.xlu0 %v3646_v0  ;;  %3685 = vrot.lane.b32.xlu1 %v6763_v7, %s6127_s12 }
0x1471   :  { %v3642_v1 = vpop.xlane.xlu1 %3641 }
0x1472   :  { %v3650_v6 = vsub.f32 %v3532_v3, %v3642_v1 }
0x1474   :  { %v3655_v9 = vmul.f32 1.442695, %v3650_v6 }
0x1475   :  { %v3686_v24 = vpop.permute.xlu1 %3685 }
0x1476   :  { %5775 = vpow2.f32 %v3655_v9  ;;  %v3691_v34 = vsel %vm681_vm5, %v3686_v24, 0  ;;  %v3639_v37 = vpop.xlane.xlu0 %3638 }
0x1477   :  { %v3649_v39 = vsub.f32 %v3482_v46, %v3639_v37  ;;  %5458 = vmatpush3.bf16.msra.mxu1 %v3691_v34 }
0x1478   :  { %5469 = vmatprep.subr.bf16.mxu1 %v6120_v16 }
0x1479   :  { %v3653_v41 = vmul.f32 1.442695, %v3649_v39 }
0x147b   :  { %5777 = vpow2.f32 %v3653_v41 }
0x147e   :  { %v3645_v15 = vpop.xlane.xlu0 %3644 }
0x147f   :  { %v3651_v4 = vsub.f32 %v3582_v58, %v3645_v15 }
0x1481   :  { %v3657_v45 = vmul.f32 1.442695, %v3651_v4 }
0x1482   :  { %v3648_v14 = vpop.xlane.xlu0 %3647 }
0x1483   :  { %v5776_v42 = vpop.eup %5775  ;;  %v3652_v36 = vsub.f32 %v3632_v61, %v3648_v14 }
0x1484   :  { %v3664_v21 = vsel %vm434_vm3, %v5776_v42, 0.0 }
0x1485   :  { %3665 = vadd.xlane.f32.xlu0 %v3664_v21  ;;  %v3659_v3 = vmul.f32 1.442695, %v3652_v36 }
0x1487   :  { %5779 = vpow2.f32 %v3659_v3 }
0x1488   :  { %v5778_v29 = vpop.eup %5777  ;;  %5781 = vpow2.f32 %v3657_v45 }
0x1489   :  { %v3661_v31 = vsel %vm434_vm3, %v5778_v29, 0.0 }
0x148a   :  { %3662 = vadd.xlane.f32.xlu1 %v3661_v31 }
0x1494   :  { %v5780_v10 = vpop.eup %5779 }
0x1495   :  { %v3670_v11 = vsel %vm434_vm3, %v5780_v10, 0.0  ;;  %v5782_v26 = vpop.eup %5781 }
0x1496   :  { %v3667_v46 = vsel %vm434_vm3, %v5782_v26, 0.0 }
0x149b   :  { %3781 = vrot.lane.b32.xlu1 %v6776_v33, %s6127_s12  ;;  %3733 = vrot.lane.b32.xlu0 %v6767_v23, %s6127_s12 }
0x149f   :  { %3829 = vrot.lane.b32.xlu1 %v6780_v40, %s6127_s12 }
0x14ba   :  { %3671 = vadd.xlane.f32.xlu0 %v3670_v11 }
0x14c3   :  { %3668 = vadd.xlane.f32.xlu1 %v3667_v46 }
0x14d0   :  { %3879 = vrot.lane.b32.xlu0 %v6763_v7, %s6131_s0 }
0x14d4   :  { %3929 = vrot.lane.b32.xlu1 %v6767_v23, %s6131_s0  ;;  %3877 = vrot.lane.b32.xlu0 %v6778_v38, %s6131_s0 }
0x14d8   :  { %3927 = vrot.lane.b32.xlu1 %v6788_v44, %s6131_s0  ;;  %3979 = vrot.lane.b32.xlu0 %v6776_v33, %s6131_s0 }
0x14dc   :  { %4029 = vrot.lane.b32.xlu1 %v6780_v40, %s6131_s0  ;;  %3977 = vrot.lane.b32.xlu0 %v6797_v27, %s6131_s0 }
0x14e0   :  { %4027 = vrot.lane.b32.xlu1 %v6804_v13, %s6131_s0 }
0x150e   :  { %v3666_v47 = vpop.xlane.xlu0 %3665 }
0x150f   :  { %5783 = vrcp.f32 %v3666_v47 }
0x1512   :  { %v3734_v49 = vpop.permute.xlu0 %3733 }
0x1513   :  { %v3663_v52 = vpop.xlane.xlu1 %3662  ;;  %v3739_v38 = vsel %vm681_vm5, %v3734_v49, 0 }
0x1514   :  { %5785 = vrcp.f32 %v3663_v52  ;;  %5464 = vmatpush3.bf16.msra.mxu0 %v3739_v38 }
0x1515   :  { %5475 = vmatprep.subr.bf16.mxu0 %v6120_v16 }
0x1517   :  { %v3782_v44 = vpop.permute.xlu1 %3781 }
0x1518   :  { %v3787_v58 = vsel %vm681_vm5, %v3782_v44, 0 }
0x151b   :  { %v3830_v55 = vpop.permute.xlu1 %3829 }
0x151c   :  { %v5784_v53 = vpop.eup %5783  ;;  %v3835_v27 = vsel %vm681_vm5, %v3830_v55, 0 }
0x151d   :  { %v3678_v54 = vmul.f32 %v5784_v53, %v5776_v42 }
0x151f   :  { %v3682_v56 = vpack.c.bf16 %v3678_v54, %v3678_v54 }
0x1521   :  { %v5786_v57 = vpop.eup %5785  ;;  %5466 = vmatmul.mubr.msk.bf16.vlgmr.msra.gmra.mxu0 %vm434_vm3, %v3682_v56 }
0x1522   :  { %v3677_v13 = vmul.f32 %v5786_v57, %v5778_v29  ;;  %5476 = vmatpush3.bf16.msra.mxu0 %v3835_v27  ;;  %5477 = vmatprep.mubr.msk.bf16.mxu0 %vm6121_vm1, %v6120_v16 }
0x1523   :  { %5487 = vmatprep.subr.bf16.mxu0 %v6120_v16 }
0x1524   :  { %v3681_v12 = vpack.c.bf16 %v3677_v13, %v3677_v13 }
0x1526   :  { %5460 = vmatmul.mubr.msk.bf16.vlgmr.msra.gmra.mxu1 %vm434_vm3, %v3681_v12 }
0x1527   :  { %5470 = vmatpush3.bf16.msra.mxu1 %v3787_v58  ;;  %5471 = vmatprep.mubr.msk.bf16.mxu1 %vm6121_vm1, %v6120_v16 }
0x1528   :  { %5481 = vmatprep.subr.bf16.mxu1 %v6120_v16 }
0x1543   :  { %v3672_v59 = vpop.xlane.xlu0 %3671 }
0x1544   :  { %5787 = vrcp.f32 %v3672_v59 }
0x1547   :  { %v3880_v6 = vpop.permute.xlu0 %3879 }
0x1548   :  { %v3885_v42 = vsel %vm434_vm3, %v3880_v6, 0 }
0x154b   :  { %v3878_v39 = vpop.permute.xlu0 %3877 }
0x154c   :  { %v3669_v60 = vpop.xlane.xlu1 %3668 }
0x154d   :  { %5789 = vrcp.f32 %v3669_v60 }
0x154f   :  { %v3980_v21 = vpop.permute.xlu0 %3979 }
0x1550   :  { %v3930_v61 = vpop.permute.xlu1 %3929  ;;  %v3985_v31 = vsel %vm434_vm3, %v3980_v21, 0 }
0x1551   :  { %v5788_v48 = vpop.eup %5787  ;;  %v3935_v1 = vsel %vm434_vm3, %v3930_v61, 0 }
0x1552   :  { %v3680_v62 = vmul.f32 %v5788_v48, %v5780_v10 }
0x1553   :  { %v3978_v15 = vpop.permute.xlu0 %3977 }
0x1554   :  { %v3684_v63 = vpack.c.bf16 %v3680_v62, %v3680_v62  ;;  %v3928_v0 = vpop.permute.xlu1 %3927 }
0x1556   :  { %5478 = vmatmul.mubr.msk.bf16.vlgmr.msra.gmra.mxu0 %vm434_vm3, %v3684_v63 }
0x1557   :  { %5488 = vmatpush3.bf16.xpose.msra.mxu0 %v3935_v1  ;;  %5489 = vmatprep.mubr.msk.bf16.mxu0 %vm6121_vm1, %v6120_v16 }
0x1558   :  { %5499 = vmatprep.subr.bf16.mxu0 %v6120_v16  ;;  %v4030_v34 = vpop.permute.xlu1 %4029 }
0x1559   :  { %v4035_v41 = vsel %vm434_vm3, %v4030_v34, 0 }
0x155a   :  { %v5790_v9 = vpop.eup %5789 }
0x155b   :  { %v3679_v24 = vmul.f32 %v5790_v9, %v5782_v26 }
0x155c   :  { %v4028_v29 = vpop.permute.xlu1 %4027 }
0x155d   :  { %v3683_v37 = vpack.c.bf16 %v3679_v24, %v3679_v24 }
0x155e   :  { %5490 = vmatmul.mubr.msk.bf16.vlgmr.msra.gmra.mxu0 %vm434_vm3, %v3928_v0 }
0x155f   :  { %5472 = vmatmul.mubr.msk.bf16.vlgmr.msra.gmra.mxu1 %vm434_vm3, %v3683_v37  ;;  %5500 = vmatpush3.bf16.xpose.msra.mxu0 %v4035_v41 }
0x1560   :  { %5482 = vmatpush3.bf16.xpose.msra.mxu1 %v3885_v42  ;;  %5483 = vmatprep.mubr.msk.bf16.mxu1 %vm6121_vm1, %v6120_v16 }
0x1561   :  { %5493 = vmatprep.subr.bf16.mxu1 %v6120_v16  ;;  %5501 = vmatprep.mubr.msk.bf16.mxu0 %vm6121_vm1, %v6120_v16 }
0x1562   :  { %5511 = vmatprep.subr.bf16.mxu0 %v6120_v16 }
0x1566   :  { %5502 = vmatmul.mubr.msk.bf16.vlgmr.msra.gmra.mxu0 %vm434_vm3, %v4028_v29 }
0x1567   :  { %5484 = vmatmul.mubr.msk.bf16.vlgmr.msra.gmra.mxu1 %vm434_vm3, %v3878_v39  ;;  %5513 = vmatprep.mubr.msk.bf16.mxu0 %vm6121_vm1, %v6120_v16 }
0x1568   :  { %5494 = vmatpush3.bf16.xpose.msra.mxu1 %v3985_v31  ;;  %5495 = vmatprep.mubr.msk.bf16.mxu1 %vm6121_vm1, %v6120_v16 }
0x1569   :  { %5505 = vmatprep.subr.bf16.mxu1 %v6120_v16 }
0x156f   :  { %5496 = vmatmul.mubr.msk.bf16.vlgmr.msra.gmra.mxu1 %vm434_vm3, %v3978_v15 }
0x1570   :  { %5507 = vmatprep.mubr.msk.bf16.mxu1 %vm6121_vm1, %v6120_v16 }
0x15e1   :  { %v7066_v14 = vpop.f32.mrf.mxu0 }
0x15e3   :  { %v5467_v36 = vpop.f32.mrf.mxu0 }
0x15e5   :  { %v3778_v3 = vpop.f32.mrf.mxu0 }
0x15e6   :  { %v7068_v4 = vpop.f32.mrf.mxu1 }
0x15e7   :  { %v5632_v45 = vpack.i.bf16 %v7066_v14, %v7068_v4  ;;  %v5468_v10 = vpop.f32.mrf.mxu0 }
0x15e8   :  { %v5461_v11 = vpop.f32.mrf.mxu1 }
0x15ea   :  { %v3730_v26 = vpop.f32.mrf.mxu1 }
0x15ec   :  { %v5462_v46 = vpop.f32.mrf.mxu1 }
0x1616   :  { %v7072_v47 = vpop.f32.mrf.mxu0 }
0x1618   :  { %v5479_v49 = vpop.f32.mrf.mxu0 }
0x161a   :  { %v3874_v52 = vpop.f32.mrf.mxu0 }
0x161c   :  { %v5480_v38 = vpop.f32.mrf.mxu0 }
0x161e   :  { %v3971_v44 = vpop.f32.mrf.mxu0 }
0x161f   :  { %v7074_v53 = vpop.f32.mrf.mxu1  ;;  %v3972_v54 = vadd.f32 %v6813_v35, %v3971_v44 }
0x1620   :  { %v5637_v55 = vpack.i.bf16 %v7072_v47, %v7074_v53  ;;  %v5491_v56 = vpop.f32.mrf.mxu0 }
0x1621   :  { %v5473_v57 = vpop.f32.mrf.mxu1  ;;  %v4080_v27 = vsel %vm434_vm3, %v3972_v54, -inf }
0x1622   :  { %4081 = vmax.xlane.f32.xlu1 %v4080_v27  ;;  %v3974_v13 = vpop.f32.mrf.mxu0 }
0x1623   :  { %v3826_v12 = vpop.f32.mrf.mxu1 }
0x1624   :  { %v5492_v58 = vpop.f32.mrf.mxu0 }
0x1625   :  { %v5474_v59 = vpop.f32.mrf.mxu1 }
0x1626   :  { %v4071_v60 = vpop.f32.mrf.mxu0 }
0x1627   :  { %v3921_v61 = vpop.f32.mrf.mxu1  ;;  %v4072_v39 = vadd.f32 %v6821_v50, %v4071_v60 }
0x1628   :  { %v3922_v48 = vadd.f32 %v6810_v18, %v3921_v61  ;;  %v5503_v62 = vpop.f32.mrf.mxu0 }
0x1629   :  { %v5485_v63 = vpop.f32.mrf.mxu1  ;;  %v4086_v21 = vsel %vm434_vm3, %v4072_v39, -inf }
0x162a   :  { %v4074_v0 = vpop.f32.mrf.mxu0  ;;  %v4077_v35 = vsel %vm434_vm3, %v3922_v48, -inf }
0x162b   :  { %4078 = vmax.xlane.f32.xlu0 %v4077_v35  ;;  %v3924_v1 = vpop.f32.mrf.mxu1  ;;  %v5662_v0 = vld [vmem:[#allocation13 + $0x8] sm:$0xff]  }
0x162c   :  { %v5504_v6 = vpop.f32.mrf.mxu0 }
0x162d   :  { %v5486_v9 = vpop.f32.mrf.mxu1 }
0x162e   :  { %v5663_v9 = vld [vmem:[#allocation13] sm:$0xff]  }
0x162f   :  { %v4021_v24 = vpop.f32.mrf.mxu1 }
0x1630   :  { %v4022_v34 = vadd.f32 %v6817_v8, %v4021_v24 }
0x1631   :  { %v5497_v37 = vpop.f32.mrf.mxu1 }
0x1632   :  { %v4083_v41 = vsel %vm434_vm3, %v4022_v34, -inf }
0x1633   :  { %4084 = vmax.xlane.f32.xlu0 %v4083_v41  ;;  %v4024_v42 = vpop.f32.mrf.mxu1  ;;  %4125 = vrot.lane.b32.xlu1 %v6763_v7, %s6130_s15 }
0x1635   :  { %v5498_v18 = vpop.f32.mrf.mxu1 }
0x1637   :  { %4087 = vmax.xlane.f32.xlu0 %v4086_v21 }
0x16ab   :  { %v4082_v29 = vpop.xlane.xlu1 %4081 }
0x16ac   :  { %v4090_v31 = vsub.f32 %v3972_v54, %v4082_v29 }
0x16ae   :  { %v4095_v15 = vmul.f32 1.442695, %v4090_v31 }
0x16af   :  { %v4126_v36 = vpop.permute.xlu1 %4125 }
0x16b0   :  { %5791 = vpow2.f32 %v4095_v15  ;;  %v4131_v8 = vsel %vm681_vm5, %v4126_v36, 0 }
0x16b1   :  { %5506 = vmatpush3.bf16.msra.mxu1 %v4131_v8 }
0x16b2   :  { %5517 = vmatprep.subr.bf16.mxu1 %v6120_v16 }
0x16b4   :  { %v4079_v50 = vpop.xlane.xlu0 %4078 }
0x16b5   :  { %v4089_v3 = vsub.f32 %v3922_v48, %v4079_v50 }
0x16b7   :  { %v4093_v10 = vmul.f32 1.442695, %v4089_v3 }
0x16b9   :  { %5793 = vpow2.f32 %v4093_v10 }
0x16bc   :  { %v4085_v11 = vpop.xlane.xlu0 %4084 }
0x16bd   :  { %v5792_v7 = vpop.eup %5791  ;;  %v4091_v26 = vsub.f32 %v4022_v34, %v4085_v11 }
0x16be   :  { %v4104_v46 = vsel %vm434_vm3, %v5792_v7, 0.0 }
0x16bf   :  { %v4097_v49 = vmul.f32 1.442695, %v4091_v26  ;;  %4105 = vadd.xlane.f32.xlu0 %v4104_v46 }
0x16c0   :  { %v4088_v52 = vpop.xlane.xlu0 %4087 }
0x16c1   :  { %5795 = vpow2.f32 %v4097_v49  ;;  %v4092_v38 = vsub.f32 %v4072_v39, %v4088_v52 }
0x16c3   :  { %v4099_v44 = vmul.f32 1.442695, %v4092_v38 }
0x16c5   :  { %5797 = vpow2.f32 %v4099_v44 }
0x16c6   :  { %v5794_v54 = vpop.eup %5793 }
0x16c7   :  { %v4101_v56 = vsel %vm434_vm3, %v5794_v54, 0.0 }
0x16c8   :  { %4102 = vadd.xlane.f32.xlu1 %v4101_v56 }
0x16ce   :  { %v5796_v57 = vpop.eup %5795 }
0x16cf   :  { %v4107_v27 = vsel %vm434_vm3, %v5796_v57, 0.0 }
0x16d0   :  { %4108 = vadd.xlane.f32.xlu1 %v4107_v27 }
0x16d2   :  { %v5798_v13 = vpop.eup %5797 }
0x16d3   :  { %v4110_v12 = vsel %vm434_vm3, %v5798_v13, 0.0 }
0x16d4   :  { %4111 = vadd.xlane.f32.xlu0 %v4110_v12 }
0x16e1   :  { %4221 = vrot.lane.b32.xlu1 %v6776_v33, %s6130_s15 }
0x16e5   :  { %4269 = vrot.lane.b32.xlu1 %v6780_v40, %s6130_s15 }
0x16e9   :  { %5628 = vrot.lane.b32.xlu1 %v5627_v19, %s6114_s6 }
0x16ea   :  { %4173 = vrot.lane.b32.xlu0 %v6767_v23, %s6130_s15 }
0x16ed   :  { %5638 = vrot.lane.b32.xlu1 %v5637_v55, %s6104_s25 }
0x16ee   :  { %5623 = vrot.lane.b32.xlu0 %v5622_v25, %s6114_s6 }
0x16f2   :  { %5633 = vrot.lane.b32.xlu0 %v5632_v45, %s6104_s25 }
0x1748   :  { %v4106_v33 = vpop.xlane.xlu0 %4105 }
0x1749   :  { %5799 = vrcp.f32 %v4106_v33 }
0x1751   :  { %v4103_v40 = vpop.xlane.xlu1 %4102 }
0x1752   :  { %5801 = vrcp.f32 %v4103_v40 }
0x1756   :  { %v5800_v43 = vpop.eup %5799 }
0x1757   :  { %v4118_v53 = vmul.f32 %v5800_v43, %v5792_v7 }
0x1759   :  { %v4109_v23 = vpop.xlane.xlu1 %4108  ;;  %v4122_v14 = vpack.c.bf16 %v4118_v53, %v4118_v53 }
0x175a   :  { %5803 = vrcp.f32 %v4109_v23 }
0x175d   :  { %v4222_v20 = vpop.permute.xlu1 %4221  ;;  %v4112_v19 = vpop.xlane.xlu0 %4111 }
0x175e   :  { %5805 = vrcp.f32 %v4112_v19  ;;  %v4227_v4 = vsel %vm681_vm5, %v4222_v20, 0 }
0x175f   :  { %v5802_v47 = vpop.eup %5801 }
0x1760   :  { %v4117_v55 = vmul.f32 %v5802_v47, %v5794_v54 }
0x1761   :  { %v4174_v51 = vpop.permute.xlu0 %4173  ;;  %v4270_v58 = vpop.permute.xlu1 %4269 }
0x1762   :  { %v4121_v22 = vpack.c.bf16 %v4117_v55, %v4117_v55  ;;  %v4179_v25 = vsel %vm681_vm5, %v4174_v51, 0  ;;  %v4275_v45 = vsel %vm681_vm5, %v4270_v58, 0 }
0x1763   :  { %5512 = vmatpush3.bf16.msra.mxu0 %v4179_v25 }
0x1764   :  { %5508 = vmatmul.mubr.msk.bf16.vlgmr.msra.gmra.mxu1 %vm434_vm3, %v4121_v22  ;;  %5523 = vmatprep.subr.bf16.mxu0 %v6120_v16 }
0x1765   :  { %5518 = vmatpush3.bf16.msra.mxu1 %v4227_v4  ;;  %5519 = vmatprep.mubr.msk.bf16.mxu1 %vm6121_vm1, %v6120_v16  ;;  %v5624_v3 = vpop.permute.xlu0 %5623  ;;  %v5629_v49 = vpop.permute.xlu1 %5628 }
0x1766   :  { %5514 = vmatmul.mubr.msk.bf16.vlgmr.msra.gmra.mxu0 %vm434_vm3, %v4122_v14  ;;  %5529 = vmatprep.subr.bf16.mxu1 %v5662_v0  ;;  %v5626_v11 = vunpack.i.h.bf16 %v5624_v3  ;;  %v5625_v7 = vunpack.i.l.bf16 %v5624_v3  ;;  %v5631_v23 = vunpack.i.h.bf16 %v5629_v49  ;;  %v5630_v43 = vunpack.i.l.bf16 %v5629_v49  ;;  %v5667_v49 = vld [vmem:[%s7235_s19 + $0x18] sm:$0xff]  }
0x1767   :  { %v5804_v59 = vpop.eup %5803  ;;  %5524 = vmatpush3.bf16.msra.mxu0 %v4275_v45  ;;  %5525 = vmatprep.mubr.msk.bf16.mxu0 %vm6121_vm1, %v6120_v16  ;;  %v4924_v45 = vld [vmem:[#allocation14] ss:$0 sm:$0xff] }
0x1768   :  { %v4119_v60 = vmul.f32 %v5804_v59, %v5796_v57  ;;  %v4366_v38 = vsel %vm434_vm3, %v6896_v17, %v5626_v11  ;;  %v4365_v44 = vsel %vm434_vm3, %v6894_v2, %v5625_v7  ;;  %v4368_v2 = vsel %vm434_vm3, %v6898_v30, %v5631_v23  ;;  %v5664_v7 = vld [vmem:[%s7233_s17 + $0x10] sm:$0xff]  }
0x1769   :  { %v5634_v10 = vpop.permute.xlu0 %5633  ;;  %v5639_v40 = vpop.permute.xlu1 %5638  ;;  %v4367_v47 = vsel %vm434_vm3, %v6900_v32, %v5630_v43  ;;  %5537 = vmatprep.subr.bf16.mxu0 %v5664_v7  ;;  %v4457_v43 = vld [vmem:[%s7230_s14] sm:$0x3] }
0x176a   :  { %v4123_v61 = vpack.c.bf16 %v4119_v60, %v4119_v60  ;;  %v5636_v26 = vunpack.i.h.bf16 %v5634_v10  ;;  %v5635_v46 = vunpack.i.l.bf16 %v5634_v10  ;;  %v5641_v17 = vunpack.i.h.bf16 %v5639_v40 }
0x176b   :  { %v5806_v48 = vpop.eup %5805  ;;  %v5640_v20 = vunpack.i.l.bf16 %v5639_v40 }
0x176c   :  { %v4120_v62 = vmul.f32 %v5806_v48, %v5798_v13  ;;  %5520 = vmatmul.mubr.msk.bf16.vlgmr.msra.gmra.mxu1 %vm434_vm3, %v4123_v61  ;;  %v4369_v57 = vsel %vm2241_vm6, %v4365_v44, %v5635_v46  ;;  %v4370_v27 = vsel %vm2241_vm6, %v4366_v38, %v5636_v26  ;;  %v4372_v22 = vsel %vm2241_vm6, %v4368_v2, %v5641_v17  ;;  %v5665_v26 = vld [vmem:[%s7233_s17 + $0x8] sm:$0xff]   ;;  %v5666_v46 = vld [vmem:[%s7233_s17] sm:$0xff]  }
0x176d   :  { %5530 = vmatpush3.bf16.msra.mxu1 %v5662_v0  ;;  %v4371_v51 = vsel %vm2241_vm6, %v4367_v47, %v5640_v20  ;;  %v4514_v20 = vrot.slane %v4457_v43, %v6746_v5 }
0x176e   :  { %v4124_v63 = vpack.c.bf16 %v4120_v62, %v4120_v62  ;;  %5531 = vmatprep.subr.bf16.mxu1 %v5663_v9 }
0x1770   :  { %5526 = vmatmul.mubr.msk.bf16.vlgmr.msra.gmra.mxu0 %vm434_vm3, %v4124_v63 }
0x1771   :  { %5532 = vmatpush3.bf16.msra.mxu1 %v5663_v9  ;;  %5538 = vmatpush3.bf16.msra.mxu0 %v5664_v7 }
0x1772   :  { %5539 = vmatprep.subr.bf16.mxu0 %v5665_v26  ;;  %5547 = vmatprep.subr.bf16.mxu1 %v5667_v49 }
0x1775   :  { %5540 = vmatpush3.bf16.msra.mxu0 %v5665_v26 }
0x1776   :  { %5541 = vmatprep.subr.bf16.mxu0 %v5666_v46 }
0x1779   :  { %5542 = vmatpush3.bf16.msra.mxu0 %v5666_v46 }
0x1824   :  { %v4167_v35 = vpop.f32.mrf.mxu1 }
0x1826   :  { %v5509_v1 = vpop.f32.mrf.mxu1  ;;  %v4215_v6 = vpop.f32.mrf.mxu0 }
0x1827   :  { %v5642_v24 = vpack.i.bf16 %v4215_v6, %v4167_v35 }
0x1828   :  { %v4170_v34 = vpop.f32.mrf.mxu1  ;;  %v5515_v37 = vpop.f32.mrf.mxu0 }
0x1829   :  { %5643 = vrot.lane.b32.xlu0 %v5642_v24, %s6133_s16 }
0x182a   :  { %v5510_v16 = vpop.f32.mrf.mxu1  ;;  %v4218_v39 = vpop.f32.mrf.mxu0 }
0x182c   :  { %v5516_v41 = vpop.f32.mrf.mxu0  ;;  %v4263_v42 = vpop.f32.mrf.mxu1 }
0x182e   :  { %v5521_v18 = vpop.f32.mrf.mxu1 }
0x1830   :  { %v4266_v21 = vpop.f32.mrf.mxu1  ;;  %v4311_v29 = vpop.f32.mrf.mxu0 }
0x1831   :  { %v5647_v31 = vpack.i.bf16 %v4311_v29, %v4263_v42 }
0x1832   :  { %v5522_v15 = vpop.f32.mrf.mxu1  ;;  %v5527_v36 = vpop.f32.mrf.mxu0 }
0x1833   :  { %5648 = vrot.lane.b32.xlu1 %v5647_v31, %s6133_s16 }
0x1834   :  { %v4314_v8 = vpop.f32.mrf.mxu0 }
0x1836   :  { %v5528_v50 = vpop.f32.mrf.mxu0 }
0x189b   :  { %v5644_v52 = vpop.permute.xlu0 %5643 }
0x189c   :  { %v5646_v54 = vunpack.i.h.bf16 %v5644_v52  ;;  %v5645_v56 = vunpack.i.l.bf16 %v5644_v52 }
0x189e   :  { %v4374_v13 = vsel %vm2246_vm7, %v4370_v27, %v5646_v54  ;;  %v4373_v12 = vsel %vm2246_vm7, %v4369_v57, %v5645_v56 }
0x189f   :  { %v4377_v33 = vpack.c.bf16 %v4374_v13, %v4373_v12 }
0x18a1   :  { %5533 = vmatprep.mubr.msk.bf16.mxu1 %vm254_vm0, %v4377_v33 }
0x18a5   :  { %v5649_v19 = vpop.permute.xlu1 %5648 }
0x18a6   :  { %v5651_v53 = vunpack.i.h.bf16 %v5649_v19  ;;  %v5650_v55 = vunpack.i.l.bf16 %v5649_v19 }
0x18a8   :  { %v4376_v25 = vsel %vm2246_vm7, %v4372_v22, %v5651_v53  ;;  %v4375_v58 = vsel %vm2246_vm7, %v4371_v51, %v5650_v55  ;;  %v4522_v22 = vrot.slane %v4457_v43, %v6753_v28 }
0x18a9   :  { %v4378_v14 = vpack.c.bf16 %v4376_v25, %v4375_v58 }
0x18ab   :  { %5534 = vmatmul.mubr.msk.bf16.vlgmr.msra.gmra.mxu1 %vm254_vm0, %v4378_v14 }
0x18ac   :  { %5548 = vmatpush3.bf16.msra.mxu1 %v5667_v49 }
0x196b   :  { %v5535_v4 = vpop.f32.mrf.mxu1 }
0x196c   :  { %v4451_v61 = vadd.f32 %v5535_v4, %v4924_v45 }
0x196d   :  { %v4442_v59 = vpop.f32.mrf.mxu1 }
0x196e   :  { %v4443_v30 = vadd.f32 %v4924_v45, %v4442_v59  ;;  %v4464_v35 = vsel %vm310_vm2, %v4451_v61, 0.0 }
0x196f   :  { %v5536_v60 = vpop.f32.mrf.mxu1 }
0x1970   :  { %v4458_v32 = vsel %vm310_vm2, %v4443_v30, 0.0  ;;  %v4454_v63 = vadd.f32 %v5536_v60, %v4924_v45 }
0x1971   :  { %v4445_v48 = vpop.f32.mrf.mxu1  ;;  %4459 = vadd.xlane.f32.xlu0 %v4458_v32 }
0x1972   :  { %v4446_v62 = vadd.f32 %v4924_v45, %v4445_v48  ;;  %v4467_v1 = vsel %vm310_vm2, %v4454_v63, 0.0 }
0x1974   :  { %v4461_v0 = vsel %vm310_vm2, %v4446_v62, 0.0 }
0x1975   :  { %4462 = vadd.xlane.f32.xlu1 %v4461_v0  ;;  %4465 = vadd.xlane.f32.xlu0 %v4464_v35  ;;  %v5670_v0 = vld [vmem:[%s7235_s19] sm:$0xff]  }
0x1979   :  { %4468 = vadd.xlane.f32.xlu0 %v4467_v1 }
0x19fa   :  { %v4460_v6 = vpop.xlane.xlu0 %4459 }
0x19fb   :  { %v4471_v9 = vmul.f32 0.020833334, %v4460_v6  ;;  %v4929_v6 = vld [vmem:[#allocation19] ss:$0 sm:$0xff] }
0x19fd   :  { %v4475_v24 = vsub.f32 %v4443_v30, %v4471_v9 }
0x19fe   :  { %v4463_v34 = vpop.xlane.xlu1 %4462  ;;  %v4466_v37 = vpop.xlane.xlu0 %4465 }
0x19ff   :  { %v4472_v16 = vmul.f32 0.020833334, %v4463_v34  ;;  %v4473_v39 = vmul.f32 0.020833334, %v4466_v37  ;;  %v4479_v41 = vmul.f32 %v4475_v24, %v4475_v24 }
0x1a01   :  { %v4476_v42 = vsub.f32 %v4446_v62, %v4472_v16  ;;  %v4477_v18 = vsub.f32 %v4451_v61, %v4473_v39  ;;  %v4483_v21 = vsel %vm310_vm2, %v4479_v41, 0.0  ;;  %v5668_v62 = vld [vmem:[%s7235_s19 + $0x10] sm:$0xff]  }
0x1a02   :  { %4484 = vadd.xlane.f32.xlu1 %v4483_v21  ;;  %v4469_v29 = vpop.xlane.xlu0 %4468  ;;  %5549 = vmatprep.subr.bf16.mxu1 %v5668_v62 }
0x1a03   :  { %v4474_v31 = vmul.f32 0.020833334, %v4469_v29  ;;  %v4480_v15 = vmul.f32 %v4476_v42, %v4476_v42  ;;  %v4481_v36 = vmul.f32 %v4477_v18, %v4477_v18  ;;  %5550 = vmatpush3.bf16.msra.mxu1 %v5668_v62 }
0x1a05   :  { %v4478_v8 = vsub.f32 %v4454_v63, %v4474_v31  ;;  %v4486_v50 = vsel %vm310_vm2, %v4480_v15, 0.0  ;;  %v4489_v3 = vsel %vm310_vm2, %v4481_v36, 0.0  ;;  %v5669_v63 = vld [vmem:[%s7235_s19 + $0x8] sm:$0xff]   ;;  %v4935_v36 = vld [vmem:[%s7236_s20] ss:$0 sm:$0xff]  ;;  %s6134_s20 = smov [#allocation21]  }
0x1a06   :  { %4487 = vadd.xlane.f32.xlu0 %v4486_v50  ;;  %4490 = vadd.xlane.f32.xlu1 %v4489_v3  ;;  %s4810_s24 = sshll.u32 %s6134_s20, 4  ;;  %s4811_s24 = int_to_ptr.vmem [resolvable:$true] %s4810_s24 }
0x1a07   :  { %v4482_v10 = vmul.f32 %v4478_v8, %v4478_v8  ;;  %5551 = vmatprep.subr.bf16.mxu1 %v5669_v63  ;;  %s6047_s27 = scalar_lea.vmem %s4811_s24, 512  ;;  %p6052_p0 = scmp.lt.s32.totalorder %s4811_s24, %s4811_s24 }
0x1a08   :  { %5552 = vmatpush3.bf16.msra.mxu1 %v5669_v63  ;;  %p6048_p13 = scmp.ne.s32.totalorder %s4811_s24, %s6047_s27  ;;  %p6053_p1 = scmp.lt.s32.totalorder %s6047_s27, %s6047_s27 }
0x1a09   :  { %v4492_v11 = vsel %vm310_vm2, %v4482_v10, 0.0  ;;  %5553 = vmatprep.subr.bf16.mxu1 %v5670_v0 }
0x1a0a   :  { %4493 = vadd.xlane.f32.xlu0 %v4492_v11  ;;  %p6054_p2 = por %p6053_p1, %p6052_p0 }
0x1a0c   :  { %5554 = vmatpush3.bf16.msra.mxu1 %v5670_v0  ;;  %p6055_p3 = pnand %p6054_p2, %p6048_p13 }
0x1a8b   :  { %v4485_v52 = vpop.xlane.xlu1 %4484 }
0x1a8c   :  { %v4495_v38 = vmul.f32 0.020833334, %v4485_v52 }
0x1a8e   :  { %v4499_v44 = vadd.f32 1e-12, %v4495_v38 }
0x1a8f   :  { %v4491_v54 = vpop.xlane.xlu1 %4490  ;;  %v4488_v56 = vpop.xlane.xlu0 %4487 }
0x1a90   :  { %5807 = vrsqrt.f32 %v4499_v44  ;;  %v4497_v57 = vmul.f32 0.020833334, %v4491_v54  ;;  %v4496_v27 = vmul.f32 0.020833334, %v4488_v56 }
0x1a92   :  { %v4501_v13 = vadd.f32 1e-12, %v4497_v57  ;;  %v4500_v12 = vadd.f32 1e-12, %v4496_v27 }
0x1a93   :  { %v4494_v33 = vpop.xlane.xlu0 %4493 }
0x1a94   :  { %5809 = vrsqrt.f32 %v4501_v13  ;;  %v4498_v40 = vmul.f32 0.020833334, %v4494_v33 }
0x1a95   :  { %5811 = vrsqrt.f32 %v4500_v12 }
0x1a96   :  { %v4502_v23 = vadd.f32 1e-12, %v4498_v40 }
0x1a98   :  { %5813 = vrsqrt.f32 %v4502_v23 }
0x1a9d   :  { %v5808_v17 = vpop.eup %5807 }
0x1a9e   :  { %v4507_v19 = vmul.f32 %v5808_v17, %v4475_v24 }
0x1aa0   :  { %v4515_v51 = vmul.f32 %v4514_v20, %v4507_v19 }
0x1aa1   :  { %v5810_v2 = vpop.eup %5809 }
0x1aa2   :  { %v5812_v47 = vpop.eup %5811  ;;  %v4509_v53 = vmul.f32 %v5810_v2, %v4477_v18  ;;  %v4523_v45 = vadd.f32 %v4522_v22, %v4515_v51 }
0x1aa3   :  { %v4508_v55 = vmul.f32 %v5812_v47, %v4476_v42 }
0x1aa4   :  { %v4517_v14 = vmul.f32 %v4514_v20, %v4509_v53 }
0x1aa5   :  { %v5814_v25 = vpop.eup %5813  ;;  %v4516_v58 = vmul.f32 %v4514_v20, %v4508_v55 }
0x1aa6   :  { %v4510_v4 = vmul.f32 %v5814_v25, %v4478_v8  ;;  %v4525_v61 = vadd.f32 %v4522_v22, %v4517_v14 }
0x1aa7   :  { %v4524_v59 = vadd.f32 %v4522_v22, %v4516_v58 }
0x1aa8   :  { %v4518_v30 = vmul.f32 %v4514_v20, %v4510_v4 }
0x1aa9   :  { %v4527_v60 = vpack.c.bf16 %v4524_v59, %v4523_v45 }
0x1aaa   :  { %v4526_v32 = vadd.f32 %v4522_v22, %v4518_v30 }
0x1aab   :  { %5543 = vmatprep.mubr.msk.bf16.mxu0 %vm310_vm2, %v4527_v60 }
0x1aac   :  { %v4528_v48 = vpack.c.bf16 %v4526_v32, %v4525_v61 }
0x1aae   :  { %5544 = vmatmul.mubr.msk.bf16.vlgmr.msra.gmra.mxu0 %vm310_vm2, %v4528_v48 }
0x1b6e   :  { %v5545_v35 = vpop.f32.mrf.mxu0 }
0x1b6f   :  { %v4609_v37 = vadd.f32 %v5545_v35, %v4929_v6 }
0x1b70   :  { %v4600_v1 = vpop.f32.mrf.mxu0 }
0x1b71   :  { %v4601_v24 = vadd.f32 %v4929_v6, %v4600_v1  ;;  %v4617_v21 = vmax.f32 %v4609_v37, 0.0 }
0x1b72   :  { %v5546_v9 = vpop.f32.mrf.mxu0 }
0x1b73   :  { %v4612_v34 = vadd.f32 %v5546_v9, %v4929_v6  ;;  %v4615_v42 = vmax.f32 %v4601_v24, 0.0 }
0x1b74   :  { %v4603_v16 = vpop.f32.mrf.mxu0 }
0x1b75   :  { %v4604_v39 = vadd.f32 %v4929_v6, %v4603_v16  ;;  %v4618_v41 = vmax.f32 %v4612_v34, 0.0 }
0x1b77   :  { %v4616_v18 = vmax.f32 %v4604_v39, 0.0  ;;  %v4620_v31 = vpack.c.bf16 %v4618_v41, %v4617_v21 }
0x1b79   :  { %v4619_v29 = vpack.c.bf16 %v4616_v18, %v4615_v42 }
0x1b7b   :  { %5555 = vmatprep.mubr.msk.bf16.mxu1 %vm4660_vm8, %v4619_v29 }
0x1b7c   :  { %5556 = vmatmul.mubr.msk.bf16.vlgmr.msra.gmra.mxu1 %vm4660_vm8, %v4620_v31 }
0x1c3c   :  { %v5557_v15 = vpop.f32.mrf.mxu1 }
0x1c3d   :  { %v4710_v50 = vadd.f32 %v5557_v15, %v4935_v36 }
0x1c3e   :  { %v4701_v8 = vpop.f32.mrf.mxu1 }
0x1c3f   :  { %v4702_v3 = vadd.f32 %v4935_v36, %v4701_v8  ;;  %v4718_v26 = vadd.f32 %v4710_v50, %v4525_v61 }
0x1c40   :  { %v5558_v10 = vpop.f32.mrf.mxu1 }
0x1c41   :  { %v4716_v11 = vadd.f32 %v4702_v3, %v4523_v45  ;;  %v4713_v46 = vadd.f32 %v5558_v10, %v4935_v36  ;;  %v4727_v56 = vsel %vm310_vm2, %v4718_v26, 0.0 }
0x1c42   :  { %v4704_v7 = vpop.f32.mrf.mxu1 }
0x1c43   :  { %v4705_v49 = vadd.f32 %v4935_v36, %v4704_v7  ;;  %v4721_v52 = vsel %vm310_vm2, %v4716_v11, 0.0  ;;  %v4719_v44 = vadd.f32 %v4713_v46, %v4526_v32 }
0x1c44   :  { %4722 = vadd.xlane.f32.xlu1 %v4721_v52 }
0x1c45   :  { %v4717_v38 = vadd.f32 %v4705_v49, %v4524_v59  ;;  %v4730_v57 = vsel %vm310_vm2, %v4719_v44, 0.0 }
0x1c47   :  { %v4724_v54 = vsel %vm310_vm2, %v4717_v38, 0.0 }
0x1c48   :  { %4725 = vadd.xlane.f32.xlu0 %v4724_v54  ;;  %4728 = vadd.xlane.f32.xlu1 %v4727_v56 }
0x1c4c   :  { %4731 = vadd.xlane.f32.xlu0 %v4730_v57 }
0x1ccd   :  { %v4723_v27 = vpop.xlane.xlu1 %4722 }
0x1cce   :  { %v4733_v13 = vmul.f32 0.020833334, %v4723_v27 }
0x1cd0   :  { %v4737_v12 = vsub.f32 %v4716_v11, %v4733_v13 }
0x1cd1   :  { %v4726_v33 = vpop.xlane.xlu0 %4725  ;;  %v4729_v40 = vpop.xlane.xlu1 %4728 }
0x1cd2   :  { %v4734_v23 = vmul.f32 0.020833334, %v4726_v33  ;;  %v4735_v43 = vmul.f32 0.020833334, %v4729_v40  ;;  %v4741_v17 = vmul.f32 %v4737_v12, %v4737_v12 }
0x1cd4   :  { %v4738_v20 = vsub.f32 %v4717_v38, %v4734_v23  ;;  %v4739_v19 = vsub.f32 %v4718_v26, %v4735_v43  ;;  %v4745_v2 = vsel %vm310_vm2, %v4741_v17, 0.0 }
0x1cd5   :  { %v4732_v47 = vpop.xlane.xlu0 %4731  ;;  %4746 = vadd.xlane.f32.xlu1 %v4745_v2 }
0x1cd6   :  { %v4736_v53 = vmul.f32 0.020833334, %v4732_v47  ;;  %v4742_v55 = vmul.f32 %v4738_v20, %v4738_v20  ;;  %v4743_v51 = vmul.f32 %v4739_v19, %v4739_v19 }
0x1cd8   :  { %v4740_v22 = vsub.f32 %v4719_v44, %v4736_v53  ;;  %v4748_v25 = vsel %vm310_vm2, %v4742_v55, 0.0  ;;  %v4751_v58 = vsel %vm310_vm2, %v4743_v51, 0.0 }
0x1cd9   :  { %4749 = vadd.xlane.f32.xlu0 %v4748_v25  ;;  %4752 = vadd.xlane.f32.xlu1 %v4751_v58 }
0x1cda   :  { %v4744_v14 = vmul.f32 %v4740_v22, %v4740_v22 }
0x1cdc   :  { %v4754_v4 = vsel %vm310_vm2, %v4744_v14, 0.0 }
0x1cdd   :  { %4755 = vadd.xlane.f32.xlu0 %v4754_v4 }
0x1cde   :  { %6058 = shalt.err (!%p6055_p3)
}
0x1cdf   :  { %4816 = dma.vmem_to_hbm [thread:$0]  %s4811_s24, 512, %s7239_s23, [#allocation22], %s6113_s13, %s6113_s13, %s6114_s6  }
0x1ce0   :  { %v4720_v6 = vld [vmem:[%s7237_s21] sm:$0x3]  ;;  %s6135_s21 = smov [#allocation20]  }
0x1ce1   :  { %v4776_v9 = vrot.slane %v4720_v6, %v6746_v5  ;;  %v4784_v37 = vrot.slane %v4720_v6, %v6753_v28  ;;  %s4798_s23 = sshll.u32 %s6135_s21, 4  ;;  %s4799_s23 = int_to_ptr.vmem [resolvable:$true] %s4798_s23 }
0x1ce2   :  { %s6067_s5 = scalar_lea.vmem %s4799_s23, 512  ;;  %p6072_p5 = scmp.lt.s32.totalorder %s4799_s23, %s4799_s23 }
0x1ce3   :  { %p6068_p4 = scmp.ne.s32.totalorder %s4799_s23, %s6067_s5  ;;  %p6073_p6 = scmp.lt.s32.totalorder %s6067_s5, %s6067_s5 }
0x1ce5   :  { %p6074_p7 = por %p6073_p6, %p6072_p5 }
0x1ce7   :  { %p6075_p8 = pnand %p6074_p7, %p6068_p4 }
0x1d5e   :  { %v4747_v45 = vpop.xlane.xlu1 %4746 }
0x1d5f   :  { %v4757_v59 = vmul.f32 0.020833334, %v4747_v45 }
0x1d61   :  { %v4761_v30 = vadd.f32 1e-12, %v4757_v59 }
0x1d62   :  { %v4750_v60 = vpop.xlane.xlu0 %4749  ;;  %v4753_v61 = vpop.xlane.xlu1 %4752 }
0x1d63   :  { %5815 = vrsqrt.f32 %v4761_v30  ;;  %v4758_v32 = vmul.f32 0.020833334, %v4750_v60  ;;  %v4759_v48 = vmul.f32 0.020833334, %v4753_v61 }
0x1d65   :  { %v4762_v62 = vadd.f32 1e-12, %v4758_v32  ;;  %v4763_v63 = vadd.f32 1e-12, %v4759_v48 }
0x1d66   :  { %v4756_v0 = vpop.xlane.xlu0 %4755 }
0x1d67   :  { %5817 = vrsqrt.f32 %v4762_v62  ;;  %v4760_v35 = vmul.f32 0.020833334, %v4756_v0 }
0x1d68   :  { %5819 = vrsqrt.f32 %v4763_v63 }
0x1d69   :  { %v4764_v1 = vadd.f32 1e-12, %v4760_v35 }
0x1d6b   :  { %5821 = vrsqrt.f32 %v4764_v1 }
0x1d70   :  { %v5816_v24 = vpop.eup %5815 }
0x1d71   :  { %v4769_v34 = vmul.f32 %v5816_v24, %v4737_v12 }
0x1d73   :  { %v4777_v16 = vmul.f32 %v4776_v9, %v4769_v34 }
0x1d74   :  { %v5818_v39 = vpop.eup %5817 }
0x1d75   :  { %v5820_v41 = vpop.eup %5819  ;;  %v4770_v42 = vmul.f32 %v5818_v39, %v4738_v20  ;;  %v4785_v18 = vadd.f32 %v4784_v37, %v4777_v16 }
0x1d76   :  { %v4771_v21 = vmul.f32 %v5820_v41, %v4739_v19 }
0x1d77   :  { %v4778_v29 = vmul.f32 %v4776_v9, %v4770_v42  ;;  %4789 = vst.msk [vmem:[#allocation20] sm:$0xff] %vm310_vm2, %v4785_v18 }
0x1d78   :  { %v5822_v31 = vpop.eup %5821  ;;  %v4779_v15 = vmul.f32 %v4776_v9, %v4771_v21 }
0x1d79   :  { %v4772_v36 = vmul.f32 %v5822_v31, %v4740_v22  ;;  %v4786_v8 = vadd.f32 %v4784_v37, %v4778_v29 }
0x1d7a   :  { %v4787_v50 = vadd.f32 %v4784_v37, %v4779_v15 }
0x1d7b   :  { %v4780_v5 = vmul.f32 %v4776_v9, %v4772_v36  ;;  %4790 = vst.msk [vmem:[#allocation20 + $0x8] sm:$0xff] %vm310_vm2, %v4786_v8 }
0x1d7c   :  { %4791 = vst.msk [vmem:[#allocation20 + $0x10] sm:$0xff] %vm310_vm2, %v4787_v50 }
0x1d7d   :  { %v4788_v28 = vadd.f32 %v4784_v37, %v4780_v5 }
0x1d7f   :  { %4792 = vst.msk [vmem:[#allocation20 + $0x18] sm:$0xff] %vm310_vm2, %v4788_v28 }
0x1d80   :  { %6078 = shalt.err (!%p6075_p8)
}
0x1d81   :  { %4804 = dma.vmem_to_hbm [thread:$0]  %s4799_s23, 512, %s7238_s22, [#allocation4], %s6113_s13, %s6113_s13, %s6114_s6  }
0x1d82   :  { %6099 = dma.done.wait [#allocation4], 512  }
0x1d83   :  { %6100 = vsyncadd [#allocation4], 4294966784 }
0x1d84   :  { %6101 = dma.done.wait [#allocation22], 512  }
0x1d85   :  { %6102 = vsyncadd [#allocation22], 4294966784 }
0x1d86   :  { %4823 = vsyncpa [#allocation3], 1 }
0x1d87   :  { %4824 = vsyncpa [#allocation6], 1 }
0x1d88   :  { %4825 = vsyncpa [#allocation9], 1 }
0x1d89   :  { %4826 = vsyncpa [#allocation12], 1 }
0x1d8a   :  { %4827 = vsyncpa [#allocation15], 1 }
0x1d8b   :  { %4828 = vsyncpa [#allocation18], 1 }
0x1d8c   :  { %4829 = vsyncpa [#allocation4], 1 }
0x1d8d   :  { %4830 = vsyncpa [#allocation22], 1 }

</bundles_post_ra>
